<compile_context>
chip_gen: v5e
topology: v5e:2x2
jax: 0.10.0
libtpu: 0.0.40
codegen_flags: <defaults>
</compile_context>

<pallas_src>
import jax
import jax.numpy as jnp
import numpy as np
from jax.experimental import pallas as pl
from jax.experimental.pallas import tpu as pltpu

NEG_SLOPE = 0.01   # nn.LeakyReLU default
BN_EPS = 1e-5      # nn.BatchNorm2d default
LANES = 128


def _leaky(x):
    return jnp.where(x > 0, x, NEG_SLOPE * x)


def _round_up(x, m):
    return (x + m - 1) // m * m


# ---------------------------------------------------------------------------
# Fused kernel.  Grid = (N, H // TH).
#   xc_ref : (1, TH,   W, Cp)  bf16  central x rows of this tile
#   xa_ref : (1, 2,    W, Cp)  bf16  2 rows above the tile (clamped at t==0)
#   xb_ref : (1, 2,    W, Cp)  bf16  2 rows below the tile (clamped at t==last)
#   w1_ref : (9, Cp, Cp)       bf16  conv1 taps, BN1 scale folded
#   b1_ref : (1, Cp)           f32   BN1 bias
#   w2_ref : (9, Cp, Cp)       bf16  conv2 taps, BN2 scale folded
#   b2_ref : (1, Cp)           f32   BN2 bias
#   o_ref  : (1, TH, W, C)     bf16  output tile, true channel count
# scratch:
#   xp_s   : (TH+4, W+2, Cp)   bf16  haloed, column-zero-padded conv1 input
#   y1p_s  : (TH+2, W+2, Cp)   bf16  haloed, column-zero-padded conv2 input
# ---------------------------------------------------------------------------
def basic_block_kernel(xc_ref, xa_ref, xb_ref, w1_ref, b1_ref, w2_ref, b2_ref,
                       o_ref, xp_s, y1p_s):
    t = pl.program_id(1)
    n_h = pl.num_programs(1)
    _, TH, W, Cp = xc_ref.shape
    C = o_ref.shape[-1]
    cdt = xp_s.dtype
    Ho = TH + 2                                     # conv1 output rows (1-row y1 halo)

    # ---- assemble the haloed conv1 input (border-only zeroing) --------------
    xp_s[:, 0:1, :] = jnp.zeros((TH + 4, 1, Cp), cdt)          # conv W zero-pad
    xp_s[:, W + 1:W + 2, :] = jnp.zeros((TH + 4, 1, Cp), cdt)
    xp_s[2:TH + 2, 1:W + 1, :] = xc_ref[0]
    # image-boundary tiles: the row halo is the conv's zero padding, not data
    xp_s[0:2, 1:W + 1, :] = jnp.where(t == 0,
                                      jnp.zeros((2, W, Cp), cdt), xa_ref[0])
    xp_s[TH + 2:TH + 4, 1:W + 1, :] = jnp.where(t == n_h - 1,
                                                jnp.zeros((2, W, Cp), cdt),
                                                xb_ref[0])

    # ---- conv1 (+BN1 fold) + LeakyReLU over TH+2 output rows ----------------
    # 9 shifted (M, Cp) x (Cp, Cp) matmuls accumulated in f32 (no im2col buffer).
    acc = None
    for k in range(9):
        kh, kw = divmod(k, 3)
        lhs = xp_s[kh:kh + Ho, kw:kw + W, :].reshape(Ho * W, Cp)
        p = jnp.dot(lhs, w1_ref[k], preferred_element_type=jnp.float32)
        acc = p if acc is None else acc + p
    y1v = _leaky(acc + b1_ref[...]).reshape(Ho, W, Cp).astype(cdt)

    # ---- stage y1 (bf16) with 1-pixel zero border for conv2 -----------------
    y1p_s[:, 0:1, :] = jnp.zeros((Ho, 1, Cp), cdt)
    y1p_s[:, W + 1:W + 2, :] = jnp.zeros((Ho, 1, Cp), cdt)
    y1p_s[1:TH + 1, 1:W + 1, :] = y1v[1:TH + 1]
    # conv2's zero padding at the image top/bottom: y1 row "-1"/"H" is zero,
    # not a value computed from zero-padded x.
    y1p_s[0:1, 1:W + 1, :] = jnp.where(t == 0,
                                       jnp.zeros((1, W, Cp), cdt), y1v[0:1])
    y1p_s[TH + 1:TH + 2, 1:W + 1, :] = jnp.where(t == n_h - 1,
                                                 jnp.zeros((1, W, Cp), cdt),
                                                 y1v[TH + 1:TH + 2])

    # ---- conv2 (+BN2 fold) + residual + LeakyReLU over TH output rows -------
    acc2 = None
    for k in range(9):
        kh, kw = divmod(k, 3)
        lhs = y1p_s[kh:kh + TH, kw:kw + W, :].reshape(TH * W, Cp)
        p = jnp.dot(lhs, w2_ref[k], preferred_element_type=jnp.float32)
        acc2 = p if acc2 is None else acc2 + p
    res = xc_ref[0].astype(jnp.float32).reshape(TH * W, Cp)
    out = _leaky(acc2 + b2_ref[...] + res)                      # (TH*W, Cp) f32
    o_ref[0] = out.reshape(TH, W, Cp)[:, :, :C].astype(o_ref.dtype)


# ---------------------------------------------------------------------------
# Parameter prep (BN fold, channel pad, bf16 cast)
# ---------------------------------------------------------------------------
def _fold_bn(gamma, beta, mean, var):
    scale = gamma / jnp.sqrt(var + BN_EPS)
    bias = beta - mean * scale
    return scale, bias


def _prep_weight(w_oihw, scale, cp, dtype):
    """(Cout, Cin, 3, 3) -> (9, Cp, Cp) per-tap weights, BN scale folded."""
    cout, cin = w_oihw.shape[0], w_oihw.shape[1]
    w = jnp.transpose(w_oihw, (2, 3, 1, 0)) * scale.reshape(1, 1, 1, cout)  # (3,3,Cin,Cout)
    w = jnp.pad(w, ((0, 0), (0, 0), (0, cp - cin), (0, cp - cout)))
    return w.reshape(9, cp, cp).astype(dtype)


def _choose_h_tile(H, W, Cp, budget_bytes=8 << 20):
    """Largest even divisor of H whose per-step scratch fits the budget and
    (when possible) still yields >= 2 H-tiles so the pipeline has work."""
    divs = [d for d in range(2, H + 1, 2) if H % d == 0]
    if not divs:
        return H                                    # odd H: single tile
    def per_tile_bytes(th):
        return (((th + 4) + (th + 2)) * (W + 2) * Cp * 2   # bf16 halo scratch
                + 2 * (th + 2) * W * Cp * 4)               # f32 matmul temporaries
    fitting = [d for d in divs if per_tile_bytes(d) <= budget_bytes]
    if not fitting:
        return divs[0]
    multi = [d for d in fitting if H // d >= 2]
    return max(multi) if multi else max(fitting)


def _vmem_limit_bytes(TH, W, Cp, C):
    """Actual-footprint-based scoped-VMEM request, capped well below v7x's
    64 MiB physical VMEM (16 MiB floor, 48 MiB ceiling)."""
    cd = 2   # bf16
    scratch = ((TH + 4) * (W + 2) * Cp + (TH + 2) * (W + 2) * Cp) * cd
    blocks = 2 * (TH * W * Cp + 2 * 2 * W * Cp) * cd + 2 * TH * W * C * cd
    weights = 2 * (2 * 9 * Cp * Cp * cd + 2 * Cp * 4)
    temps = 4 * (TH + 2) * W * Cp * 4
    est = scratch + blocks + weights + temps
    return int(min(48 << 20, max(16 << 20, 2 * est)))


# ---------------------------------------------------------------------------
# Layout-native entry point: NHWC in, NHWC (compute_dtype) out.  Chain these
# back-to-back to avoid per-block NCHW<->NHWC transposes in HBM.
# ---------------------------------------------------------------------------
def basic_block_forward_nhwc(x_nhwc, params, *, compute_dtype=jnp.bfloat16,
                             h_tile=None):
    w1, bn1, w2, bn2 = params["w1"], params["bn1"], params["w2"], params["bn2"]
    N, H, W, C = x_nhwc.shape
    Cp = _round_up(C, LANES)

    s1, b1 = _fold_bn(*bn1)
    s2, b2 = _fold_bn(*bn2)
    w1k = _prep_weight(w1, s1, Cp, compute_dtype)
    w2k = _prep_weight(w2, s2, Cp, compute_dtype)
    b1k = jnp.pad(b1, (0, Cp - C)).reshape(1, Cp).astype(jnp.float32)
    b2k = jnp.pad(b2, (0, Cp - C)).reshape(1, Cp).astype(jnp.float32)

    # Activations in bf16; channel pad is a no-op for realistic C (>=128 mult).
    xk = x_nhwc.astype(compute_dtype)
    if Cp != C:
        xk = jnp.pad(xk, ((0, 0), (0, 0), (0, 0), (0, Cp - C)))

    TH = h_tile if h_tile is not None else _choose_h_tile(H, W, Cp)
    assert H % TH == 0
    n_h = H // TH
    THB = TH // 2                       # above/below halo blocks are 2 rows tall
    max_hb = (H - 2) // 2               # last fully in-range 2-row block

    flops = 2 * (2 * 9 * N * H * W * C * C)              # two 3x3 convs, true C
    bytes_accessed = (N * H * W * Cp * 2                 # center x read (bf16)
                      + N * n_h * 4 * W * Cp * 2         # row-halo re-reads
                      + N * H * W * C * 2                # output write (bf16, true C)
                      + 2 * 9 * Cp * Cp * 2 + 2 * Cp * 4)  # weights + biases

    out = pl.pallas_call(
        basic_block_kernel,
        out_shape=jax.ShapeDtypeStruct((N, H, W, C), compute_dtype),
        grid_spec=pltpu.PrefetchScalarGridSpec(
            num_scalar_prefetch=0,
            grid=(N, n_h),
            in_specs=[
                # central TH rows of this tile
                pl.BlockSpec((1, TH, W, Cp), lambda n, t: (n, t, 0, 0)),
                # 2 rows above / below (clamped at the image boundary; the
                # kernel replaces them with zeros there)
                pl.BlockSpec((1, 2, W, Cp),
                             lambda n, t: (n, jnp.maximum(t * THB - 1, 0), 0, 0)),
                pl.BlockSpec((1, 2, W, Cp),
                             lambda n, t: (n, jnp.minimum((t + 1) * THB, max_hb), 0, 0)),
                pl.BlockSpec((9, Cp, Cp), lambda n, t: (0, 0, 0)),
                pl.BlockSpec((1, Cp), lambda n, t: (0, 0)),
                pl.BlockSpec((9, Cp, Cp), lambda n, t: (0, 0, 0)),
                pl.BlockSpec((1, Cp), lambda n, t: (0, 0)),
            ],
            out_specs=pl.BlockSpec((1, TH, W, C), lambda n, t: (n, t, 0, 0)),
            scratch_shapes=[
                pltpu.VMEM((TH + 4, W + 2, Cp), compute_dtype),
                pltpu.VMEM((TH + 2, W + 2, Cp), compute_dtype),
            ],
        ),
        compiler_params=pltpu.CompilerParams(
            dimension_semantics=("parallel", "parallel"),
            vmem_limit_bytes=_vmem_limit_bytes(TH, W, Cp, C),
        ),
        cost_estimate=pl.CostEstimate(flops=flops, transcendentals=0,
                                      bytes_accessed=bytes_accessed),
    )(xk, xk, xk, w1k, b1k, w2k, b2k)
    return out


def basic_block_forward(x_nchw, params, *, compute_dtype=jnp.bfloat16):
    """PyTorch-parity interface: (N, C, H, W) in/out, caller dtype."""
    x = jnp.transpose(x_nchw, (0, 2, 3, 1))
    out = basic_block_forward_nhwc(x, params, compute_dtype=compute_dtype)
    return jnp.transpose(out, (0, 3, 1, 2)).astype(x_nchw.dtype)


# ---------------------------------------------------------------------------
# References for validation.
# ---------------------------------------------------------------------------
def basic_block_reference_f32(x_nchw, params):
    """Pure-f32 reference (same math as the PyTorch module, eval-mode BN)."""
    w1, bn1, w2, bn2 = params["w1"], params["bn1"], params["w2"], params["bn2"]

    def conv(x, w):
        return jax.lax.conv_general_dilated(
            x, w, window_strides=(1, 1), padding=((1, 1), (1, 1)),
            dimension_numbers=("NCHW", "OIHW", "NCHW"))

    def bn(x, p):
        gamma, beta, mean, var = (t.reshape(1, -1, 1, 1) for t in p)
        return (x - mean) / jnp.sqrt(var + BN_EPS) * gamma + beta

    out = _leaky(bn(conv(x_nchw, w1), bn1))
    out = bn(conv(out, w2), bn2) + x_nchw
    return _leaky(out)


def basic_block_reference_matched(x_nchw, params, compute_dtype=jnp.bfloat16):
    """Same math at the kernel's precision (bf16 inputs/weights, f32 accum)."""
    w1, bn1, w2, bn2 = params["w1"], params["bn1"], params["w2"], params["bn2"]

    def fold(w, bn):
        s, b = _fold_bn(*bn)
        return (w * s.reshape(-1, 1, 1, 1)).astype(compute_dtype), b

    w1f, b1 = fold(w1, bn1)
    w2f, b2 = fold(w2, bn2)
    x = x_nchw.astype(compute_dtype)

    def conv(x_, w_):
        return jax.lax.conv_general_dilated(
            x_, w_, window_strides=(1, 1), padding=((1, 1), (1, 1)),
            dimension_numbers=("NCHW", "OIHW", "NCHW"),
            preferred_element_type=jnp.float32)

    y1 = _leaky(conv(x, w1f) + b1.reshape(1, -1, 1, 1))
    y2 = conv(y1.astype(compute_dtype), w2f) + b2.reshape(1, -1, 1, 1)
    return _leaky(y2 + x.astype(jnp.float32))


if __name__ == "__main__":
    # BasicBlock(inplanes=4, planes=4, stride=1, downsample=None)
    N, C, H, W = 2, 4, 16, 16

    key = jax.random.PRNGKey(0)
    ks = jax.random.split(key, 11)

    x = jax.random.normal(ks[0], (N, C, H, W), jnp.float32)
    params = {
        "w1": jax.random.normal(ks[1], (C, C, 3, 3), jnp.float32) * 0.1,
        "w2": jax.random.normal(ks[2], (C, C, 3, 3), jnp.float32) * 0.1,
        "bn1": (
            1.0 + 0.1 * jax.random.normal(ks[3], (C,), jnp.float32),   # gamma
            0.1 * jax.random.normal(ks[4], (C,), jnp.float32),         # beta
            0.1 * jax.random.normal(ks[5], (C,), jnp.float32),         # running_mean
            0.5 + jax.random.uniform(ks[6], (C,), jnp.float32),        # running_var > 0
        ),
        "bn2": (
            1.0 + 0.1 * jax.random.normal(ks[7], (C,), jnp.float32),
            0.1 * jax.random.normal(ks[8], (C,), jnp.float32),
            0.1 * jax.random.normal(ks[9], (C,), jnp.float32),
            0.5 + jax.random.uniform(ks[10], (C,), jnp.float32),
        ),
    }

    out = jax.block_until_ready(basic_block_forward(x, params))
    assert out.shape == (N, C, H, W)

    ref_matched = jax.block_until_ready(basic_block_reference_matched(x, params))
    ref_f32 = jax.block_until_ready(basic_block_reference_f32(x, params))

    # Kernel vs. precision-matched reference: agree up to accumulation order
    # and the final bf16 output rounding.
    np.testing.assert_allclose(np.asarray(out), np.asarray(ref_matched),
                               rtol=1e-2, atol=1e-2)
    # Kernel (bf16 matmuls, bf16 output) vs. full-f32 reference.
    np.testing.assert_allclose(np.asarray(out), np.asarray(ref_f32),
                               rtol=5e-2, atol=5e-2)

    print("KERNEL_OK")
</pallas_src>

<mosaic_0001>
module attributes {stable_mosaic.version = 11 : i64} {
  func.func @basic_block_kernel(%arg0: i32, %arg1: i32, %arg2: memref<1x8x16x128xbf16, #tpu.memory_space<vmem>>, %arg3: memref<1x2x16x128xbf16, #tpu.memory_space<vmem>>, %arg4: memref<1x2x16x128xbf16, #tpu.memory_space<vmem>>, %arg5: memref<9x128x128xbf16, #tpu.memory_space<vmem>>, %arg6: memref<1x128xf32, #tpu.memory_space<vmem>>, %arg7: memref<9x128x128xbf16, #tpu.memory_space<vmem>>, %arg8: memref<1x128xf32, #tpu.memory_space<vmem>>, %arg9: memref<1x8x16x4xbf16, #tpu.memory_space<vmem>>, %arg10: memref<12x18x128xbf16, #tpu.memory_space<vmem>>, %arg11: memref<10x18x128xbf16, #tpu.memory_space<vmem>>) attributes {dimension_semantics = [#tpu.dimension_semantics<parallel>, #tpu.dimension_semantics<parallel>], iteration_bounds = array<i64: 2, 2>, scalar_prefetch = 0 : i64, scratch_operands = 2 : i64, tpu.core_type = #tpu.core_type<tc>, window_params = [{transform_indices = @transform_0, window_bounds = array<i64: 1, 8, 16, 128>}, {transform_indices = @transform_1, window_bounds = array<i64: 1, 2, 16, 128>}, {transform_indices = @transform_2, window_bounds = array<i64: 1, 2, 16, 128>}, {pipeline_mode = #tpu.pipeline_mode<synchronous>, transform_indices = @transform_3, window_bounds = array<i64: 9, 128, 128>}, {pipeline_mode = #tpu.pipeline_mode<synchronous>, transform_indices = @transform_4, window_bounds = array<i64: 1, 128>}, {pipeline_mode = #tpu.pipeline_mode<synchronous>, transform_indices = @transform_5, window_bounds = array<i64: 9, 128, 128>}, {pipeline_mode = #tpu.pipeline_mode<synchronous>, transform_indices = @transform_6, window_bounds = array<i64: 1, 128>}, {transform_indices = @transform_7, window_bounds = array<i64: 1, 8, 16, 4>}]} {
    %cst = arith.constant 0.000000e+00 : bf16
    %0 = vector.broadcast %cst : bf16 to vector<12x1x128xbf16>
    %c0 = arith.constant 0 : index
    %c0_0 = arith.constant 0 : index
    %c0_1 = arith.constant 0 : index
    %1 = vector.load %arg10[%c0, %c0_0, %c0_1] : memref<12x18x128xbf16, #tpu.memory_space<vmem>>, vector<12x1x128xbf16>
    tpu.vector_store %arg10[%c0, %c0_0, %c0_1], %0 {strides = array<i32>} : memref<12x18x128xbf16, #tpu.memory_space<vmem>>, vector<12x1x128xbf16>,
    %cst_2 = arith.constant 0.000000e+00 : bf16
    %2 = vector.broadcast %cst_2 : bf16 to vector<12x1x128xbf16>
    %c0_3 = arith.constant 0 : index
    %c17 = arith.constant 17 : index
    %c0_4 = arith.constant 0 : index
    %3 = vector.load %arg10[%c0_3, %c17, %c0_4] : memref<12x18x128xbf16, #tpu.memory_space<vmem>>, vector<12x1x128xbf16>
    tpu.vector_store %arg10[%c0_3, %c17, %c0_4], %2 {strides = array<i32>} : memref<12x18x128xbf16, #tpu.memory_space<vmem>>, vector<12x1x128xbf16>,
    %c0_5 = arith.constant 0 : index
    %c0_6 = arith.constant 0 : index
    %c0_7 = arith.constant 0 : index
    %c0_8 = arith.constant 0 : index
    %4 = vector.load %arg2[%c0_5, %c0_6, %c0_7, %c0_8] : memref<1x8x16x128xbf16, #tpu.memory_space<vmem>>, vector<1x8x16x128xbf16>
    %5 = vector.shape_cast %4 : vector<1x8x16x128xbf16> to vector<8x16x128xbf16>
    %c2 = arith.constant 2 : index
    %c1 = arith.constant 1 : index
    %c0_9 = arith.constant 0 : index
    %6 = vector.load %arg10[%c2, %c1, %c0_9] : memref<12x18x128xbf16, #tpu.memory_space<vmem>>, vector<8x16x128xbf16>
    tpu.vector_store %arg10[%c2, %c1, %c0_9], %5 {strides = array<i32>} : memref<12x18x128xbf16, #tpu.memory_space<vmem>>, vector<8x16x128xbf16>,
    %c0_i32 = arith.constant 0 : i32
    %7 = arith.cmpi eq, %arg1, %c0_i32 : i32
    %cst_10 = arith.constant 0.000000e+00 : bf16
    %8 = vector.broadcast %cst_10 : bf16 to vector<2x16x128xbf16>
    %c0_11 = arith.constant 0 : index
    %c0_12 = arith.constant 0 : index
    %c0_13 = arith.constant 0 : index
    %c0_14 = arith.constant 0 : index
    %9 = vector.load %arg3[%c0_11, %c0_12, %c0_13, %c0_14] : memref<1x2x16x128xbf16, #tpu.memory_space<vmem>>, vector<1x2x16x128xbf16>
    %10 = vector.shape_cast %9 : vector<1x2x16x128xbf16> to vector<2x16x128xbf16>
    %11 = arith.select %7, %8, %10 : vector<2x16x128xbf16>
    %c0_15 = arith.constant 0 : index
    %c1_16 = arith.constant 1 : index
    %c0_17 = arith.constant 0 : index
    %12 = vector.load %arg10[%c0_15, %c1_16, %c0_17] : memref<12x18x128xbf16, #tpu.memory_space<vmem>>, vector<2x16x128xbf16>
    tpu.vector_store %arg10[%c0_15, %c1_16, %c0_17], %11 {strides = array<i32>} : memref<12x18x128xbf16, #tpu.memory_space<vmem>>, vector<2x16x128xbf16>,
    %c1_i32 = arith.constant 1 : i32
    %13 = arith.cmpi eq, %arg1, %c1_i32 : i32
    %cst_18 = arith.constant 0.000000e+00 : bf16
    %14 = vector.broadcast %cst_18 : bf16 to vector<2x16x128xbf16>
    %c0_19 = arith.constant 0 : index
    %c0_20 = arith.constant 0 : index
    %c0_21 = arith.constant 0 : index
    %c0_22 = arith.constant 0 : index
    %15 = vector.load %arg4[%c0_19, %c0_20, %c0_21, %c0_22] : memref<1x2x16x128xbf16, #tpu.memory_space<vmem>>, vector<1x2x16x128xbf16>
    %16 = vector.shape_cast %15 : vector<1x2x16x128xbf16> to vector<2x16x128xbf16>
    %17 = arith.select %13, %14, %16 : vector<2x16x128xbf16>
    %c10 = arith.constant 10 : index
    %c1_23 = arith.constant 1 : index
    %c0_24 = arith.constant 0 : index
    %18 = vector.load %arg10[%c10, %c1_23, %c0_24] : memref<12x18x128xbf16, #tpu.memory_space<vmem>>, vector<2x16x128xbf16>
    tpu.vector_store %arg10[%c10, %c1_23, %c0_24], %17 {strides = array<i32>} : memref<12x18x128xbf16, #tpu.memory_space<vmem>>, vector<2x16x128xbf16>,
    %c0_25 = arith.constant 0 : index
    %c0_26 = arith.constant 0 : index
    %c0_27 = arith.constant 0 : index
    %19 = vector.load %arg10[%c0_25, %c0_26, %c0_27] : memref<12x18x128xbf16, #tpu.memory_space<vmem>>, vector<10x16x128xbf16>
    %20 = vector.shape_cast %19 : vector<10x16x128xbf16> to vector<160x128xbf16>
    %c0_28 = arith.constant 0 : index
    %c0_29 = arith.constant 0 : index
    %c0_30 = arith.constant 0 : index
    %21 = vector.load %arg5[%c0_28, %c0_29, %c0_30] : memref<9x128x128xbf16, #tpu.memory_space<vmem>>, vector<1x128x128xbf16>
    %22 = vector.shape_cast %21 : vector<1x128x128xbf16> to vector<128x128xbf16>
    %cst_31 = arith.constant dense<0.000000e+00> : vector<160x128xf32>
    %23 = tpu.matmul %20, %22, %cst_31 {dimension_numbers = #tpu.dot_dimension_numbers<[1], [0], [0], [1], [0, 0, 1, 1], [], []>} : vector<160x128xbf16>, vector<128x128xbf16>, vector<160x128xf32> -> vector<160x128xf32>
    %c0_32 = arith.constant 0 : index
    %c1_33 = arith.constant 1 : index
    %c0_34 = arith.constant 0 : index
    %24 = vector.load %arg10[%c0_32, %c1_33, %c0_34] : memref<12x18x128xbf16, #tpu.memory_space<vmem>>, vector<10x16x128xbf16>
    %25 = vector.shape_cast %24 : vector<10x16x128xbf16> to vector<160x128xbf16>
    %c1_35 = arith.constant 1 : index
    %c0_36 = arith.constant 0 : index
    %c0_37 = arith.constant 0 : index
    %26 = vector.load %arg5[%c1_35, %c0_36, %c0_37] : memref<9x128x128xbf16, #tpu.memory_space<vmem>>, vector<1x128x128xbf16>
    %27 = vector.shape_cast %26 : vector<1x128x128xbf16> to vector<128x128xbf16>
    %cst_38 = arith.constant dense<0.000000e+00> : vector<160x128xf32>
    %28 = tpu.matmul %25, %27, %cst_38 {dimension_numbers = #tpu.dot_dimension_numbers<[1], [0], [0], [1], [0, 0, 1, 1], [], []>} : vector<160x128xbf16>, vector<128x128xbf16>, vector<160x128xf32> -> vector<160x128xf32>
    %29 = arith.addf %23, %28 : vector<160x128xf32>
    %c0_39 = arith.constant 0 : index
    %c2_40 = arith.constant 2 : index
    %c0_41 = arith.constant 0 : index
    %30 = vector.load %arg10[%c0_39, %c2_40, %c0_41] : memref<12x18x128xbf16, #tpu.memory_space<vmem>>, vector<10x16x128xbf16>
    %31 = vector.shape_cast %30 : vector<10x16x128xbf16> to vector<160x128xbf16>
    %c2_42 = arith.constant 2 : index
    %c0_43 = arith.constant 0 : index
    %c0_44 = arith.constant 0 : index
    %32 = vector.load %arg5[%c2_42, %c0_43, %c0_44] : memref<9x128x128xbf16, #tpu.memory_space<vmem>>, vector<1x128x128xbf16>
    %33 = vector.shape_cast %32 : vector<1x128x128xbf16> to vector<128x128xbf16>
    %cst_45 = arith.constant dense<0.000000e+00> : vector<160x128xf32>
    %34 = tpu.matmul %31, %33, %cst_45 {dimension_numbers = #tpu.dot_dimension_numbers<[1], [0], [0], [1], [0, 0, 1, 1], [], []>} : vector<160x128xbf16>, vector<128x128xbf16>, vector<160x128xf32> -> vector<160x128xf32>
    %35 = arith.addf %29, %34 : vector<160x128xf32>
    %c1_46 = arith.constant 1 : index
    %c0_47 = arith.constant 0 : index
    %c0_48 = arith.constant 0 : index
    %36 = vector.load %arg10[%c1_46, %c0_47, %c0_48] : memref<12x18x128xbf16, #tpu.memory_space<vmem>>, vector<10x16x128xbf16>
    %37 = vector.shape_cast %36 : vector<10x16x128xbf16> to vector<160x128xbf16>
    %c3 = arith.constant 3 : index
    %c0_49 = arith.constant 0 : index
    %c0_50 = arith.constant 0 : index
    %38 = vector.load %arg5[%c3, %c0_49, %c0_50] : memref<9x128x128xbf16, #tpu.memory_space<vmem>>, vector<1x128x128xbf16>
    %39 = vector.shape_cast %38 : vector<1x128x128xbf16> to vector<128x128xbf16>
    %cst_51 = arith.constant dense<0.000000e+00> : vector<160x128xf32>
    %40 = tpu.matmul %37, %39, %cst_51 {dimension_numbers = #tpu.dot_dimension_numbers<[1], [0], [0], [1], [0, 0, 1, 1], [], []>} : vector<160x128xbf16>, vector<128x128xbf16>, vector<160x128xf32> -> vector<160x128xf32>
    %41 = arith.addf %35, %40 : vector<160x128xf32>
    %c1_52 = arith.constant 1 : index
    %c1_53 = arith.constant 1 : index
    %c0_54 = arith.constant 0 : index
    %42 = vector.load %arg10[%c1_52, %c1_53, %c0_54] : memref<12x18x128xbf16, #tpu.memory_space<vmem>>, vector<10x16x128xbf16>
    %43 = vector.shape_cast %42 : vector<10x16x128xbf16> to vector<160x128xbf16>
    %c4 = arith.constant 4 : index
    %c0_55 = arith.constant 0 : index
    %c0_56 = arith.constant 0 : index
    %44 = vector.load %arg5[%c4, %c0_55, %c0_56] : memref<9x128x128xbf16, #tpu.memory_space<vmem>>, vector<1x128x128xbf16>
    %45 = vector.shape_cast %44 : vector<1x128x128xbf16> to vector<128x128xbf16>
    %cst_57 = arith.constant dense<0.000000e+00> : vector<160x128xf32>
    %46 = tpu.matmul %43, %45, %cst_57 {dimension_numbers = #tpu.dot_dimension_numbers<[1], [0], [0], [1], [0, 0, 1, 1], [], []>} : vector<160x128xbf16>, vector<128x128xbf16>, vector<160x128xf32> -> vector<160x128xf32>
    %47 = arith.addf %41, %46 : vector<160x128xf32>
    %c1_58 = arith.constant 1 : index
    %c2_59 = arith.constant 2 : index
    %c0_60 = arith.constant 0 : index
    %48 = vector.load %arg10[%c1_58, %c2_59, %c0_60] : memref<12x18x128xbf16, #tpu.memory_space<vmem>>, vector<10x16x128xbf16>
    %49 = vector.shape_cast %48 : vector<10x16x128xbf16> to vector<160x128xbf16>
    %c5 = arith.constant 5 : index
    %c0_61 = arith.constant 0 : index
    %c0_62 = arith.constant 0 : index
    %50 = vector.load %arg5[%c5, %c0_61, %c0_62] : memref<9x128x128xbf16, #tpu.memory_space<vmem>>, vector<1x128x128xbf16>
    %51 = vector.shape_cast %50 : vector<1x128x128xbf16> to vector<128x128xbf16>
    %cst_63 = arith.constant dense<0.000000e+00> : vector<160x128xf32>
    %52 = tpu.matmul %49, %51, %cst_63 {dimension_numbers = #tpu.dot_dimension_numbers<[1], [0], [0], [1], [0, 0, 1, 1], [], []>} : vector<160x128xbf16>, vector<128x128xbf16>, vector<160x128xf32> -> vector<160x128xf32>
    %53 = arith.addf %47, %52 : vector<160x128xf32>
    %c2_64 = arith.constant 2 : index
    %c0_65 = arith.constant 0 : index
    %c0_66 = arith.constant 0 : index
    %54 = vector.load %arg10[%c2_64, %c0_65, %c0_66] : memref<12x18x128xbf16, #tpu.memory_space<vmem>>, vector<10x16x128xbf16>
    %55 = vector.shape_cast %54 : vector<10x16x128xbf16> to vector<160x128xbf16>
    %c6 = arith.constant 6 : index
    %c0_67 = arith.constant 0 : index
    %c0_68 = arith.constant 0 : index
    %56 = vector.load %arg5[%c6, %c0_67, %c0_68] : memref<9x128x128xbf16, #tpu.memory_space<vmem>>, vector<1x128x128xbf16>
    %57 = vector.shape_cast %56 : vector<1x128x128xbf16> to vector<128x128xbf16>
    %cst_69 = arith.constant dense<0.000000e+00> : vector<160x128xf32>
    %58 = tpu.matmul %55, %57, %cst_69 {dimension_numbers = #tpu.dot_dimension_numbers<[1], [0], [0], [1], [0, 0, 1, 1], [], []>} : vector<160x128xbf16>, vector<128x128xbf16>, vector<160x128xf32> -> vector<160x128xf32>
    %59 = arith.addf %53, %58 : vector<160x128xf32>
    %c2_70 = arith.constant 2 : index
    %c1_71 = arith.constant 1 : index
    %c0_72 = arith.constant 0 : index
    %60 = vector.load %arg10[%c2_70, %c1_71, %c0_72] : memref<12x18x128xbf16, #tpu.memory_space<vmem>>, vector<10x16x128xbf16>
    %61 = vector.shape_cast %60 : vector<10x16x128xbf16> to vector<160x128xbf16>
    %c7 = arith.constant 7 : index
    %c0_73 = arith.constant 0 : index
    %c0_74 = arith.constant 0 : index
    %62 = vector.load %arg5[%c7, %c0_73, %c0_74] : memref<9x128x128xbf16, #tpu.memory_space<vmem>>, vector<1x128x128xbf16>
    %63 = vector.shape_cast %62 : vector<1x128x128xbf16> to vector<128x128xbf16>
    %cst_75 = arith.constant dense<0.000000e+00> : vector<160x128xf32>
    %64 = tpu.matmul %61, %63, %cst_75 {dimension_numbers = #tpu.dot_dimension_numbers<[1], [0], [0], [1], [0, 0, 1, 1], [], []>} : vector<160x128xbf16>, vector<128x128xbf16>, vector<160x128xf32> -> vector<160x128xf32>
    %65 = arith.addf %59, %64 : vector<160x128xf32>
    %c2_76 = arith.constant 2 : index
    %c2_77 = arith.constant 2 : index
    %c0_78 = arith.constant 0 : index
    %66 = vector.load %arg10[%c2_76, %c2_77, %c0_78] : memref<12x18x128xbf16, #tpu.memory_space<vmem>>, vector<10x16x128xbf16>
    %67 = vector.shape_cast %66 : vector<10x16x128xbf16> to vector<160x128xbf16>
    %c8 = arith.constant 8 : index
    %c0_79 = arith.constant 0 : index
    %c0_80 = arith.constant 0 : index
    %68 = vector.load %arg5[%c8, %c0_79, %c0_80] : memref<9x128x128xbf16, #tpu.memory_space<vmem>>, vector<1x128x128xbf16>
    %69 = vector.shape_cast %68 : vector<1x128x128xbf16> to vector<128x128xbf16>
    %cst_81 = arith.constant dense<0.000000e+00> : vector<160x128xf32>
    %70 = tpu.matmul %67, %69, %cst_81 {dimension_numbers = #tpu.dot_dimension_numbers<[1], [0], [0], [1], [0, 0, 1, 1], [], []>} : vector<160x128xbf16>, vector<128x128xbf16>, vector<160x128xf32> -> vector<160x128xf32>
    %71 = arith.addf %65, %70 : vector<160x128xf32>
    %c0_82 = arith.constant 0 : index
    %c0_83 = arith.constant 0 : index
    %72 = vector.load %arg6[%c0_82, %c0_83] : memref<1x128xf32, #tpu.memory_space<vmem>>, vector<1x128xf32>
    %73 = vector.broadcast %72 : vector<1x128xf32> to vector<160x128xf32>
    %74 = arith.addf %71, %73 : vector<160x128xf32>
    %cst_84 = arith.constant 0.000000e+00 : f32
    %75 = vector.broadcast %cst_84 : f32 to vector<160x128xf32>
    %76 = arith.cmpf ogt, %74, %75 : vector<160x128xf32>
    %cst_85 = arith.constant 0.00999999977 : f32
    %77 = vector.broadcast %cst_85 : f32 to vector<160x128xf32>
    %78 = arith.mulf %77, %74 : vector<160x128xf32>
    %79 = arith.select %76, %74, %78 : vector<160x128xi1>, vector<160x128xf32>
    %80 = vector.shape_cast %79 : vector<160x128xf32> to vector<10x16x128xf32>
    %81 = arith.truncf %80 : vector<10x16x128xf32> to vector<10x16x128xbf16>
    %cst_86 = arith.constant 0.000000e+00 : bf16
    %82 = vector.broadcast %cst_86 : bf16 to vector<10x1x128xbf16>
    %c0_87 = arith.constant 0 : index
    %c0_88 = arith.constant 0 : index
    %c0_89 = arith.constant 0 : index
    %83 = vector.load %arg11[%c0_87, %c0_88, %c0_89] : memref<10x18x128xbf16, #tpu.memory_space<vmem>>, vector<10x1x128xbf16>
    tpu.vector_store %arg11[%c0_87, %c0_88, %c0_89], %82 {strides = array<i32>} : memref<10x18x128xbf16, #tpu.memory_space<vmem>>, vector<10x1x128xbf16>,
    %cst_90 = arith.constant 0.000000e+00 : bf16
    %84 = vector.broadcast %cst_90 : bf16 to vector<10x1x128xbf16>
    %c0_91 = arith.constant 0 : index
    %c17_92 = arith.constant 17 : index
    %c0_93 = arith.constant 0 : index
    %85 = vector.load %arg11[%c0_91, %c17_92, %c0_93] : memref<10x18x128xbf16, #tpu.memory_space<vmem>>, vector<10x1x128xbf16>
    tpu.vector_store %arg11[%c0_91, %c17_92, %c0_93], %84 {strides = array<i32>} : memref<10x18x128xbf16, #tpu.memory_space<vmem>>, vector<10x1x128xbf16>,
    %86 = vector.extract_strided_slice %81 {offsets = [1, 0, 0], sizes = [8, 16, 128], strides = [1, 1, 1]} : vector<10x16x128xbf16> to vector<8x16x128xbf16>
    %c1_94 = arith.constant 1 : index
    %c1_95 = arith.constant 1 : index
    %c0_96 = arith.constant 0 : index
    %87 = vector.load %arg11[%c1_94, %c1_95, %c0_96] : memref<10x18x128xbf16, #tpu.memory_space<vmem>>, vector<8x16x128xbf16>
    tpu.vector_store %arg11[%c1_94, %c1_95, %c0_96], %86 {strides = array<i32>} : memref<10x18x128xbf16, #tpu.memory_space<vmem>>, vector<8x16x128xbf16>,
    %c0_i32_97 = arith.constant 0 : i32
    %88 = arith.cmpi eq, %arg1, %c0_i32_97 : i32
    %cst_98 = arith.constant 0.000000e+00 : bf16
    %89 = vector.broadcast %cst_98 : bf16 to vector<1x16x128xbf16>
    %90 = vector.extract_strided_slice %81 {offsets = [0, 0, 0], sizes = [1, 16, 128], strides = [1, 1, 1]} : vector<10x16x128xbf16> to vector<1x16x128xbf16>
    %91 = arith.select %88, %89, %90 : vector<1x16x128xbf16>
    %c0_99 = arith.constant 0 : index
    %c1_100 = arith.constant 1 : index
    %c0_101 = arith.constant 0 : index
    %92 = vector.load %arg11[%c0_99, %c1_100, %c0_101] : memref<10x18x128xbf16, #tpu.memory_space<vmem>>, vector<1x16x128xbf16>
    tpu.vector_store %arg11[%c0_99, %c1_100, %c0_101], %91 {strides = array<i32>} : memref<10x18x128xbf16, #tpu.memory_space<vmem>>, vector<1x16x128xbf16>,
    %c1_i32_102 = arith.constant 1 : i32
    %93 = arith.cmpi eq, %arg1, %c1_i32_102 : i32
    %cst_103 = arith.constant 0.000000e+00 : bf16
    %94 = vector.broadcast %cst_103 : bf16 to vector<1x16x128xbf16>
    %95 = vector.extract_strided_slice %81 {offsets = [9, 0, 0], sizes = [1, 16, 128], strides = [1, 1, 1]} : vector<10x16x128xbf16> to vector<1x16x128xbf16>
    %96 = arith.select %93, %94, %95 : vector<1x16x128xbf16>
    %c9 = arith.constant 9 : index
    %c1_104 = arith.constant 1 : index
    %c0_105 = arith.constant 0 : index
    %97 = vector.load %arg11[%c9, %c1_104, %c0_105] : memref<10x18x128xbf16, #tpu.memory_space<vmem>>, vector<1x16x128xbf16>
    tpu.vector_store %arg11[%c9, %c1_104, %c0_105], %96 {strides = array<i32>} : memref<10x18x128xbf16, #tpu.memory_space<vmem>>, vector<1x16x128xbf16>,
    %c0_106 = arith.constant 0 : index
    %c0_107 = arith.constant 0 : index
    %c0_108 = arith.constant 0 : index
    %98 = vector.load %arg11[%c0_106, %c0_107, %c0_108] : memref<10x18x128xbf16, #tpu.memory_space<vmem>>, vector<8x16x128xbf16>
    %99 = vector.shape_cast %98 : vector<8x16x128xbf16> to vector<128x128xbf16>
    %c0_109 = arith.constant 0 : index
    %c0_110 = arith.constant 0 : index
    %c0_111 = arith.constant 0 : index
    %100 = vector.load %arg7[%c0_109, %c0_110, %c0_111] : memref<9x128x128xbf16, #tpu.memory_space<vmem>>, vector<1x128x128xbf16>
    %101 = vector.shape_cast %100 : vector<1x128x128xbf16> to vector<128x128xbf16>
    %cst_112 = arith.constant dense<0.000000e+00> : vector<128x128xf32>
    %102 = tpu.matmul %99, %101, %cst_112 {dimension_numbers = #tpu.dot_dimension_numbers<[1], [0], [0], [1], [0, 0, 1, 1], [], []>} : vector<128x128xbf16>, vector<128x128xbf16>, vector<128x128xf32> -> vector<128x128xf32>
    %c0_113 = arith.constant 0 : index
    %c1_114 = arith.constant 1 : index
    %c0_115 = arith.constant 0 : index
    %103 = vector.load %arg11[%c0_113, %c1_114, %c0_115] : memref<10x18x128xbf16, #tpu.memory_space<vmem>>, vector<8x16x128xbf16>
    %104 = vector.shape_cast %103 : vector<8x16x128xbf16> to vector<128x128xbf16>
    %c1_116 = arith.constant 1 : index
    %c0_117 = arith.constant 0 : index
    %c0_118 = arith.constant 0 : index
    %105 = vector.load %arg7[%c1_116, %c0_117, %c0_118] : memref<9x128x128xbf16, #tpu.memory_space<vmem>>, vector<1x128x128xbf16>
    %106 = vector.shape_cast %105 : vector<1x128x128xbf16> to vector<128x128xbf16>
    %cst_119 = arith.constant dense<0.000000e+00> : vector<128x128xf32>
    %107 = tpu.matmul %104, %106, %cst_119 {dimension_numbers = #tpu.dot_dimension_numbers<[1], [0], [0], [1], [0, 0, 1, 1], [], []>} : vector<128x128xbf16>, vector<128x128xbf16>, vector<128x128xf32> -> vector<128x128xf32>
    %108 = arith.addf %102, %107 : vector<128x128xf32>
    %c0_120 = arith.constant 0 : index
    %c2_121 = arith.constant 2 : index
    %c0_122 = arith.constant 0 : index
    %109 = vector.load %arg11[%c0_120, %c2_121, %c0_122] : memref<10x18x128xbf16, #tpu.memory_space<vmem>>, vector<8x16x128xbf16>
    %110 = vector.shape_cast %109 : vector<8x16x128xbf16> to vector<128x128xbf16>
    %c2_123 = arith.constant 2 : index
    %c0_124 = arith.constant 0 : index
    %c0_125 = arith.constant 0 : index
    %111 = vector.load %arg7[%c2_123, %c0_124, %c0_125] : memref<9x128x128xbf16, #tpu.memory_space<vmem>>, vector<1x128x128xbf16>
    %112 = vector.shape_cast %111 : vector<1x128x128xbf16> to vector<128x128xbf16>
    %cst_126 = arith.constant dense<0.000000e+00> : vector<128x128xf32>
    %113 = tpu.matmul %110, %112, %cst_126 {dimension_numbers = #tpu.dot_dimension_numbers<[1], [0], [0], [1], [0, 0, 1, 1], [], []>} : vector<128x128xbf16>, vector<128x128xbf16>, vector<128x128xf32> -> vector<128x128xf32>
    %114 = arith.addf %108, %113 : vector<128x128xf32>
    %c1_127 = arith.constant 1 : index
    %c0_128 = arith.constant 0 : index
    %c0_129 = arith.constant 0 : index
    %115 = vector.load %arg11[%c1_127, %c0_128, %c0_129] : memref<10x18x128xbf16, #tpu.memory_space<vmem>>, vector<8x16x128xbf16>
    %116 = vector.shape_cast %115 : vector<8x16x128xbf16> to vector<128x128xbf16>
    %c3_130 = arith.constant 3 : index
    %c0_131 = arith.constant 0 : index
    %c0_132 = arith.constant 0 : index
    %117 = vector.load %arg7[%c3_130, %c0_131, %c0_132] : memref<9x128x128xbf16, #tpu.memory_space<vmem>>, vector<1x128x128xbf16>
    %118 = vector.shape_cast %117 : vector<1x128x128xbf16> to vector<128x128xbf16>
    %cst_133 = arith.constant dense<0.000000e+00> : vector<128x128xf32>
    %119 = tpu.matmul %116, %118, %cst_133 {dimension_numbers = #tpu.dot_dimension_numbers<[1], [0], [0], [1], [0, 0, 1, 1], [], []>} : vector<128x128xbf16>, vector<128x128xbf16>, vector<128x128xf32> -> vector<128x128xf32>
    %120 = arith.addf %114, %119 : vector<128x128xf32>
    %c1_134 = arith.constant 1 : index
    %c1_135 = arith.constant 1 : index
    %c0_136 = arith.constant 0 : index
    %121 = vector.load %arg11[%c1_134, %c1_135, %c0_136] : memref<10x18x128xbf16, #tpu.memory_space<vmem>>, vector<8x16x128xbf16>
    %122 = vector.shape_cast %121 : vector<8x16x128xbf16> to vector<128x128xbf16>
    %c4_137 = arith.constant 4 : index
    %c0_138 = arith.constant 0 : index
    %c0_139 = arith.constant 0 : index
    %123 = vector.load %arg7[%c4_137, %c0_138, %c0_139] : memref<9x128x128xbf16, #tpu.memory_space<vmem>>, vector<1x128x128xbf16>
    %124 = vector.shape_cast %123 : vector<1x128x128xbf16> to vector<128x128xbf16>
    %cst_140 = arith.constant dense<0.000000e+00> : vector<128x128xf32>
    %125 = tpu.matmul %122, %124, %cst_140 {dimension_numbers = #tpu.dot_dimension_numbers<[1], [0], [0], [1], [0, 0, 1, 1], [], []>} : vector<128x128xbf16>, vector<128x128xbf16>, vector<128x128xf32> -> vector<128x128xf32>
    %126 = arith.addf %120, %125 : vector<128x128xf32>
    %c1_141 = arith.constant 1 : index
    %c2_142 = arith.constant 2 : index
    %c0_143 = arith.constant 0 : index
    %127 = vector.load %arg11[%c1_141, %c2_142, %c0_143] : memref<10x18x128xbf16, #tpu.memory_space<vmem>>, vector<8x16x128xbf16>
    %128 = vector.shape_cast %127 : vector<8x16x128xbf16> to vector<128x128xbf16>
    %c5_144 = arith.constant 5 : index
    %c0_145 = arith.constant 0 : index
    %c0_146 = arith.constant 0 : index
    %129 = vector.load %arg7[%c5_144, %c0_145, %c0_146] : memref<9x128x128xbf16, #tpu.memory_space<vmem>>, vector<1x128x128xbf16>
    %130 = vector.shape_cast %129 : vector<1x128x128xbf16> to vector<128x128xbf16>
    %cst_147 = arith.constant dense<0.000000e+00> : vector<128x128xf32>
    %131 = tpu.matmul %128, %130, %cst_147 {dimension_numbers = #tpu.dot_dimension_numbers<[1], [0], [0], [1], [0, 0, 1, 1], [], []>} : vector<128x128xbf16>, vector<128x128xbf16>, vector<128x128xf32> -> vector<128x128xf32>
    %132 = arith.addf %126, %131 : vector<128x128xf32>
    %c2_148 = arith.constant 2 : index
    %c0_149 = arith.constant 0 : index
    %c0_150 = arith.constant 0 : index
    %133 = vector.load %arg11[%c2_148, %c0_149, %c0_150] : memref<10x18x128xbf16, #tpu.memory_space<vmem>>, vector<8x16x128xbf16>
    %134 = vector.shape_cast %133 : vector<8x16x128xbf16> to vector<128x128xbf16>
    %c6_151 = arith.constant 6 : index
    %c0_152 = arith.constant 0 : index
    %c0_153 = arith.constant 0 : index
    %135 = vector.load %arg7[%c6_151, %c0_152, %c0_153] : memref<9x128x128xbf16, #tpu.memory_space<vmem>>, vector<1x128x128xbf16>
    %136 = vector.shape_cast %135 : vector<1x128x128xbf16> to vector<128x128xbf16>
    %cst_154 = arith.constant dense<0.000000e+00> : vector<128x128xf32>
    %137 = tpu.matmul %134, %136, %cst_154 {dimension_numbers = #tpu.dot_dimension_numbers<[1], [0], [0], [1], [0, 0, 1, 1], [], []>} : vector<128x128xbf16>, vector<128x128xbf16>, vector<128x128xf32> -> vector<128x128xf32>
    %138 = arith.addf %132, %137 : vector<128x128xf32>
    %c2_155 = arith.constant 2 : index
    %c1_156 = arith.constant 1 : index
    %c0_157 = arith.constant 0 : index
    %139 = vector.load %arg11[%c2_155, %c1_156, %c0_157] : memref<10x18x128xbf16, #tpu.memory_space<vmem>>, vector<8x16x128xbf16>
    %140 = vector.shape_cast %139 : vector<8x16x128xbf16> to vector<128x128xbf16>
    %c7_158 = arith.constant 7 : index
    %c0_159 = arith.constant 0 : index
    %c0_160 = arith.constant 0 : index
    %141 = vector.load %arg7[%c7_158, %c0_159, %c0_160] : memref<9x128x128xbf16, #tpu.memory_space<vmem>>, vector<1x128x128xbf16>
    %142 = vector.shape_cast %141 : vector<1x128x128xbf16> to vector<128x128xbf16>
    %cst_161 = arith.constant dense<0.000000e+00> : vector<128x128xf32>
    %143 = tpu.matmul %140, %142, %cst_161 {dimension_numbers = #tpu.dot_dimension_numbers<[1], [0], [0], [1], [0, 0, 1, 1], [], []>} : vector<128x128xbf16>, vector<128x128xbf16>, vector<128x128xf32> -> vector<128x128xf32>
    %144 = arith.addf %138, %143 : vector<128x128xf32>
    %c2_162 = arith.constant 2 : index
    %c2_163 = arith.constant 2 : index
    %c0_164 = arith.constant 0 : index
    %145 = vector.load %arg11[%c2_162, %c2_163, %c0_164] : memref<10x18x128xbf16, #tpu.memory_space<vmem>>, vector<8x16x128xbf16>
    %146 = vector.shape_cast %145 : vector<8x16x128xbf16> to vector<128x128xbf16>
    %c8_165 = arith.constant 8 : index
    %c0_166 = arith.constant 0 : index
    %c0_167 = arith.constant 0 : index
    %147 = vector.load %arg7[%c8_165, %c0_166, %c0_167] : memref<9x128x128xbf16, #tpu.memory_space<vmem>>, vector<1x128x128xbf16>
    %148 = vector.shape_cast %147 : vector<1x128x128xbf16> to vector<128x128xbf16>
    %cst_168 = arith.constant dense<0.000000e+00> : vector<128x128xf32>
    %149 = tpu.matmul %146, %148, %cst_168 {dimension_numbers = #tpu.dot_dimension_numbers<[1], [0], [0], [1], [0, 0, 1, 1], [], []>} : vector<128x128xbf16>, vector<128x128xbf16>, vector<128x128xf32> -> vector<128x128xf32>
    %150 = arith.addf %144, %149 : vector<128x128xf32>
    %c0_169 = arith.constant 0 : index
    %c0_170 = arith.constant 0 : index
    %c0_171 = arith.constant 0 : index
    %c0_172 = arith.constant 0 : index
    %151 = vector.load %arg2[%c0_169, %c0_170, %c0_171, %c0_172] : memref<1x8x16x128xbf16, #tpu.memory_space<vmem>>, vector<1x8x16x128xbf16>
    %152 = vector.shape_cast %151 : vector<1x8x16x128xbf16> to vector<8x16x128xbf16>
    %153 = arith.extf %152 : vector<8x16x128xbf16> to vector<8x16x128xf32>
    %154 = vector.shape_cast %153 : vector<8x16x128xf32> to vector<128x128xf32>
    %c0_173 = arith.constant 0 : index
    %c0_174 = arith.constant 0 : index
    %155 = vector.load %arg8[%c0_173, %c0_174] : memref<1x128xf32, #tpu.memory_space<vmem>>, vector<1x128xf32>
    %156 = vector.broadcast %155 : vector<1x128xf32> to vector<128x128xf32>
    %157 = arith.addf %150, %156 : vector<128x128xf32>
    %158 = arith.addf %157, %154 : vector<128x128xf32>
    %cst_175 = arith.constant 0.000000e+00 : f32
    %159 = vector.broadcast %cst_175 : f32 to vector<128x128xf32>
    %160 = arith.cmpf ogt, %158, %159 : vector<128x128xf32>
    %cst_176 = arith.constant 0.00999999977 : f32
    %161 = vector.broadcast %cst_176 : f32 to vector<128x128xf32>
    %162 = arith.mulf %161, %158 : vector<128x128xf32>
    %163 = arith.select %160, %158, %162 : vector<128x128xi1>, vector<128x128xf32>
    %164 = vector.shape_cast %163 : vector<128x128xf32> to vector<8x16x128xf32>
    %165 = vector.extract_strided_slice %164 {offsets = [0, 0, 0], sizes = [8, 16, 4], strides = [1, 1, 1]} : vector<8x16x128xf32> to vector<8x16x4xf32>
    %166 = arith.truncf %165 : vector<8x16x4xf32> to vector<8x16x4xbf16>
    %c0_177 = arith.constant 0 : index
    %c0_178 = arith.constant 0 : index
    %c0_179 = arith.constant 0 : index
    %c0_180 = arith.constant 0 : index
    %167 = vector.load %arg9[%c0_177, %c0_178, %c0_179, %c0_180] : memref<1x8x16x4xbf16, #tpu.memory_space<vmem>>, vector<1x8x16x4xbf16>
    %168 = vector.shape_cast %167 : vector<1x8x16x4xbf16> to vector<8x16x4xbf16>
    %169 = vector.shape_cast %166 : vector<8x16x4xbf16> to vector<1x8x16x4xbf16>
    tpu.vector_store %arg9[%c0_177, %c0_178, %c0_179, %c0_180], %169 {strides = array<i32>} : memref<1x8x16x4xbf16, #tpu.memory_space<vmem>>, vector<1x8x16x4xbf16>,
    return
  }
  func.func @transform_0(%arg0: i32, %arg1: i32) -> (i32, i32, i32, i32) {
    %c0_i32 = arith.constant 0 : i32
    %c0_i32_0 = arith.constant 0 : i32
    %c0_i32_1 = arith.constant 0 : i32
    return %arg0, %arg1, %c0_i32, %c0_i32_0 : i32, i32, i32, i32
  }
  func.func @transform_1(%arg0: i32, %arg1: i32) -> (i32, i32, i32, i32) {
    %c4_i32 = arith.constant 4 : i32
    %0 = arith.muli %arg1, %c4_i32 : i32
    %c1_i32 = arith.constant 1 : i32
    %1 = arith.subi %0, %c1_i32 : i32
    %c0_i32 = arith.constant 0 : i32
    %2 = arith.maxsi %1, %c0_i32 : i32
    %c0_i32_0 = arith.constant 0 : i32
    %c0_i32_1 = arith.constant 0 : i32
    %c0_i32_2 = arith.constant 0 : i32
    return %arg0, %2, %c0_i32_0, %c0_i32_1 : i32, i32, i32, i32
  }
  func.func @transform_2(%arg0: i32, %arg1: i32) -> (i32, i32, i32, i32) {
    %c1_i32 = arith.constant 1 : i32
    %0 = arith.addi %arg1, %c1_i32 : i32
    %c4_i32 = arith.constant 4 : i32
    %1 = arith.muli %0, %c4_i32 : i32
    %c7_i32 = arith.constant 7 : i32
    %2 = arith.minsi %1, %c7_i32 : i32
    %c0_i32 = arith.constant 0 : i32
    %c0_i32_0 = arith.constant 0 : i32
    %c0_i32_1 = arith.constant 0 : i32
    return %arg0, %2, %c0_i32, %c0_i32_0 : i32, i32, i32, i32
  }
  func.func @transform_3(%arg0: i32, %arg1: i32) -> (i32, i32, i32) {
    %c0_i32 = arith.constant 0 : i32
    %c0_i32_0 = arith.constant 0 : i32
    %c0_i32_1 = arith.constant 0 : i32
    %c0_i32_2 = arith.constant 0 : i32
    return %c0_i32, %c0_i32_0, %c0_i32_1 : i32, i32, i32
  }
  func.func @transform_4(%arg0: i32, %arg1: i32) -> (i32, i32) {
    %c0_i32 = arith.constant 0 : i32
    %c0_i32_0 = arith.constant 0 : i32
    %c0_i32_1 = arith.constant 0 : i32
    return %c0_i32, %c0_i32_0 : i32, i32
  }
  func.func @transform_5(%arg0: i32, %arg1: i32) -> (i32, i32, i32) {
    %c0_i32 = arith.constant 0 : i32
    %c0_i32_0 = arith.constant 0 : i32
    %c0_i32_1 = arith.constant 0 : i32
    %c0_i32_2 = arith.constant 0 : i32
    return %c0_i32, %c0_i32_0, %c0_i32_1 : i32, i32, i32
  }
  func.func @transform_6(%arg0: i32, %arg1: i32) -> (i32, i32) {
    %c0_i32 = arith.constant 0 : i32
    %c0_i32_0 = arith.constant 0 : i32
    %c0_i32_1 = arith.constant 0 : i32
    return %c0_i32, %c0_i32_0 : i32, i32
  }
  func.func @transform_7(%arg0: i32, %arg1: i32) -> (i32, i32, i32, i32) {
    %c0_i32 = arith.constant 0 : i32
    %c0_i32_0 = arith.constant 0 : i32
    %c0_i32_1 = arith.constant 0 : i32
    return %arg0, %arg1, %c0_i32, %c0_i32_0 : i32, i32, i32, i32
  }
}

</mosaic_0001>

<bundles_post_ra>
// kernel: tpu_custom_call.1
= control target key start
LH: loop header
LB: loop body
LE: loop exit
PB: predicated region body
PF: predicated region fallthrough
CT: control target
= control target key end

     0   :  { %s10676_s0 = inlined_call_operand.hbm [shape: bf16[2,16,16,128], index: 0, kind: input, shape index: {}]   ;;  %s10677_s1 = inlined_call_operand.hbm [shape: bf16[2,16,16,128], index: 1, kind: input, shape index: {}]   ;;  %s10678_s2 = inlined_call_operand.hbm [shape: bf16[2,16,16,128], index: 2, kind: input, shape index: {}]   ;;  %s10679_s3 = inlined_call_operand.hbm [shape: bf16[9,128,128], index: 3, kind: input, shape index: {}]   ;;  %s10680_s4 = inlined_call_operand.vmem [shape: f32[1,128], index: 4, kind: input, shape index: {}]   ;;  %s10681_s5 = inlined_call_operand.hbm [shape: bf16[9,128,128], index: 5, kind: input, shape index: {}]   ;;  %s10682_s6 = inlined_call_operand.vmem [shape: f32[1,128], index: 6, kind: input, shape index: {}]   ;;  %s10683_s7 = inlined_call_operand.vmem [shape: bf16[2,16,16,4], index: 7, kind: output, shape index: {}]  }
   0x1   :  { %10707 = sst [smem:[#allocation44_spill]] %s10676_s0 }
   0x2   :  { %10708 = sst [smem:[#allocation45_spill]] %s10677_s1 }
   0x3   :  { %10709 = sst [smem:[#allocation46_spill]] %s10678_s2 }
   0x4   :  { %10710 = sst [smem:[#allocation47_spill]] %s10679_s3 }
   0x5   :  { %10711 = sst [smem:[#allocation48_spill]] %s10680_s4 }
   0x6   :  { %10712 = sst [smem:[#allocation49_spill]] %s10681_s5 }
   0x7   :  { %10713 = sst [smem:[#allocation50_spill]] %s10682_s6 }
   0x8   :  { %10714 = sst [smem:[#allocation51_spill]] %s10683_s7 }
   0x9   :  { %12 = vsyncpa [#allocation5], 0 }
   0xa   :  { %14 = vsyncpa [#allocation5 + $0x1], 0 }
   0xb   :  { %15 = vsyncpa [#allocation7], 0 }
   0xc   :  { %17 = vsyncpa [#allocation7 + $0x1], 0 }
   0xd   :  { %18 = vsyncpa [#allocation10], 0  ;;  %s8604_s24 = smov 0   ;;  %s8606_s25 = smov 0  }
   0xe   :  { %s8608_s26 = smov 0   ;;  %s8610_s27 = smov 0  }
   0xf   :  { %s8612_s28 = smov 0   ;;  %s8614_s29 = smov 0  }
  0x10   :  { %s8616_s30 = smov 0   ;;  %s8618_s8 = smov 0  }
  0x11   :  { %s8620_s9 = smov 0   ;;  %s8622_s10 = smov 0  }
  0x12   :  { %s8624_s11 = smov 0   ;;  %s8626_s12 = smov 0  }
  0x13   :  { %s8628_s13 = smov 0   ;;  %s8630_s14 = smov 0  }
  0x14 LB: > { %10715 = sst [smem:[#allocation16_spill]] %s8522_s28  ;;  %s10684_s15 = sadd.s32 4294967295, %s8558_s14   ;;  %s8558_s14 = sphi %s8630_s14, %s24_s14   ;;  %s8554_s13 = sphi %s8628_s13, %s10817_s13   ;;  %s8550_s12 = sphi %s8626_s12, %s10816_s12   ;;  %s8546_s11 = sphi %s8624_s11, %s10815_s11   ;;  %s8542_s10 = sphi %s8622_s10, %s10814_s10   ;;  %s8538_s9 = sphi %s8620_s9, %s10825_s9   ;;  %s8534_s8 = sphi %s8618_s8, %s10824_s8   ;;  %s8530_s30 = sphi %s8616_s30, %s10823_s30   ;;  %s8526_s29 = sphi %s8614_s29, %s10822_s29   ;;  %s8522_s28 = sphi %s8612_s28, %s10821_s28   ;;  %s8518_s27 = sphi %s8610_s27, %s10812_s27   ;;  %s8514_s26 = sphi %s8608_s26, %s10820_s26   ;;  %s8510_s25 = sphi %s8606_s25, %s10819_s25   ;;  %s8506_s24 = sphi %s8604_s24, %s10818_s24  }
  0x15   : > { %10716 = sst [smem:[#allocation17_spill]] %s8542_s10  ;;  %p6969_p0 = scmp.ge.s32.totalorder %s8558_s14, 1 }
  0x16   : > { %10717 = sst [smem:[#allocation18_spill]] %s8546_s11  ;;  %p8678_p1 = scmp.eq.s32.totalorder %s10684_s15, 0 }
  0x17   : > { %10718 = sst [smem:[#allocation19_spill]] %s8550_s12  ;;  %p253_p2 = scmp.lt.s32.totalorder %s8558_s14, 5 }
  0x18   : > { %10719 = sst [smem:[#allocation20_spill]] %s8554_s13  ;;  %s8560_s21 = smov [#allocation9]  }
  0x19   : > { %s10721_s3 = sld [smem:[#allocation47_spill]]  ;;  %p8686_p3 = pnand %p6969_p0, %p253_p2 }
  0x1a   : > { %s266_s22 = sshll.u32 %s8560_s21, 4  ;;  %s10685_s17 = smov 64   ;;  %s267_s22 = int_to_ptr.vmem [resolvable:$true] %s266_s22 }
  0x1b   : > { %s10722_s20 = scalar_select %p8686_p3, 1, 0 }
  0x1c   : > { %p8125_p4 = pneg %p8686_p3  ;;  %s10687_s18 = smov 4  }
  0x1d   : > { %10723 = sst [smem:[#allocation21_spill]] %s10722_s20  ;;  %s33_s15 = sadd.s32 1, %s8550_s12 }
  0x1e   : > { %p8694_p5 = pnand %p8125_p4, %p8678_p1  ;;  %p34_p6 = scmp.ge.s32.totalorder %s33_s15, 2 }
  0x1f   : > { %s264_s19 = sshll.u32 %s10721_s3, 4  ;;  %s36_s3 = sadd.s32 1, %s8554_s13  ;;  %s265_s19 = int_to_ptr.hbm [resolvable:$true] %s264_s19 }
  0x20   : > { %8128 = dma.hbm_to_vmem [thread:$0]  (!%p8694_p5), %s265_s19, 9216, %s267_s22, [#allocation10], %s10685_s17, %s10685_s17, %s10687_s18  }
  0x21   : > { %p53_p7 = scmp.eq.s32.totalorder %s8558_s14, 0  ;;  %s6963_s21 = sshll.u32 %s8550_s12, 2 }
  0x22   : > { %s10827_s15 = smov (%p34_p6, %s33_s15), 0  ;;  %s10829_s3 = smov (!%p34_p6, %s36_s3), %s8554_s13 }
  0x23   : > { %10725 = sst [smem:[#allocation22_spill]] %s10827_s15  ;;  %s41_s7 = ssub.s32 %s8550_s12, %s10827_s15 }
  0x24   : > { %s6964_s6 = sadd.s32 4294967295, %s6963_s21  ;;  %p38_p8 = scmp.ge.s32.totalorder %s10829_s3, 2 }
  0x25   : > { %p70_p9 = scmp.gt.s32.totalorder %s6964_s6, 0  ;;  %s6965_s19 = sshll.u32 %s10827_s15, 2 }
  0x26   : > { %s81_s22 = sadd.s32 1, %s8526_s29  ;;  %s10831_s3 = smov (%p38_p8, %s10829_s3), 0 }
  0x27   : > { %10726 = sst [smem:[#allocation23_spill]] %s10831_s3  ;;  %s10833_s6 = smov (!%p70_p9, %s6964_s6), 0 }
  0x28   : > { %s8718_s17 = ssub.s32 %s8554_s13, %s10831_s3  ;;  %s6966_s18 = sadd.s32 4294967295, %s6965_s19 }
  0x29   : > { %10727 = sst [smem:[#allocation24_spill]] %s8718_s17  ;;  %s8721_s11 = sor.u32 %s41_s7, %s8718_s17 }
  0x2a   : > { %p74_p10 = scmp.gt.s32.totalorder %s6966_s18, 0  ;;  %p43_p11 = scmp.eq.s32.totalorder %s8721_s11, 0 }
  0x2b   : > { %p88_p12 = scmp.ne.s32.totalorder %s8526_s29, %s8522_s28  ;;  %p94_p0 = scmp.ne.s32.totalorder %s8522_s28, %s8518_s27 }
  0x2c   : > { %s10835_s18 = smov (!%p74_p10, %s6966_s18), 0  ;;  %s8734_s4 = sadd.s32 4, %s6963_s21 }
  0x2d   : > { %p8728_p13 = por %p88_p12, %p53_p7  ;;  %s77_s3 = ssub.s32 %s10833_s6, %s10835_s18 }
  0x2e   : > { %s78_s7 = sor.u32 %s77_s3, %s8718_s17  ;;  %p8739_p2 = por %p94_p0, %p8678_p1 }
  0x2f   : > { %p79_p4 = scmp.eq.s32.totalorder %s78_s7, 0  ;;  %p106_p6 = scmp.lt.s32.totalorder %s8734_s4, 7 }
  0x30   : > { %s10729_s10 = scalar_select %p8739_p2, 1, 0 }
  0x31   : > { %s8744_s20 = sadd.s32 4, %s6965_s19  ;;  %p8144_p8 = scmp.lt.s32.totalorder %s8558_s14, 4 }
  0x32   : > { %10730 = sst [smem:[#allocation25_spill]] %s10729_s10  ;;  %p110_p9 = scmp.lt.s32.totalorder %s8744_s20, 7 }
  0x33   : > { %s8748_s2 = scalar_select %p79_p4, %s8526_s29, %s81_s22  }
  0x34   : > { %s8752_s27 = sshll.u32 %s8554_s13, 5  ;;  %s325_s3 = sand.u32 1, %s8558_s14  }
  0x35   : > { %10731 = sst [smem:[#allocation26_spill]] %s8748_s2  ;;  %s327_s18 = sand.u32 1, %s8526_s29  }
  0x36   : > { %s6978_s21 = sshll.u32 %s327_s18, 4  ;;  %s7854_s28 = sshll.u32 %s10833_s6, 2 }
  0x37   : > { %s339_s17 = sadd.s32 %s7854_s28, %s8752_s27  ;;  %s329_s7 = scalar_lea.vmem [#allocation6], %s6978_s21 }
  0x38   : > { %s344_s10 = sshll.u32 %s329_s7, 4  ;;  %s6984_s19 = sshll.u32 %s339_s17, 2  ;;  %s345_s10 = int_to_ptr.vmem [resolvable:$true] %s344_s10 }
  0x39   : > { %s10732_s1 = sld [smem:[#allocation45_spill]]  ;;  %p8136_p10 = pnand %p8144_p8, %p8728_p13 }
  0x3a   : > { %s10733_s5 = sld [smem:[#allocation49_spill]]  ;;  %s8767_s21 = scalar_lea.sflag [#allocation7], %s325_s3 }
  0x3b   : > { %s10734_s7 = smov 4   ;;  %s10735_s2 = smov 64  }
  0x3c   : > { %s8563_s15 = smov [#allocation11]   ;;  %p52_p12 = scmp.ne.s32.totalorder %s8538_s9, %s8534_s8 }
  0x3d   : > { %p58_p0 = scmp.ne.s32.totalorder %s8534_s8, %s8530_s30  ;;  %s7853_s23 = sshll.u32 %s8550_s12, 4 }
  0x3e   : > { %p8788_p13 = por %p53_p7, %p52_p12  ;;  %s310_s28 = sadd.s32 %s7853_s23, %s8752_s27 }
  0x3f   : > { %s341_s13 = scalar_lea.hbm %s10732_s1, %s6984_s19  ;;  %s283_s19 = sshll.u32 %s8563_s15, 4  ;;  %s284_s19 = int_to_ptr.vmem [resolvable:$true] %s283_s19 }
  0x40   : > { %s342_s6 = sshll.u32 %s341_s13, 4  ;;  %s281_s17 = sshll.u32 %s10733_s5, 4  ;;  %s343_s6 = int_to_ptr.hbm [resolvable:$true] %s342_s6  ;;  %s282_s17 = int_to_ptr.hbm [resolvable:$true] %s281_s17 }
  0x41   : > { %8138 = dma.hbm_to_vmem [thread:$0]  (!%p8136_p10), %s343_s6, 256, %s345_s10, %s8767_s21, %s10735_s2, %s10735_s2, %s10734_s7  }
  0x42   : > { %8131 = dma.hbm_to_vmem [thread:$0]  (!%p8694_p5), %s282_s17, 9216, %s284_s19, [#allocation10], %s10735_s2, %s10735_s2, %s10734_s7  }
  0x43   : > { %s45_s13 = sadd.s32 1, %s8538_s9  ;;  %s300_s10 = sand.u32 1, %s8538_s9  }
  0x44   : > { %s8784_s3 = scalar_select %p43_p11, %s8538_s9, %s45_s13  }
  0x45   : > { %p8798_p5 = por %p8678_p1, %p58_p0  ;;  %s6973_s6 = sshll.u32 %s300_s10, 6 }
  0x46   : > { %s6977_s18 = sshll.u32 %s310_s28, 2  ;;  %s10738_s0 = sld [smem:[#allocation44_spill]] }
  0x47   : > { %s10739_s19 = sld [smem:[#allocation24_spill]]  ;;  %s304_s13 = scalar_lea.vmem [#allocation4], %s6973_s6 }
  0x48   : > { %s315_s1 = sshll.u32 %s304_s13, 4  ;;  %p8133_p11 = pnand %p8144_p8, %p8788_p13  ;;  %s316_s1 = int_to_ptr.vmem [resolvable:$true] %s315_s1 }
  0x49   : > { %s301_s12 = scalar_lea.sflag [#allocation5], %s300_s10  ;;  %s117_s23 = sadd.s32 1, %s8514_s26 }
  0x4a   : > { %s10837_s4 = smov (!%p106_p6, %s8734_s4), 7  ;;  %s10839_s20 = smov (!%p110_p9, %s8744_s20), 7 }
  0x4b   : > { %p124_p4 = scmp.ne.s32.totalorder %s8514_s26, %s8510_s25  ;;  %p130_p10 = scmp.ne.s32.totalorder %s8510_s25, %s8506_s24 }
  0x4c   : > { %s312_s15 = scalar_lea.hbm %s10738_s0, %s6977_s18  ;;  %s113_s6 = ssub.s32 %s10837_s4, %s10839_s20 }
  0x4d   : > { %s313_s5 = sshll.u32 %s312_s15, 4  ;;  %s356_s28 = sand.u32 1, %s8514_s26   ;;  %s314_s5 = int_to_ptr.hbm [resolvable:$true] %s313_s5 }
  0x4e   : > { %8135 = dma.hbm_to_vmem [thread:$0]  (!%p8133_p11), %s314_s5, 1024, %s316_s1, %s301_s12, %s10735_s2, %s10735_s2, %s10734_s7  }
  0x4f   : > { %s114_s22 = sor.u32 %s113_s6, %s10739_s19  ;;  %p8828_p12 = por %p124_p4, %p53_p7 }
  0x50   : > { %p115_p13 = scmp.eq.s32.totalorder %s114_s22, 0  ;;  %p8834_p0 = por %p130_p10, %p8678_p1 }
  0x51   : > { %s6985_s5 = sshll.u32 %s356_s28, 4  ;;  %s7857_s12 = sshll.u32 %s10837_s4, 2 }
  0x52   : > { %s8839_s24 = scalar_select %p115_p13, %s8514_s26, %s117_s23  }
  0x53   : > { %s368_s20 = sadd.s32 %s7857_s12, %s8752_s27  ;;  %s358_s30 = scalar_lea.vmem [#allocation8], %s6985_s5 }
  0x54   : > { %s6990_s18 = sshll.u32 %s368_s20, 2  ;;  %s373_s17 = sshll.u32 %s358_s30, 4  ;;  %s374_s17 = int_to_ptr.vmem [resolvable:$true] %s373_s17 }
  0x55   : > { %s10742_s13 = sld [smem:[#allocation46_spill]]  ;;  %p8139_p7 = pnand %p8144_p8, %p8828_p12 }
  0x59   : > { %385 = sbr.rel (%p8686_p3) target bundleno = 1215 (0x4bf), region = 48 }
  0x5b   : > { %s370_s6 = scalar_lea.hbm %s10742_s13, %s6990_s18 }
  0x5c   : > { %s371_s0 = sshll.u32 %s370_s6, 4  ;;  %s372_s0 = int_to_ptr.hbm [resolvable:$true] %s371_s0 }
  0x5d   : > { %8141 = dma.hbm_to_vmem [thread:$0]  (!%p8139_p7), %s372_s0, 256, %s374_s17, %s8767_s21, %s10735_s2, %s10735_s2, %s10734_s7  }
  0x5e   : > { %s387_s27 = sand.u32 1, %s8534_s8  }
  0x5f   : > { %s6992_s23 = sshll.u32 %s387_s27, 6  ;;  %s388_s28 = scalar_lea.sflag [#allocation5], %s387_s27 }
  0x60   : > { %s8856_s22 = scalar_lea.vmem [#allocation4], %s6992_s23 }
  0x61   : > { %8489 = dma.done.wait (%p8798_p5), %s388_s28, 1024  }
  0x62   : > { %8491 = vsyncadd (%p8798_p5), %s388_s28, 4294966272  ;;  %s10744_s10 = sadd.s32 4294967295, %s8558_s14   ;;  %s10745_s5 = sld [smem:[#allocation16_spill]] }
  0x63   : > { %s397_s0 = sand.u32 1, %s10744_s10  }
  0x64   : > { %s398_s2 = scalar_lea.sflag [#allocation7], %s397_s0 }
  0x68   : > { %s399_s21 = sand.u32 1, %s10745_s5  }
  0x69   : > { %s6993_s7 = sshll.u32 %s399_s21, 4 }
  0x6a   : > { %s8865_s20 = scalar_lea.vmem [#allocation6], %s6993_s7 }
  0x6b   : > { %8493 = dma.done.wait (%p8739_p2), %s398_s2, 256  }
  0x6c   : > { %8495 = vsyncadd (%p8739_p2), %s398_s2, 4294967040  ;;  %s409_s18 = sand.u32 1, %s8510_s25  }
  0x6d   : > { %s6994_s11 = sshll.u32 %s409_s18, 4 }
  0x6e   : > { %s8872_s30 = scalar_lea.vmem [#allocation8], %s6994_s11 }
  0x6f   : > { %8497 = dma.done.wait (%p8834_p0), %s398_s2, 256  }
  0x70   : > { %8499 = vsyncadd (%p8834_p0), %s398_s2, 4294967040 }
  0x71   : > { %8501 = dma.done.wait (%p8678_p1), [#allocation10], 18432  }
  0x72   : > { %8503 = vsyncadd (%p8678_p1), [#allocation10], 4294948864  ;;  %s10747_s17 = sld [smem:[#allocation17_spill]]  ;;  %vm491_vm0 = vcmask 1040384   ;;  %vm492_vm1 = vsmask.f32 256 }
  0x73   : > { %v7883_v0 = vld [vmem:[#allocation9 + $0x78] sm:$0xff]  ;;  %vm530_vm2 = vsmask.f32 7938  ;;  %v7882_v3 = vld [vmem:[#allocation9 + $0x70] sm:$0xff]  ;;  %vm8884_vm3 = vmand %vm491_vm0, %vm492_vm1  ;;  %vm584_vm5 = vsmask.f32 4368 }
  0x74   : > { %v7875_v1 = vld [vmem:[#allocation9 + $0x38] sm:$0xff]  ;;  %1332 = vmatpush.bf16.msra.mxu0 %v7883_v0  ;;  %v7874_v4 = vld [vmem:[#allocation9 + $0x30] sm:$0xff]  ;;  %vm8889_vm4 = vmand %vm491_vm0, %vm530_vm2  ;;  %v10752_v8 = vmov 0  ;;  %vm747_vm7 = vcmask 1043456   ;;  %v10755_v33 = vmov 0  ;;  %vm1588_vm13 = vcmask 1042432  }
  0x75   : > { %1499 = vmatpush.bf16.msra.mxu1 %v7875_v1  ;;  %8095 = vmatpush.bf16.msra.mxu3 %v7875_v1  ;;  %v7881_v7 = vld [vmem:[#allocation9 + $0x68] sm:$0xff]  ;;  %v494_v10 = vld [vmem:[#allocation2] sm:$0x1]  ;;  %v532_v11 = vld [vmem:[#allocation2 + $0x8] sm:$0x1]  ;;  %vm1589_vm14 = vcmask 1046532  }
  0x76   : > { %v7873_v9 = vld [vmem:[#allocation9 + $0x28] sm:$0xff]  ;;  %v495_v12 = vsel %vm8884_vm3, 0, %v494_v10  ;;  %v533_v13 = vsel %vm8889_vm4, 0, %v532_v11  ;;  %v806_v14 = vld [vmem:[%s8865_s20] sm:$0xf]  ;;  %v8911_v28 = vld [vmem:[#allocation9 + $0xb8] sm:$0xff] }
  0x77   : > { %v807_v15 = vld [vmem:[%s8865_s20 + $0x4] sm:$0xf]  ;;  %496 = vst [vmem:[#allocation2] sm:$0x1] %v495_v12  ;;  %v515_v18 = vld [vmem:[#allocation2 + $0x54] sm:$0x1]  ;;  %vm8915_vm8 = vmor %vm492_vm1, %vm584_vm5  ;;  %8103 = vmatpush.bf16.msra.mxu2 %v8911_v28 }
  0x78   : > { %p805_p3 = scmp.eq.s32.totalorder %s10747_s17, 0  ;;  %1333 = vmatpush.bf16.msra.mxu0 %v7882_v3  ;;  %v7880_v19 = vld [vmem:[#allocation9 + $0x60] sm:$0xff]  ;;  %534 = vst [vmem:[#allocation2 + $0x8] sm:$0x1] %v533_v13  ;;  %v516_v25 = vsel %vm8884_vm3, 0, %v515_v18  ;;  %v10756_v33 = vsel %vm8915_vm8, 4294967295, %v10755_v33  ;;  %vm8922_vm9 = vmand %vm747_vm7, %vm530_vm2 }
  0x79   : > { %1500 = vmatpush.bf16.msra.mxu1 %v7874_v4  ;;  %8096 = vmatpush.bf16.msra.mxu3 %v7874_v4  ;;  %v7872_v20 = vld [vmem:[#allocation9 + $0x20] sm:$0xff]  ;;  %v578_v26 = vld [vmem:[%s8856_s22 + $0x28] sm:$0xf]  ;;  %v579_v27 = vld [vmem:[%s8856_s22 + $0x2c] sm:$0xf]  ;;  %10757 = vst [vmem:[#allocation28_spill] sm:$0xff] %v10756_v33 }
  0x7a   : > { %s810_s15 = scalar_select %p805_p3, 1, 0  ;;  %517 = vst [vmem:[#allocation2 + $0x54] sm:$0x1] %v516_v25  ;;  %v672_v31 = vshrl.u32 %v578_v26, 16  ;;  %v675_v32 = vshll.u32 %v578_v26, 16  ;;  %vm9058_vm15 = vmor %vm1588_vm13, %vm1589_vm14 }
  0x7b   : > { %v680_v34 = vshrl.u32 %v579_v27, 16  ;;  %v683_v35 = vshll.u32 %v579_v27, 16  ;;  %v497_v36 = vld [vmem:[#allocation2 + $0xc] sm:$0x1]  ;;  %v535_v37 = vld [vmem:[#allocation2 + $0x14] sm:$0x1] }
  0x7c   : > { %v811_v2 = vstv %s810_s15  ;;  %1334 = vmatpush.bf16.msra.mxu0 %v7881_v7  ;;  %v7879_v38 = vld [vmem:[#allocation9 + $0x58] sm:$0xff]  ;;  %v674_v47 = vrot.slane %v672_v31, 7  ;;  %v498_v49 = vsel %vm8884_vm3, 0, %v497_v36  ;;  %v7878_v60 = vld [vmem:[#allocation9 + $0x50] sm:$0xff]  ;;  %v536_v63 = vsel %vm8889_vm4, 0, %v535_v37  ;;  %v7869_v25 = vld [vmem:[#allocation9 + $0x8] sm:$0xff] }
  0x7d   : > { %vm8893_vm6 = vcmp.eq.s32.totalorder %v811_v2, 1  ;;  %1501 = vmatpush.bf16.msra.mxu1 %v7873_v9  ;;  %8097 = vmatpush.bf16.msra.mxu3 %v7873_v9  ;;  %v808_v44 = vld [vmem:[%s8865_s20 + $0x8] sm:$0xf]  ;;  %v809_v45 = vld [vmem:[%s8865_s20 + $0xc] sm:$0xf]  ;;  %v8928_v48 = vrot.slane %v680_v34, 7 }
  0x7e   : > { %v10753_v8 = vsel %vm8893_vm6, 4294967295, %v10752_v8  ;;  %v813_v16 = vsel %vm8893_vm6, 0, %v806_v14  ;;  %v814_v17 = vsel %vm8893_vm6, 0, %v807_v15  ;;  %v7871_v46 = vld [vmem:[#allocation9 + $0x18] sm:$0xff]  ;;  %499 = vst [vmem:[#allocation2 + $0xc] sm:$0x1] %v498_v49  ;;  %v677_v57 = vor.u32 %v675_v32, %v674_v47 }
  0x7f   : > { %10754 = vst [vmem:[#allocation27_spill] sm:$0xff] %v10753_v8  ;;  %v818_v21 = vshrl.u32 %v813_v16, 16  ;;  %v821_v22 = vshll.u32 %v813_v16, 16  ;;  %v826_v23 = vshrl.u32 %v814_v17, 16  ;;  %v829_v24 = vshll.u32 %v814_v17, 16  ;;  %v7870_v61 = vld [vmem:[#allocation9 + $0x10] sm:$0xff] }
  0x80   : > { %v518_v50 = vld [vmem:[#allocation2 + $0x60] sm:$0x1]  ;;  %1335 = vmatpush.bf16.msra.mxu0 %v7880_v19  ;;  %v815_v53 = vsel %vm8893_vm6, 0, %v808_v44  ;;  %v816_v54 = vsel %vm8893_vm6, 0, %v809_v45  ;;  %v861_v56 = vld [vmem:[#allocation2 + $0x8] sm:$0x1]  ;;  %v685_v59 = vor.u32 %v683_v35, %v8928_v48 }
  0x81   : > { %v820_v29 = vrot.slane %v818_v21, 7  ;;  %v828_v30 = vrot.slane %v826_v23, 7  ;;  %1502 = vmatpush.bf16.msra.mxu1 %v7872_v20  ;;  %v857_v52 = vld [vmem:[#allocation2] sm:$0xf]  ;;  %8098 = vmatpush.bf16.msra.mxu3 %v7872_v20  ;;  %v678_v58 = vrot.slane %v674_v47, 4  ;;  %v835_v0 = vshrl.u32 %v815_v53, 16 }
  0x82   : > { %v838_v1 = vshll.u32 %v815_v53, 16  ;;  %vm984_vm10 = vsmask.f32 3328  ;;  %vm985_vm11 = vsmask.f32 7440  ;;  %v843_v4 = vshrl.u32 %v816_v54, 16 }
  0x83   : > { %v823_v40 = vor.u32 %v821_v22, %v820_v29  ;;  %v824_v41 = vrot.slane %v820_v29, 4  ;;  %v831_v42 = vor.u32 %v829_v24, %v828_v30  ;;  %v833_v43 = vrot.slane %v828_v30, 4  ;;  %v784_v3 = vld [vmem:[#allocation2 + $0x54] sm:$0xf]  ;;  %v580_v12 = vld [vmem:[%s8856_s22 + $0x30] sm:$0xf]  ;;  %vm8972_vm12 = vmor %vm984_vm10, %vm985_vm11 }
  0x84   : > { %v686_v2 = vsel %vm8915_vm8, %v678_v58, %v685_v59  ;;  %v846_v7 = vshll.u32 %v816_v54, 16  ;;  %1336 = vmatpush.bf16.msra.mxu0 %v7879_v38  ;;  %v785_v9 = vsel %vm8922_vm9, %v677_v57, %v784_v3  ;;  %v837_v10 = vrot.slane %v835_v0, 7  ;;  %v581_v14 = vld [vmem:[%s8856_s22 + $0x34] sm:$0xf]  ;;  %537 = vst [vmem:[#allocation2 + $0x14] sm:$0x1] %v536_v63 }
  0x85   : > { %v832_v51 = vsel %vm8915_vm8, %v824_v41, %v831_v42  ;;  %v858_v55 = vsel %vm8922_vm9, %v823_v40, %v857_v52  ;;  %v862_v62 = vsel %vm8884_vm3, %v833_v43, %v861_v56  ;;  %1503 = vmatpush.bf16.msra.mxu1 %v7871_v46  ;;  %787 = vst [vmem:[#allocation2 + $0x58] sm:$0xf] %v686_v2  ;;  %v519_v11 = vsel %vm8884_vm3, 0, %v518_v50  ;;  %v8953_v20 = vld [vmem:[#allocation9 + $0xb0] sm:$0xff]  ;;  %v864_v22 = vld [vmem:[#allocation2 + $0xc] sm:$0xf] }
  0x86   : > { %860 = vst [vmem:[#allocation2 + $0x4] sm:$0xf] %v832_v51  ;;  %8099 = vmatpush.bf16.msra.mxu3 %v7871_v46  ;;  %v845_v13 = vrot.slane %v843_v4, 7  ;;  %v689_v15 = vshrl.u32 %v580_v12, 16  ;;  %v840_v16 = vor.u32 %v838_v1, %v837_v10  ;;  %v841_v17 = vrot.slane %v837_v10, 4  ;;  %v7877_v24 = vld [vmem:[#allocation9 + $0x48] sm:$0xff]  ;;  %8104 = vmatpush.bf16.msra.mxu2 %v8953_v20 }
  0x87   : > { %859 = vst [vmem:[#allocation2] sm:$0xf] %v858_v55  ;;  %v692_v18 = vshll.u32 %v580_v12, 16  ;;  %v697_v19 = vshrl.u32 %v581_v14, 16  ;;  %v700_v30 = vshll.u32 %v581_v14, 16  ;;  %v8962_v37 = vld [vmem:[#allocation9 + $0xa8] sm:$0xff] }
  0x88   : > { %863 = vst [vmem:[#allocation2 + $0x8] sm:$0x1] %v862_v62  ;;  %v848_v21 = vor.u32 %v846_v7, %v845_v13  ;;  %v691_v23 = vrot.slane %v689_v15, 7  ;;  %1337 = vmatpush.bf16.msra.mxu0 %v7878_v60  ;;  %v865_v27 = vsel %vm8922_vm9, %v840_v16, %v864_v22  ;;  %v850_v36 = vrot.slane %v845_v13, 4  ;;  %v7876_v49 = vld [vmem:[#allocation9 + $0x40] sm:$0xff]  ;;  %v7909_v53 = vld [vmem:[#allocation9 + $0xf8] sm:$0xff] }
  0x89   : > { %786 = vst [vmem:[#allocation2 + $0x54] sm:$0xf] %v785_v9  ;;  %1504 = vmatpush.bf16.msra.mxu1 %v7870_v61  ;;  %v8957_v29 = vrot.slane %v697_v19, 7  ;;  %v7868_v50 = vld [vmem:[#allocation9] sm:$0xff]  ;;  %v500_v1 = vld [vmem:[#allocation2 + $0x18] sm:$0x1] }
  0x8a   : > { %520 = vst [vmem:[#allocation2 + $0x60] sm:$0x1] %v519_v11  ;;  %8100 = vmatpush.bf16.msra.mxu3 %v7870_v61  ;;  %v849_v35 = vsel %vm8915_vm8, %v841_v17, %v848_v21  ;;  %v694_v42 = vor.u32 %v692_v18, %v691_v23  ;;  %v695_v47 = vrot.slane %v691_v23, 4  ;;  %8105 = vmatpush.bf16.msra.mxu2 %v8962_v37  ;;  %v8968_v59 = vld [vmem:[#allocation9 + $0xa0] sm:$0xff]  ;;  %v501_v4 = vsel %vm8884_vm3, 0, %v500_v1  ;;  %v7908_v21 = vld [vmem:[#allocation9 + $0xf0] sm:$0xff] }
  0x8b   : > { %866 = vst [vmem:[#allocation2 + $0xc] sm:$0xf] %v865_v27  ;;  %v702_v43 = vor.u32 %v700_v30, %v8957_v29  ;;  %v868_v57 = vld [vmem:[#allocation2 + $0x14] sm:$0x1]  ;;  %v538_v7 = vld [vmem:[#allocation2 + $0x20] sm:$0x1] }
  0x8c   : > { %867 = vst [vmem:[#allocation2 + $0x10] sm:$0xf] %v849_v35  ;;  %1338 = vmatpush.bf16.msra.mxu0 %v7877_v24  ;;  %v869_v63 = vsel %vm8884_vm3, %v850_v36, %v868_v57  ;;  %v539_v10 = vsel %vm8889_vm4, 0, %v538_v7  ;;  %v568_v11 = vld [vmem:[%s8856_s22] sm:$0xf]  ;;  %v8992_v22 = vld [vmem:[#allocation9 + $0x98] sm:$0xff] }
  0x8d   : > { %v939_v26 = vld [vmem:[#allocation2 + $0x4] sm:$0xf]  ;;  %1505 = vmatpush.bf16.msra.mxu1 %v7869_v25  ;;  %v703_v58 = vsel %vm8915_vm8, %v695_v47, %v702_v43  ;;  %870 = vst [vmem:[#allocation2 + $0x14] sm:$0x1] %v869_v63  ;;  %v569_v14 = vld [vmem:[%s8856_s22 + $0x4] sm:$0xf] }
  0x8e   : > { %v938_v31 = vld [vmem:[#allocation2] sm:$0xf]  ;;  %v997_v32 = vshll.u32 %v939_v26, 16  ;;  %v1001_v34 = vshrl.u32 %v939_v26, 16  ;;  %8101 = vmatpush.bf16.msra.mxu3 %v7869_v25  ;;  %794 = vst [vmem:[#allocation2 + $0x64] sm:$0xf] %v703_v58  ;;  %8106 = vmatpush.bf16.msra.mxu2 %v8968_v59 }
  0x8f   : > { %v974_v38 = vld [vmem:[#allocation2 + $0x8] sm:$0x1]  ;;  %v988_v40 = vshrl.u32 %v938_v31, 16  ;;  %v991_v41 = vshll.u32 %v938_v31, 16  ;;  %v7858_v56 = vld [vmem:[#allocation2] sm:$0xff]  ;;  %v587_v25 = vshrl.u32 %v568_v11, 16 }
  0x90   : > { %v999_v44 = vrot.slane %v997_v32, 5  ;;  %v1003_v45 = vrot.slane %v1001_v34, 4  ;;  %v1007_v46 = vshll.u32 %v974_v38, 16  ;;  %v7865_v62 = vld [vmem:[#allocation2 + $0x54] sm:$0xff]  ;;  %1339 = vmatpush.bf16.msra.mxu0 %v7876_v49  ;;  %502 = vst [vmem:[#allocation2 + $0x18] sm:$0x1] %v501_v4 }
  0x91   : > { %v990_v51 = vrot.slane %v988_v40, 4  ;;  %v993_v52 = vrot.slane %v991_v41, 5  ;;  %v791_v0 = vld [vmem:[#allocation2 + $0x60] sm:$0xf]  ;;  %1506 = vmatpush.bf16.msra.mxu1 %v7868_v50  ;;  %540 = vst [vmem:[#allocation2 + $0x20] sm:$0x1] %v539_v10 }
  0x92   : > { %v1004_v54 = vor.u32 %v1003_v45, %v999_v44  ;;  %v1009_v55 = vrot.slane %v1007_v46, 5  ;;  %v792_v3 = vsel %vm8922_vm9, %v694_v42, %v791_v0  ;;  %8102 = vmatpush.bf16.msra.mxu3 %v7868_v50  ;;  %v940_v13 = vld [vmem:[#allocation2 + $0xc] sm:$0xf]  ;;  %v590_v30 = vshll.u32 %v568_v11, 16  ;;  %v7907_v38 = vld [vmem:[#allocation9 + $0xe8] sm:$0xff]  ;;  %8107 = vmatpush.bf16.msra.mxu2 %v8992_v22  ;;  %v8999_v47 = vld [vmem:[#allocation9 + $0x90] sm:$0xff] }
  0x93   : > { %v994_v61 = vor.u32 %v993_v52, %v990_v51  ;;  %793 = vst [vmem:[#allocation2 + $0x60] sm:$0xf] %v792_v3  ;;  %v941_v17 = vld [vmem:[#allocation2 + $0x10] sm:$0xf]  ;;  %v1012_v18 = vshrl.u32 %v940_v13, 16  ;;  %v1015_v19 = vshll.u32 %v940_v13, 16 }
  0x94   : > { %v1005_v2 = vrot.slane %v1004_v54, 4  ;;  %1766 = vmatpush.bf16.msrb.mxu0 %v8911_v28  ;;  %1507 = vmatmul.bf16.vlgmr.msra.gmra.mxu1 %v7858_v56  ;;  %v1021_v24 = vshll.u32 %v941_v17, 16  ;;  %v1025_v28 = vshrl.u32 %v941_v17, 16  ;;  %v595_v31 = vshrl.u32 %v569_v14, 16  ;;  %v521_v32 = vld [vmem:[#allocation2 + $0x6c] sm:$0x1] }
  0x95   : > { %v995_v9 = vrot.slane %v994_v61, 4  ;;  %1542 = vmatmul.bf16.vlgmr.msra.gmra.mxu3 %v7865_v62  ;;  %v1014_v26 = vrot.slane %v1012_v18, 4  ;;  %v1017_v27 = vrot.slane %v1015_v19, 5  ;;  %v589_v40 = vrot.slane %v587_v25, 7  ;;  %v582_v41 = vld [vmem:[%s8856_s22 + $0x38] sm:$0xf] }
  0x96   : > { %v1010_v12 = vsel %vm8972_vm12, %v1005_v2, %v1009_v55  ;;  %1991 = vmatpush.bf16.msrb.mxu3 %v7909_v53  ;;  %v1023_v35 = vrot.slane %v1021_v24, 5  ;;  %v1027_v36 = vrot.slane %v1025_v28, 4  ;;  %v975_v42 = vld [vmem:[#allocation2 + $0x14] sm:$0x1]  ;;  %v598_v45 = vshll.u32 %v569_v14, 16  ;;  %v7906_v61 = vld [vmem:[#allocation9 + $0xe0] sm:$0xff]  ;;  %8108 = vmatpush.bf16.msra.mxu2 %v8999_v47 }
  0x97   : > { %v1000_v15 = vsel %vm8972_vm12, %v995_v9, %v999_v44  ;;  %v1245_v16 = vunpack.c.l.b16 %v1010_v12  ;;  %v1018_v43 = vor.u32 %v1017_v27, %v1014_v26  ;;  %v597_v44 = vrot.slane %v595_v31, 7  ;;  %v749_v55 = vld [vmem:[#allocation2 + $0x18] sm:$0xf]  ;;  %v583_v56 = vld [vmem:[%s8856_s22 + $0x3c] sm:$0xf]  ;;  %v9004_v0 = vld [vmem:[#allocation9 + $0x88] sm:$0xff] }
  0x98   : > { %v1244_v23 = vunpack.c.l.b16 %v1000_v15  ;;  %1767 = vmatpush.bf16.msrb.mxu0 %v8953_v20  ;;  %v522_v46 = vsel %vm8884_vm3, 0, %v521_v32  ;;  %v1028_v49 = vor.u32 %v1027_v36, %v1023_v35  ;;  %v1031_v50 = vshll.u32 %v975_v42, 16  ;;  %v753_v2 = vld [vmem:[#allocation2 + $0x20] sm:$0x1]  ;;  %v503_v11 = vld [vmem:[#allocation2 + $0x24] sm:$0x1] }
  0x99   : > { %v592_v20 = vor.u32 %v590_v30, %v589_v40  ;;  %v593_v51 = vrot.slane %v589_v40, 4  ;;  %523 = vst [vmem:[#allocation2 + $0x6c] sm:$0x1] %v522_v46  ;;  %v1019_v52 = vrot.slane %v1018_v43, 4  ;;  %v600_v53 = vor.u32 %v598_v45, %v597_v44  ;;  %v7859_v15 = vld [vmem:[#allocation2 + $0xc] sm:$0xff]  ;;  %v7905_v18 = vld [vmem:[#allocation9 + $0xd8] sm:$0xff] }
  0x9a   : > { %v1264_v34 = vpack.c.b16 %v1245_v16, %v1244_v23  ;;  %1992 = vmatpush.bf16.msrb.mxu3 %v7908_v21  ;;  %v602_v54 = vrot.slane %v597_v44, 4  ;;  %v1029_v57 = vrot.slane %v1028_v49, 4  ;;  %v1033_v58 = vrot.slane %v1031_v50, 5  ;;  %v541_v19 = vld [vmem:[#allocation2 + $0x2c] sm:$0x1]  ;;  %8109 = vmatpush.bf16.msra.mxu2 %v9004_v0  ;;  %v7904_v46 = vld [vmem:[#allocation9 + $0xd0] sm:$0xff] }
  0x9b   : > { %v750_v62 = vsel %vm8922_vm9, %v592_v20, %v749_v55  ;;  %v706_v63 = vshrl.u32 %v582_v41, 16  ;;  %v601_v1 = vsel %vm8915_vm8, %v593_v51, %v600_v53  ;;  %v709_v3 = vshll.u32 %v582_v41, 16  ;;  %v9023_v25 = vld [vmem:[#allocation9 + $0x80] sm:$0xff]  ;;  %v570_v27 = vld [vmem:[%s8856_s22 + $0x8] sm:$0xf]  ;;  %p871_p1 = scmp.eq.s32.totalorder %s10747_s17, 1 }
  0x9c   : > { %1340 = vmatmul.bf16.vlgmr.msra.gmra.mxu0 %v1264_v34  ;;  %751 = vst [vmem:[#allocation2 + $0x18] sm:$0xf] %v750_v62  ;;  %v714_v4 = vshrl.u32 %v583_v56, 16  ;;  %v1024_v7 = vsel %vm8972_vm12, %v1019_v52, %v1023_v35  ;;  %v1034_v9 = vsel %vm8972_vm12, %v1029_v57, %v1033_v58  ;;  %v717_v13 = vshll.u32 %v583_v56, 16  ;;  %v571_v31 = vld [vmem:[%s8856_s22 + $0xc] sm:$0xf] }
  0x9d   : > { %1768 = vmatpush.bf16.msrb.mxu0 %v8962_v37  ;;  %752 = vst [vmem:[#allocation2 + $0x1c] sm:$0xf] %v601_v1  ;;  %v754_v37 = vsel %vm8884_vm3, %v602_v54, %v753_v2  ;;  %v708_v10 = vrot.slane %v706_v63, 7  ;;  %v504_v14 = vsel %vm8884_vm3, 0, %v503_v11  ;;  %v1246_v21 = vunpack.c.l.b16 %v1024_v7  ;;  %v7866_v34 = vld [vmem:[#allocation2 + $0x60] sm:$0xff]  ;;  %v7903_v62 = vld [vmem:[#allocation9 + $0xc8] sm:$0xff] }
  0x9e   : > { %1993 = vmatpush.bf16.msrb.mxu3 %v7907_v38  ;;  %755 = vst [vmem:[#allocation2 + $0x20] sm:$0x1] %v754_v37  ;;  %v9016_v12 = vrot.slane %v714_v4, 7  ;;  %v1247_v23 = vunpack.c.l.b16 %v1034_v9  ;;  %v542_v26 = vsel %vm8889_vm4, 0, %v541_v19  ;;  %v607_v32 = vshll.u32 %v570_v27, 16  ;;  %8110 = vmatpush.bf16.msra.mxu2 %v9023_v25  ;;  %s10795_s13 = sld [smem:[#allocation48_spill]] }
  0x9f   : > { %v711_v16 = vor.u32 %v709_v3, %v708_v10  ;;  %v712_v17 = vrot.slane %v708_v10, 4  ;;  %505 = vst [vmem:[#allocation2 + $0x24] sm:$0x1] %v504_v14  ;;  %v612_v36 = vshrl.u32 %v571_v31, 16  ;;  %v615_v38 = vshll.u32 %v571_v31, 16  ;;  %s10807_s23 = sld [smem:[#allocation18_spill]] }
  0xa0   : > { %v719_v24 = vor.u32 %v717_v13, %v9016_v12  ;;  %v798_v28 = vld [vmem:[#allocation2 + $0x6c] sm:$0xf]  ;;  %543 = vst [vmem:[#allocation2 + $0x2c] sm:$0x1] %v542_v26  ;;  %v1265_v42 = vpack.c.b16 %v1247_v23, %v1246_v21  ;;  %v506_v2 = vld [vmem:[#allocation2 + $0x30] sm:$0x1] }
  0xa1   : > { %1769 = vmatpush.bf16.msrb.mxu0 %v8968_v59  ;;  %v799_v30 = vsel %vm8922_vm9, %v711_v16, %v798_v28  ;;  %v604_v59 = vshrl.u32 %v570_v27, 16  ;;  %v614_v49 = vrot.slane %v612_v36, 7  ;;  %v507_v37 = vsel %vm8884_vm3, 0, %v506_v2  ;;  %v544_v13 = vld [vmem:[#allocation2 + $0x38] sm:$0x1]  ;;  %v7902_v23 = vld [vmem:[#allocation9 + $0xc0] sm:$0xff] }
  0xa2   : > { %1994 = vmatpush.bf16.msrb.mxu3 %v7906_v61  ;;  %v720_v35 = vsel %vm8915_vm8, %v712_v17, %v719_v24  ;;  %800 = vst [vmem:[#allocation2 + $0x6c] sm:$0xf] %v799_v30  ;;  %v509_v30 = vld [vmem:[#allocation2 + $0x3c] sm:$0x1]  ;;  %v547_v31 = vld [vmem:[#allocation2 + $0x44] sm:$0x1] }
  0xa3   : > { %v942_v40 = vld [vmem:[#allocation2 + $0x18] sm:$0xf]  ;;  %801 = vst [vmem:[#allocation2 + $0x70] sm:$0xf] %v720_v35  ;;  %v606_v41 = vrot.slane %v604_v59, 7  ;;  %v619_v63 = vrot.slane %v614_v49, 4 }
  0xa4   : > { %v943_v43 = vld [vmem:[#allocation2 + $0x1c] sm:$0xf]  ;;  %v1036_v44 = vshrl.u32 %v942_v40, 16  ;;  %v1039_v45 = vshll.u32 %v942_v40, 16  ;;  %1512 = vmatmul.bf16.gmra.mxu1 %v7859_v15  ;;  %v545_v15 = vsel %vm8889_vm4, 0, %v544_v13  ;;  %s10796_s6 = smov %s10795_s13  ;;  %s6997_s28 = sshll.u32 %s10747_s17, 3 }
  0xa5   : > { %1770 = vmatpush.bf16.msrb.mxu0 %v8992_v22  ;;  %v976_v50 = vld [vmem:[#allocation2 + $0x20] sm:$0x1]  ;;  %v1045_v20 = vshll.u32 %v943_v43, 16  ;;  %v1049_v51 = vshrl.u32 %v943_v43, 16  ;;  %v609_v52 = vor.u32 %v607_v32, %v606_v41  ;;  %v610_v53 = vrot.slane %v606_v41, 4  ;;  %1547 = vmatmul.bf16.gmra.mxu3 %v7866_v34  ;;  %p480_p2 = scmp.lt.s32.totalorder %s10807_s23, 1 }
  0xa6   : > { %1995 = vmatpush.bf16.msrb.mxu3 %v7905_v18  ;;  %v1038_v54 = vrot.slane %v1036_v44, 4  ;;  %v1041_v55 = vrot.slane %v1039_v45, 5  ;;  %v1055_v56 = vshll.u32 %v976_v50, 16  ;;  %v617_v22 = vor.u32 %v615_v38, %v614_v49  ;;  %v756_v57 = vld [vmem:[#allocation2 + $0x24] sm:$0xf]  ;;  %p482_p6 = scmp.lt.s32.totalorder %s6997_s28, 15 }
  0xa7   : > { %v1047_v58 = vrot.slane %v1045_v20, 5  ;;  %v1051_v61 = vrot.slane %v1049_v51, 4  ;;  %v757_v1 = vsel %vm8922_vm9, %v609_v52, %v756_v57  ;;  %v760_v9 = vld [vmem:[#allocation2 + $0x2c] sm:$0x1]  ;;  %508 = vst [vmem:[#allocation2 + $0x30] sm:$0x1] %v507_v37 }
  0xa8   : > { %v1042_v3 = vor.u32 %v1041_v55, %v1038_v54  ;;  %v1057_v4 = vrot.slane %v1055_v56, 5  ;;  %v618_v7 = vsel %vm8915_vm8, %v610_v53, %v617_v22  ;;  %758 = vst [vmem:[#allocation2 + $0x24] sm:$0xf] %v757_v1  ;;  %v761_v11 = vsel %vm8884_vm3, %v619_v63, %v760_v9  ;;  %v573_v18 = vld [vmem:[%s8856_s22 + $0x14] sm:$0xf]  ;;  %s10841_s23 = smov (!%p480_p2, %s10807_s23), 1 }
  0xa9   : > { %1771 = vmatpush.bf16.msrb.mxu0 %v8999_v47  ;;  %v1052_v10 = vor.u32 %v1051_v61, %v1047_v58  ;;  %759 = vst [vmem:[#allocation2 + $0x28] sm:$0xf] %v618_v7  ;;  %v572_v47 = vld [vmem:[%s8856_s22 + $0x10] sm:$0xf]  ;;  %v629_v28 = vshrl.u32 %v573_v18, 16  ;;  %v632_v27 = vshll.u32 %v573_v18, 16 }
  0xaa   : > { %1996 = vmatpush.bf16.msrb.mxu3 %v7904_v46  ;;  %v1043_v14 = vrot.slane %v1042_v3, 4  ;;  %762 = vst [vmem:[#allocation2 + $0x2c] sm:$0x1] %v761_v11  ;;  %v621_v16 = vshrl.u32 %v572_v47, 16  ;;  %v624_v19 = vshll.u32 %v572_v47, 16  ;;  %v510_v41 = vsel %vm8884_vm3, 0, %v509_v30 }
  0xab   : > { %v1053_v17 = vrot.slane %v1052_v10, 4  ;;  %546 = vst [vmem:[#allocation2 + $0x38] sm:$0x1] %v545_v15  ;;  %v631_v32 = vrot.slane %v629_v28, 7  ;;  %v548_v49 = vsel %vm8889_vm4, 0, %v547_v31  ;;  %v7867_v50 = vld [vmem:[#allocation2 + $0x6c] sm:$0xff] }
  0xac   : > { %1345 = vmatmul.bf16.gmra.mxu0 %v1265_v42  ;;  %v1048_v21 = vsel %vm8972_vm12, %v1043_v14, %v1047_v58  ;;  %v623_v24 = vrot.slane %v621_v16, 7  ;;  %v574_v54 = vld [vmem:[%s8856_s22 + $0x18] sm:$0xf]  ;;  %v575_v2 = vld [vmem:[%s8856_s22 + $0x1c] sm:$0xf]  ;;  %s10843_s28 = smov (!%p482_p6, %s6997_s28), 15 }
  0xad   : > { %1772 = vmatpush.bf16.msrb.mxu0 %v9004_v0  ;;  %v1058_v26 = vsel %vm8972_vm12, %v1053_v17, %v1057_v4  ;;  %v1248_v59 = vunpack.c.l.b16 %v1048_v21  ;;  %v7860_v0 = vld [vmem:[#allocation2 + $0x18] sm:$0xff]  ;;  %v634_v53 = vor.u32 %v632_v27, %v631_v32  ;;  %511 = vst [vmem:[#allocation2 + $0x3c] sm:$0x1] %v510_v41  ;;  %v636_v13 = vrot.slane %v631_v32, 4  ;;  %v512_v30 = vld [vmem:[#allocation2 + $0x48] sm:$0x1] }
  0xae   : > { %1997 = vmatpush.bf16.msrb.mxu3 %v7903_v62  ;;  %v1249_v34 = vunpack.c.l.b16 %v1058_v26  ;;  %v626_v38 = vor.u32 %v624_v19, %v623_v24  ;;  %v627_v40 = vrot.slane %v623_v24, 4  ;;  %v763_v58 = vld [vmem:[#allocation2 + $0x30] sm:$0xf]  ;;  %v638_v15 = vshrl.u32 %v574_v54, 16  ;;  %549 = vst [vmem:[#allocation2 + $0x44] sm:$0x1] %v548_v49 }
  0xaf   : > { %v1561_v35 = vld [vmem:[#allocation2 + $0x24] sm:$0xe]  ;;  %v641_v16 = vshll.u32 %v574_v54, 16  ;;  %v646_v18 = vshrl.u32 %v575_v2, 16  ;;  %v649_v19 = vshll.u32 %v575_v2, 16  ;;  %v513_v32 = vsel %vm8884_vm3, 0, %v512_v30 }
  0xb0   : > { %v944_v36 = vld [vmem:[#allocation2 + $0x24] sm:$0xf]  ;;  %v945_v42 = vld [vmem:[#allocation2 + $0x28] sm:$0xf]  ;;  %v7108_v44 = vrot.slane %v1561_v35, 9  ;;  %v1266_v3 = vpack.c.b16 %v1249_v34, %v1248_v59  ;;  %v635_v9 = vsel %vm8915_vm8, %v627_v40, %v634_v53  ;;  %v764_v47 = vsel %vm8922_vm9, %v626_v38, %v763_v58  ;;  %s10808_s12 = sld [smem:[#allocation50_spill]] }
  0xb1   : > { %1773 = vmatpush.bf16.msrb.mxu0 %v9023_v25  ;;  %v1060_v45 = vshrl.u32 %v944_v36, 16  ;;  %v1063_v46 = vshll.u32 %v944_v36, 16  ;;  %v977_v20 = vld [vmem:[#allocation2 + $0x2c] sm:$0x1]  ;;  %v1614_v51 = vrot.slane %v945_v42, 5  ;;  %v1069_v52 = vshll.u32 %v945_v42, 16 }
  0xb2   : > { %1998 = vmatpush.bf16.msrb.mxu3 %v7902_v23  ;;  %v1073_v25 = vshrl.u32 %v945_v42, 16  ;;  %v1617_v55 = vrot.slane %v977_v20, 5  ;;  %v1079_v57 = vshll.u32 %v977_v20, 16  ;;  %v767_v37 = vld [vmem:[#allocation2 + $0x38] sm:$0x1]  ;;  %v640_v24 = vrot.slane %v638_v15, 7 }
  0xb3   : > { %v1062_v56 = vrot.slane %v1060_v45, 4  ;;  %v1065_v22 = vrot.slane %v1063_v46, 5  ;;  %v1615_v61 = vsel %vm9058_vm15, %v7108_v44, %v1614_v51  ;;  %v1616_v62 = vrot.slane %v1614_v51, 4  ;;  %766 = vst [vmem:[#allocation2 + $0x34] sm:$0xf] %v635_v9  ;;  %s6998_s0 = sshll.u32 %s10843_s28, 1 }
  0xb4   : > { %v1071_v63 = vrot.slane %v1069_v52, 5  ;;  %v1075_v1 = vrot.slane %v1073_v25, 4  ;;  %v1684_v4 = vunpack.c.l.b16 %v1615_v61  ;;  %1517 = vmatmul.bf16.gmra.mxu1 %v7860_v0  ;;  %765 = vst [vmem:[#allocation2 + $0x30] sm:$0xf] %v764_v47  ;;  %v768_v17 = vsel %vm8884_vm3, %v636_v13, %v767_v37  ;;  %v770_v0 = vld [vmem:[#allocation2 + $0x3c] sm:$0xf] }
  0xb5   : > { %v1066_v7 = vor.u32 %v1065_v22, %v1062_v56  ;;  %v1618_v10 = vsel %vm9058_vm15, %v1616_v62, %v1617_v55  ;;  %1552 = vmatmul.bf16.gmra.mxu3 %v7867_v50  ;;  %769 = vst [vmem:[#allocation2 + $0x38] sm:$0x1] %v768_v17  ;;  %v1081_v26 = vrot.slane %v1079_v57, 5  ;;  %v648_v27 = vrot.slane %v646_v18, 7  ;;  %v550_v41 = vld [vmem:[#allocation2 + $0x50] sm:$0x1] }
  0xb6   : > { %v1076_v11 = vor.u32 %v1075_v1, %v1071_v63  ;;  %v1685_v14 = vunpack.c.l.b16 %v1618_v10  ;;  %v643_v31 = vor.u32 %v641_v16, %v640_v24  ;;  %v644_v59 = vrot.slane %v640_v24, 4  ;;  %514 = vst [vmem:[#allocation2 + $0x48] sm:$0x1] %v513_v32  ;;  %v576_v53 = vld [vmem:[%s8856_s22 + $0x20] sm:$0xf]  ;;  %s6999_s21 = sshll.u32 %s10841_s23, 5 }
  0xb7   : > { %v1067_v23 = vrot.slane %v1066_v7, 4  ;;  %v651_v34 = vor.u32 %v649_v19, %v648_v27  ;;  %v653_v38 = vrot.slane %v648_v27, 4  ;;  %v7861_v57 = vld [vmem:[#allocation2 + $0x24] sm:$0xff]  ;;  %v7892_v7 = vld [vmem:[#allocation2 + $0xc] sm:$0xff]  ;;  %v655_v13 = vshrl.u32 %v576_v53, 16  ;;  %s486_s7 = sadd.s32 %s6999_s21, %s6998_s0  ;;  %s10809_s11 = sld [smem:[#allocation51_spill]] }
  0xb8   : > { %v1701_v21 = vpack.c.b16 %v1685_v14, %v1684_v4  ;;  %v1077_v28 = vrot.slane %v1076_v11, 4  ;;  %v771_v40 = vsel %vm8922_vm9, %v643_v31, %v770_v0  ;;  %v551_v4 = vsel %vm8889_vm4, 0, %v550_v41  ;;  %v577_v11 = vld [vmem:[%s8856_s22 + $0x24] sm:$0xf]  ;;  %s876_s16 = scalar_select %p871_p1, 1, 0 }
  0xb9   : > { %v1072_v35 = vsel %vm8972_vm12, %v1067_v23, %v1071_v63  ;;  %v652_v50 = vsel %vm8915_vm8, %v644_v59, %v651_v34  ;;  %772 = vst [vmem:[#allocation2 + $0x3c] sm:$0xf] %v771_v40  ;;  %v657_v15 = vrot.slane %v655_v13, 7  ;;  %v658_v16 = vshll.u32 %v576_v53, 16  ;;  %s7000_s2 = sshll.u32 %s486_s7, 2 }
  0xba   : > { %1789 = vmatmul.bf16.vlgmr.msra.gmra.mxu2 %v1701_v21  ;;  %v947_v36 = vld [vmem:[#allocation2 + $0x34] sm:$0xf]  ;;  %v1082_v42 = vsel %vm8972_vm12, %v1077_v28, %v1081_v26  ;;  %v1250_v54 = vunpack.c.l.b16 %v1072_v35  ;;  %773 = vst [vmem:[#allocation2 + $0x40] sm:$0xf] %v652_v50  ;;  %v663_v17 = vshrl.u32 %v577_v11, 16  ;;  %v666_v23 = vshll.u32 %v577_v11, 16 }
  0xbb   : > { %v1562_v44 = vld [vmem:[#allocation2 + $0x30] sm:$0xe]  ;;  %v1621_v45 = vrot.slane %v947_v36, 5  ;;  %v1093_v49 = vshll.u32 %v947_v36, 16  ;;  %v1097_v25 = vshrl.u32 %v947_v36, 16  ;;  %v1251_v22 = vunpack.c.l.b16 %v1082_v42 }
  0xbc   : > { %1350 = vmatmul.bf16.gmra.mxu0 %v1266_v3  ;;  %v946_v46 = vld [vmem:[#allocation2 + $0x30] sm:$0xf]  ;;  %v7109_v20 = vrot.slane %v1562_v44, 9  ;;  %v978_v55 = vld [vmem:[#allocation2 + $0x38] sm:$0x1]  ;;  %v665_v28 = vrot.slane %v663_v17, 7  ;;  %v660_v59 = vor.u32 %v658_v16, %v657_v15 }
  0xbd   : > { %v1084_v51 = vshrl.u32 %v946_v46, 16  ;;  %v1087_v52 = vshll.u32 %v946_v46, 16  ;;  %v1623_v56 = vrot.slane %v1621_v45, 4  ;;  %v1624_v61 = vrot.slane %v978_v55, 5  ;;  %v774_v3 = vld [vmem:[#allocation2 + $0x44] sm:$0x1] }
  0xbe   : > { %v1622_v58 = vsel %vm9058_vm15, %v7109_v20, %v1621_v45  ;;  %v9089_v62 = vrot.slane %v1093_v49, 5  ;;  %v1099_v2 = vrot.slane %v1097_v25, 4  ;;  %v775_v10 = vsel %vm8884_vm3, %v653_v38, %v774_v3  ;;  %552 = vst [vmem:[#allocation2 + $0x50] sm:$0x1] %v551_v4  ;;  %v777_v38 = vld [vmem:[#allocation2 + $0x48] sm:$0xf] }
  0xbf   : > { %v1086_v63 = vrot.slane %v1084_v51, 4  ;;  %v1089_v1 = vrot.slane %v1087_v52, 5  ;;  %v1625_v9 = vsel %vm9058_vm15, %v1623_v56, %v1624_v61  ;;  %v1686_v37 = vunpack.c.l.b16 %v1622_v58  ;;  %776 = vst [vmem:[#allocation2 + $0x44] sm:$0x1] %v775_v10  ;;  %v553_v49 = vld [vmem:[#allocation2 + $0x5c] sm:$0x1] }
  0xc0   : > { %v1687_v47 = vunpack.c.l.b16 %v1625_v9  ;;  %v1103_v14 = vshll.u32 %v978_v55, 16  ;;  %v1267_v18 = vpack.c.b16 %v1251_v22, %v1250_v54  ;;  %v1100_v21 = vor.u32 %v1099_v2, %v9089_v62  ;;  %v1563_v30 = vld [vmem:[#allocation2 + $0x3c] sm:$0xe] }
  0xc1   : > { %v1090_v19 = vor.u32 %v1089_v1, %v1086_v63  ;;  %v949_v26 = vld [vmem:[#allocation2 + $0x40] sm:$0xf]  ;;  %v661_v32 = vrot.slane %v657_v15, 4  ;;  %v668_v35 = vor.u32 %v666_v23, %v665_v28  ;;  %v670_v36 = vrot.slane %v665_v28, 4  ;;  %v948_v41 = vld [vmem:[#allocation2 + $0x3c] sm:$0xf] }
  0xc2   : > { %v1702_v24 = vpack.c.b16 %v1687_v47, %v1686_v37  ;;  %v1105_v27 = vrot.slane %v1103_v14, 5  ;;  %v1628_v31 = vrot.slane %v949_v26, 5  ;;  %v1101_v0 = vrot.slane %v1100_v21, 4  ;;  %v7862_v1 = vld [vmem:[#allocation2 + $0x30] sm:$0xff] }
  0xc3   : > { %v1091_v34 = vrot.slane %v1090_v19, 4  ;;  %v7110_v44 = vrot.slane %v1563_v30, 9  ;;  %v669_v50 = vsel %vm8915_vm8, %v661_v32, %v668_v35  ;;  %v778_v20 = vsel %vm8922_vm9, %v660_v59, %v777_v38  ;;  %v556_v59 = vld [vmem:[#allocation2 + $0x68] sm:$0x1] }
  0xc4   : > { %1522 = vmatmul.bf16.gmra.mxu1 %v7861_v57  ;;  %v1630_v45 = vrot.slane %v1628_v31, 4  ;;  %v1108_v51 = vshrl.u32 %v948_v41, 16  ;;  %v1111_v52 = vshll.u32 %v948_v41, 16  ;;  %779 = vst [vmem:[#allocation2 + $0x48] sm:$0xf] %v778_v20  ;;  %v554_v53 = vsel %vm8889_vm4, 0, %v553_v49 }
  0xc5   : > { %1999 = vmatmul.bf16.vlgmr.msrb.gmra.mxu3 %v7892_v7  ;;  %v781_v42 = vld [vmem:[#allocation2 + $0x50] sm:$0x1]  ;;  %v1096_v54 = vsel %vm8972_vm12, %v1091_v34, %v9089_v62  ;;  %v1106_v55 = vsel %vm8972_vm12, %v1101_v0, %v1105_v27  ;;  %v1117_v56 = vshll.u32 %v949_v26, 16  ;;  %v1121_v22 = vshrl.u32 %v949_v26, 16  ;;  %780 = vst [vmem:[#allocation2 + $0x4c] sm:$0xf] %v669_v50 }
  0xc6   : > { %v979_v40 = vld [vmem:[#allocation2 + $0x44] sm:$0x1]  ;;  %v782_v25 = vsel %vm8884_vm3, %v670_v36, %v781_v42  ;;  %v1629_v57 = vsel %vm9058_vm15, %v7110_v44, %v1628_v31  ;;  %555 = vst [vmem:[#allocation2 + $0x5c] sm:$0x1] %v554_v53  ;;  %v1252_v61 = vunpack.c.l.b16 %v1096_v54  ;;  %v1253_v63 = vunpack.c.l.b16 %v1106_v55  ;;  %v7893_v62 = vld [vmem:[#allocation2 + $0x18] sm:$0xff] }
  0xc7   : > { %v1631_v46 = vrot.slane %v979_v40, 5  ;;  %783 = vst [vmem:[#allocation2 + $0x50] sm:$0x1] %v782_v25  ;;  %v1110_v2 = vrot.slane %v1108_v51, 4  ;;  %v1113_v3 = vrot.slane %v1111_v52, 5  ;;  %v1688_v4 = vunpack.c.l.b16 %v1629_v57  ;;  %v7894_v20 = vld [vmem:[#allocation2 + $0x24] sm:$0xff] }
  0xc8   : > { %v1119_v9 = vrot.slane %v1117_v56, 5  ;;  %v1123_v37 = vrot.slane %v1121_v22, 4  ;;  %v687_v10 = vrot.slane %v8928_v48, 4  ;;  %v1268_v11 = vpack.c.b16 %v1253_v63, %v1252_v61  ;;  %v953_v55 = vld [vmem:[#allocation2 + $0x58] sm:$0xf] }
  0xc9   : > { %v1632_v58 = vsel %vm9058_vm15, %v1630_v45, %v1631_v46  ;;  %v1114_v13 = vor.u32 %v1113_v3, %v1110_v2  ;;  %v1127_v16 = vshll.u32 %v979_v40, 16  ;;  %v557_v42 = vsel %vm8889_vm4, 0, %v556_v59  ;;  %v7863_v46 = vld [vmem:[#allocation2 + $0x3c] sm:$0xff]  ;;  %v1565_v3 = vld [vmem:[#allocation2 + $0x54] sm:$0xe] }
  0xca   : > { %1794 = vmatmul.bf16.gmra.mxu2 %v1702_v24  ;;  %v1689_v7 = vunpack.c.l.b16 %v1632_v58  ;;  %v1124_v15 = vor.u32 %v1123_v37, %v1119_v9  ;;  %558 = vst [vmem:[#allocation2 + $0x68] sm:$0x1] %v557_v42  ;;  %v704_v54 = vrot.slane %v8957_v29, 4  ;;  %v1642_v63 = vrot.slane %v953_v55, 5 }
  0xcb   : > { %v1564_v19 = vld [vmem:[#allocation2 + $0x48] sm:$0xe]  ;;  %v1115_v23 = vrot.slane %v1114_v13, 4  ;;  %v1129_v48 = vrot.slane %v1127_v16, 5  ;;  %v7112_v37 = vrot.slane %v1565_v3, 9  ;;  %v1165_v16 = vshll.u32 %v953_v55, 16 }
  0xcc   : > { %1355 = vmatmul.bf16.gmra.mxu0 %v1267_v18  ;;  %v951_v47 = vld [vmem:[#allocation2 + $0x4c] sm:$0xf]  ;;  %v1703_v14 = vpack.c.b16 %v1689_v7, %v1688_v4  ;;  %v1125_v28 = vrot.slane %v1124_v15, 4  ;;  %v950_v26 = vld [vmem:[#allocation2 + $0x48] sm:$0xf]  ;;  %v7111_v27 = vrot.slane %v1564_v19, 9 }
  0xcd   : > { %v1635_v17 = vrot.slane %v951_v47, 5  ;;  %v788_v21 = vld [vmem:[#allocation2 + $0x5c] sm:$0x1]  ;;  %v1132_v32 = vshrl.u32 %v950_v26, 16  ;;  %v1135_v34 = vshll.u32 %v950_v26, 16  ;;  %v1120_v0 = vsel %vm8972_vm12, %v1115_v23, %v1119_v9  ;;  %v7864_v26 = vld [vmem:[#allocation2 + $0x48] sm:$0xff] }
  0xce   : > { %v980_v18 = vld [vmem:[#allocation2 + $0x50] sm:$0x1]  ;;  %v789_v24 = vsel %vm8884_vm3, %v687_v10, %v788_v21  ;;  %v1130_v35 = vsel %vm8972_vm12, %v1125_v28, %v1129_v48  ;;  %v1141_v36 = vshll.u32 %v951_v47, 16  ;;  %v1145_v38 = vshrl.u32 %v951_v47, 16  ;;  %v952_v7 = vld [vmem:[#allocation2 + $0x54] sm:$0xf] }
  0xcf   : > { %790 = vst [vmem:[#allocation2 + $0x5c] sm:$0x1] %v789_v24  ;;  %v1637_v30 = vrot.slane %v1635_v17, 4  ;;  %v1638_v31 = vrot.slane %v980_v18, 5  ;;  %v1636_v40 = vsel %vm9058_vm15, %v7111_v27, %v1635_v17  ;;  %v1254_v44 = vunpack.c.l.b16 %v1120_v0  ;;  %v559_v13 = vld [vmem:[#allocation2 + $0x74] sm:$0x1] }
  0xd0   : > { %v1255_v45 = vunpack.c.l.b16 %v1130_v35  ;;  %v1134_v49 = vrot.slane %v1132_v32, 4  ;;  %v1137_v50 = vrot.slane %v1135_v34, 5  ;;  %v1690_v51 = vunpack.c.l.b16 %v1636_v40  ;;  %v7895_v32 = vld [vmem:[#allocation2 + $0x30] sm:$0xff]  ;;  %v955_v35 = vld [vmem:[#allocation2 + $0x64] sm:$0xf] }
  0xd1   : > { %v1639_v41 = vsel %vm9058_vm15, %v1637_v30, %v1638_v31  ;;  %v1143_v25 = vrot.slane %v1141_v36, 5  ;;  %v1147_v53 = vrot.slane %v1145_v38, 4  ;;  %v1151_v61 = vshll.u32 %v980_v18, 16 }
  0xd2   : > { %v1691_v52 = vunpack.c.l.b16 %v1639_v41  ;;  %v1269_v56 = vpack.c.b16 %v1255_v45, %v1254_v44  ;;  %v1138_v22 = vor.u32 %v1137_v50, %v1134_v49  ;;  %v1644_v10 = vrot.slane %v1642_v63, 4 }
  0xd3   : > { %v1148_v58 = vor.u32 %v1147_v53, %v1143_v25  ;;  %v1153_v9 = vrot.slane %v1151_v61, 5  ;;  %v1156_v47 = vshrl.u32 %v952_v7, 16  ;;  %v1169_v17 = vshrl.u32 %v953_v55, 16 }
  0xd4   : > { %1527 = vmatmul.bf16.gmra.mxu1 %v7862_v1  ;;  %v1704_v57 = vpack.c.b16 %v1691_v52, %v1690_v51  ;;  %v795_v1 = vld [vmem:[#allocation2 + $0x68] sm:$0x1]  ;;  %v1139_v4 = vrot.slane %v1138_v22, 4  ;;  %v560_v18 = vsel %vm8889_vm4, 0, %v559_v13  ;;  %v1643_v21 = vsel %vm9058_vm15, %v7112_v37, %v1642_v63 }
  0xd5   : > { %2004 = vmatmul.bf16.gmra.mxu3 %v7893_v62  ;;  %v796_v62 = vsel %vm8884_vm3, %v704_v54, %v795_v1  ;;  %v1149_v29 = vrot.slane %v1148_v58, 4  ;;  %561 = vst [vmem:[#allocation2 + $0x74] sm:$0x1] %v560_v18  ;;  %v1158_v28 = vrot.slane %v1156_v47, 4  ;;  %v1167_v30 = vrot.slane %v1165_v16, 5 }
  0xd6   : > { %v981_v2 = vld [vmem:[#allocation2 + $0x5c] sm:$0x1]  ;;  %797 = vst [vmem:[#allocation2 + $0x68] sm:$0x1] %v796_v62  ;;  %v1144_v15 = vsel %vm8972_vm12, %v1139_v4, %v1143_v25  ;;  %v1171_v31 = vrot.slane %v1169_v17, 4  ;;  %v721_v59 = vrot.slane %v9016_v12, 4  ;;  %v1692_v34 = vunpack.c.l.b16 %v1643_v21 }
  0xd7   : > { %v1154_v19 = vsel %vm8972_vm12, %v1149_v29, %v1153_v9  ;;  %v1256_v24 = vunpack.c.l.b16 %v1144_v15  ;;  %v1175_v41 = vshll.u32 %v981_v2, 16  ;;  %v1649_v49 = vrot.slane %v955_v35, 5  ;;  %v954_v25 = vld [vmem:[#allocation2 + $0x60] sm:$0xf] }
  0xd8   : > { %v1257_v48 = vunpack.c.l.b16 %v1154_v19  ;;  %v1172_v40 = vor.u32 %v1171_v31, %v1167_v30  ;;  %v1180_v22 = vshrl.u32 %v954_v25, 16  ;;  %v1183_v58 = vshll.u32 %v954_v25, 16  ;;  %v1567_v19 = vld [vmem:[#allocation2 + $0x6c] sm:$0xe] }
  0xd9   : > { %v1177_v51 = vrot.slane %v1175_v41, 5  ;;  %v1651_v53 = vrot.slane %v1649_v49, 4  ;;  %v1189_v61 = vshll.u32 %v955_v35, 16  ;;  %v1193_v63 = vshrl.u32 %v955_v35, 16 }
  0xda   : > { %1799 = vmatmul.bf16.gmra.mxu2 %v1703_v14  ;;  %v1159_v14 = vshll.u32 %v952_v7, 16  ;;  %v1270_v36 = vpack.c.b16 %v1257_v48, %v1256_v24  ;;  %v1182_v4 = vrot.slane %v1180_v22, 4  ;;  %v7896_v7 = vld [vmem:[#allocation2 + $0x3c] sm:$0xff]  ;;  %v1185_v9 = vrot.slane %v1183_v58, 5 }
  0xdb   : > { %v1191_v37 = vrot.slane %v1189_v61, 5  ;;  %v7114_v48 = vrot.slane %v1567_v19, 9  ;;  %v7917_v22 = vld [vmem:[#allocation9 + $0x138] sm:$0xff]  ;;  %v877_v19 = vstv %s876_s16 }
  0xdc   : > { %1360 = vmatmul.bf16.gmra.mxu0 %v1268_v11  ;;  %v1645_v11 = vrot.slane %v981_v2, 5  ;;  %v1161_v27 = vrot.slane %v1159_v14, 5  ;;  %v802_v42 = vld [vmem:[#allocation2 + $0x74] sm:$0x1]  ;;  %v1186_v14 = vor.u32 %v1185_v9, %v1182_v4  ;;  %vm9181_vm0 = vcmp.eq.s32.totalorder %v877_v19, 1 }
  0xdd   : > { %v803_v45 = vsel %vm8884_vm3, %v721_v59, %v802_v42  ;;  %v982_v50 = vld [vmem:[#allocation2 + $0x68] sm:$0x1]  ;;  %2445 = vmatpush.bf16.msra.mxu0 %v7917_v22  ;;  %v7915_v9 = vld [vmem:[#allocation9 + $0x128] sm:$0xff]  ;;  %v1559_v19 = vld [vmem:[#allocation2 + $0xc] sm:$0xe] }
  0xde   : > { %v1646_v23 = vsel %vm9058_vm15, %v1644_v10, %v1645_v11  ;;  %v1162_v38 = vor.u32 %v1161_v27, %v1158_v28  ;;  %804 = vst [vmem:[#allocation2 + $0x74] sm:$0x1] %v803_v45  ;;  %v1652_v54 = vrot.slane %v982_v50, 5  ;;  %v1195_v10 = vrot.slane %v1193_v63, 4  ;;  %v957_v11 = vld [vmem:[#allocation2 + $0x70] sm:$0xf] }
  0xdf   : > { %v1693_v0 = vunpack.c.l.b16 %v1646_v23  ;;  %v1199_v16 = vshll.u32 %v982_v50, 16  ;;  %v1656_v17 = vrot.slane %v957_v11, 5  ;;  %v1187_v21 = vrot.slane %v1186_v14, 4  ;;  %v956_v28 = vld [vmem:[#allocation2 + $0x6c] sm:$0xf] }
  0xe0   : > { %v1163_v12 = vrot.slane %v1162_v38, 4  ;;  %v1653_v1 = vsel %vm9058_vm15, %v1651_v53, %v1652_v54  ;;  %v1196_v15 = vor.u32 %v1195_v10, %v1191_v37  ;;  %v1207_v31 = vshll.u32 %v956_v28, 16  ;;  %v7897_v45 = vld [vmem:[#allocation2 + $0x48] sm:$0xff]  ;;  %v7898_v10 = vld [vmem:[#allocation2 + $0x54] sm:$0xff]  ;;  %v1558_v14 = vld [vmem:[#allocation2] sm:$0xe] }
  0xe1   : > { %v1705_v44 = vpack.c.b16 %v1693_v0, %v1692_v34  ;;  %v1695_v29 = vunpack.c.l.b16 %v1653_v1  ;;  %v1201_v24 = vrot.slane %v1199_v16, 5  ;;  %v1192_v59 = vsel %vm8972_vm12, %v1187_v21, %v1191_v37 }
  0xe2   : > { %v1168_v55 = vsel %vm8972_vm12, %v1163_v12, %v1167_v30  ;;  %v1197_v23 = vrot.slane %v1196_v15, 4  ;;  %v1204_v30 = vshrl.u32 %v956_v28, 16  ;;  %v1213_v34 = vshll.u32 %v957_v11, 16  ;;  %v8265_v15 = vld [vmem:[#allocation2 + $0x4] sm:$0xf] }
  0xe3   : > { %v1258_v2 = vunpack.c.l.b16 %v1168_v55  ;;  %v1217_v0 = vshrl.u32 %v957_v11, 16  ;;  %v1657_v35 = vsel %vm9058_vm15, %v7114_v48, %v1656_v17  ;;  %v1260_v38 = vunpack.c.l.b16 %v1192_v59  ;;  %v7951_v28 = vld [vmem:[#allocation9 + $0x1f8] sm:$0xff]  ;;  %v873_v48 = vld [vmem:[%s8872_s30 + $0x4] sm:$0xf] }
  0xe4   : > { %1532 = vmatmul.bf16.gmra.mxu1 %v7863_v46  ;;  %v1566_v46 = vld [vmem:[#allocation2 + $0x60] sm:$0xe]  ;;  %v1206_v41 = vrot.slane %v1204_v30, 4  ;;  %v1209_v42 = vrot.slane %v1207_v31, 5  ;;  %v1215_v50 = vrot.slane %v1213_v34, 5  ;;  %v1593_v16 = vrot.slane %v8265_v15, 5  ;;  %3417 = vmatpush.bf16.msra.mxu3 %v7951_v28 }
  0xe5   : > { %2009 = vmatmul.bf16.gmra.mxu3 %v7894_v20  ;;  %v1173_v20 = vrot.slane %v1172_v40, 4  ;;  %v7113_v52 = vrot.slane %v1566_v46, 9  ;;  %v983_v18 = vld [vmem:[#allocation2 + $0x74] sm:$0x1]  ;;  %v1696_v46 = vunpack.c.l.b16 %v1657_v35  ;;  %v1219_v12 = vrot.slane %v1217_v0, 4  ;;  %v7914_v30 = vld [vmem:[#allocation9 + $0x120] sm:$0xff] }
  0xe6   : > { %v1659_v27 = vrot.slane %v983_v18, 5  ;;  %v1210_v25 = vor.u32 %v1209_v42, %v1206_v41  ;;  %v1223_v54 = vshll.u32 %v983_v18, 16  ;;  %v7925_v31 = vld [vmem:[#allocation9 + $0x178] sm:$0xff]  ;;  %v7942_v59 = vld [vmem:[#allocation9 + $0x1b0] sm:$0xff]  ;;  %v7105_v35 = vrot.slane %v1558_v14, 9 }
  0xe7   : > { %v1220_v53 = vor.u32 %v1219_v12, %v1215_v50  ;;  %2739 = vmatpush.bf16.msrb.mxu1 %v7925_v31  ;;  %v8267_v14 = vld [vmem:[#allocation2 + $0x10] sm:$0xf]  ;;  %v7947_v28 = vld [vmem:[#allocation9 + $0x1d8] sm:$0xff] }
  0xe8   : > { %v1211_v58 = vrot.slane %v1210_v25, 4  ;;  %v1225_v63 = vrot.slane %v1223_v54, 5  ;;  %v7924_v25 = vld [vmem:[#allocation9 + $0x170] sm:$0xff]  ;;  %v1600_v15 = vrot.slane %v8267_v14, 5 }
  0xe9   : > { %v1221_v61 = vrot.slane %v1220_v53, 4  ;;  %v7941_v53 = vld [vmem:[#allocation9 + $0x1a8] sm:$0xff]  ;;  %v7926_v14 = vld [vmem:[#allocation2 + $0x18] sm:$0xff] }
  0xea   : > { %1804 = vmatmul.bf16.gmra.mxu2 %v1704_v57  ;;  %v1650_v57 = vsel %vm9058_vm15, %v7113_v52, %v1649_v49 }
  0xeb   : > { %v1694_v62 = vunpack.c.l.b16 %v1650_v57  ;;  %2740 = vmatpush.bf16.msrb.mxu1 %v7924_v25  ;;  %v7910_v25 = vld [vmem:[#allocation9 + $0x100] sm:$0xff] }
  0xec   : > { %1365 = vmatmul.bf16.gmra.mxu0 %v1269_v56  ;;  %v1178_v56 = vsel %vm8972_vm12, %v1173_v20, %v1177_v51 }
  0xed   : > { %v1259_v3 = vunpack.c.l.b16 %v1178_v56  ;;  %v1706_v47 = vpack.c.b16 %v1695_v29, %v1694_v62  ;;  %v7916_v62 = vld [vmem:[#allocation9 + $0x130] sm:$0xff] }
  0xee   : > { %2446 = vmatpush.bf16.msra.mxu0 %v7916_v62 }
  0xef   : > { %v1271_v13 = vpack.c.b16 %v1259_v3, %v1258_v2  ;;  %v1216_v2 = vsel %vm8972_vm12, %v1211_v58, %v1215_v50  ;;  %v1226_v3 = vsel %vm8972_vm12, %v1221_v61, %v1225_v63  ;;  %v7949_v61 = vld [vmem:[#allocation9 + $0x1e8] sm:$0xff] }
  0xf0   : > { %v1263_v29 = vunpack.c.l.b16 %v1226_v3 }
  0xf2   : > { %2447 = vmatpush.bf16.msra.mxu0 %v7915_v9  ;;  %v7940_v9 = vld [vmem:[#allocation9 + $0x1a0] sm:$0xff] }
  0xf4   : > { %1537 = vmatmul.bf16.gmra.mxu1 %v7864_v26  ;;  %v1658_v26 = vrot.slane %v1656_v17, 4  ;;  %v7943_v17 = vld [vmem:[#allocation9 + $0x1b8] sm:$0xff] }
  0xf5   : > { %2014 = vmatmul.bf16.gmra.mxu3 %v7895_v32  ;;  %v1202_v32 = vsel %vm8972_vm12, %v1197_v23, %v1201_v24  ;;  %v872_v23 = vld [vmem:[%s8872_s30] sm:$0xf]  ;;  %v10764_v24 = vmov 0  ;;  %2963 = vmatpush.bf16.msrb.mxu2 %v7943_v17  ;;  %v7939_v17 = vld [vmem:[#allocation9 + $0x198] sm:$0xff] }
  0xf6   : > { %v1261_v40 = vunpack.c.l.b16 %v1202_v32  ;;  %v10765_v24 = vsel %vm9181_vm0, 4294967295, %v10764_v24  ;;  %v880_v32 = vsel %vm9181_vm0, 0, %v873_v48  ;;  %2448 = vmatpush.bf16.msra.mxu0 %v7914_v30  ;;  %v7938_v30 = vld [vmem:[#allocation9 + $0x190] sm:$0xff] }
  0xf7   : > { %10766 = vst [vmem:[#allocation29_spill] sm:$0xff] %v10765_v24  ;;  %v892_v41 = vshrl.u32 %v880_v32, 16 }
  0xf8   : > { %v1272_v20 = vpack.c.b16 %v1261_v40, %v1260_v38  ;;  %v8266_v38 = vld [vmem:[#allocation2 + $0x8] sm:$0x1] }
  0xf9   : > { %v1596_v40 = vrot.slane %v8266_v38, 5  ;;  %2964 = vmatpush.bf16.msrb.mxu2 %v7942_v59  ;;  %v7106_v59 = vrot.slane %v1559_v19, 9  ;;  %v7946_v38 = vld [vmem:[#allocation9 + $0x1d0] sm:$0xff] }
  0xfa   : > { %1809 = vmatmul.bf16.gmra.mxu2 %v1705_v44 }
  0xfc   : > { %1370 = vmatmul.bf16.gmra.mxu0 %v1270_v36  ;;  %v1660_v36 = vsel %vm9058_vm15, %v1658_v26, %v1659_v27  ;;  %v879_v26 = vsel %vm9181_vm0, 0, %v872_v23  ;;  %v7912_v23 = vld [vmem:[#allocation9 + $0x110] sm:$0xff] }
  0xfd   : > { %v1697_v49 = vunpack.c.l.b16 %v1660_v36  ;;  %v884_v34 = vshrl.u32 %v879_v26, 16  ;;  %v1595_v36 = vrot.slane %v1593_v16, 4  ;;  %2965 = vmatpush.bf16.msrb.mxu2 %v7941_v53  ;;  %v7919_v53 = vld [vmem:[#allocation9 + $0x148] sm:$0xff] }
  0xff   : > { %v1707_v52 = vpack.c.b16 %v1697_v49, %v1696_v46  ;;  %v886_v42 = vrot.slane %v884_v34, 7  ;;  %v7950_v46 = vld [vmem:[#allocation9 + $0x1f0] sm:$0xff]  ;;  %v9194_v49 = vrot.slane %v892_v41, 7  ;;  %v8268_v34 = vld [vmem:[#allocation2 + $0x14] sm:$0x1] }
 0x100   : > { %3418 = vmatpush.bf16.msra.mxu3 %v7950_v46  ;;  %v7937_v46 = vld [vmem:[#allocation9 + $0x188] sm:$0xff] }
 0x101   : > { %v890_v12 = vrot.slane %v886_v42, 4  ;;  %2966 = vmatpush.bf16.msrb.mxu2 %v7940_v9  ;;  %v7944_v9 = vld [vmem:[#allocation9 + $0x1c0] sm:$0xff] }
 0x104   : > { %3419 = vmatpush.bf16.msra.mxu3 %v7949_v61  ;;  %v9223_v61 = vld [vmem:[#allocation2 + $0x10] sm:$0xf] }
 0x105   : > { %2019 = vmatmul.bf16.gmra.mxu3 %v7896_v7  ;;  %v1262_v7 = vunpack.c.l.b16 %v1216_v2  ;;  %2967 = vmatpush.bf16.msrb.mxu2 %v7939_v17 }
 0x107   : > { %v1273_v11 = vpack.c.b16 %v1263_v29, %v1262_v7  ;;  %v7913_v7 = vld [vmem:[#allocation9 + $0x118] sm:$0xff]  ;;  %v7923_v29 = vld [vmem:[#allocation9 + $0x168] sm:$0xff] }
 0x108   : > { %2449 = vmatpush.bf16.msra.mxu0 %v7913_v7  ;;  %2741 = vmatpush.bf16.msrb.mxu1 %v7923_v29  ;;  %v8269_v7 = vld [vmem:[#allocation2 + $0x1c] sm:$0xf] }
 0x109   : > { %2968 = vmatpush.bf16.msrb.mxu2 %v7938_v30  ;;  %v1607_v29 = vrot.slane %v8269_v7, 5  ;;  %v2110_v7 = vshll.u32 %v9223_v61, 16 }
 0x10a   : > { %1814 = vmatmul.bf16.gmra.mxu2 %v1706_v47 }
 0x10c   : > { %1375 = vmatmul.bf16.gmra.mxu0 %v1271_v13  ;;  %v524_v13 = vld [vmem:[#allocation2 + $0x78] sm:$0x1] }
 0x10d   : > { %v525_v18 = vsel %vm8884_vm3, 0, %v524_v13  ;;  %2450 = vmatpush.bf16.msra.mxu0 %v7912_v23  ;;  %2969 = vmatpush.bf16.msrb.mxu2 %v7937_v46 }
 0x10e   : > { %526 = vst [vmem:[#allocation2 + $0x78] sm:$0x1] %v525_v18 }
 0x111   : > { %v1508_v44 = vpop.f32.mrf.mxu1 }
 0x115   : > { %2024 = vmatmul.bf16.gmra.mxu3 %v7897_v45  ;;  %v895_v45 = vshll.u32 %v880_v32, 16  ;;  %v924_v22 = vld [vmem:[#allocation2 + $0x78] sm:$0xf]  ;;  %v1602_v32 = vrot.slane %v1600_v15, 4 }
 0x117   : > { %v897_v54 = vor.u32 %v895_v45, %v9194_v49  ;;  %v7920_v45 = vld [vmem:[#allocation9 + $0x150] sm:$0xff] }
 0x118   : > { %v9163_v56 = vpop.f32.mrf.mxu3 }
 0x119   : > { %v1341_v51 = vpop.f32.mrf.mxu0  ;;  %v9165_v57 = vpop.f32.mrf.mxu1  ;;  %v898_v63 = vsel %vm8915_vm8, %v890_v12, %v897_v54  ;;  %v7936_v54 = vld [vmem:[#allocation9 + $0x180] sm:$0xff] }
 0x11a   : > { %v9161_v55 = vadd.f32 %v1508_v44, %v1341_v51  ;;  %1819 = vmatmul.bf16.gmra.mxu2 %v1707_v52  ;;  %v887_v44 = vshll.u32 %v879_v26, 16  ;;  %v1594_v51 = vsel %vm9058_vm15, %v7105_v35, %v1593_v16  ;;  %v1597_v52 = vsel %vm9058_vm15, %v1595_v36, %v1596_v40  ;;  %927 = vst [vmem:[#allocation2 + $0x7c] sm:$0xf] %v898_v63  ;;  %v7922_v16 = vld [vmem:[#allocation9 + $0x160] sm:$0xff]  ;;  %v7921_v26 = vld [vmem:[#allocation9 + $0x158] sm:$0xff]  ;;  %v7911_v36 = vld [vmem:[#allocation9 + $0x108] sm:$0xff] }
 0x11b   : > { %v1678_v3 = vunpack.c.l.b16 %v1594_v51  ;;  %v1679_v62 = vunpack.c.l.b16 %v1597_v52  ;;  %2742 = vmatpush.bf16.msrb.mxu1 %v7922_v16  ;;  %v1603_v35 = vrot.slane %v8268_v34, 5  ;;  %2451 = vmatpush.bf16.msra.mxu0 %v7911_v36  ;;  %v9225_v63 = vld [vmem:[#allocation2 + $0x14] sm:$0x1]  ;;  %v7918_v16 = vld [vmem:[#allocation9 + $0x140] sm:$0xff]  ;;  %v8270_v34 = vld [vmem:[#allocation2 + $0x20] sm:$0x1] }
 0x11c   : > { %1380 = vmatmul.bf16.gmra.mxu0 %v1272_v20  ;;  %v889_v50 = vor.u32 %v887_v44, %v886_v42  ;;  %v1601_v42 = vsel %vm9058_vm15, %v7106_v59, %v1600_v15  ;;  %2970 = vmatpush.bf16.msrb.mxu2 %v7936_v54 }
 0x11d   : > { %v1698_v13 = vpack.c.b16 %v1679_v62, %v1678_v3  ;;  %v1604_v44 = vsel %vm9058_vm15, %v1602_v32, %v1603_v35  ;;  %v1680_v51 = vunpack.c.l.b16 %v1601_v42  ;;  %v2524_v3 = vld [vmem:[#allocation2 + $0xc] sm:$0xe]  ;;  %v2566_v62 = vrot.slane %v9223_v61, 5 }
 0x11e   : > { %v925_v58 = vsel %vm8922_vm9, %v889_v50, %v924_v22  ;;  %v7945_v50 = vld [vmem:[#allocation9 + $0x1c8] sm:$0xff]  ;;  %v1681_v52 = vunpack.c.l.b16 %v1604_v44  ;;  %v1609_v32 = vrot.slane %v1607_v29, 4  ;;  %v1610_v35 = vrot.slane %v8270_v34, 5  ;;  %v7959_v44 = vld [vmem:[#allocation9 + $0x238] sm:$0xff] }
 0x11f   : > { %926 = vst [vmem:[#allocation2 + $0x78] sm:$0xf] %v925_v58  ;;  %2743 = vmatpush.bf16.msrb.mxu1 %v7921_v26  ;;  %v7900_v58 = vld [vmem:[#allocation2 + $0x6c] sm:$0xff]  ;;  %2452 = vmatpush.bf16.msra.mxu0 %v7910_v25  ;;  %v2568_v19 = vrot.slane %v2566_v62, 4  ;;  %v3043_v26 = vld [vmem:[#allocation2 + $0x1c] sm:$0xf] }
 0x120   : > { %v9174_v4 = vpop.f32.mrf.mxu3  ;;  %v3082_v25 = vshll.u32 %v3043_v26, 16 }
 0x121   : > { %v9167_v1 = vpop.f32.mrf.mxu0  ;;  %v1513_v37 = vpop.f32.mrf.mxu1 }
 0x123   : > { %2744 = vmatpush.bf16.msrb.mxu1 %v7920_v45 }
 0x125   : > { %2029 = vmatmul.bf16.gmra.mxu3 %v7898_v10  ;;  %v7899_v10 = vld [vmem:[#allocation2 + $0x60] sm:$0xff] }
 0x127   : > { %2745 = vmatpush.bf16.msrb.mxu1 %v7919_v53  ;;  %v3086_v53 = vshrl.u32 %v3043_v26, 16 }
 0x128   : > { %v9188_v27 = vpop.f32.mrf.mxu3 }
 0x129   : > { %v1346_v47 = vpop.f32.mrf.mxu0  ;;  %v9192_v0 = vpop.f32.mrf.mxu1 }
 0x12a   : > { %v9178_v21 = vadd.f32 %v1513_v37, %v1346_v47  ;;  %2971 = vmatmul.bf16.vlgmr.msrb.gmra.mxu2 %v7926_v14  ;;  %v3088_v14 = vrot.slane %v3086_v53, 4 }
 0x12b   : > { %2746 = vmatpush.bf16.msrb.mxu1 %v7918_v16 }
 0x12c   : > { %1385 = vmatmul.bf16.gmra.mxu0 %v1273_v11  ;;  %v7948_v11 = vld [vmem:[#allocation9 + $0x1e0] sm:$0xff] }
 0x12d   : > { %3420 = vmatpush.bf16.msra.mxu3 %v7948_v11  ;;  %v1699_v11 = vpack.c.b16 %v1681_v52, %v1680_v51 }
 0x130   : > { %v9207_v2 = vpop.f32.mrf.mxu3 }
 0x131   : > { %v9196_v20 = vpop.f32.mrf.mxu0  ;;  %10767 = vst [vmem:[#allocation30_spill] sm:$0xff] %v9207_v2  ;;  %v1518_v37 = vpop.f32.mrf.mxu1  ;;  %3421 = vmatpush.bf16.msra.mxu3 %v7947_v28  ;;  %v3042_v28 = vld [vmem:[#allocation2 + $0x18] sm:$0xf] }
 0x132   : > { %v3073_v51 = vshrl.u32 %v3042_v28, 16  ;;  %v3076_v52 = vshll.u32 %v3042_v28, 16  ;;  %v9253_v28 = vrot.slane %v2110_v7, 5 }
 0x135   : > { %2034 = vmatmul.bf16.gmra.mxu3 %v7899_v10  ;;  %v2569_v10 = vrot.slane %v9225_v63, 5 }
 0x136   : > { %3422 = vmatpush.bf16.msra.mxu3 %v7946_v38 }
 0x137   : > { %v2570_v36 = vsel %vm9058_vm15, %v2568_v19, %v2569_v10  ;;  %v3075_v10 = vrot.slane %v3073_v51, 4  ;;  %v3045_v51 = vld [vmem:[#allocation2 + $0x24] sm:$0xf] }
 0x138   : > { %v9211_v48 = vpop.f32.mrf.mxu3  ;;  %v2652_v45 = vunpack.c.l.b16 %v2570_v36 }
 0x139   : > { %v1351_v47 = vpop.f32.mrf.mxu0  ;;  %v9213_v31 = vpop.f32.mrf.mxu1 }
 0x13a   : > { %v9209_v18 = vadd.f32 %v1518_v37, %v1351_v47  ;;  %10769 = vst [vmem:[#allocation32_spill] sm:$0xff] %v9213_v31  ;;  %3423 = vmatpush.bf16.msra.mxu3 %v7945_v50  ;;  %v7251_v37 = vrot.slane %v2524_v3, 9  ;;  %v1560_v47 = vld [vmem:[#allocation2 + $0x18] sm:$0xe]  ;;  %v2070_v50 = vld [vmem:[#allocation2 + $0xc] sm:$0xf] }
 0x13b   : > { %v7107_v59 = vrot.slane %v1560_v47, 9  ;;  %v2101_v3 = vshrl.u32 %v2070_v50, 16  ;;  %v9249_v47 = vrot.slane %v3082_v25, 5 }
 0x13c   : > { %10768 = vst [vmem:[#allocation31_spill] sm:$0xff] %v9209_v18  ;;  %1774 = vmatmul.bf16.vlgmr.msrb.gmra.mxu0 %v1698_v13  ;;  %v2567_v17 = vsel %vm9058_vm15, %v7251_v37, %v2566_v62  ;;  %v2104_v62 = vshll.u32 %v2070_v50, 16  ;;  %v9259_v50 = vld [vmem:[#allocation2 + $0x20] sm:$0x1] }
 0x13d   : > { %v1790_v40 = vpop.f32.mrf.mxu2  ;;  %v2651_v30 = vunpack.c.l.b16 %v2567_v17  ;;  %3711 = vmatpush.bf16.msrb.mxu0 %v7959_v44  ;;  %v2103_v19 = vrot.slane %v2101_v3, 4  ;;  %v3089_v34 = vor.u32 %v3088_v14, %v9249_v47  ;;  %v2525_v44 = vld [vmem:[#allocation2 + $0x18] sm:$0xe]  ;;  %v7927_v3 = vld [vmem:[#allocation2 + $0x24] sm:$0xff]  ;;  %v2576_v7 = vrot.slane %v9259_v50, 5 }
 0x13e   : > { %3424 = vmatpush.bf16.msra.mxu3 %v7944_v9  ;;  %v2114_v9 = vshrl.u32 %v9223_v61, 16  ;;  %2976 = vmatmul.bf16.gmra.mxu2 %v7927_v3  ;;  %v3052_v18 = vld [vmem:[#allocation2 + $0x40] sm:$0xf] }
 0x13f   : > { %v2671_v54 = vpack.c.b16 %v2652_v45, %v2651_v30  ;;  %v9255_v30 = vld [vmem:[#allocation2 + $0x1c] sm:$0xf] }
 0x140   : > { %v9221_v12 = vpop.f32.mrf.mxu3  ;;  %v2116_v26 = vrot.slane %v2114_v9, 4  ;;  %v2573_v36 = vrot.slane %v9255_v30, 5 }
 0x141   : > { %v9215_v41 = vpop.f32.mrf.mxu0  ;;  %10771 = vst [vmem:[#allocation34_spill] sm:$0xff] %v9221_v12  ;;  %v1523_v22 = vpop.f32.mrf.mxu1  ;;  %2747 = vmatmul.bf16.vlgmr.msrb.gmra.mxu1 %v2671_v54 }
 0x142   : > { %10770 = vst [vmem:[#allocation33_spill] sm:$0xff] %v9215_v41  ;;  %v2575_v25 = vrot.slane %v2573_v36, 4 }
 0x145   : > { %v9229_v13 = vpop.f32.mrf.mxu2  ;;  %2039 = vmatmul.bf16.gmra.mxu3 %v7900_v58 }
 0x148   : > { %v9237_v42 = vpop.f32.mrf.mxu3 }
 0x149   : > { %v1356_v15 = vpop.f32.mrf.mxu0  ;;  %10772 = vst [vmem:[#allocation35_spill] sm:$0xff] %v9237_v42  ;;  %v9239_v46 = vpop.f32.mrf.mxu1 }
 0x14a   : > { %v1524_v23 = vadd.f32 %v1523_v22, %v1356_v15  ;;  %v1608_v22 = vsel %vm9058_vm15, %v7107_v59, %v1607_v29  ;;  %v3044_v15 = vld [vmem:[#allocation2 + $0x20] sm:$0x1]  ;;  %v7901_v59 = vld [vmem:[#allocation2 + $0x78] sm:$0xff] }
 0x14b   : > { %v1682_v29 = vunpack.c.l.b16 %v1608_v22  ;;  %v2117_v22 = vor.u32 %v2116_v26, %v9253_v28 }
 0x14c   : > { %v9235_v38 = vadd.f32 %v1790_v40, %v1524_v23  ;;  %1779 = vmatmul.bf16.gmra.mxu0 %v1699_v11  ;;  %v1611_v40 = vsel %vm9058_vm15, %v1609_v32, %v1610_v35  ;;  %v3078_v11 = vrot.slane %v3076_v52, 5  ;;  %v2106_v23 = vrot.slane %v2104_v62, 5  ;;  %v3046_v62 = vld [vmem:[#allocation2 + $0x28] sm:$0xf] }
 0x14d   : > { %v1795_v58 = vpop.f32.mrf.mxu2  ;;  %v1683_v16 = vunpack.c.l.b16 %v1611_v40  ;;  %v3092_v35 = vshll.u32 %v3044_v15, 16  ;;  %v7252_v52 = vrot.slane %v2525_v44, 9  ;;  %v2120_v40 = vshll.u32 %v9225_v63, 16 }
 0x14e   : > { %v3079_v32 = vor.u32 %v3078_v11, %v3075_v10  ;;  %v2107_v54 = vor.u32 %v2106_v23, %v2103_v19  ;;  %v3090_v11 = vrot.slane %v3089_v34, 4  ;;  %v3097_v19 = vshrl.u32 %v3045_v51, 16 }
 0x14f   : > { %v1700_v45 = vpack.c.b16 %v1683_v16, %v1682_v29  ;;  %v3094_v14 = vrot.slane %v3092_v35, 5  ;;  %v2574_v15 = vsel %vm9058_vm15, %v7252_v52, %v2573_v36  ;;  %v2073_v16 = vld [vmem:[#allocation2 + $0x18] sm:$0xf]  ;;  %v3100_v23 = vshll.u32 %v3045_v51, 16 }
 0x150   : > { %v9251_v17 = vpop.f32.mrf.mxu3  ;;  %v3080_v10 = vrot.slane %v3079_v32, 4  ;;  %v2577_v63 = vsel %vm9058_vm15, %v2575_v25, %v2576_v7  ;;  %v3106_v26 = vshll.u32 %v3046_v62, 16  ;;  %v3110_v44 = vshrl.u32 %v3046_v62, 16  ;;  %v7958_v25 = vld [vmem:[#allocation9 + $0x230] sm:$0xff] }
 0x151   : > { %v9247_v37 = vpop.f32.mrf.mxu0  ;;  %10773 = vst [vmem:[#allocation36_spill] sm:$0xff] %v9251_v17  ;;  %v1528_v61 = vpop.f32.mrf.mxu1  ;;  %v2653_v12 = vunpack.c.l.b16 %v2574_v15  ;;  %v2654_v2 = vunpack.c.l.b16 %v2577_v63  ;;  %v2108_v32 = vrot.slane %v2107_v54, 4  ;;  %v2118_v34 = vrot.slane %v2117_v22, 4  ;;  %v3047_v54 = vld [vmem:[#allocation2 + $0x2c] sm:$0x1]  ;;  %3712 = vmatpush.bf16.msrb.mxu0 %v7958_v25 }
 0x152   : > { %v3085_v36 = vsel %vm8972_vm12, %v3080_v10, %v9249_v47  ;;  %v2125_v51 = vshrl.u32 %v2073_v16, 16  ;;  %v3095_v3 = vsel %vm8972_vm12, %v3090_v11, %v3094_v14  ;;  %v2138_v62 = vshrl.u32 %v9255_v30, 16 }
 0x153   : > { %v2672_v52 = vpack.c.b16 %v2654_v2, %v2653_v12  ;;  %v3099_v22 = vrot.slane %v3097_v19, 4  ;;  %v3102_v7 = vrot.slane %v3100_v23, 5  ;;  %v2113_v2 = vsel %vm8972_vm12, %v2108_v32, %v9253_v28  ;;  %v2077_v32 = vld [vmem:[#allocation2 + $0x28] sm:$0xf] }
 0x154   : > { %v3329_v10 = vunpack.c.l.b16 %v3085_v36  ;;  %v2127_v11 = vrot.slane %v2125_v51, 4  ;;  %v3116_v19 = vshll.u32 %v3047_v54, 16  ;;  %v2357_v28 = vunpack.c.l.b16 %v2113_v2  ;;  %v9301_v2 = vld [vmem:[#allocation2 + $0x2c] sm:$0x1] }
 0x155   : > { %v9261_v53 = vpop.f32.mrf.mxu2  ;;  %2044 = vmatmul.bf16.gmra.mxu3 %v7901_v59  ;;  %2752 = vmatmul.bf16.gmra.mxu1 %v2672_v52  ;;  %v3103_v23 = vor.u32 %v3102_v7, %v3099_v22  ;;  %v2144_v36 = vshll.u32 %v9259_v50, 16  ;;  %v2583_v50 = vrot.slane %v9301_v2, 5 }
 0x156   : > { %v3118_v51 = vrot.slane %v3116_v19, 5  ;;  %v3048_v19 = vld [vmem:[#allocation2 + $0x30] sm:$0xf] }
 0x158   : > { %v9272_v59 = vpop.f32.mrf.mxu3 }
 0x159   : > { %v1361_v9 = vpop.f32.mrf.mxu0  ;;  %10774 = vst [vmem:[#allocation37_spill] sm:$0xff] %v9272_v59  ;;  %v9274_v35 = vpop.f32.mrf.mxu1  ;;  %v2580_v59 = vrot.slane %v2077_v32, 5 }
 0x15a   : > { %v1529_v29 = vadd.f32 %v1528_v61, %v1361_v9  ;;  %v2122_v61 = vrot.slane %v2120_v40, 5  ;;  %v9283_v9 = vrot.slane %v3106_v26, 5  ;;  %v3112_v40 = vrot.slane %v3110_v44, 4 }
 0x15b   : > { %v2582_v54 = vrot.slane %v2580_v59, 4 }
 0x15c   : > { %v9270_v8 = vadd.f32 %v1795_v58, %v1529_v29  ;;  %1784 = vmatmul.bf16.gmra.mxu0 %v1700_v45  ;;  %v2128_v58 = vshll.u32 %v2073_v16, 16  ;;  %v2134_v45 = vshll.u32 %v9255_v30, 16  ;;  %v2123_v47 = vsel %vm8972_vm12, %v2118_v34, %v2122_v61 }
 0x15d   : > { %v1800_v15 = vpop.f32.mrf.mxu2  ;;  %v3330_v30 = vunpack.c.l.b16 %v3095_v3  ;;  %v2140_v16 = vrot.slane %v2138_v62, 4  ;;  %v3113_v63 = vor.u32 %v3112_v40, %v9283_v9  ;;  %v2358_v44 = vunpack.c.l.b16 %v2123_v47  ;;  %v2526_v3 = vld [vmem:[#allocation2 + $0x24] sm:$0xe]  ;;  %v7928_v40 = vld [vmem:[#allocation2 + $0x30] sm:$0xff] }
 0x15e   : > { %v2130_v14 = vrot.slane %v2128_v58, 5  ;;  %v9292_v29 = vrot.slane %v2134_v45, 5  ;;  %v3104_v58 = vrot.slane %v3103_v23, 4  ;;  %v7253_v62 = vrot.slane %v2526_v3, 9  ;;  %2981 = vmatmul.bf16.gmra.mxu2 %v7928_v40 }
 0x15f   : > { %v3349_v25 = vpack.c.b16 %v3330_v30, %v3329_v10  ;;  %v3114_v45 = vrot.slane %v3113_v63, 4  ;;  %v2377_v22 = vpack.c.b16 %v2358_v44, %v2357_v28  ;;  %v2076_v10 = vld [vmem:[#allocation2 + $0x24] sm:$0xf]  ;;  %v2158_v40 = vshll.u32 %v2077_v32, 16 }
 0x160   : > { %v9295_v26 = vpop.f32.mrf.mxu3  ;;  %v2131_v34 = vor.u32 %v2130_v14, %v2127_v11  ;;  %v2141_v61 = vor.u32 %v2140_v16, %v9292_v29  ;;  %v2581_v30 = vsel %vm9058_vm15, %v7253_v62, %v2580_v59  ;;  %v2146_v16 = vrot.slane %v2144_v36, 5 }
 0x161   : > { %v9288_v12 = vpop.f32.mrf.mxu0  ;;  %10775 = vst [vmem:[#allocation38_spill] sm:$0xff] %v9295_v26  ;;  %v1533_v52 = vpop.f32.mrf.mxu1  ;;  %v2655_v23 = vunpack.c.l.b16 %v2581_v30  ;;  %v3109_v28 = vsel %vm8972_vm12, %v3104_v58, %v9283_v9  ;;  %v3119_v44 = vsel %vm8972_vm12, %v3114_v45, %v3118_v51  ;;  %v2584_v59 = vsel %vm9058_vm15, %v2582_v54, %v2583_v50 }
 0x162   : > { %v2132_v14 = vrot.slane %v2131_v34, 4  ;;  %v2142_v63 = vrot.slane %v2141_v61, 4  ;;  %v2149_v34 = vshrl.u32 %v2076_v10, 16  ;;  %v2152_v36 = vshll.u32 %v2076_v10, 16 }
 0x163   : > { %v2656_v62 = vunpack.c.l.b16 %v2584_v59  ;;  %v3121_v9 = vshrl.u32 %v3048_v19, 16  ;;  %v3124_v58 = vshll.u32 %v3048_v19, 16  ;;  %v3331_v50 = vunpack.c.l.b16 %v3109_v28 }
 0x164   : > { %v2147_v54 = vsel %vm8972_vm12, %v2142_v63, %v2146_v16  ;;  %v3332_v10 = vunpack.c.l.b16 %v3119_v44  ;;  %v2154_v59 = vrot.slane %v2152_v36, 5  ;;  %v7957_v44 = vld [vmem:[#allocation9 + $0x228] sm:$0xff] }
 0x165   : > { %v9299_v7 = vpop.f32.mrf.mxu2  ;;  %3425 = vmatmul.bf16.vlgmr.msra.gmra.mxu3 %v3349_v25  ;;  %v3049_v25 = vld [vmem:[#allocation2 + $0x34] sm:$0xf]  ;;  %v2673_v45 = vpack.c.b16 %v2656_v62, %v2655_v23  ;;  %v3126_v23 = vrot.slane %v3124_v58, 5  ;;  %v2360_v63 = vunpack.c.l.b16 %v2147_v54  ;;  %3713 = vmatpush.bf16.msrb.mxu0 %v7957_v44  ;;  %v2527_v58 = vld [vmem:[#allocation2 + $0x30] sm:$0xe] }
 0x166   : > { %v3130_v30 = vshll.u32 %v3049_v25, 16  ;;  %v3134_v51 = vshrl.u32 %v3049_v25, 16  ;;  %v3123_v25 = vrot.slane %v3121_v9, 4  ;;  %v3350_v36 = vpack.c.b16 %v3332_v10, %v3331_v50  ;;  %v2079_v50 = vld [vmem:[#allocation2 + $0x30] sm:$0xf] }
 0x167   : > { %2757 = vmatmul.bf16.gmra.mxu1 %v2673_v45  ;;  %v7254_v42 = vrot.slane %v2527_v58, 9  ;;  %v9337_v10 = vld [vmem:[#allocation2 + $0x38] sm:$0x1]  ;;  %v2173_v31 = vshrl.u32 %v2079_v50, 16  ;;  %v2176_v41 = vshll.u32 %v2079_v50, 16 }
 0x168   : > { %v9328_v62 = vrot.slane %v3130_v30, 5  ;;  %v3136_v26 = vrot.slane %v3134_v51, 4  ;;  %v3127_v17 = vor.u32 %v3126_v23, %v3123_v25  ;;  %v2168_v51 = vshll.u32 %v9301_v2, 16 }
 0x169   : > { %v1366_v47 = vpop.f32.mrf.mxu0  ;;  %v9317_v61 = vpop.f32.mrf.mxu1 }
 0x16a   : > { %v1534_v11 = vadd.f32 %v1533_v52, %v1366_v47  ;;  %v9315_v52 = vpop.f32.mrf.mxu3  ;;  %v2162_v47 = vshrl.u32 %v2077_v32, 16  ;;  %v9326_v32 = vrot.slane %v2158_v40, 5 }
 0x16b   : > { %10776 = vst [vmem:[#allocation39_spill] sm:$0xff] %v9315_v52 }
 0x16c   : > { %v9313_v3 = vadd.f32 %v1800_v15, %v1534_v11  ;;  %2453 = vmatmul.bf16.vlgmr.msra.gmra.mxu0 %v2377_v22  ;;  %v2137_v15 = vsel %vm8972_vm12, %v2132_v14, %v9292_v29  ;;  %v2151_v11 = vrot.slane %v2149_v34, 4  ;;  %v2164_v19 = vrot.slane %v2162_v47, 4  ;;  %v3050_v29 = vld [vmem:[#allocation2 + $0x38] sm:$0x1]  ;;  %v2080_v34 = vld [vmem:[#allocation2 + $0x34] sm:$0xf] }
 0x16d   : > { %v1805_v22 = vpop.f32.mrf.mxu2  ;;  %v2359_v16 = vunpack.c.l.b16 %v2137_v15  ;;  %v2587_v40 = vrot.slane %v2080_v34, 5  ;;  %v3137_v47 = vor.u32 %v3136_v26, %v9328_v62  ;;  %v3140_v9 = vshll.u32 %v3050_v29, 16 }
 0x16e   : > { %v2155_v28 = vor.u32 %v2154_v59, %v2151_v11  ;;  %v2165_v45 = vor.u32 %v2164_v19, %v9326_v32  ;;  %v7929_v59 = vld [vmem:[#allocation2 + $0x3c] sm:$0xff]  ;;  %v3128_v26 = vrot.slane %v3127_v17, 4  ;;  %v2590_v29 = vrot.slane %v9337_v10, 5 }
 0x16f   : > { %v2378_v15 = vpack.c.b16 %v2360_v63, %v2359_v16  ;;  %v2588_v23 = vsel %vm9058_vm15, %v7254_v42, %v2587_v40  ;;  %v3138_v44 = vrot.slane %v3137_v47, 4  ;;  %v3142_v58 = vrot.slane %v3140_v9, 5  ;;  %2986 = vmatmul.bf16.gmra.mxu2 %v7929_v59  ;;  %v3051_v16 = vld [vmem:[#allocation2 + $0x3c] sm:$0xf] }
 0x170   : > { %v2156_v11 = vrot.slane %v2155_v28, 4  ;;  %v2166_v25 = vrot.slane %v2165_v45, 4  ;;  %v2657_v63 = vunpack.c.l.b16 %v2588_v23  ;;  %v2170_v28 = vrot.slane %v2168_v51, 5 }
 0x171   : > { %v9324_v52 = vpop.f32.mrf.mxu0  ;;  %v1538_v30 = vpop.f32.mrf.mxu1  ;;  %v2182_v42 = vshll.u32 %v2080_v34, 16  ;;  %v3133_v9 = vsel %vm8972_vm12, %v3128_v26, %v9328_v62  ;;  %v3148_v51 = vshll.u32 %v3051_v16, 16  ;;  %v3143_v59 = vsel %vm8972_vm12, %v3138_v44, %v3142_v58 }
 0x172   : > { %v9330_v14 = vpop.f32.mrf.mxu3  ;;  %v2178_v62 = vrot.slane %v2176_v41, 5 }
 0x173   : > { %10777 = vst [vmem:[#allocation40_spill] sm:$0xff] %v9330_v14  ;;  %v2589_v14 = vrot.slane %v2587_v40, 4  ;;  %v2186_v40 = vshrl.u32 %v2080_v34, 16  ;;  %v2171_v34 = vsel %vm8972_vm12, %v2166_v25, %v2170_v28  ;;  %v9361_v26 = vrot.slane %v2182_v42, 5 }
 0x174   : > { %v2362_v41 = vunpack.c.l.b16 %v2171_v34  ;;  %v2192_v28 = vshll.u32 %v9337_v10, 16 }
 0x175   : > { %v9335_v54 = vpop.f32.mrf.mxu2  ;;  %3430 = vmatmul.bf16.gmra.mxu3 %v3350_v36  ;;  %v2591_v36 = vsel %vm9058_vm15, %v2589_v14, %v2590_v29  ;;  %v3154_v14 = vshll.u32 %v3052_v18, 16  ;;  %v2188_v23 = vrot.slane %v2186_v40, 4 }
 0x176   : > { %v2658_v33 = vunpack.c.l.b16 %v2591_v36 }
 0x177   : > { %v9365_v58 = vrot.slane %v3154_v14, 5 }
 0x178   : > { %v2674_v50 = vpack.c.b16 %v2658_v33, %v2657_v63  ;;  %v3333_v33 = vunpack.c.l.b16 %v3133_v9  ;;  %v2189_v63 = vor.u32 %v2188_v23, %v9361_v26  ;;  %v7956_v9 = vld [vmem:[#allocation9 + $0x220] sm:$0xff] }
 0x179   : > { %v1371_v19 = vpop.f32.mrf.mxu0  ;;  %3714 = vmatpush.bf16.msrb.mxu0 %v7956_v9  ;;  %v3055_v9 = vld [vmem:[#allocation2 + $0x4c] sm:$0xf] }
 0x17a   : > { %v1539_v2 = vadd.f32 %v1538_v30, %v1371_v19  ;;  %v2015_v17 = vpop.f32.mrf.mxu3  ;;  %v3145_v30 = vshrl.u32 %v3051_v16, 16  ;;  %v2175_v19 = vrot.slane %v2173_v31, 4  ;;  %2762 = vmatmul.bf16.gmra.mxu1 %v2674_v50  ;;  %v2190_v34 = vrot.slane %v2189_v63, 4 }
 0x17b   : > { %v9347_v47 = vadd.f32 %v2015_v17, %v9235_v38  ;;  %v2161_v38 = vsel %vm8972_vm12, %v2156_v11, %v9326_v32 }
 0x17c   : > { %v9344_v45 = vadd.f32 %v1805_v22, %v1539_v2  ;;  %2458 = vmatmul.bf16.gmra.mxu0 %v2378_v15  ;;  %v3158_v22 = vshrl.u32 %v3052_v18, 16  ;;  %v1526_v15 = vadd.f32 %v9239_v46, %v9247_v37  ;;  %v3334_v2 = vunpack.c.l.b16 %v3143_v59  ;;  %v3053_v37 = vld [vmem:[#allocation2 + $0x44] sm:$0x1] }
 0x17d   : > { %v1810_v18 = vpop.f32.mrf.mxu2  ;;  %v3147_v44 = vrot.slane %v3145_v30, 4  ;;  %v3150_v46 = vrot.slane %v3148_v51, 5  ;;  %v2361_v25 = vunpack.c.l.b16 %v2161_v38  ;;  %v2179_v16 = vor.u32 %v2178_v62, %v2175_v19  ;;  %v2083_v30 = vld [vmem:[#allocation2 + $0x40] sm:$0xf]  ;;  %v9373_v59 = vld [vmem:[#allocation2 + $0x44] sm:$0x1] }
 0x17e   : > { %v3160_v32 = vrot.slane %v3158_v22, 4  ;;  %v1832_v11 = vadd.f32 %v9229_v13, %v1526_v15  ;;  %v3351_v17 = vpack.c.b16 %v3334_v2, %v3333_v33  ;;  %v3164_v40 = vshll.u32 %v3053_v37, 16  ;;  %v2528_v13 = vld [vmem:[#allocation2 + $0x3c] sm:$0xe]  ;;  %v7930_v62 = vld [vmem:[#allocation2 + $0x48] sm:$0xff] }
 0x17f   : > { %v3151_v42 = vor.u32 %v3150_v46, %v3147_v44  ;;  %v2594_v14 = vrot.slane %v2083_v30, 5  ;;  %v2082_v22 = vld [vmem:[#allocation2 + $0x3c] sm:$0xf]  ;;  %v7255_v50 = vrot.slane %v2528_v13, 9  ;;  %v2597_v15 = vrot.slane %v9373_v59, 5  ;;  %2991 = vmatmul.bf16.gmra.mxu2 %v7930_v62 }
 0x180   : > { %v3161_v51 = vor.u32 %v3160_v32, %v9365_v58  ;;  %v2379_v38 = vpack.c.b16 %v2362_v41, %v2361_v25  ;;  %v2180_v10 = vrot.slane %v2179_v16, 4  ;;  %v2194_v19 = vrot.slane %v2192_v28, 5  ;;  %v3054_v44 = vld [vmem:[#allocation2 + $0x48] sm:$0xf] }
 0x181   : > { %v9363_v29 = vpop.f32.mrf.mxu0  ;;  %v3152_v33 = vrot.slane %v3151_v42, 4  ;;  %v3166_v2 = vrot.slane %v3164_v40, 5  ;;  %v2595_v46 = vsel %vm9058_vm15, %v7255_v50, %v2594_v14  ;;  %v2596_v37 = vrot.slane %v2594_v14, 4 }
 0x182   : > { %v2017_v31 = vpop.f32.mrf.mxu3  ;;  %v2659_v25 = vunpack.c.l.b16 %v2595_v46  ;;  %v2200_v16 = vshll.u32 %v2082_v22, 16  ;;  %v2206_v63 = vshll.u32 %v2083_v30, 16  ;;  %v2210_v28 = vshrl.u32 %v2083_v30, 16 }
 0x183   : > { %v9370_v36 = vadd.f32 %v2017_v31, %v1832_v11  ;;  %v3162_v11 = vrot.slane %v3161_v51, 4  ;;  %v2197_v31 = vshrl.u32 %v2082_v22, 16  ;;  %v3169_v13 = vshrl.u32 %v3054_v44, 16 }
 0x184   : > { %v3172_v14 = vshll.u32 %v3054_v44, 16  ;;  %v3178_v50 = vshll.u32 %v3055_v9, 16  ;;  %v3182_v62 = vshrl.u32 %v3055_v9, 16  ;;  %v1531_v22 = vadd.f32 %v9274_v35, %v9288_v12  ;;  %v3056_v9 = vld [vmem:[#allocation2 + $0x50] sm:$0x1] }
 0x185   : > { %3435 = vmatmul.bf16.gmra.mxu3 %v3351_v17  ;;  %v9379_v41 = vpop.f32.mrf.mxu2  ;;  %v2598_v17 = vsel %vm9058_vm15, %v2596_v37, %v2597_v15  ;;  %v3157_v30 = vsel %vm8972_vm12, %v3152_v33, %v9365_v58  ;;  %v2202_v44 = vrot.slane %v2200_v16, 5  ;;  %v9400_v46 = vrot.slane %v2206_v63, 5 }
 0x186   : > { %v2212_v35 = vrot.slane %v2210_v28, 4  ;;  %v3171_v12 = vrot.slane %v3169_v13, 4  ;;  %v3174_v37 = vrot.slane %v3172_v14, 5  ;;  %v3335_v33 = vunpack.c.l.b16 %v3157_v30  ;;  %v2086_v14 = vld [vmem:[#allocation2 + $0x4c] sm:$0xf] }
 0x187   : > { %v3188_v13 = vshll.u32 %v3056_v9, 16 }
 0x188   : > { %v3175_v16 = vor.u32 %v3174_v37, %v3171_v12 }
 0x189   : > { %v1376_v23 = vpop.f32.mrf.mxu0  ;;  %v3190_v37 = vrot.slane %v3188_v13, 5 }
 0x18a   : > { %v1544_v32 = vadd.f32 %v9163_v56, %v1376_v23  ;;  %v2020_v40 = vpop.f32.mrf.mxu3  ;;  %v2660_v56 = vunpack.c.l.b16 %v2598_v17  ;;  %v2199_v23 = vrot.slane %v2197_v31, 4 }
 0x18b   : > { %v9386_v51 = vadd.f32 %v2020_v40, %v9270_v8  ;;  %v2195_v8 = vsel %vm8972_vm12, %v2190_v34, %v2194_v19 }
 0x18c   : > { %v9383_v42 = vadd.f32 %v1810_v18, %v1544_v32  ;;  %2463 = vmatmul.bf16.gmra.mxu0 %v2379_v38  ;;  %v3167_v18 = vsel %vm8972_vm12, %v3162_v11, %v3166_v2  ;;  %v2675_v15 = vpack.c.b16 %v2660_v56, %v2659_v25  ;;  %v2185_v38 = vsel %vm8972_vm12, %v2180_v10, %v9361_v26  ;;  %v9411_v56 = vld [vmem:[#allocation2 + $0x50] sm:$0x1] }
 0x18d   : > { %v3336_v2 = vunpack.c.l.b16 %v3167_v18  ;;  %v9404_v32 = vrot.slane %v3178_v50, 5  ;;  %v3184_v11 = vrot.slane %v3182_v62, 4  ;;  %v1834_v26 = vadd.f32 %v9261_v53, %v1531_v22  ;;  %v1815_v28 = vpop.f32.mrf.mxu2  ;;  %v2529_v50 = vld [vmem:[#allocation2 + $0x48] sm:$0xe] }
 0x18e   : > { %2767 = vmatmul.bf16.gmra.mxu1 %v2675_v15  ;;  %v2363_v10 = vunpack.c.l.b16 %v2185_v38  ;;  %v2364_v19 = vunpack.c.l.b16 %v2195_v8  ;;  %v2203_v31 = vor.u32 %v2202_v44, %v2199_v23  ;;  %v2213_v25 = vor.u32 %v2212_v35, %v9400_v46  ;;  %v2085_v22 = vld [vmem:[#allocation2 + $0x48] sm:$0xf]  ;;  %v7931_v44 = vld [vmem:[#allocation2 + $0x54] sm:$0xff] }
 0x18f   : > { %v3352_v17 = vpack.c.b16 %v3336_v2, %v3335_v33  ;;  %v3185_v40 = vor.u32 %v3184_v11, %v9404_v32  ;;  %v2601_v62 = vrot.slane %v2086_v14, 5  ;;  %v2216_v53 = vshll.u32 %v9373_v59, 16  ;;  %v3057_v33 = vld [vmem:[#allocation2 + $0x54] sm:$0xf]  ;;  %2996 = vmatmul.bf16.gmra.mxu2 %v7931_v44 }
 0x190   : > { %v7256_v30 = vrot.slane %v2529_v50, 9  ;;  %v2604_v18 = vrot.slane %v9411_v56, 5  ;;  %v2380_v15 = vpack.c.b16 %v2364_v19, %v2363_v10  ;;  %v2204_v38 = vrot.slane %v2203_v31, 4 }
 0x191   : > { %v9402_v58 = vpop.f32.mrf.mxu0  ;;  %v2214_v8 = vrot.slane %v2213_v25, 4  ;;  %v3176_v23 = vrot.slane %v3175_v16, 4  ;;  %v3186_v12 = vrot.slane %v3185_v40, 4  ;;  %v2603_v11 = vrot.slane %v2601_v62, 4 }
 0x192   : > { %v2022_v34 = vpop.f32.mrf.mxu3  ;;  %v2602_v2 = vsel %vm9058_vm15, %v7256_v30, %v2601_v62  ;;  %v2221_v9 = vshrl.u32 %v2085_v22, 16  ;;  %v2218_v19 = vrot.slane %v2216_v53, 5  ;;  %v2230_v31 = vshll.u32 %v2086_v14, 16  ;;  %v7955_v62 = vld [vmem:[#allocation9 + $0x218] sm:$0xff] }
 0x193   : > { %v9408_v63 = vadd.f32 %v2022_v34, %v1834_v26  ;;  %v2224_v26 = vshll.u32 %v2085_v22, 16  ;;  %v9418_v34 = vld [vmem:[#allocation2 + $0x58] sm:$0xf]  ;;  %v2661_v10 = vunpack.c.l.b16 %v2602_v2  ;;  %v2234_v25 = vshrl.u32 %v2086_v14, 16  ;;  %3715 = vmatpush.bf16.msrb.mxu0 %v7955_v62 }
 0x194   : > { %v2605_v16 = vsel %vm9058_vm15, %v2603_v11, %v2604_v18  ;;  %v3193_v13 = vshrl.u32 %v3057_v33, 16  ;;  %v3196_v50 = vshll.u32 %v3057_v33, 16  ;;  %v3181_v53 = vsel %vm8972_vm12, %v3176_v23, %v9404_v32 }
 0x195   : > { %3440 = vmatmul.bf16.gmra.mxu3 %v3352_v17  ;;  %v3202_v14 = vshll.u32 %v9418_v34, 16  ;;  %v3206_v22 = vshrl.u32 %v9418_v34, 16  ;;  %v2223_v18 = vrot.slane %v2221_v9, 4  ;;  %v9438_v33 = vrot.slane %v2230_v31, 5 }
 0x196   : > { %v2236_v2 = vrot.slane %v2234_v25, 4  ;;  %v2209_v32 = vsel %vm8972_vm12, %v2204_v38, %v9400_v46  ;;  %v2219_v23 = vsel %vm8972_vm12, %v2214_v8, %v2218_v19  ;;  %v2240_v38 = vshll.u32 %v9411_v56, 16 }
 0x197   : > { %v2365_v19 = vunpack.c.l.b16 %v2209_v32  ;;  %v2366_v25 = vunpack.c.l.b16 %v2219_v23  ;;  %v7932_v32 = vld [vmem:[#allocation2 + $0x60] sm:$0xff] }
 0x198   : > { %v2237_v46 = vor.u32 %v2236_v2, %v9438_v33  ;;  %v2242_v56 = vrot.slane %v2240_v38, 5 }
 0x199   : > { %v1381_v35 = vpop.f32.mrf.mxu0 }
 0x19a   : > { %v1549_v59 = vadd.f32 %v9188_v27, %v1381_v35  ;;  %v2025_v40 = vpop.f32.mrf.mxu3  ;;  %v2662_v27 = vunpack.c.l.b16 %v2605_v16  ;;  %v1536_v35 = vadd.f32 %v9317_v61, %v9324_v52  ;;  %v9447_v52 = vrot.slane %v3202_v14, 5 }
 0x19b   : > { %v9425_v30 = vadd.f32 %v2025_v40, %v9313_v3  ;;  %v9436_v3 = vpop.f32.mrf.mxu2  ;;  %v3208_v61 = vrot.slane %v3206_v22, 4  ;;  %v9458_v22 = vld [vmem:[#allocation2 + $0x5c] sm:$0x1] }
 0x19c   : > { %v9422_v17 = vadd.f32 %v1815_v28, %v1549_v59  ;;  %2468 = vmatmul.bf16.gmra.mxu0 %v2380_v15  ;;  %v3191_v28 = vsel %vm8972_vm12, %v3186_v12, %v3190_v37  ;;  %v2226_v15 = vrot.slane %v2224_v26, 5  ;;  %v2676_v44 = vpack.c.b16 %v2662_v27, %v2661_v10  ;;  %10778 = vst [vmem:[#allocation41_spill] sm:$0xff] %v9436_v3  ;;  %v9449_v10 = vld [vmem:[#allocation2 + $0x5c] sm:$0x1]  ;;  %v2088_v27 = vld [vmem:[#allocation2 + $0x54] sm:$0xf] }
 0x19d   : > { %v3195_v12 = vrot.slane %v3193_v13, 4  ;;  %v3198_v37 = vrot.slane %v3196_v50, 5  ;;  %v3337_v59 = vunpack.c.l.b16 %v3181_v53  ;;  %v3338_v9 = vunpack.c.l.b16 %v3191_v28  ;;  %v2089_v53 = vld [vmem:[#allocation2 + $0x58] sm:$0xf] }
 0x19e   : > { %2772 = vmatmul.bf16.gmra.mxu1 %v2676_v44  ;;  %v2227_v26 = vor.u32 %v2226_v15, %v2223_v18  ;;  %v1836_v31 = vadd.f32 %v9299_v7, %v1536_v35  ;;  %v3209_v50 = vor.u32 %v3208_v61, %v9447_v52  ;;  %v3212_v62 = vshll.u32 %v9449_v10, 16  ;;  %v2530_v7 = vld [vmem:[#allocation2 + $0x54] sm:$0xe] }
 0x19f   : > { %v3199_v16 = vor.u32 %v3198_v37, %v3195_v12  ;;  %v3353_v13 = vpack.c.b16 %v3338_v9, %v3337_v59  ;;  %v2608_v28 = vrot.slane %v2089_v53, 5  ;;  %v2238_v18 = vrot.slane %v2237_v46, 4  ;;  %v3060_v37 = vld [vmem:[#allocation2 + $0x60] sm:$0xf]  ;;  %3001 = vmatmul.bf16.gmra.mxu2 %v7932_v32 }
 0x1a0   : > { %v2228_v14 = vrot.slane %v2227_v26, 4  ;;  %v7257_v15 = vrot.slane %v2530_v7, 9  ;;  %v2611_v44 = vrot.slane %v9458_v22, 5  ;;  %v2381_v35 = vpack.c.b16 %v2366_v25, %v2365_v19  ;;  %v9464_v19 = vld [vmem:[#allocation2 + $0x64] sm:$0xf] }
 0x1a1   : > { %v9445_v11 = vpop.f32.mrf.mxu0  ;;  %v3200_v2 = vrot.slane %v3199_v16, 4  ;;  %v2245_v23 = vshrl.u32 %v2088_v27, 16  ;;  %v2248_v12 = vshll.u32 %v2088_v27, 16  ;;  %v3210_v61 = vrot.slane %v3209_v50, 4 }
 0x1a2   : > { %10779 = vst [vmem:[#allocation42_spill] sm:$0xff] %v9445_v11  ;;  %v2027_v8 = vpop.f32.mrf.mxu3  ;;  %v3214_v26 = vrot.slane %v3212_v62, 5  ;;  %v2254_v38 = vshll.u32 %v2089_v53, 16  ;;  %v2258_v7 = vshrl.u32 %v2089_v53, 16  ;;  %v2233_v16 = vsel %vm8972_vm12, %v2228_v14, %v9438_v33  ;;  %v1540_v62 = vpop.f32.mrf.mxu1  ;;  %v9519_v11 = vld [vmem:[#allocation2 + $0x70] sm:$0xf] }
 0x1a3   : > { %v9454_v40 = vadd.f32 %v2027_v8, %v1836_v31  ;;  %v1820_v9 = vpop.f32.mrf.mxu2  ;;  %v2609_v31 = vsel %vm9058_vm15, %v7257_v15, %v2608_v28  ;;  %v2610_v8 = vrot.slane %v2608_v28, 4  ;;  %v3217_v27 = vshrl.u32 %v3060_v37, 16 }
 0x1a4   : > { %v2663_v25 = vunpack.c.l.b16 %v2609_v31  ;;  %v2247_v28 = vrot.slane %v2245_v23, 4  ;;  %v2250_v32 = vrot.slane %v2248_v12, 5  ;;  %v3205_v33 = vsel %vm8972_vm12, %v3200_v2, %v9447_v52 }
 0x1a5   : > { %3445 = vmatmul.bf16.gmra.mxu3 %v3353_v13  ;;  %v3220_v13 = vshll.u32 %v3060_v37, 16  ;;  %v2612_v50 = vsel %vm9058_vm15, %v2610_v8, %v2611_v44  ;;  %v3215_v14 = vsel %vm8972_vm12, %v3210_v61, %v3214_v26  ;;  %v3226_v44 = vshll.u32 %v9464_v19, 16  ;;  %v7954_v37 = vld [vmem:[#allocation9 + $0x210] sm:$0xff] }
 0x1a6   : > { %v2664_v53 = vunpack.c.l.b16 %v2612_v50  ;;  %v3230_v23 = vshrl.u32 %v9464_v19, 16  ;;  %v1541_v31 = vadd.f32 %v1540_v62, %v9363_v29  ;;  %v3219_v8 = vrot.slane %v3217_v27, 4  ;;  %3716 = vmatpush.bf16.msrb.mxu0 %v7954_v37  ;;  %v9490_v50 = vld [vmem:[#allocation2 + $0x68] sm:$0x1]  ;;  %v562_v37 = vld [vmem:[#allocation2 + $0x80] sm:$0x1] }
 0x1a7   : > { %v2251_v52 = vor.u32 %v2250_v32, %v2247_v28  ;;  %v2367_v61 = vunpack.c.l.b16 %v2233_v16  ;;  %v3339_v26 = vunpack.c.l.b16 %v3205_v33  ;;  %v2264_v16 = vshll.u32 %v9458_v22, 16  ;;  %v2091_v32 = vld [vmem:[#allocation2 + $0x60] sm:$0xf] }
 0x1a8   : > { %v2677_v12 = vpack.c.b16 %v2664_v53, %v2663_v25  ;;  %v3232_v29 = vrot.slane %v3230_v23, 4  ;;  %v3236_v28 = vshll.u32 %v9490_v50, 16  ;;  %v2269_v22 = vshrl.u32 %v2091_v32, 16 }
 0x1a9   : > { %v1386_v59 = vpop.f32.mrf.mxu0  ;;  %v9497_v62 = vrot.slane %v2251_v52, 4 }
 0x1aa   : > { %v1554_v46 = vadd.f32 %v9211_v48, %v1386_v59  ;;  %v2030_v48 = vpop.f32.mrf.mxu3  ;;  %v3238_v3 = vrot.slane %v3236_v28, 5 }
 0x1ab   : > { %v9474_v59 = vadd.f32 %v2030_v48, %v9344_v45  ;;  %v2243_v45 = vsel %vm8972_vm12, %v2238_v18, %v2242_v56  ;;  %v9493_v48 = vrot.slane %v3226_v44, 5  ;;  %v1838_v18 = vadd.f32 %v9335_v54, %v1541_v31  ;;  %v3063_v44 = vld [vmem:[#allocation2 + $0x6c] sm:$0xf]  ;;  %v2531_v31 = vld [vmem:[#allocation2 + $0x60] sm:$0xe] }
 0x1ac   : > { %v9471_v15 = vadd.f32 %v1820_v9, %v1554_v46  ;;  %2473 = vmatmul.bf16.gmra.mxu0 %v2381_v35  ;;  %v9482_v9 = vrot.slane %v2254_v38, 5  ;;  %v2260_v35 = vrot.slane %v2258_v7, 4  ;;  %v3222_v46 = vrot.slane %v3220_v13, 5 }
 0x1ad   : > { %v3340_v38 = vunpack.c.l.b16 %v3215_v14  ;;  %v2368_v7 = vunpack.c.l.b16 %v2243_v45  ;;  %v2092_v14 = vld [vmem:[#allocation2 + $0x64] sm:$0xf]  ;;  %v3233_v54 = vor.u32 %v3232_v29, %v9493_v48  ;;  %v3241_v27 = vshrl.u32 %v3063_v44, 16 }
 0x1ae   : > { %2777 = vmatmul.bf16.gmra.mxu1 %v2677_v12  ;;  %v2261_v25 = vor.u32 %v2260_v35, %v9482_v9  ;;  %v3223_v56 = vor.u32 %v3222_v46, %v3219_v8  ;;  %v9506_v12 = vld [vmem:[#allocation2 + $0x68] sm:$0x1]  ;;  %v2615_v45 = vrot.slane %v2092_v14, 5  ;;  %v7258_v46 = vrot.slane %v2531_v31, 9 }
 0x1af   : > { %v3354_v33 = vpack.c.b16 %v3340_v38, %v3339_v26  ;;  %v2382_v35 = vpack.c.b16 %v2368_v7, %v2367_v61  ;;  %v2618_v52 = vrot.slane %v9506_v12, 5  ;;  %v2278_v26 = vshll.u32 %v2092_v14, 16 }
 0x1b0   : > { %v9503_v23 = vrot.slane %v2261_v25, 4  ;;  %v3224_v8 = vrot.slane %v3223_v56, 4  ;;  %v2282_v38 = vshrl.u32 %v2092_v14, 16  ;;  %v3244_v61 = vshll.u32 %v3063_v44, 16 }
 0x1b1   : > { %v9488_v2 = vpop.f32.mrf.mxu0  ;;  %v2616_v7 = vsel %vm9058_vm15, %v7258_v46, %v2615_v45  ;;  %v2617_v25 = vrot.slane %v2615_v45, 4  ;;  %v563_v29 = vsel %vm8889_vm4, 0, %v562_v37  ;;  %v3234_v31 = vrot.slane %v3233_v54, 4  ;;  %v527_v46 = vld [vmem:[#allocation2 + $0x84] sm:$0x1] }
 0x1b2   : > { %10780 = vst [vmem:[#allocation43_spill] sm:$0xff] %v9488_v2  ;;  %v2032_v13 = vpop.f32.mrf.mxu3  ;;  %v2266_v14 = vrot.slane %v2264_v16, 5  ;;  %v2271_v44 = vrot.slane %v2269_v22, 4  ;;  %v2284_v28 = vrot.slane %v2282_v38, 4  ;;  %v3254_v22 = vshrl.u32 %v9519_v11, 16 }
 0x1b3   : > { %v9501_v53 = vadd.f32 %v2032_v13, %v1838_v18  ;;  %v7933_v18 = vld [vmem:[#allocation2 + $0x6c] sm:$0xff]  ;;  %v2272_v13 = vshll.u32 %v2091_v32, 16  ;;  %v2665_v32 = vunpack.c.l.b16 %v2616_v7  ;;  %564 = vst [vmem:[#allocation2 + $0x80] sm:$0x1] %v563_v29  ;;  %v2619_v45 = vsel %vm9058_vm15, %v2617_v25, %v2618_v52 }
 0x1b4   : > { %3006 = vmatmul.bf16.gmra.mxu2 %v7933_v18  ;;  %v2666_v54 = vunpack.c.l.b16 %v2619_v45  ;;  %v3243_v18 = vrot.slane %v3241_v27, 4  ;;  %v3246_v7 = vrot.slane %v3244_v61, 5  ;;  %v2257_v27 = vsel %vm8972_vm12, %v9497_v62, %v9482_v9  ;;  %v874_v45 = vld [vmem:[%s8872_s30 + $0x8] sm:$0xf] }
 0x1b5   : > { %3450 = vmatmul.bf16.gmra.mxu3 %v3354_v33  ;;  %v3229_v33 = vsel %vm8972_vm12, %v3224_v8, %v9493_v48  ;;  %v528_v48 = vsel %vm8884_vm3, 0, %v527_v46  ;;  %v3239_v8 = vsel %vm8972_vm12, %v3234_v31, %v3238_v3  ;;  %v2267_v3 = vsel %vm8972_vm12, %v9503_v23, %v2266_v14  ;;  %v7953_v31 = vld [vmem:[#allocation9 + $0x208] sm:$0xff] }
 0x1b6   : > { %v2678_v52 = vpack.c.b16 %v2666_v54, %v2665_v32  ;;  %v2288_v61 = vshll.u32 %v9506_v12, 16  ;;  %529 = vst [vmem:[#allocation2 + $0x84] sm:$0x1] %v528_v48  ;;  %v3247_v25 = vor.u32 %v3246_v7, %v3243_v18  ;;  %v3256_v23 = vrot.slane %v3254_v22, 4  ;;  %3717 = vmatpush.bf16.msrb.mxu0 %v7953_v31  ;;  %v875_v48 = vld [vmem:[%s8872_s30 + $0xc] sm:$0xf]  ;;  %s10559_s30 = scalar_lea.vmem %s10809_s11, %s7000_s2 }
 0x1b7   : > { %v10781_v32 = vrot.slane %v9194_v49, 4  ;;  %v2532_v22 = vld [vmem:[#allocation2 + $0x6c] sm:$0xe]  ;;  %v565_v31 = vld [vmem:[#allocation2 + $0x8c] sm:$0x1] }
 0x1b8   : > { %v9563_v54 = vrot.slane %v2288_v61, 5  ;;  %v9568_v7 = vrot.slane %v3247_v25, 4 }
 0x1b9   : > { %v1775_v2 = vpop.f32.mrf.mxu0 }
 0x1ba   : > { %v9514_v56 = vadd.f32 %v1775_v2, %v9161_v55  ;;  %v2035_v37 = vpop.f32.mrf.mxu3  ;;  %v2274_v55 = vrot.slane %v2272_v13, 5  ;;  %v9523_v2 = vrot.slane %v2278_v26, 5  ;;  %v1511_v13 = vadd.f32 %v9165_v57, %v9167_v1  ;;  %v928_v29 = vld [vmem:[#allocation2 + $0x80] sm:$0x1] }
 0x1bb   : > { %v9526_v16 = vadd.f32 %v2035_v37, %v9383_v42  ;;  %v1546_v42 = vadd.f32 %v9174_v4, %v9402_v58  ;;  %v3341_v1 = vunpack.c.l.b16 %v3229_v33  ;;  %v3342_v4 = vunpack.c.l.b16 %v3239_v8  ;;  %v9547_v58 = vld [vmem:[#allocation2 + $0x74] sm:$0x1] }
 0x1bc   : > { %2478 = vmatmul.bf16.gmra.mxu0 %v2382_v35  ;;  %v3250_v35 = vshll.u32 %v9519_v11, 16  ;;  %v2275_v26 = vor.u32 %v2274_v55, %v2271_v44  ;;  %v2285_v38 = vor.u32 %v2284_v28, %v9523_v2  ;;  %v929_v12 = vsel %vm8884_vm3, %v10781_v32, %v928_v29 }
 0x1bd   : > { %v1840_v14 = vadd.f32 %v9379_v41, %v1546_v42  ;;  %v2369_v33 = vunpack.c.l.b16 %v2257_v27  ;;  %v2370_v44 = vunpack.c.l.b16 %v2267_v3  ;;  %930 = vst [vmem:[#allocation2 + $0x80] sm:$0x1] %v929_v12  ;;  %v3260_v46 = vshll.u32 %v9547_v58, 16  ;;  %v9570_v41 = vld [vmem:[#allocation2 + $0x70] sm:$0xf] }
 0x1be   : > { %2782 = vmatmul.bf16.gmra.mxu1 %v2678_v52  ;;  %v9551_v62 = vrot.slane %v3250_v35, 5  ;;  %v9559_v55 = vrot.slane %v2275_v26, 4  ;;  %v9561_v28 = vrot.slane %v2285_v38, 4  ;;  %v3355_v18 = vpack.c.b16 %v3342_v4, %v3341_v1  ;;  %v9574_v35 = vld [vmem:[#allocation2 + $0x74] sm:$0x1]  ;;  %v7934_v1 = vld [vmem:[#allocation2 + $0x78] sm:$0xff] }
 0x1bf   : > { %v2622_v52 = vrot.slane %v9570_v41, 5  ;;  %v1516_v42 = vadd.f32 %v9192_v0, %v9196_v20  ;;  %v2383_v27 = vpack.c.b16 %v2370_v44, %v2369_v33  ;;  %v7259_v3 = vrot.slane %v2532_v22, 9  ;;  %v3066_v4 = vld [vmem:[#allocation2 + $0x78] sm:$0xf] }
 0x1c0   : > { %v3257_v8 = vor.u32 %v3256_v23, %v9551_v62  ;;  %v2625_v26 = vrot.slane %v9574_v35, 5  ;;  %v2281_v38 = vsel %vm8972_vm12, %v9559_v55, %v9523_v2  ;;  %v2291_v61 = vsel %vm8972_vm12, %v9561_v28, %v9563_v54 }
 0x1c1   : > { %v1777_v57 = vpop.f32.mrf.mxu0  ;;  %v882_v0 = vsel %vm9181_vm0, 0, %v875_v48  ;;  %v3253_v25 = vsel %vm8972_vm12, %v9568_v7, %v9551_v62  ;;  %v2623_v2 = vsel %vm9058_vm15, %v7259_v3, %v2622_v52  ;;  %v2624_v29 = vrot.slane %v2622_v52, 4 }
 0x1c2   : > { %v9549_v9 = vadd.f32 %v1777_v57, %v1511_v13  ;;  %v2037_v37 = vpop.f32.mrf.mxu3  ;;  %v881_v13 = vsel %vm9181_vm0, 0, %v874_v45  ;;  %v3262_v57 = vrot.slane %v3260_v46, 5  ;;  %v3258_v12 = vrot.slane %v3257_v8, 4  ;;  %v2094_v45 = vld [vmem:[#allocation2 + $0x6c] sm:$0xf] }
 0x1c3   : > { %v9566_v49 = vadd.f32 %v2037_v37, %v1840_v14  ;;  %v901_v23 = vshrl.u32 %v881_v13, 16  ;;  %v9601_v14 = vld [vmem:[#allocation2 + $0x7c] sm:$0xf]  ;;  %v2667_v33 = vunpack.c.l.b16 %v2623_v2  ;;  %v904_v44 = vshll.u32 %v881_v13, 16 }
 0x1c4   : > { %3011 = vmatmul.bf16.gmra.mxu2 %v7934_v1  ;;  %v3265_v37 = vshrl.u32 %v3066_v4, 16  ;;  %v2626_v62 = vsel %vm9058_vm15, %v2624_v29, %v2625_v26  ;;  %v909_v28 = vshrl.u32 %v882_v0, 16  ;;  %v3268_v46 = vshll.u32 %v3066_v4, 16 }
 0x1c5   : > { %3455 = vmatmul.bf16.gmra.mxu3 %v3355_v18  ;;  %v903_v55 = vrot.slane %v901_v23, 7  ;;  %v2668_v18 = vunpack.c.l.b16 %v2626_v62  ;;  %v912_v7 = vshll.u32 %v882_v0, 16  ;;  %v566_v48 = vsel %vm8889_vm4, 0, %v565_v31 }
 0x1c6   : > { %v3274_v22 = vshll.u32 %v9601_v14, 16  ;;  %v3278_v52 = vshrl.u32 %v9601_v14, 16  ;;  %567 = vst [vmem:[#allocation2 + $0x8c] sm:$0x1] %v566_v48  ;;  %v911_v1 = vrot.slane %v909_v28, 7  ;;  %v2293_v4 = vshrl.u32 %v2094_v45, 16 }
 0x1c7   : > { %v906_v13 = vor.u32 %v904_v44, %v903_v55  ;;  %v2679_v3 = vpack.c.b16 %v2668_v18, %v2667_v33  ;;  %v907_v26 = vrot.slane %v903_v55, 4  ;;  %v2296_v0 = vshll.u32 %v2094_v45, 16  ;;  %v9622_v45 = vld [vmem:[#allocation2 + $0x80] sm:$0x1]  ;;  %v8053_v28 = vld [vmem:[#allocation11 + $0x228] sm:$0xff] }
 0x1c8   : > { %v2306_v2 = vshrl.u32 %v9570_v41, 16  ;;  %v3267_v29 = vrot.slane %v3265_v37, 4  ;;  %v3270_v23 = vrot.slane %v3268_v46, 5  ;;  %v914_v31 = vor.u32 %v912_v7, %v911_v1 }
 0x1c9   : > { %v1780_v20 = vpop.f32.mrf.mxu0  ;;  %v3343_v62 = vunpack.c.l.b16 %v3253_v25  ;;  %v3280_v33 = vrot.slane %v3278_v52, 4  ;;  %v916_v18 = vrot.slane %v911_v1, 4  ;;  %v2372_v37 = vunpack.c.l.b16 %v2291_v61  ;;  %v2533_v61 = vld [vmem:[#allocation2 + $0x78] sm:$0xe] }
 0x1ca   : > { %v9599_v32 = vadd.f32 %v1780_v20, %v9178_v21  ;;  %v2040_v54 = vpop.f32.mrf.mxu3  ;;  %v931_v21 = vld [vmem:[#allocation2 + $0x84] sm:$0xf]  ;;  %v2302_v20 = vshll.u32 %v9570_v41, 16  ;;  %v2371_v41 = vunpack.c.l.b16 %v2281_v38  ;;  %v2295_v46 = vrot.slane %v2293_v4, 4 }
 0x1cb   : > { %v9608_v8 = vadd.f32 %v2040_v54, %v9422_v17  ;;  %v932_v17 = vsel %vm8922_vm9, %v906_v13, %v931_v21  ;;  %v915_v54 = vsel %vm8915_vm8, %v907_v26, %v914_v31  ;;  %v2298_v21 = vrot.slane %v2296_v0, 5 }
 0x1cc   : > { %2483 = vmatmul.bf16.gmra.mxu0 %v2383_v27  ;;  %v3263_v27 = vsel %vm8972_vm12, %v3258_v12, %v3262_v57  ;;  %933 = vst [vmem:[#allocation2 + $0x84] sm:$0xf] %v932_v17  ;;  %v9618_v12 = vrot.slane %v3274_v22, 5  ;;  %v9628_v25 = vrot.slane %v2302_v20, 5  ;;  %v2308_v48 = vrot.slane %v2306_v2, 4 }
 0x1cd   : > { %v3344_v57 = vunpack.c.l.b16 %v3263_v27  ;;  %934 = vst [vmem:[#allocation2 + $0x88] sm:$0xf] %v915_v54  ;;  %v3271_v22 = vor.u32 %v3270_v23, %v3267_v29  ;;  %v935_v52 = vld [vmem:[#allocation2 + $0x8c] sm:$0x1]  ;;  %v3284_v27 = vshll.u32 %v9622_v45, 16  ;;  %v2384_v1 = vpack.c.b16 %v2372_v37, %v2371_v41 }
 0x1ce   : > { %2787 = vmatmul.bf16.gmra.mxu1 %v2679_v3  ;;  %v3281_v13 = vor.u32 %v3280_v33, %v9618_v12  ;;  %v9632_v3 = vld [vmem:[#allocation2 + $0x7c] sm:$0xf]  ;;  %v936_v38 = vsel %vm8884_vm3, %v916_v18, %v935_v52  ;;  %v2299_v4 = vor.u32 %v2298_v21, %v2295_v46  ;;  %v7260_v0 = vrot.slane %v2533_v61, 9  ;;  %v7952_v29 = vld [vmem:[#allocation9 + $0x200] sm:$0xff]  ;;  %v9639_v23 = vld [vmem:[#allocation2 + $0x80] sm:$0x1] }
 0x1cf   : > { %v2629_v26 = vrot.slane %v9632_v3, 5  ;;  %937 = vst [vmem:[#allocation2 + $0x8c] sm:$0x1] %v936_v38  ;;  %v2309_v20 = vor.u32 %v2308_v48, %v9628_v25  ;;  %v2312_v17 = vshll.u32 %v9574_v35, 16  ;;  %v3272_v2 = vrot.slane %v3271_v22, 4  ;;  %v10784_v18 = vld [vmem:[#allocation31_spill] sm:$0xff]  ;;  %3718 = vmatpush.bf16.msrb.mxu0 %v7952_v29 }
 0x1d0   : > { %v2632_v54 = vrot.slane %v9639_v23, 5  ;;  %v2300_v46 = vrot.slane %v2299_v4, 4  ;;  %v2097_v4 = vld [vmem:[#allocation2 + $0x78] sm:$0xf] }
 0x1d1   : > { %v1782_v44 = vpop.f32.mrf.mxu0  ;;  %v2631_v31 = vrot.slane %v2629_v26, 4  ;;  %v2630_v33 = vsel %vm9058_vm15, %v7260_v0, %v2629_v26  ;;  %v3277_v61 = vsel %vm8972_vm12, %v3272_v2, %v9618_v12 }
 0x1d2   : > { %v9620_v55 = vadd.f32 %v1782_v44, %v1516_v42  ;;  %v9626_v7 = vpop.f32.mrf.mxu3  ;;  %v3356_v42 = vpack.c.b16 %v3344_v57, %v3343_v62  ;;  %v3282_v62 = vrot.slane %v3281_v13, 4  ;;  %v3286_v57 = vrot.slane %v3284_v27, 5 }
 0x1d3   : > { %10783 = vst [vmem:[#allocation28_spill] sm:$0xff] %v9626_v7  ;;  %v3069_v35 = vld [vmem:[#allocation2 + $0x84] sm:$0xf]  ;;  %v2633_v48 = vsel %vm9058_vm15, %v2631_v31, %v2632_v54  ;;  %v2669_v22 = vunpack.c.l.b16 %v2630_v33  ;;  %v2314_v13 = vrot.slane %v2312_v17, 5  ;;  %v10785_v31 = vld [vmem:[#allocation33_spill] sm:$0xff]  ;;  %v3345_v2 = vunpack.c.l.b16 %v3277_v61 }
 0x1d4   : > { %v7935_v37 = vld [vmem:[#allocation2 + $0x84] sm:$0xff]  ;;  %v2670_v27 = vunpack.c.l.b16 %v2633_v48  ;;  %v3287_v26 = vsel %vm8972_vm12, %v3282_v62, %v3286_v57  ;;  %v3289_v0 = vshrl.u32 %v3069_v35, 16  ;;  %v3292_v29 = vshll.u32 %v3069_v35, 16 }
 0x1d5   : > { %3460 = vmatmul.bf16.gmra.mxu3 %v3356_v42  ;;  %v9647_v21 = vld [vmem:[#allocation2 + $0x88] sm:$0xf]  ;;  %v2310_v42 = vrot.slane %v2309_v20, 4  ;;  %3016 = vmatmul.bf16.gmra.mxu2 %v7935_v37  ;;  %v2317_v62 = vshrl.u32 %v2097_v4, 16  ;;  %v2320_v57 = vshll.u32 %v2097_v4, 16  ;;  %v2326_v37 = vshll.u32 %v9632_v3, 16 }
 0x1d6   : > { %v3302_v20 = vshrl.u32 %v9647_v21, 16  ;;  %v2680_v17 = vpack.c.b16 %v2670_v27, %v2669_v22  ;;  %v2330_v35 = vshrl.u32 %v9632_v3, 16  ;;  %v3291_v48 = vrot.slane %v3289_v0, 4  ;;  %v10787_v3 = vld [vmem:[#allocation35_spill] sm:$0xff] }
 0x1d7   : > { %v2315_v12 = vsel %vm8972_vm12, %v2310_v42, %v2314_v13  ;;  %v2319_v13 = vrot.slane %v2317_v62, 4  ;;  %v2322_v4 = vrot.slane %v2320_v57, 5  ;;  %v2050_v0 = vadd.f32 %v10787_v3, %v9514_v56  ;;  %v7983_v3 = vld [vmem:[#allocation11 + $0x78] sm:$0xff] }
 0x1d8   : > { %v2374_v42 = vunpack.c.l.b16 %v2315_v12  ;;  %4559 = vmatpush.bf16.msra.mxu1 %v7983_v3  ;;  %v10792_v3 = vld [vmem:[#allocation40_spill] sm:$0xff] }
 0x1d9   : > { %v1785_v44 = vpop.f32.mrf.mxu0 }
 0x1da   : > { %v9645_v41 = vadd.f32 %v1785_v44, %v10784_v18  ;;  %v2045_v52 = vpop.f32.mrf.mxu3  ;;  %v10786_v44 = vld [vmem:[#allocation32_spill] sm:$0xff]  ;;  %v3346_v18 = vunpack.c.l.b16 %v3287_v26 }
 0x1db   : > { %v9652_v38 = vadd.f32 %v2045_v52, %v9471_v15  ;;  %v1521_v33 = vadd.f32 %v10786_v44, %v10785_v31  ;;  %v2305_v15 = vsel %vm8972_vm12, %v2300_v46, %v9628_v25  ;;  %v3294_v52 = vrot.slane %v3292_v29, 5  ;;  %v9672_v25 = vld [vmem:[#allocation2 + $0x8c] sm:$0x1] }
 0x1dc   : > { %2488 = vmatmul.bf16.gmra.mxu0 %v2384_v1  ;;  %v3298_v1 = vshll.u32 %v9647_v21, 16  ;;  %v3304_v31 = vrot.slane %v3302_v20, 4  ;;  %v2373_v46 = vunpack.c.l.b16 %v2305_v15  ;;  %v3357_v61 = vpack.c.b16 %v3346_v18, %v3345_v2 }
 0x1dd   : > { %v2332_v44 = vrot.slane %v2330_v35, 4  ;;  %v3295_v26 = vor.u32 %v3294_v52, %v3291_v48  ;;  %v3308_v7 = vshll.u32 %v9672_v25, 16  ;;  %v2336_v15 = vshll.u32 %v9639_v23, 16  ;;  %v10788_v48 = vld [vmem:[#allocation36_spill] sm:$0xff] }
 0x1de   : > { %2792 = vmatmul.bf16.gmra.mxu1 %v2680_v17  ;;  %v3300_v27 = vrot.slane %v3298_v1, 5  ;;  %v2328_v17 = vrot.slane %v2326_v37, 5  ;;  %v2323_v1 = vor.u32 %v2322_v4, %v2319_v13  ;;  %v2051_v52 = vadd.f32 %v10788_v48, %v9549_v9 }
 0x1df   : > { %v3296_v2 = vrot.slane %v3295_v26, 4  ;;  %v3310_v57 = vrot.slane %v3308_v7, 5  ;;  %v2338_v37 = vrot.slane %v2336_v15, 5 }
 0x1e0   : > { %v3305_v24 = vor.u32 %v3304_v31, %v3300_v27  ;;  %v2333_v20 = vor.u32 %v2332_v44, %v2328_v17  ;;  %v10789_v44 = vld [vmem:[#allocation37_spill] sm:$0xff] }
 0x1e1   : > { %v1787_v54 = vpop.f32.mrf.mxu0  ;;  %v3301_v35 = vsel %vm8972_vm12, %v3296_v2, %v3300_v27  ;;  %v7975_v27 = vld [vmem:[#allocation11 + $0x38] sm:$0xff]  ;;  %v2052_v26 = vadd.f32 %v10789_v44, %v9599_v32 }
 0x1e2   : > { %v9670_v22 = vadd.f32 %v1787_v54, %v1521_v33  ;;  %v2385_v33 = vpack.c.b16 %v2374_v42, %v2373_v46  ;;  %v3306_v62 = vrot.slane %v3305_v24, 4  ;;  %v2324_v54 = vrot.slane %v2323_v1, 4  ;;  %4704 = vmatpush.bf16.msra.mxu2 %v7975_v27  ;;  %v3496_v1 = vld [vmem:[#allocation2 + $0x18] sm:$0xe]  ;;  %v8272_v2 = vld [vmem:[#allocation2 + $0x20] sm:$0x1] }
 0x1e3   : > { %v2334_v18 = vrot.slane %v2333_v20, 4  ;;  %v3347_v7 = vunpack.c.l.b16 %v3301_v35  ;;  %v7397_v20 = vrot.slane %v3496_v1, 9  ;;  %v7982_v27 = vld [vmem:[#allocation11 + $0x70] sm:$0xff] }
 0x1e4   : > { %v3311_v56 = vsel %vm8972_vm12, %v3306_v62, %v3310_v57  ;;  %v2329_v23 = vsel %vm8972_vm12, %v2324_v54, %v2328_v17  ;;  %v8271_v17 = vld [vmem:[#allocation2 + $0x1c] sm:$0xf]  ;;  %v3541_v62 = vrot.slane %v8272_v2, 5  ;;  %v10790_v57 = vld [vmem:[#allocation38_spill] sm:$0xff]  ;;  %4560 = vmatpush.bf16.msra.mxu1 %v7982_v27 }
 0x1e5   : > { %3465 = vmatmul.bf16.gmra.mxu3 %v3357_v61  ;;  %v2339_v24 = vsel %vm8972_vm12, %v2334_v18, %v2338_v37  ;;  %v3348_v46 = vunpack.c.l.b16 %v3311_v56  ;;  %v2375_v13 = vunpack.c.l.b16 %v2329_v23  ;;  %v2053_v54 = vadd.f32 %v10790_v57, %v9620_v55  ;;  %v8275_v57 = vld [vmem:[#allocation2 + $0x34] sm:$0xf] }
 0x1e6   : > { %v2376_v61 = vunpack.c.l.b16 %v2339_v24  ;;  %v7974_v24 = vld [vmem:[#allocation11 + $0x30] sm:$0xff] }
 0x1e7   : > { %v3358_v4 = vpack.c.b16 %v3348_v46, %v3347_v7  ;;  %v8273_v46 = vld [vmem:[#allocation2 + $0x28] sm:$0xf]  ;;  %4705 = vmatpush.bf16.msra.mxu2 %v7974_v24 }
 0x1e8   : > { %v2386_v9 = vpack.c.b16 %v2376_v61, %v2375_v13  ;;  %v3545_v13 = vrot.slane %v8273_v46, 5  ;;  %v3497_v61 = vld [vmem:[#allocation2 + $0x24] sm:$0xe] }
 0x1e9   : > { %v2454_v29 = vpop.f32.mrf.mxu0 }
 0x1ea   : > { %v9678_v12 = vadd.f32 %v2454_v29, %v2050_v0  ;;  %v3547_v44 = vrot.slane %v3545_v13, 4 }
 0x1ec   : > { %2493 = vmatmul.bf16.gmra.mxu0 %v2385_v33  ;;  %v3538_v33 = vrot.slane %v8271_v17, 5 }
 0x1ee   : > { %v3540_v15 = vrot.slane %v3538_v33, 4  ;;  %v3539_v32 = vsel %vm9058_vm15, %v7397_v20, %v3538_v33 }
 0x1ef   : > { %v3623_v56 = vunpack.c.l.b16 %v3539_v32  ;;  %v3498_v32 = vld [vmem:[#allocation2 + $0x30] sm:$0xe] }
 0x1f0   : > { %v3542_v37 = vsel %vm9058_vm15, %v3540_v15, %v3541_v62 }
 0x1f1   : > { %v2456_v31 = vpop.f32.mrf.mxu0  ;;  %v3624_v48 = vunpack.c.l.b16 %v3542_v37  ;;  %v7399_v37 = vrot.slane %v3498_v32, 9 }
 0x1f2   : > { %v9690_v42 = vadd.f32 %v2456_v31, %v2051_v52  ;;  %v10791_v52 = vld [vmem:[#allocation39_spill] sm:$0xff] }
 0x1f3   : > { %v2054_v31 = vadd.f32 %v10791_v52, %v9645_v41  ;;  %v3643_v23 = vpack.c.b16 %v3624_v48, %v3623_v56  ;;  %v8276_v48 = vld [vmem:[#allocation2 + $0x38] sm:$0x1] }
 0x1f4   : > { %v3555_v52 = vrot.slane %v8276_v48, 5  ;;  %v3500_v48 = vld [vmem:[#allocation2 + $0x48] sm:$0xe] }
 0x1f5   : > { %3470 = vmatmul.bf16.gmra.mxu3 %v3358_v4  ;;  %v7398_v4 = vrot.slane %v3497_v61, 9 }
 0x1f7   : > { %v3546_v17 = vsel %vm9058_vm15, %v7398_v4, %v3545_v13  ;;  %v8277_v4 = vld [vmem:[#allocation2 + $0x40] sm:$0xf] }
 0x1f8   : > { %v3625_v20 = vunpack.c.l.b16 %v3546_v17 }
 0x1f9   : > { %v2459_v0 = vpop.f32.mrf.mxu0 }
 0x1fa   : > { %v9694_v29 = vadd.f32 %v2459_v0, %v2052_v26  ;;  %v8274_v26 = vld [vmem:[#allocation2 + $0x2c] sm:$0x1]  ;;  %v2055_v0 = vadd.f32 %v10792_v3, %v9670_v22  ;;  %v7973_v22 = vld [vmem:[#allocation11 + $0x28] sm:$0xff] }
 0x1fb   : > { %4706 = vmatpush.bf16.msra.mxu2 %v7973_v22  ;;  %v8279_v22 = vld [vmem:[#allocation2 + $0x4c] sm:$0xf] }
 0x1fc   : > { %2498 = vmatmul.bf16.gmra.mxu0 %v2386_v9  ;;  %v3548_v9 = vrot.slane %v8274_v26, 5 }
 0x1fe   : > { %v3549_v33 = vsel %vm9058_vm15, %v3547_v44, %v3548_v9  ;;  %v3559_v44 = vrot.slane %v8277_v4, 5  ;;  %v3499_v9 = vld [vmem:[#allocation2 + $0x3c] sm:$0xe] }
 0x1ff   : > { %v3626_v15 = vunpack.c.l.b16 %v3549_v33  ;;  %v7400_v3 = vrot.slane %v3499_v9, 9  ;;  %v7972_v33 = vld [vmem:[#allocation11 + $0x20] sm:$0xff]  ;;  %v7971_v9 = vld [vmem:[#allocation11 + $0x18] sm:$0xff] }
 0x200   : > { %4707 = vmatpush.bf16.msra.mxu2 %v7972_v33  ;;  %v3573_v33 = vrot.slane %v9418_v34, 5 }
 0x201   : > { %v2461_v18 = vpop.f32.mrf.mxu0  ;;  %v3644_v2 = vpack.c.b16 %v3626_v15, %v3625_v20 }
 0x202   : > { %v9702_v35 = vadd.f32 %v2461_v18, %v2053_v54  ;;  %v3552_v54 = vrot.slane %v8275_v57, 5  ;;  %v7980_v57 = vld [vmem:[#allocation11 + $0x60] sm:$0xff] }
 0x204   : > { %v3554_v56 = vrot.slane %v3552_v54, 4  ;;  %v3553_v24 = vsel %vm9058_vm15, %v7399_v37, %v3552_v54  ;;  %v3566_v37 = vrot.slane %v8279_v22, 5  ;;  %4708 = vmatpush.bf16.msra.mxu2 %v7971_v9 }
 0x209   : > { %v2464_v7 = vpop.f32.mrf.mxu0 }
 0x20a   : > { %v9706_v55 = vadd.f32 %v2464_v7, %v2054_v31  ;;  %v7981_v31 = vld [vmem:[#allocation11 + $0x68] sm:$0xff]  ;;  %v3556_v7 = vsel %vm9058_vm15, %v3554_v56, %v3555_v52  ;;  %v7401_v52 = vrot.slane %v3500_v48, 9 }
 0x20b   : > { %4561 = vmatpush.bf16.msra.mxu1 %v7981_v31  ;;  %v3628_v13 = vunpack.c.l.b16 %v3556_v7  ;;  %v3568_v31 = vrot.slane %v3566_v37, 4 }
 0x20c   : > { %3719 = vmatmul.bf16.vlgmr.msrb.gmra.mxu0 %v3643_v23 }
 0x20f   : > { %4562 = vmatpush.bf16.msra.mxu1 %v7980_v57  ;;  %v3576_v57 = vrot.slane %v9449_v10, 5  ;;  %v7970_v10 = vld [vmem:[#allocation11 + $0x10] sm:$0xff] }
 0x210   : > { %4709 = vmatpush.bf16.msra.mxu2 %v7970_v10 }
 0x211   : > { %v2466_v41 = vpop.f32.mrf.mxu0 }
 0x212   : > { %v9714_v1 = vadd.f32 %v2466_v41, %v2055_v0  ;;  %v3561_v0 = vrot.slane %v3559_v44, 4  ;;  %v8278_v41 = vld [vmem:[#allocation2 + $0x44] sm:$0x1] }
 0x213   : > { %v3562_v17 = vrot.slane %v8278_v41, 5 }
 0x215   : > { %v3563_v15 = vsel %vm9058_vm15, %v3561_v0, %v3562_v17  ;;  %v7979_v0 = vld [vmem:[#allocation11 + $0x58] sm:$0xff] }
 0x216   : > { %4563 = vmatpush.bf16.msra.mxu1 %v7979_v0 }
 0x219   : > { %v2469_v62 = vpop.f32.mrf.mxu0 }
 0x21a   : > { %v9717_v18 = vadd.f32 %v2469_v62, %v9347_v47  ;;  %v3627_v47 = vunpack.c.l.b16 %v3553_v24  ;;  %v3630_v62 = vunpack.c.l.b16 %v3563_v15 }
 0x21c   : > { %3724 = vmatmul.bf16.gmra.mxu0 %v3644_v2  ;;  %v3645_v61 = vpack.c.b16 %v3628_v13, %v3627_v47  ;;  %v3567_v47 = vsel %vm9058_vm15, %v7401_v52, %v3566_v37 }
 0x21d   : > { %v3631_v4 = vunpack.c.l.b16 %v3567_v47 }
 0x221   : > { %v2471_v23 = vpop.f32.mrf.mxu0 }
 0x222   : > { %v9724_v46 = vadd.f32 %v2471_v23, %v9370_v36  ;;  %v3560_v36 = vsel %vm9058_vm15, %v7400_v3, %v3559_v44  ;;  %v8280_v23 = vld [vmem:[#allocation2 + $0x50] sm:$0x1] }
 0x223   : > { %v3569_v24 = vrot.slane %v8280_v23, 5 }
 0x225   : > { %v3570_v13 = vsel %vm9058_vm15, %v3568_v31, %v3569_v24 }
 0x226   : > { %v3632_v44 = vunpack.c.l.b16 %v3570_v13  ;;  %v3502_v13 = vld [vmem:[#allocation2 + $0x60] sm:$0xe] }
 0x228   : > { %v3647_v3 = vpack.c.b16 %v3632_v44, %v3631_v4  ;;  %v7403_v44 = vrot.slane %v3502_v13, 9 }
 0x229   : > { %v2474_v27 = vpop.f32.mrf.mxu0 }
 0x22a   : > { %v9727_v26 = vadd.f32 %v2474_v27, %v9386_v51  ;;  %v3629_v51 = vunpack.c.l.b16 %v3560_v36  ;;  %v9750_v27 = vpop.f32.mrf.mxu3  ;;  %v3501_v36 = vld [vmem:[#allocation2 + $0x54] sm:$0xe] }
 0x22c   : > { %3729 = vmatmul.bf16.gmra.mxu0 %v3645_v61  ;;  %v3646_v54 = vpack.c.b16 %v3630_v62, %v3629_v51  ;;  %v9745_v61 = vpop.f32.mrf.mxu1  ;;  %v7402_v51 = vrot.slane %v3501_v36, 9  ;;  %v3575_v62 = vrot.slane %v3573_v33, 4 }
 0x22e   : > { %v3577_v34 = vsel %vm9058_vm15, %v3575_v62, %v3576_v57 }
 0x22f   : > { %v3634_v48 = vunpack.c.l.b16 %v3577_v34 }
 0x231   : > { %v2476_v20 = vpop.f32.mrf.mxu0 }
 0x232   : > { %v9734_v2 = vadd.f32 %v2476_v20, %v9408_v63  ;;  %v9739_v63 = vpop.f32.mrf.mxu2  ;;  %v9760_v15 = vpop.f32.mrf.mxu3 }
 0x239   : > { %v2479_v32 = vpop.f32.mrf.mxu0 }
 0x23a   : > { %v9737_v56 = vadd.f32 %v2479_v32, %v9425_v30  ;;  %v9752_v41 = vpop.f32.mrf.mxu2  ;;  %v3574_v32 = vsel %vm9058_vm15, %v7402_v51, %v3573_v33  ;;  %v9774_v31 = vpop.f32.mrf.mxu3 }
 0x23b   : > { %v3633_v37 = vunpack.c.l.b16 %v3574_v32  ;;  %v3587_v32 = vrot.slane %v9519_v11, 5 }
 0x23c   : > { %3734 = vmatmul.bf16.gmra.mxu0 %v3646_v54 }
 0x23d   : > { %v3648_v23 = vpack.c.b16 %v3634_v48, %v3633_v37  ;;  %v3503_v48 = vld [vmem:[#allocation2 + $0x6c] sm:$0xe] }
 0x23e   : > { %v7404_v10 = vrot.slane %v3503_v48, 9 }
 0x240   : > { %v3588_v11 = vsel %vm9058_vm15, %v7404_v10, %v3587_v32  ;;  %v3504_v10 = vld [vmem:[#allocation2 + $0x78] sm:$0xe] }
 0x241   : > { %v2481_v7 = vpop.f32.mrf.mxu0 }
 0x242   : > { %v9748_v30 = vadd.f32 %v2481_v7, %v9454_v40  ;;  %v9758_v40 = vpop.f32.mrf.mxu1  ;;  %v9770_v22 = vpop.f32.mrf.mxu2  ;;  %v3580_v7 = vrot.slane %v9464_v19, 5 }
 0x244   : > { %v3582_v9 = vrot.slane %v3580_v7, 4  ;;  %v3581_v19 = vsel %vm9058_vm15, %v7403_v44, %v3580_v7  ;;  %v3894_v7 = vld [vmem:[#allocation3] sm:$0x1] }
 0x245   : > { %v3635_v51 = vunpack.c.l.b16 %v3581_v19  ;;  %v3895_v44 = vsel %vm8884_vm3, 0, %v3894_v7  ;;  %v7977_v7 = vld [vmem:[#allocation11 + $0x48] sm:$0xff] }
 0x246   : > { %3896 = vst [vmem:[#allocation3] sm:$0x1] %v3895_v44 }
 0x249   : > { %v2484_v17 = vpop.f32.mrf.mxu0 }
 0x24a   : > { %v9756_v20 = vadd.f32 %v2484_v17, %v9474_v59  ;;  %v9772_v52 = vpop.f32.mrf.mxu1  ;;  %v9780_v4 = vpop.f32.mrf.mxu2 }
 0x24b   : > { %v9785_v17 = vpop.f32.mrf.mxu3 }
 0x24c   : > { %3739 = vmatmul.bf16.gmra.mxu0 %v3647_v3  ;;  %v3583_v3 = vrot.slane %v9490_v50, 5 }
 0x251   : > { %v2486_v54 = vpop.f32.mrf.mxu0 }
 0x252   : > { %v9768_v59 = vadd.f32 %v2486_v54, %v9501_v53  ;;  %v7978_v53 = vld [vmem:[#allocation11 + $0x50] sm:$0xff]  ;;  %v9783_v0 = vpop.f32.mrf.mxu1  ;;  %v9794_v57 = vpop.f32.mrf.mxu2 }
 0x253   : > { %4564 = vmatpush.bf16.msra.mxu1 %v7978_v53 }
 0x257   : > { %4565 = vmatpush.bf16.msra.mxu1 %v7977_v7 }
 0x259   : > { %v2489_v24 = vpop.f32.mrf.mxu0 }
 0x25a   : > { %v9778_v47 = vadd.f32 %v2489_v24, %v9526_v16  ;;  %v3584_v16 = vsel %vm9058_vm15, %v3582_v9, %v3583_v3  ;;  %v9797_v34 = vpop.f32.mrf.mxu1  ;;  %v3590_v24 = vrot.slane %v9547_v58, 5  ;;  %v9805_v13 = vpop.f32.mrf.mxu2  ;;  %v7991_v9 = vld [vmem:[#allocation11 + $0xb8] sm:$0xff] }
 0x25b   : > { %v3636_v62 = vunpack.c.l.b16 %v3584_v16  ;;  %4930 = vmatpush.bf16.msrb.mxu3 %v7991_v9  ;;  %v3597_v9 = vrot.slane %v9622_v45, 5 }
 0x25c   : > { %3744 = vmatmul.bf16.gmra.mxu0 %v3648_v23  ;;  %v9802_v23 = vpop.f32.mrf.mxu3 }
 0x25d   : > { %v3649_v50 = vpack.c.b16 %v3636_v62, %v3635_v51  ;;  %v3924_v51 = vld [vmem:[#allocation3 + $0x8] sm:$0x1] }
 0x25e   : > { %v7990_v62 = vld [vmem:[#allocation11 + $0xb0] sm:$0xff] }
 0x25f   : > { %4931 = vmatpush.bf16.msrb.mxu3 %v7990_v62 }
 0x261   : > { %v2491_v33 = vpop.f32.mrf.mxu0 }
 0x262   : > { %v9792_v36 = vadd.f32 %v2491_v33, %v9566_v49  ;;  %v3589_v49 = vrot.slane %v3587_v32, 4  ;;  %v9815_v3 = vpop.f32.mrf.mxu1  ;;  %v3637_v33 = vunpack.c.l.b16 %v3588_v11  ;;  %v3925_v32 = vsel %vm8889_vm4, 0, %v3924_v51  ;;  %v7989_v11 = vld [vmem:[#allocation11 + $0xa8] sm:$0xff]  ;;  %v7988_v51 = vld [vmem:[#allocation11 + $0xa0] sm:$0xff] }
 0x263   : > { %3926 = vst [vmem:[#allocation3 + $0x8] sm:$0x1] %v3925_v32  ;;  %4932 = vmatpush.bf16.msrb.mxu3 %v7989_v11  ;;  %v2799_v11 = vadd.f32 %v9758_v40, %v9690_v42  ;;  %v8039_v42 = vld [vmem:[#allocation11 + $0x1b8] sm:$0xff] }
 0x264   : > { %v9817_v19 = vpop.f32.mrf.mxu3  ;;  %5947 = vmatpush.bf16.msra.mxu0 %v8039_v42 }
 0x265   : > { %v3023_v40 = vadd.f32 %v9770_v22, %v2799_v11 }
 0x267   : > { %4933 = vmatpush.bf16.msrb.mxu3 %v7988_v51  ;;  %v3477_v22 = vadd.f32 %v9774_v31, %v3023_v40  ;;  %v2802_v40 = vadd.f32 %v9797_v34, %v9706_v55  ;;  %v3903_v34 = vld [vmem:[#allocation3 + $0x24] sm:$0x1] }
 0x269   : > { %v2494_v54 = vpop.f32.mrf.mxu0 }
 0x26a   : > { %v9800_v37 = vadd.f32 %v2494_v54, %v9608_v8  ;;  %v3591_v8 = vsel %vm9058_vm15, %v3589_v49, %v3590_v24  ;;  %v3594_v54 = vrot.slane %v9601_v14, 5  ;;  %v9825_v49 = vpop.f32.mrf.mxu2  ;;  %v7969_v24 = vld [vmem:[#allocation11 + $0x8] sm:$0xff]  ;;  %v9828_v14 = vpop.f32.mrf.mxu1 }
 0x26b   : > { %v3638_v58 = vunpack.c.l.b16 %v3591_v8  ;;  %v7405_v8 = vrot.slane %v3504_v10, 9  ;;  %4710 = vmatpush.bf16.msra.mxu2 %v7969_v24 }
 0x26c   : > { %3749 = vmatmul.bf16.gmra.mxu0 %v3649_v50  ;;  %v3596_v44 = vrot.slane %v3594_v54, 4 }
 0x26d   : > { %v3650_v16 = vpack.c.b16 %v3638_v58, %v3637_v33  ;;  %v2798_v33 = vadd.f32 %v9745_v61, %v9678_v12  ;;  %v3897_v58 = vld [vmem:[#allocation3 + $0xc] sm:$0x1]  ;;  %v7987_v12 = vld [vmem:[#allocation11 + $0x98] sm:$0xff] }
 0x26e   : > { %v3598_v45 = vsel %vm9058_vm15, %v3596_v44, %v3597_v9  ;;  %4934 = vmatpush.bf16.msrb.mxu3 %v7987_v12  ;;  %v3927_v9 = vld [vmem:[#allocation3 + $0x14] sm:$0x1]  ;;  %v3505_v12 = vld [vmem:[#allocation2 + $0x84] sm:$0xe] }
 0x26f   : > { %v3022_v32 = vadd.f32 %v9752_v41, %v2798_v33  ;;  %v3640_v24 = vunpack.c.l.b16 %v3598_v45  ;;  %v7968_v41 = vld [vmem:[#allocation11] sm:$0xff]  ;;  %v7986_v33 = vld [vmem:[#allocation11 + $0x90] sm:$0xff]  ;;  %v3928_v45 = vsel %vm8889_vm4, 0, %v3927_v9 }
 0x270   : > { %4711 = vmatpush.bf16.msra.mxu2 %v7968_v41  ;;  %3929 = vst [vmem:[#allocation3 + $0x14] sm:$0x1] %v3928_v45  ;;  %v8038_v9 = vld [vmem:[#allocation11 + $0x1b0] sm:$0xff] }
 0x271   : > { %v9807_v53 = vpop.f32.mrf.mxu0  ;;  %v3476_v7 = vadd.f32 %v9760_v15, %v3022_v32  ;;  %v7985_v32 = vld [vmem:[#allocation11 + $0x88] sm:$0xff]  ;;  %5948 = vmatpush.bf16.msra.mxu0 %v8038_v9 }
 0x272   : > { %v9843_v61 = vpop.f32.mrf.mxu2  ;;  %4935 = vmatpush.bf16.msrb.mxu3 %v7986_v33  ;;  %v3900_v33 = vld [vmem:[#allocation3 + $0x18] sm:$0x1] }
 0x276   : > { %4936 = vmatpush.bf16.msrb.mxu3 %v7985_v32  ;;  %v8037_v32 = vld [vmem:[#allocation11 + $0x1a8] sm:$0xff] }
 0x277   : > { %5949 = vmatpush.bf16.msra.mxu0 %v8037_v32 }
 0x279   : > { %v2499_v50 = vpop.f32.mrf.mxu0 }
 0x27a   : > { %v9823_v48 = vadd.f32 %v2499_v50, %v9652_v38  ;;  %v9830_v38 = vpop.f32.mrf.mxu3  ;;  %v3898_v50 = vsel %vm8884_vm3, 0, %v3897_v58  ;;  %v9865_v41 = vpop.f32.mrf.mxu2 }
 0x27b   : > { %3899 = vst [vmem:[#allocation3 + $0xc] sm:$0x1] %v3898_v50 }
 0x27c   : > { %10793 = vst [vmem:[#allocation31_spill] sm:$0xff] %v9823_v48  ;;  %3754 = vmatmul.bf16.gmra.mxu0 %v3650_v16  ;;  %v3595_v16 = vsel %vm9058_vm15, %v7405_v8, %v3594_v54  ;;  %v9848_v54 = vld [vmem:[%s10795_s13] ss:$0 sm:$0xff]  ;;  %v9853_v8 = vpop.f32.mrf.mxu1 }
 0x27d   : > { %v3639_v10 = vunpack.c.l.b16 %v3595_v16  ;;  %v3601_v16 = vrot.slane %v9647_v21, 5 }
 0x27f   : > { %v3651_v44 = vpack.c.b16 %v3640_v24, %v3639_v10  ;;  %v7406_v10 = vrot.slane %v3505_v12, 9  ;;  %v3603_v24 = vrot.slane %v3601_v16, 4  ;;  %v3901_v12 = vsel %vm8884_vm3, 0, %v3900_v33 }
 0x280   : > { %3902 = vst [vmem:[#allocation3 + $0x18] sm:$0x1] %v3901_v12  ;;  %v3930_v12 = vld [vmem:[#allocation3 + $0x20] sm:$0x1] }
 0x281   : > { %v9834_v62 = vpop.f32.mrf.mxu0 }
 0x282   : > { %10794 = vst [vmem:[#allocation33_spill] sm:$0xff] %v9834_v62  ;;  %v9855_v58 = vpop.f32.mrf.mxu3  ;;  %v3604_v62 = vrot.slane %v9672_v25, 5  ;;  %v3602_v25 = vsel %vm9058_vm15, %v7406_v10, %v3601_v16  ;;  %v7976_v16 = vld [vmem:[#allocation11 + $0x40] sm:$0xff]  ;;  %v9885_v48 = vpop.f32.mrf.mxu2 }
 0x283   : > { %4566 = vmatpush.bf16.msra.mxu1 %v7976_v16 }
 0x289   : > { %v3720_v51 = vpop.f32.mrf.mxu0 }
 0x28a   : > { %v3770_v50 = vadd.f32 %v3720_v51, %v3476_v7  ;;  %v2800_v7 = vadd.f32 %v9772_v52, %v9694_v29  ;;  %v9874_v29 = vpop.f32.mrf.mxu1  ;;  %v9877_v42 = vpop.f32.mrf.mxu3 }
 0x28c   : > { %v3794_v15 = vadd.f32 %v9848_v54, %v3770_v50  ;;  %3759 = vmatmul.bf16.gmra.mxu0 %v3651_v44  ;;  %v7984_v44 = vld [vmem:[#allocation11 + $0x80] sm:$0xff]  ;;  %v3605_v50 = vsel %vm9058_vm15, %v3603_v24, %v3604_v62  ;;  %v3024_v31 = vadd.f32 %v9780_v4, %v2800_v7  ;;  %v3641_v24 = vunpack.c.l.b16 %v3602_v25  ;;  %v4193_v7 = vld [vmem:[#allocation3] sm:$0xf] }
 0x28d   : > { %4937 = vmatpush.bf16.msrb.mxu3 %v7984_v44  ;;  %v2801_v4 = vadd.f32 %v9783_v0, %v9702_v35 }
 0x28e   : > { %vm3814_vm1 = vcmp.gt.f32.partialorder %v3794_v15, 0.0  ;;  %v3834_v21 = vmul.f32 0.01, %v3794_v15  ;;  %v3478_v33 = vadd.f32 %v9785_v17, %v3024_v31 }
 0x28f   : > { %v3025_v35 = vadd.f32 %v9794_v57, %v2801_v4  ;;  %v2803_v4 = vadd.f32 %v9815_v3, %v9714_v1  ;;  %v3026_v1 = vadd.f32 %v9805_v13, %v2802_v40 }
 0x290   : > { %v3854_v11 = vsel %vm3814_vm1, %v3794_v15, %v3834_v21  ;;  %v3642_v21 = vunpack.c.l.b16 %v3605_v50 }
 0x291   : > { %v3874_v51 = vpack.c.bf16 %v3854_v11, %v3854_v11  ;;  %v3722_v45 = vpop.f32.mrf.mxu0  ;;  %v3479_v57 = vadd.f32 %v9802_v23, %v3025_v35  ;;  %v3027_v3 = vadd.f32 %v9825_v49, %v2803_v4  ;;  %v4115_v35 = vld [vmem:[#allocation3 + $0xc] sm:$0xf] }
 0x292   : > { %v3771_v52 = vadd.f32 %v3722_v45, %v3477_v22  ;;  %v3652_v45 = vpack.c.b16 %v3642_v21, %v3641_v24  ;;  %v9894_v17 = vpop.f32.mrf.mxu1  ;;  %v8035_v24 = vld [vmem:[#allocation11 + $0x198] sm:$0xff] }
 0x293   : > { %v4171_v15 = vsel %vm8893_vm6, 0, %v3874_v51 }
 0x294   : > { %v4174_v10 = vshrl.u32 %v4171_v15, 16  ;;  %v3795_v62 = vadd.f32 %v9848_v54, %v3771_v52  ;;  %v4177_v22 = vshll.u32 %v4171_v15, 16  ;;  %v3931_v52 = vsel %vm8889_vm4, 0, %v3930_v12  ;;  %v8036_v15 = vld [vmem:[#allocation11 + $0x1a0] sm:$0xff] }
 0x295   : > { %3932 = vst [vmem:[#allocation3 + $0x20] sm:$0x1] %v3931_v52  ;;  %5950 = vmatpush.bf16.msra.mxu0 %v8036_v15 }
 0x296   : > { %v4176_v9 = vrot.slane %v4174_v10, 7  ;;  %vm3815_vm2 = vcmp.gt.f32.partialorder %v3795_v62, 0.0  ;;  %v3835_v11 = vmul.f32 0.01, %v3795_v62 }
 0x298   : > { %v4179_v44 = vor.u32 %v4177_v22, %v4176_v9  ;;  %v3855_v51 = vsel %vm3815_vm2, %v3795_v62, %v3835_v11  ;;  %v9897_v62 = vpop.f32.mrf.mxu3 }
 0x299   : > { %v3875_v25 = vpack.c.bf16 %v3855_v51, %v3855_v51  ;;  %v3725_v50 = vpop.f32.mrf.mxu0  ;;  %5951 = vmatpush.bf16.msra.mxu0 %v8035_v24 }
 0x29a   : > { %v4194_v16 = vsel %vm8922_vm9, %v4179_v44, %v4193_v7  ;;  %v3772_v32 = vadd.f32 %v3725_v50, %v3478_v33  ;;  %v4197_v7 = vld [vmem:[#allocation3 + $0x8] sm:$0x1]  ;;  %v4180_v33 = vrot.slane %v4176_v9, 4  ;;  %v9910_v9 = vpop.f32.mrf.mxu2 }
 0x29b   : > { %4195 = vst [vmem:[#allocation3] sm:$0xf] %v4194_v16  ;;  %v4172_v0 = vsel %vm8893_vm6, 0, %v3875_v25  ;;  %v8034_v50 = vld [vmem:[#allocation11 + $0x190] sm:$0xff] }
 0x29c   : > { %v4182_v31 = vshrl.u32 %v4172_v0, 16  ;;  %v3796_v10 = vadd.f32 %v9848_v54, %v3772_v32  ;;  %3764 = vmatmul.bf16.gmra.mxu0 %v3652_v45  ;;  %v4185_v22 = vshll.u32 %v4172_v0, 16  ;;  %v8015_v32 = vld [vmem:[#allocation11 + $0x138] sm:$0xff] }
 0x29d   : > { %5952 = vmatpush.bf16.msra.mxu0 %v8034_v50  ;;  %5502 = vmatpush.bf16.msrb.mxu2 %v8015_v32 }
 0x29e   : > { %v4184_v21 = vrot.slane %v4182_v31, 7  ;;  %vm3816_vm5 = vcmp.gt.f32.partialorder %v3796_v10, 0.0  ;;  %v3836_v11 = vmul.f32 0.01, %v3796_v10 }
 0x2a0   : > { %v4187_v44 = vor.u32 %v4185_v22, %v4184_v21  ;;  %v4189_v51 = vrot.slane %v4184_v21, 4  ;;  %v3856_v45 = vsel %vm3816_vm5, %v3796_v10, %v3836_v11  ;;  %v8007_v21 = vld [vmem:[#allocation11 + $0xf8] sm:$0xff]  ;;  %v3904_v22 = vsel %vm8884_vm3, 0, %v3903_v34  ;;  %v8033_v11 = vld [vmem:[#allocation11 + $0x188] sm:$0xff] }
 0x2a1   : > { %v3876_v12 = vpack.c.bf16 %v3856_v45, %v3856_v45  ;;  %v3727_v25 = vpop.f32.mrf.mxu0  ;;  %3905 = vst [vmem:[#allocation3 + $0x24] sm:$0x1] %v3904_v22  ;;  %5124 = vmatpush.bf16.msrb.mxu1 %v8007_v21  ;;  %5953 = vmatpush.bf16.msra.mxu0 %v8033_v11  ;;  %v3481_v45 = vadd.f32 %v9830_v38, %v3027_v3  ;;  %v8032_v21 = vld [vmem:[#allocation11 + $0x180] sm:$0xff]  ;;  %v4119_v22 = vld [vmem:[#allocation3 + $0x14] sm:$0x1] }
 0x2a2   : > { %v4188_v52 = vsel %vm8915_vm8, %v4180_v33, %v4187_v44  ;;  %v4198_v23 = vsel %vm8884_vm3, %v4189_v51, %v4197_v7  ;;  %v3773_v15 = vadd.f32 %v3727_v25, %v3479_v57  ;;  %v4230_v55 = vld [vmem:[#allocation3] sm:$0xf]  ;;  %v9917_v57 = vpop.f32.mrf.mxu1  ;;  %v9919_v33 = vpop.f32.mrf.mxu3  ;;  %v3480_v51 = vadd.f32 %v9817_v19, %v3026_v1 }
 0x2a3   : > { %4196 = vst [vmem:[#allocation3 + $0x4] sm:$0xf] %v4188_v52  ;;  %v3955_v16 = vshrl.u32 %v3876_v12, 16  ;;  %v4753_v31 = vld [vmem:[#allocation3] sm:$0xe]  ;;  %v4271_v10 = vshrl.u32 %v4230_v55, 16  ;;  %v2804_v25 = vadd.f32 %v9828_v14, %v9717_v18 }
 0x2a4   : > { %4199 = vst [vmem:[#allocation3 + $0x8] sm:$0x1] %v4198_v23  ;;  %v3797_v0 = vadd.f32 %v9848_v54, %v3773_v15  ;;  %v4274_v24 = vshll.u32 %v4230_v55, 16  ;;  %v3958_v49 = vshll.u32 %v3876_v12, 16  ;;  %v7535_v15 = vrot.slane %v4753_v31, 9 }
 0x2a5   : > { %v9915_v13 = vrot.slane %v3955_v16, 7  ;;  %v4273_v4 = vrot.slane %v4271_v10, 4  ;;  %v2805_v55 = vadd.f32 %v9853_v8, %v9724_v46  ;;  %v9932_v46 = vpop.f32.mrf.mxu2  ;;  %5954 = vmatpush.bf16.msra.mxu0 %v8032_v21 }
 0x2a6   : > { %vm3817_vm6 = vcmp.gt.f32.partialorder %v3797_v0, 0.0  ;;  %v3837_v40 = vmul.f32 0.01, %v3797_v0  ;;  %v4276_v7 = vrot.slane %v4274_v24, 5 }
 0x2a7   : > { %v3960_v44 = vor.u32 %v3958_v49, %v9915_v13  ;;  %v3961_v34 = vrot.slane %v9915_v13, 4 }
 0x2a8   : > { %v3857_v12 = vsel %vm3817_vm6, %v3797_v0, %v3837_v40  ;;  %v4277_v38 = vor.u32 %v4276_v7, %v4273_v4 }
 0x2a9   : > { %v4116_v50 = vsel %vm8922_vm9, %v3960_v44, %v4115_v35  ;;  %v3877_v52 = vpack.c.bf16 %v3857_v12, %v3857_v12  ;;  %v3730_v23 = vpop.f32.mrf.mxu0 }
 0x2aa   : > { %4117 = vst [vmem:[#allocation3 + $0xc] sm:$0xf] %v4116_v50  ;;  %v3774_v16 = vadd.f32 %v3730_v23, %v3480_v51  ;;  %v7960_v19 = vld [vmem:[#allocation3] sm:$0xff]  ;;  %v4278_v4 = vrot.slane %v4277_v38, 4  ;;  %v9938_v23 = vpop.f32.mrf.mxu1 }
 0x2ab   : > { %v4231_v1 = vld [vmem:[#allocation3 + $0x4] sm:$0xf]  ;;  %v3963_v3 = vshrl.u32 %v3877_v52, 16  ;;  %v3966_v32 = vshll.u32 %v3877_v52, 16  ;;  %v4262_v0 = vld [vmem:[#allocation3 + $0x8] sm:$0x1]  ;;  %4712 = vmatmul.bf16.vlgmr.msra.gmra.mxu2 %v7960_v19 }
 0x2ac   : > { %v4779_v18 = vrot.slane %v4231_v1, 5  ;;  %v4280_v14 = vshll.u32 %v4231_v1, 16  ;;  %v3798_v35 = vadd.f32 %v9848_v54, %v3774_v16  ;;  %v4782_v10 = vrot.slane %v4262_v0, 5  ;;  %v3933_v52 = vld [vmem:[#allocation3 + $0x2c] sm:$0x1] }
 0x2ad   : > { %v4284_v31 = vshrl.u32 %v4231_v1, 16  ;;  %v4290_v24 = vshll.u32 %v4262_v0, 16  ;;  %v3965_v8 = vrot.slane %v3963_v3, 7  ;;  %v9942_v3 = vpop.f32.mrf.mxu3 }
 0x2ae   : > { %v4780_v13 = vsel %vm9058_vm15, %v7535_v15, %v4779_v18  ;;  %v4781_v49 = vrot.slane %v4779_v18, 4  ;;  %v4282_v11 = vrot.slane %v4280_v14, 5  ;;  %vm3818_vm7 = vcmp.gt.f32.partialorder %v3798_v35, 0.0 }
 0x2af   : > { %v3838_v40 = vmul.f32 0.01, %v3798_v35  ;;  %v4286_v7 = vrot.slane %v4284_v31, 4  ;;  %v3968_v44 = vor.u32 %v3966_v32, %v3965_v8  ;;  %v3970_v51 = vrot.slane %v3965_v8, 4 }
 0x2b0   : > { %v4783_v12 = vsel %vm9058_vm15, %v4781_v49, %v4782_v10  ;;  %v4850_v50 = vunpack.c.l.b16 %v4780_v13  ;;  %v4283_v15 = vsel %vm8972_vm12, %v4278_v4, %v4282_v11  ;;  %v4292_v14 = vrot.slane %v4290_v24, 5 }
 0x2b1   : > { %v3858_v16 = vsel %vm3818_vm7, %v3798_v35, %v3838_v40  ;;  %v4851_v19 = vunpack.c.l.b16 %v4783_v12  ;;  %v4287_v1 = vor.u32 %v4286_v7, %v4282_v11  ;;  %v3969_v38 = vsel %vm8915_vm8, %v3961_v34, %v3968_v44  ;;  %v3732_v18 = vpop.f32.mrf.mxu0  ;;  %v4232_v10 = vld [vmem:[#allocation3 + $0xc] sm:$0xf]  ;;  %v4122_v40 = vld [vmem:[#allocation3 + $0x18] sm:$0xf] }
 0x2b2   : > { %v4120_v32 = vsel %vm8884_vm3, %v3970_v51, %v4119_v22  ;;  %v3878_v0 = vpack.c.bf16 %v3858_v16, %v3858_v16  ;;  %4118 = vst [vmem:[#allocation3 + $0x10] sm:$0xf] %v3969_v38  ;;  %v3775_v31 = vadd.f32 %v3732_v18, %v3481_v45  ;;  %v3934_v8 = vsel %vm8889_vm4, 0, %v3933_v52  ;;  %v8014_v11 = vld [vmem:[#allocation11 + $0x130] sm:$0xff]  ;;  %v10798_v52 = vld [vmem:[#allocation42_spill] sm:$0xff] }
 0x2b3   : > { %v4866_v35 = vpack.c.b16 %v4851_v19, %v4850_v50  ;;  %v4288_v21 = vrot.slane %v4287_v1, 4  ;;  %v3028_v13 = vadd.f32 %v9843_v61, %v2804_v25  ;;  %v3029_v49 = vadd.f32 %v9865_v41, %v2805_v55  ;;  %4121 = vst [vmem:[#allocation3 + $0x14] sm:$0x1] %v4120_v32  ;;  %v8006_v44 = vld [vmem:[#allocation11 + $0xf0] sm:$0xff]  ;;  %5503 = vmatpush.bf16.msrb.mxu2 %v8014_v11  ;;  %v10799_v16 = vld [vmem:[#allocation30_spill] sm:$0xff]  ;;  %v9963_v1 = vpop.f32.mrf.mxu2 }
 0x2b4   : > { %v2806_v34 = vadd.f32 %v9874_v29, %v9727_v26  ;;  %v3972_v22 = vshrl.u32 %v3878_v0, 16  ;;  %v3799_v24 = vadd.f32 %v9848_v54, %v3775_v31  ;;  %3935 = vst [vmem:[#allocation3 + $0x2c] sm:$0x1] %v3934_v8  ;;  %v4295_v4 = vshrl.u32 %v4232_v10, 16  ;;  %v4754_v26 = vld [vmem:[#allocation3 + $0xc] sm:$0xe]  ;;  %5125 = vmatpush.bf16.msrb.mxu1 %v8006_v44 }
 0x2b5   : > { %4938 = vmatmul.bf16.vlgmr.msrb.gmra.mxu3 %v4866_v35  ;;  %v4293_v45 = vsel %vm8972_vm12, %v4288_v21, %v4292_v14  ;;  %v4298_v7 = vshll.u32 %v4232_v10, 16  ;;  %v3975_v41 = vshll.u32 %v3878_v0, 16  ;;  %v4479_v25 = vunpack.c.l.b16 %v4283_v15  ;;  %v3906_v29 = vld [vmem:[#allocation3 + $0x30] sm:$0x1] }
 0x2b6   : > { %v9957_v61 = vrot.slane %v3972_v22, 7  ;;  %v4480_v55 = vunpack.c.l.b16 %v4293_v45  ;;  %vm3819_vm10 = vcmp.gt.f32.partialorder %v3799_v24, 0.0  ;;  %v3839_v51 = vmul.f32 0.01, %v3799_v24 }
 0x2b7   : > { %v4297_v12 = vrot.slane %v4295_v4, 4  ;;  %v4300_v50 = vrot.slane %v4298_v7, 5  ;;  %v9961_v19 = vadd.f32 %v10799_v16, %v10798_v52  ;;  %v3907_v15 = vsel %vm8884_vm3, 0, %v3906_v29 }
 0x2b8   : > { %v3977_v38 = vor.u32 %v3975_v41, %v9957_v61  ;;  %v4495_v32 = vpack.c.b16 %v4480_v55, %v4479_v25  ;;  %v3482_v0 = vadd.f32 %v9855_v58, %v3028_v13  ;;  %v3483_v18 = vadd.f32 %v9877_v42, %v3029_v49  ;;  %3908 = vst [vmem:[#allocation3 + $0x30] sm:$0x1] %v3907_v15  ;;  %v9977_v13 = vpop.f32.mrf.mxu1 }
 0x2b9   : > { %v3859_v14 = vsel %vm3819_vm10, %v3799_v24, %v3839_v51  ;;  %v4301_v10 = vor.u32 %v4300_v50, %v4297_v12  ;;  %v9971_v31 = vadd.f32 %v9885_v48, %v2806_v34  ;;  %v3735_v8 = vpop.f32.mrf.mxu0  ;;  %v7961_v22 = vld [vmem:[#allocation3 + $0xc] sm:$0xff]  ;;  %v7536_v45 = vrot.slane %v4754_v26, 9  ;;  %v9980_v24 = vpop.f32.mrf.mxu3  ;;  %v4126_v51 = vld [vmem:[#allocation3 + $0x20] sm:$0x1] }
 0x2ba   : > { %v4123_v35 = vsel %vm8922_vm9, %v3977_v38, %v4122_v40  ;;  %v3879_v21 = vpack.c.bf16 %v3859_v14, %v3859_v14  ;;  %4567 = vmatmul.bf16.vlgmr.msra.gmra.mxu1 %v4495_v32  ;;  %v4233_v11 = vld [vmem:[#allocation3 + $0x10] sm:$0xf]  ;;  %v2807_v58 = vadd.f32 %v9894_v17, %v9734_v2  ;;  %v3978_v42 = vrot.slane %v9957_v61, 4  ;;  %v4263_v48 = vld [vmem:[#allocation3 + $0x14] sm:$0x1] }
 0x2bb   : > { %4124 = vst [vmem:[#allocation3 + $0x18] sm:$0xf] %v4123_v35  ;;  %v3776_v49 = vadd.f32 %v3735_v8, %v3482_v0  ;;  %v4786_v34 = vrot.slane %v4233_v11, 5  ;;  %v4789_v4 = vrot.slane %v4263_v48, 5  ;;  %v4302_v7 = vrot.slane %v4301_v10, 4  ;;  %4717 = vmatmul.bf16.gmra.mxu2 %v7961_v22  ;;  %v9990_v8 = vpop.f32.mrf.mxu2 }
 0x2bc   : > { %v3980_v40 = vshrl.u32 %v3879_v21, 16  ;;  %v4304_v44 = vshll.u32 %v4233_v11, 16  ;;  %v4308_v25 = vshrl.u32 %v4233_v11, 16  ;;  %v3983_v61 = vshll.u32 %v3879_v21, 16  ;;  %v3936_v0 = vld [vmem:[#allocation3 + $0x38] sm:$0x1] }
 0x2bd   : > { %v3800_v41 = vadd.f32 %v9848_v54, %v3776_v49  ;;  %v4787_v2 = vsel %vm9058_vm15, %v7536_v45, %v4786_v34  ;;  %v4788_v17 = vrot.slane %v4786_v34, 4  ;;  %v4314_v29 = vshll.u32 %v4263_v48, 16 }
 0x2be   : > { %v3982_v55 = vrot.slane %v3980_v40, 7  ;;  %v4306_v26 = vrot.slane %v4304_v44, 5  ;;  %v4310_v52 = vrot.slane %v4308_v25, 4  ;;  %v4852_v32 = vunpack.c.l.b16 %v4787_v2  ;;  %v4129_v25 = vld [vmem:[#allocation3 + $0x24] sm:$0xf] }
 0x2bf   : > { %vm3820_vm11 = vcmp.gt.f32.partialorder %v3800_v41, 0.0  ;;  %v3840_v12 = vmul.f32 0.01, %v3800_v41  ;;  %v4790_v50 = vsel %vm9058_vm15, %v4788_v17, %v4789_v4  ;;  %v3031_v14 = vadd.f32 %v9910_v9, %v2807_v58 }
 0x2c0   : > { %v3985_v16 = vor.u32 %v3983_v61, %v3982_v55  ;;  %v3987_v38 = vrot.slane %v3982_v55, 4  ;;  %v4853_v15 = vunpack.c.l.b16 %v4790_v50  ;;  %v4307_v35 = vsel %vm8972_vm12, %v4302_v7, %v4306_v26  ;;  %v10000_v17 = vpop.f32.mrf.mxu1 }
 0x2c1   : > { %v3860_v10 = vsel %vm3820_vm11, %v3800_v41, %v3840_v12  ;;  %v4311_v21 = vor.u32 %v4310_v52, %v4306_v26  ;;  %v3737_v49 = vpop.f32.mrf.mxu0  ;;  %v4316_v58 = vrot.slane %v4314_v29, 5  ;;  %v3937_v4 = vsel %vm8889_vm4, 0, %v3936_v0  ;;  %v8013_v41 = vld [vmem:[#allocation11 + $0x128] sm:$0xff] }
 0x2c2   : > { %v3986_v22 = vsel %vm8915_vm8, %v3978_v42, %v3985_v16  ;;  %v4127_v11 = vsel %vm8884_vm3, %v3987_v38, %v4126_v51  ;;  %v3880_v45 = vpack.c.bf16 %v3860_v10, %v3860_v10  ;;  %v4867_v48 = vpack.c.b16 %v4853_v15, %v4852_v32  ;;  %v4234_v34 = vld [vmem:[#allocation3 + $0x18] sm:$0xf]  ;;  %3938 = vst [vmem:[#allocation3 + $0x38] sm:$0x1] %v3937_v4  ;;  %v8005_v29 = vld [vmem:[#allocation11 + $0xe8] sm:$0xff]  ;;  %v10800_v15 = vld [vmem:[#allocation41_spill] sm:$0xff] }
 0x2c3   : > { %4125 = vst [vmem:[#allocation3 + $0x1c] sm:$0xf] %v3986_v22  ;;  %v3777_v40 = vadd.f32 %v3737_v49, %v3483_v18  ;;  %v4312_v9 = vrot.slane %v4311_v21, 4  ;;  %v2808_v7 = vadd.f32 %v9917_v57, %v9737_v56  ;;  %v4319_v2 = vshrl.u32 %v4234_v34, 16  ;;  %v3909_v51 = vld [vmem:[#allocation3 + $0x3c] sm:$0x1]  ;;  %v10005_v56 = vpop.f32.mrf.mxu3  ;;  %5504 = vmatpush.bf16.msrb.mxu2 %v8013_v41  ;;  %5126 = vmatpush.bf16.msrb.mxu1 %v8005_v29 }
 0x2c4   : > { %4128 = vst [vmem:[#allocation3 + $0x20] sm:$0x1] %v4127_v11  ;;  %v3989_v44 = vshrl.u32 %v3880_v45, 16  ;;  %v3992_v42 = vshll.u32 %v3880_v45, 16  ;;  %v4481_v61 = vunpack.c.l.b16 %v4307_v35  ;;  %v4322_v26 = vshll.u32 %v4234_v34, 16  ;;  %v10801_v10 = vld [vmem:[#allocation43_spill] sm:$0xff] }
 0x2c5   : > { %v3801_v55 = vadd.f32 %v9848_v54, %v3777_v40  ;;  %4943 = vmatmul.bf16.gmra.mxu3 %v4867_v48  ;;  %v4317_v18 = vsel %vm8972_vm12, %v4312_v9, %v4316_v58  ;;  %v4755_v50 = vld [vmem:[#allocation3 + $0x18] sm:$0xe]  ;;  %v4321_v52 = vrot.slane %v4319_v2, 4  ;;  %v3910_v16 = vsel %vm8884_vm3, 0, %v3909_v51  ;;  %v10802_v35 = vld [vmem:[#allocation34_spill] sm:$0xff] }
 0x2c6   : > { %v10007_v57 = vrot.slane %v3989_v44, 7  ;;  %v4482_v12 = vunpack.c.l.b16 %v4317_v18  ;;  %v4324_v32 = vrot.slane %v4322_v26, 5  ;;  %3911 = vst [vmem:[#allocation3 + $0x3c] sm:$0x1] %v3910_v16  ;;  %v10013_v0 = vadd.f32 %v10800_v15, %v9961_v19 }
 0x2c7   : > { %vm3821_vm13 = vcmp.gt.f32.partialorder %v3801_v55, 0.0  ;;  %v3841_v38 = vmul.f32 0.01, %v3801_v55  ;;  %v10017_v21 = vadd.f32 %v10802_v35, %v10801_v10  ;;  %v3484_v45 = vadd.f32 %v9897_v62, %v9971_v31 }
 0x2c8   : > { %v3994_v22 = vor.u32 %v3992_v42, %v10007_v57  ;;  %v4496_v11 = vpack.c.b16 %v4482_v12, %v4481_v61  ;;  %v3485_v49 = vadd.f32 %v9919_v33, %v3031_v14  ;;  %v4325_v34 = vor.u32 %v4324_v32, %v4321_v52  ;;  %v4133_v52 = vld [vmem:[#allocation3 + $0x2c] sm:$0x1] }
 0x2c9   : > { %v3861_v48 = vsel %vm3821_vm13, %v3801_v55, %v3841_v38  ;;  %v10024_v40 = vadd.f32 %v9932_v46, %v2808_v7  ;;  %v3740_v58 = vpop.f32.mrf.mxu0  ;;  %v7537_v41 = vrot.slane %v4755_v50, 9  ;;  %v2809_v62 = vadd.f32 %v9938_v23, %v9748_v30  ;;  %v10031_v7 = vpop.f32.mrf.mxu2 }
 0x2ca   : > { %v4130_v19 = vsel %vm8922_vm9, %v3994_v22, %v4129_v25  ;;  %v3881_v9 = vpack.c.bf16 %v3861_v48, %v3861_v48  ;;  %4572 = vmatmul.bf16.gmra.mxu1 %v4496_v11  ;;  %v8024_v4 = vld [vmem:[#allocation3 + $0x18] sm:$0xff]  ;;  %v3995_v33 = vrot.slane %v10007_v57, 4  ;;  %v3778_v31 = vadd.f32 %v3740_v58, %v3484_v45  ;;  %v10036_v50 = vpop.f32.mrf.mxu1  ;;  %v3939_v45 = vld [vmem:[#allocation3 + $0x44] sm:$0x1] }
 0x2cb   : > { %v7962_v44 = vld [vmem:[#allocation3 + $0x18] sm:$0xff]  ;;  %4131 = vst [vmem:[#allocation3 + $0x24] sm:$0xf] %v4130_v19  ;;  %v4264_v14 = vld [vmem:[#allocation3 + $0x20] sm:$0x1]  ;;  %5955 = vmatmul.bf16.vlgmr.msra.gmra.mxu0 %v8024_v4  ;;  %v4326_v55 = vrot.slane %v4325_v34, 4  ;;  %v10040_v15 = vpop.f32.mrf.mxu3  ;;  %v3033_v48 = vadd.f32 %v9963_v1, %v2809_v62  ;;  %v2810_v62 = vadd.f32 %v9977_v13, %v9756_v20 }
 0x2cc   : > { %v4235_v42 = vld [vmem:[#allocation3 + $0x1c] sm:$0xf]  ;;  %v3997_v2 = vshrl.u32 %v3881_v9, 16  ;;  %v4796_v25 = vrot.slane %v4264_v14, 5  ;;  %v3802_v61 = vadd.f32 %v9848_v54, %v3778_v31  ;;  %4722 = vmatmul.bf16.gmra.mxu2 %v7962_v44  ;;  %v4000_v51 = vshll.u32 %v3881_v9, 16 }
 0x2cd   : > { %v4793_v46 = vrot.slane %v4235_v42, 5  ;;  %v4328_v18 = vshll.u32 %v4235_v42, 16  ;;  %v4332_v23 = vshrl.u32 %v4235_v42, 16  ;;  %v4338_v12 = vshll.u32 %v4264_v14, 16 }
 0x2ce   : > { %v3999_v29 = vrot.slane %v3997_v2, 7  ;;  %vm3822_vm14 = vcmp.gt.f32.partialorder %v3802_v61, 0.0  ;;  %v3842_v16 = vmul.f32 0.01, %v3802_v61  ;;  %v3940_v1 = vsel %vm8889_vm4, 0, %v3939_v45 }
 0x2cf   : > { %v4794_v26 = vsel %vm9058_vm15, %v7537_v41, %v4793_v46  ;;  %v4795_v30 = vrot.slane %v4793_v46, 4  ;;  %v4330_v57 = vrot.slane %v4328_v18, 5  ;;  %v4334_v32 = vrot.slane %v4332_v23, 4  ;;  %3941 = vst [vmem:[#allocation3 + $0x44] sm:$0x1] %v3940_v1 }
 0x2d0   : > { %v4002_v10 = vor.u32 %v4000_v51, %v3999_v29  ;;  %v4004_v35 = vrot.slane %v3999_v29, 4  ;;  %v4854_v22 = vunpack.c.l.b16 %v4794_v26  ;;  %v3862_v34 = vsel %vm3822_vm14, %v3802_v61, %v3842_v16  ;;  %v4136_v61 = vld [vmem:[#allocation3 + $0x30] sm:$0xf]  ;;  %v8004_v29 = vld [vmem:[#allocation11 + $0xe0] sm:$0xff]  ;;  %v3912_v51 = vld [vmem:[#allocation3 + $0x48] sm:$0x1] }
 0x2d1   : > { %v4797_v38 = vsel %vm9058_vm15, %v4795_v30, %v4796_v25  ;;  %v4331_v19 = vsel %vm8972_vm12, %v4326_v55, %v4330_v57  ;;  %v4335_v9 = vor.u32 %v4334_v32, %v4330_v57  ;;  %v3882_v44 = vpack.c.bf16 %v3862_v34, %v3862_v34  ;;  %v3742_v42 = vpop.f32.mrf.mxu0  ;;  %v8012_v55 = vld [vmem:[#allocation11 + $0x120] sm:$0xff]  ;;  %v10056_v57 = vpop.f32.mrf.mxu2  ;;  %5127 = vmatpush.bf16.msrb.mxu1 %v8004_v29 }
 0x2d2   : > { %v4855_v11 = vunpack.c.l.b16 %v4797_v38  ;;  %v4003_v58 = vsel %vm8915_vm8, %v3995_v33, %v4002_v10  ;;  %v4134_v4 = vsel %vm8884_vm3, %v4004_v35, %v4133_v52  ;;  %v4236_v31 = vld [vmem:[#allocation3 + $0x24] sm:$0xf]  ;;  %v3779_v14 = vadd.f32 %v3742_v42, %v3485_v49  ;;  %5505 = vmatpush.bf16.msrb.mxu2 %v8012_v55 }
 0x2d3   : > { %4132 = vst [vmem:[#allocation3 + $0x28] sm:$0xf] %v4003_v58  ;;  %v4336_v46 = vrot.slane %v4335_v9, 4  ;;  %v4340_v2 = vrot.slane %v4338_v12, 5  ;;  %v4006_v25 = vshrl.u32 %v3882_v44, 16  ;;  %v4009_v33 = vshll.u32 %v3882_v44, 16 }
 0x2d4   : > { %v4868_v41 = vpack.c.b16 %v4855_v11, %v4854_v22  ;;  %4135 = vst [vmem:[#allocation3 + $0x2c] sm:$0x1] %v4134_v4  ;;  %v4343_v18 = vshrl.u32 %v4236_v31, 16  ;;  %v3803_v26 = vadd.f32 %v9848_v54, %v3779_v14  ;;  %v4483_v30 = vunpack.c.l.b16 %v4331_v19  ;;  %v4756_v12 = vld [vmem:[#allocation3 + $0x24] sm:$0xe] }
 0x2d5   : > { %v4341_v49 = vsel %vm8972_vm12, %v4336_v46, %v4340_v2  ;;  %v4346_v23 = vshll.u32 %v4236_v31, 16  ;;  %v10058_v20 = vrot.slane %v4006_v25, 7  ;;  %v3913_v16 = vsel %vm8884_vm3, 0, %v3912_v51  ;;  %v10803_v22 = vld [vmem:[#allocation28_spill] sm:$0xff] }
 0x2d6   : > { %4948 = vmatmul.bf16.gmra.mxu3 %v4868_v41  ;;  %v4484_v13 = vunpack.c.l.b16 %v4341_v49  ;;  %v4345_v52 = vrot.slane %v4343_v18, 4  ;;  %v2811_v38 = vadd.f32 %v10000_v17, %v9768_v59  ;;  %vm3823_vm1 = vcmp.gt.f32.partialorder %v3803_v26, 0.0  ;;  %3914 = vst [vmem:[#allocation3 + $0x48] sm:$0x1] %v3913_v16  ;;  %v2785_v17 = vpop.f32.mrf.mxu1 }
 0x2d7   : > { %v3843_v32 = vmul.f32 0.01, %v3803_v26  ;;  %v4348_v10 = vrot.slane %v4346_v23, 5  ;;  %v10066_v35 = vadd.f32 %v9739_v63, %v10017_v21  ;;  %v10070_v11 = vadd.f32 %v10803_v22, %v10013_v0  ;;  %v10079_v63 = vpop.f32.mrf.mxu3 }
 0x2d8   : > { %v4011_v45 = vor.u32 %v4009_v33, %v10058_v20  ;;  %v4497_v34 = vpack.c.b16 %v4484_v13, %v4483_v30  ;;  %v3486_v19 = vadd.f32 %v9942_v3, %v10024_v40  ;;  %v3487_v59 = vadd.f32 %v9980_v24, %v3033_v48  ;;  %v4140_v30 = vld [vmem:[#allocation3 + $0x38] sm:$0x1] }
 0x2d9   : > { %v3863_v9 = vsel %vm3823_vm1, %v3803_v26, %v3843_v32  ;;  %v4349_v58 = vor.u32 %v4348_v10, %v4345_v52  ;;  %v10077_v4 = vadd.f32 %v9990_v8, %v2810_v62  ;;  %v3745_v44 = vpop.f32.mrf.mxu0  ;;  %v7538_v3 = vrot.slane %v4756_v12, 9 }
 0x2da   : > { %v4137_v0 = vsel %vm8922_vm9, %v4011_v45, %v4136_v61  ;;  %v3883_v21 = vpack.c.bf16 %v3863_v9, %v3863_v9  ;;  %4577 = vmatmul.bf16.gmra.mxu1 %v4497_v34  ;;  %v8025_v42 = vld [vmem:[#allocation3 + $0x24] sm:$0xff]  ;;  %v10084_v24 = vadd.f32 %v10031_v7, %v2811_v38  ;;  %v4012_v40 = vrot.slane %v10058_v20, 4  ;;  %v3009_v20 = vpop.f32.mrf.mxu2  ;;  %v3942_v38 = vld [vmem:[#allocation3 + $0x50] sm:$0x1] }
 0x2db   : > { %v7963_v41 = vld [vmem:[#allocation3 + $0x24] sm:$0xff]  ;;  %4138 = vst [vmem:[#allocation3 + $0x30] sm:$0xf] %v4137_v0  ;;  %v3780_v8 = vadd.f32 %v3745_v44, %v3486_v19  ;;  %v4265_v48 = vld [vmem:[#allocation3 + $0x2c] sm:$0x1]  ;;  %5960 = vmatmul.bf16.gmra.mxu0 %v8025_v42  ;;  %v4350_v1 = vrot.slane %v4349_v58, 4  ;;  %v2812_v32 = vadd.f32 %v10036_v50, %v9778_v47  ;;  %v2813_v50 = vadd.f32 %v2785_v17, %v9792_v36 }
 0x2dc   : > { %v4237_v31 = vld [vmem:[#allocation3 + $0x28] sm:$0xf]  ;;  %v4014_v46 = vshrl.u32 %v3883_v21, 16  ;;  %v4803_v2 = vrot.slane %v4265_v48, 5  ;;  %4727 = vmatmul.bf16.gmra.mxu2 %v7963_v41  ;;  %v4017_v61 = vshll.u32 %v3883_v21, 16  ;;  %v4362_v49 = vshll.u32 %v4265_v48, 16 }
 0x2dd   : > { %v4800_v14 = vrot.slane %v4237_v31, 5  ;;  %v4352_v62 = vshll.u32 %v4237_v31, 16  ;;  %v3804_v25 = vadd.f32 %v9848_v54, %v3780_v8  ;;  %v4356_v7 = vshrl.u32 %v4237_v31, 16  ;;  %v8011_v48 = vld [vmem:[#allocation11 + $0x118] sm:$0xff] }
 0x2de   : > { %v4016_v18 = vrot.slane %v4014_v46, 7  ;;  %v4364_v41 = vrot.slane %v4362_v49, 5  ;;  %v3943_v47 = vsel %vm8889_vm4, 0, %v3942_v38  ;;  %v4143_v46 = vld [vmem:[#allocation3 + $0x3c] sm:$0xf]  ;;  %5506 = vmatpush.bf16.msrb.mxu2 %v8011_v48  ;;  %v3488_v49 = vadd.f32 %v10005_v56, %v10077_v4 }
 0x2df   : > { %v4801_v33 = vsel %vm9058_vm15, %v7538_v3, %v4800_v14  ;;  %v4802_v55 = vrot.slane %v4800_v14, 4  ;;  %v4354_v26 = vrot.slane %v4352_v62, 5  ;;  %vm3824_vm2 = vcmp.gt.f32.partialorder %v3804_v25, 0.0  ;;  %v10103_v31 = vpop.f32.mrf.mxu3  ;;  %v2788_v3 = vpop.f32.mrf.mxu1  ;;  %3944 = vst [vmem:[#allocation3 + $0x50] sm:$0x1] %v3943_v47 }
 0x2e0   : > { %v3844_v23 = vmul.f32 0.01, %v3804_v25  ;;  %v4358_v51 = vrot.slane %v4356_v7, 4  ;;  %v4019_v13 = vor.u32 %v4017_v61, %v4016_v18  ;;  %v4021_v12 = vrot.slane %v4016_v18, 4  ;;  %v3915_v36 = vld [vmem:[#allocation3 + $0x54] sm:$0x1] }
 0x2e1   : > { %v4804_v29 = vsel %vm9058_vm15, %v4802_v55, %v4803_v2  ;;  %v4856_v52 = vunpack.c.l.b16 %v4801_v33  ;;  %v4355_v22 = vsel %vm8972_vm12, %v4350_v1, %v4354_v26  ;;  %v3747_v58 = vpop.f32.mrf.mxu0  ;;  %v3916_v18 = vsel %vm8884_vm3, 0, %v3915_v36 }
 0x2e2   : > { %v4857_v16 = vunpack.c.l.b16 %v4804_v29  ;;  %v3864_v10 = vsel %vm3824_vm2, %v3804_v25, %v3844_v23  ;;  %v4359_v45 = vor.u32 %v4358_v51, %v4354_v26  ;;  %v4020_v34 = vsel %vm8915_vm8, %v4012_v40, %v4019_v13  ;;  %v4238_v21 = vld [vmem:[#allocation3 + $0x30] sm:$0xf]  ;;  %3917 = vst [vmem:[#allocation3 + $0x54] sm:$0x1] %v3916_v18 }
 0x2e3   : > { %v4141_v19 = vsel %vm8884_vm3, %v4021_v12, %v4140_v30  ;;  %v3884_v9 = vpack.c.bf16 %v3864_v10, %v3864_v10  ;;  %4139 = vst [vmem:[#allocation3 + $0x34] sm:$0xf] %v4020_v34  ;;  %v3781_v44 = vadd.f32 %v3747_v58, %v3487_v59  ;;  %v4367_v14 = vshrl.u32 %v4238_v21, 16  ;;  %v8003_v25 = vld [vmem:[#allocation11 + $0xd8] sm:$0xff] }
 0x2e4   : > { %v4869_v0 = vpack.c.b16 %v4857_v16, %v4856_v52  ;;  %v4360_v42 = vrot.slane %v4359_v45, 4  ;;  %4142 = vst [vmem:[#allocation3 + $0x38] sm:$0x1] %v4141_v19  ;;  %v4485_v1 = vunpack.c.l.b16 %v4355_v22  ;;  %v4370_v62 = vshll.u32 %v4238_v21, 16  ;;  %v4757_v55 = vld [vmem:[#allocation3 + $0x30] sm:$0xe]  ;;  %5128 = vmatpush.bf16.msrb.mxu1 %v8003_v25  ;;  %v3012_v52 = vpop.f32.mrf.mxu2 }
 0x2e5   : > { %v4023_v40 = vshrl.u32 %v3884_v9, 16  ;;  %v4026_v8 = vshll.u32 %v3884_v9, 16  ;;  %v3805_v2 = vadd.f32 %v9848_v54, %v3781_v44  ;;  %v4369_v7 = vrot.slane %v4367_v14, 4  ;;  %v10135_v58 = vld [vmem:[%s10796_s6] ss:$0 sm:$0xff] }
 0x2e6   : > { %4953 = vmatmul.bf16.gmra.mxu3 %v4869_v0  ;;  %v4365_v59 = vsel %vm8972_vm12, %v4360_v42, %v4364_v41  ;;  %v10114_v54 = vadd.f32 %v9750_v27, %v10066_v35  ;;  %v4372_v26 = vrot.slane %v4370_v62, 5  ;;  %v3489_v30 = vadd.f32 %v10040_v15, %v10084_v24  ;;  %v3945_v62 = vld [vmem:[#allocation3 + $0x5c] sm:$0x1] }
 0x2e7   : > { %v10108_v17 = vrot.slane %v4023_v40, 7  ;;  %v4486_v33 = vunpack.c.l.b16 %v4365_v59  ;;  %vm3825_vm5 = vcmp.gt.f32.partialorder %v3805_v2, 0.0  ;;  %v3845_v61 = vmul.f32 0.01, %v3805_v2  ;;  %v10140_v44 = vpop.f32.mrf.mxu3  ;;  %v2790_v42 = vpop.f32.mrf.mxu1  ;;  %v4147_v40 = vld [vmem:[#allocation3 + $0x44] sm:$0x1] }
 0x2e8   : > { %v10122_v51 = vadd.f32 %v10056_v57, %v2812_v32  ;;  %v10124_v13 = vadd.f32 %v3009_v20, %v2813_v50  ;;  %v4373_v35 = vor.u32 %v4372_v26, %v4369_v7  ;;  %v2814_v12 = vadd.f32 %v2788_v3, %v9800_v37 }
 0x2e9   : > { %v4028_v23 = vor.u32 %v4026_v8, %v10108_v17  ;;  %v4498_v29 = vpack.c.b16 %v4486_v33, %v4485_v1  ;;  %v3865_v27 = vsel %vm3825_vm5, %v3805_v2, %v3845_v61  ;;  %v3750_v4 = vpop.f32.mrf.mxu0  ;;  %v7539_v10 = vrot.slane %v4757_v55, 9 }
 0x2ea   : > { %v3885_v56 = vpack.c.bf16 %v3865_v27, %v3865_v27  ;;  %v8026_v15 = vld [vmem:[#allocation3 + $0x30] sm:$0xff]  ;;  %v2521_v57 = vadd.f32 %v9807_v53, %v10070_v11  ;;  %v4029_v20 = vrot.slane %v10108_v17, 4  ;;  %v3782_v32 = vadd.f32 %v3750_v4, %v3488_v49 }
 0x2eb   : > { %v4144_v16 = vsel %vm8922_vm9, %v4028_v23, %v4143_v46  ;;  %4582 = vmatmul.bf16.gmra.mxu1 %v4498_v29  ;;  %v7964_v24 = vld [vmem:[#allocation3 + $0x30] sm:$0xff]  ;;  %v4266_v22 = vld [vmem:[#allocation3 + $0x38] sm:$0x1]  ;;  %5965 = vmatmul.bf16.gmra.mxu0 %v8026_v15  ;;  %v4374_v19 = vrot.slane %v4373_v35, 4  ;;  %v3946_v35 = vsel %vm8889_vm4, 0, %v3945_v62 }
 0x2ec   : > { %v4239_v38 = vld [vmem:[#allocation3 + $0x34] sm:$0xf]  ;;  %4145 = vst [vmem:[#allocation3 + $0x3c] sm:$0xf] %v4144_v16  ;;  %v4031_v45 = vshrl.u32 %v3885_v56, 16  ;;  %v4810_v34 = vrot.slane %v4266_v22, 5  ;;  %v3806_v0 = vadd.f32 %v10135_v58, %v3782_v32  ;;  %4732 = vmatmul.bf16.gmra.mxu2 %v7964_v24  ;;  %v2815_v25 = vadd.f32 %v2790_v42, %v2521_v57 }
 0x2ed   : > { %v4807_v37 = vrot.slane %v4239_v38, 5  ;;  %v4376_v9 = vshll.u32 %v4239_v38, 16  ;;  %v4380_v21 = vshrl.u32 %v4239_v38, 16  ;;  %v4034_v47 = vshll.u32 %v3885_v56, 16  ;;  %v3014_v56 = vpop.f32.mrf.mxu2  ;;  %v8010_v24 = vld [vmem:[#allocation11 + $0x110] sm:$0xff] }
 0x2ee   : > { %v4033_v41 = vrot.slane %v4031_v45, 7  ;;  %v4386_v3 = vshll.u32 %v4266_v22, 16  ;;  %vm3826_vm6 = vcmp.gt.f32.partialorder %v3806_v0, 0.0  ;;  %v3846_v8 = vmul.f32 0.01, %v3806_v0  ;;  %5507 = vmatpush.bf16.msrb.mxu2 %v8010_v24 }
 0x2ef   : > { %v4808_v53 = vsel %vm9058_vm15, %v7539_v10, %v4807_v37  ;;  %v4809_v11 = vrot.slane %v4807_v37, 4  ;;  %v4378_v50 = vrot.slane %v4376_v9, 5  ;;  %v4382_v14 = vrot.slane %v4380_v21, 4  ;;  %v10152_v10 = vld [vmem:[#allocation3 + $0xc] sm:$0xf] }
 0x2f0   : > { %v4036_v46 = vor.u32 %v4034_v47, %v4033_v41  ;;  %v4038_v2 = vrot.slane %v4033_v41, 4  ;;  %v4858_v59 = vunpack.c.l.b16 %v4808_v53  ;;  %v3866_v36 = vsel %vm3826_vm6, %v3806_v0, %v3846_v8  ;;  %v4150_v57 = vld [vmem:[#allocation3 + $0x48] sm:$0xf]  ;;  %3947 = vst [vmem:[#allocation3 + $0x5c] sm:$0x1] %v3946_v35  ;;  %v3468_v41 = vpop.f32.mrf.mxu3 }
 0x2f1   : > { %v4811_v48 = vsel %vm9058_vm15, %v4809_v11, %v4810_v34  ;;  %v4379_v17 = vsel %vm8972_vm12, %v4374_v19, %v4378_v50  ;;  %v4383_v33 = vor.u32 %v4382_v14, %v4378_v50  ;;  %v3886_v18 = vpack.c.bf16 %v3866_v36, %v3866_v36  ;;  %v3752_v61 = vpop.f32.mrf.mxu0  ;;  %v8002_v37 = vld [vmem:[#allocation11 + $0xd0] sm:$0xff]  ;;  %v4154_v24 = vld [vmem:[#allocation3 + $0x50] sm:$0x1] }
 0x2f2   : > { %v4859_v1 = vunpack.c.l.b16 %v4811_v48  ;;  %v4037_v55 = vsel %vm8915_vm8, %v4029_v20, %v4036_v46  ;;  %v4148_v7 = vsel %vm8884_vm3, %v4038_v2, %v4147_v40  ;;  %v3783_v23 = vadd.f32 %v3752_v61, %v3489_v30  ;;  %5129 = vmatpush.bf16.msrb.mxu1 %v8002_v37 }
 0x2f3   : > { %v4240_v49 = vld [vmem:[#allocation3 + $0x3c] sm:$0xf]  ;;  %4146 = vst [vmem:[#allocation3 + $0x40] sm:$0xf] %v4037_v55  ;;  %v4384_v29 = vrot.slane %v4383_v33, 4  ;;  %v4388_v27 = vrot.slane %v4386_v3, 5  ;;  %v3038_v16 = vadd.f32 %v3012_v52, %v2814_v12  ;;  %v4487_v32 = vunpack.c.l.b16 %v4379_v17 }
 0x2f4   : > { %v4870_v26 = vpack.c.b16 %v4859_v1, %v4858_v59  ;;  %4149 = vst [vmem:[#allocation3 + $0x44] sm:$0x1] %v4148_v7  ;;  %v4040_v4 = vshrl.u32 %v3886_v18, 16  ;;  %v4043_v15 = vshll.u32 %v3886_v18, 16  ;;  %v4391_v38 = vshrl.u32 %v4240_v49, 16  ;;  %v8023_v3 = vld [vmem:[#allocation11 + $0x178] sm:$0xff] }
 0x2f5   : > { %v3807_v20 = vadd.f32 %v10135_v58, %v3783_v23  ;;  %v4389_v30 = vsel %vm8972_vm12, %v4384_v29, %v4388_v27  ;;  %v4394_v22 = vshll.u32 %v4240_v49, 16  ;;  %v3918_v12 = vld [vmem:[#allocation3 + $0x60] sm:$0x1]  ;;  %v4758_v34 = vld [vmem:[#allocation3 + $0x3c] sm:$0xe]  ;;  %v3039_v0 = vadd.f32 %v3014_v56, %v2815_v25  ;;  %5752 = vmatpush.bf16.msra.mxu3 %v8023_v3  ;;  %v8022_v29 = vld [vmem:[#allocation11 + $0x170] sm:$0xff]  ;;  %v2793_v27 = vpop.f32.mrf.mxu1 }
 0x2f6   : > { %4958 = vmatmul.bf16.gmra.mxu3 %v4870_v26  ;;  %v10157_v52 = vrot.slane %v4040_v4, 7  ;;  %v4488_v45 = vunpack.c.l.b16 %v4389_v30  ;;  %v4393_v19 = vrot.slane %v4391_v38, 4  ;;  %v3919_v9 = vsel %vm8884_vm3, 0, %v3918_v12  ;;  %v3948_v12 = vld [vmem:[#allocation3 + $0x68] sm:$0x1] }
 0x2f7   : > { %vm3827_vm7 = vcmp.gt.f32.partialorder %v3807_v20, 0.0  ;;  %v3847_v53 = vmul.f32 0.01, %v3807_v20  ;;  %v4396_v11 = vrot.slane %v4394_v22, 5  ;;  %3920 = vst [vmem:[#allocation3 + $0x60] sm:$0x1] %v3919_v9  ;;  %v3490_v21 = vadd.f32 %v10079_v63, %v10122_v51 }
 0x2f8   : > { %v10165_v42 = vadd.f32 %v10103_v31, %v10124_v13  ;;  %v4045_v47 = vor.u32 %v4043_v15, %v10157_v52  ;;  %v4499_v50 = vpack.c.b16 %v4488_v45, %v4487_v32  ;;  %v10169_v40 = vadd.f32 %v10140_v44, %v3038_v16  ;;  %v10181_v15 = vld [vmem:[#allocation3 + $0x10] sm:$0xf] }
 0x2f9   : > { %v3867_v8 = vsel %vm3827_vm7, %v3807_v20, %v3847_v53  ;;  %v4397_v48 = vor.u32 %v4396_v11, %v4393_v19  ;;  %v5214_v14 = vshrl.u32 %v10152_v10, 16  ;;  %v3755_v51 = vpop.f32.mrf.mxu0  ;;  %v7540_v59 = vrot.slane %v4758_v34, 9  ;;  %5753 = vmatpush.bf16.msra.mxu3 %v8022_v29  ;;  %v10805_v29 = vld [vmem:[#allocation33_spill] sm:$0xff] }
 0x2fa   : > { %v4151_v46 = vsel %vm8922_vm9, %v4045_v47, %v4150_v57  ;;  %v3887_v63 = vpack.c.bf16 %v3867_v8, %v3867_v8  ;;  %v8027_v31 = vld [vmem:[#allocation3 + $0x3c] sm:$0xff]  ;;  %v5217_v1 = vshll.u32 %v10152_v10, 16  ;;  %v10175_v62 = vadd.f32 %v3468_v41, %v3039_v0 }
 0x2fb   : > { %4587 = vmatmul.bf16.gmra.mxu1 %v4499_v50  ;;  %v7965_v13 = vld [vmem:[#allocation3 + $0x3c] sm:$0xff]  ;;  %v4046_v44 = vrot.slane %v10157_v52, 4  ;;  %4152 = vst [vmem:[#allocation3 + $0x48] sm:$0xf] %v4151_v46  ;;  %v3784_v25 = vadd.f32 %v3755_v51, %v3490_v21  ;;  %v4267_v36 = vld [vmem:[#allocation3 + $0x44] sm:$0x1]  ;;  %5970 = vmatmul.bf16.gmra.mxu0 %v8027_v31 }
 0x2fc   : > { %v4241_v2 = vld [vmem:[#allocation3 + $0x40] sm:$0xf]  ;;  %v4048_v33 = vshrl.u32 %v3887_v63, 16  ;;  %v4817_v55 = vrot.slane %v4267_v36, 5  ;;  %v4398_v7 = vrot.slane %v4397_v48, 4  ;;  %4737 = vmatmul.bf16.gmra.mxu2 %v7965_v13  ;;  %v4051_v16 = vshll.u32 %v3887_v63, 16 }
 0x2fd   : > { %v4814_v17 = vrot.slane %v4241_v2, 5  ;;  %v4400_v18 = vshll.u32 %v4241_v2, 16  ;;  %v3808_v61 = vadd.f32 %v10135_v58, %v3784_v25  ;;  %v4404_v23 = vshrl.u32 %v4241_v2, 16  ;;  %v8021_v52 = vld [vmem:[#allocation11 + $0x168] sm:$0xff]  ;;  %v10804_v46 = vld [vmem:[#allocation31_spill] sm:$0xff] }
 0x2fe   : > { %v4050_v35 = vrot.slane %v4048_v33, 7  ;;  %v4410_v4 = vshll.u32 %v4267_v36, 16  ;;  %v5223_v9 = vshll.u32 %v10181_v15, 16  ;;  %v3949_v48 = vsel %vm8889_vm4, 0, %v3948_v12  ;;  %5754 = vmatpush.bf16.msra.mxu3 %v8021_v52  ;;  %v8009_v13 = vld [vmem:[#allocation11 + $0x108] sm:$0xff] }
 0x2ff   : > { %v4815_v26 = vsel %vm9058_vm15, %v7540_v59, %v4814_v17  ;;  %v4816_v49 = vrot.slane %v4814_v17, 4  ;;  %v4402_v56 = vrot.slane %v4400_v18, 5  ;;  %vm3828_vm10 = vcmp.gt.f32.partialorder %v3808_v61, 0.0  ;;  %v3017_v59 = vpop.f32.mrf.mxu2  ;;  %3950 = vst [vmem:[#allocation3 + $0x68] sm:$0x1] %v3949_v48  ;;  %v8001_v33 = vld [vmem:[#allocation11 + $0xc8] sm:$0xff]  ;;  %5508 = vmatpush.bf16.msrb.mxu2 %v8009_v13 }
 0x300   : > { %v3848_v38 = vmul.f32 0.01, %v3808_v61  ;;  %v4406_v20 = vrot.slane %v4404_v23, 4  ;;  %v4053_v30 = vor.u32 %v4051_v16, %v4050_v35  ;;  %v4055_v32 = vrot.slane %v4050_v35, 4  ;;  %v8020_v23 = vld [vmem:[#allocation11 + $0x160] sm:$0xff]  ;;  %5130 = vmatpush.bf16.msrb.mxu1 %v8001_v33 }
 0x301   : > { %v4818_v57 = vsel %vm9058_vm15, %v4816_v49, %v4817_v55  ;;  %v4860_v22 = vunpack.c.l.b16 %v4815_v26  ;;  %v4403_v34 = vsel %vm8972_vm12, %v4398_v7, %v4402_v56  ;;  %v3757_v21 = vpop.f32.mrf.mxu0  ;;  %v4412_v8 = vrot.slane %v4410_v4, 5  ;;  %v3921_v55 = vld [vmem:[#allocation3 + $0x6c] sm:$0x1]  ;;  %v2795_v4 = vpop.f32.mrf.mxu1 }
 0x302   : > { %v4861_v37 = vunpack.c.l.b16 %v4818_v57  ;;  %v3868_v45 = vsel %vm3828_vm10, %v3808_v61, %v3848_v38  ;;  %v4407_v19 = vor.u32 %v4406_v20, %v4402_v56  ;;  %v4054_v0 = vsel %vm8915_vm8, %v4046_v44, %v4053_v30  ;;  %v4242_v47 = vld [vmem:[#allocation3 + $0x48] sm:$0xf]  ;;  %v4157_v44 = vld [vmem:[#allocation3 + $0x54] sm:$0xf]  ;;  %5755 = vmatpush.bf16.msra.mxu3 %v8020_v23 }
 0x303   : > { %v4155_v53 = vsel %vm8884_vm3, %v4055_v32, %v4154_v24  ;;  %v3888_v11 = vpack.c.bf16 %v3868_v45, %v3868_v45  ;;  %4153 = vst [vmem:[#allocation3 + $0x4c] sm:$0xf] %v4054_v0  ;;  %v3785_v50 = vadd.f32 %v3757_v21, %v10165_v42  ;;  %v2816_v63 = vadd.f32 %v2793_v27, %v10804_v46  ;;  %v4759_v61 = vld [vmem:[#allocation3 + $0x48] sm:$0xe]  ;;  %v8019_v57 = vld [vmem:[#allocation11 + $0x158] sm:$0xff] }
 0x304   : > { %v4871_v41 = vpack.c.b16 %v4861_v37, %v4860_v22  ;;  %v4408_v3 = vrot.slane %v4407_v19, 4  ;;  %4156 = vst [vmem:[#allocation3 + $0x50] sm:$0x1] %v4155_v53  ;;  %v4415_v2 = vshrl.u32 %v4242_v47, 16  ;;  %v4489_v36 = vunpack.c.l.b16 %v4403_v34 }
 0x305   : > { %v4057_v51 = vshrl.u32 %v3888_v11, 16  ;;  %v4060_v31 = vshll.u32 %v3888_v11, 16  ;;  %v3809_v25 = vadd.f32 %v10135_v58, %v3785_v50  ;;  %v4418_v17 = vshll.u32 %v4242_v47, 16 }
 0x306   : > { %4963 = vmatmul.bf16.gmra.mxu3 %v4871_v41  ;;  %v4413_v42 = vsel %vm8972_vm12, %v4408_v3, %v4412_v8  ;;  %v4417_v26 = vrot.slane %v4415_v2, 4  ;;  %v3922_v49 = vsel %vm8884_vm3, 0, %v3921_v55  ;;  %v2523_v27 = vadd.f32 %v10805_v29, %v10114_v54 }
 0x307   : > { %v10199_v7 = vrot.slane %v4057_v51, 7  ;;  %v4490_v18 = vunpack.c.l.b16 %v4413_v42  ;;  %vm3829_vm11 = vcmp.gt.f32.partialorder %v3809_v25, 0.0  ;;  %v3849_v35 = vmul.f32 0.01, %v3809_v25  ;;  %3923 = vst [vmem:[#allocation3 + $0x6c] sm:$0x1] %v3922_v49  ;;  %5756 = vmatpush.bf16.msra.mxu3 %v8019_v57 }
 0x308   : > { %v4420_v16 = vrot.slane %v4418_v17, 5  ;;  %v10205_v56 = vadd.f32 %v3017_v59, %v2816_v63  ;;  %v10210_v20 = vrot.slane %v5214_v14, 4  ;;  %v10214_v54 = vrot.slane %v5217_v1, 5  ;;  %v8008_v63 = vld [vmem:[#allocation11 + $0x100] sm:$0xff]  ;;  %v8018_v51 = vld [vmem:[#allocation11 + $0x150] sm:$0xff] }
 0x309   : > { %v4062_v24 = vor.u32 %v4060_v31, %v10199_v7  ;;  %v4500_v38 = vpack.c.b16 %v4490_v18, %v4489_v36  ;;  %v3869_v30 = vsel %vm3829_vm11, %v3809_v25, %v3849_v35  ;;  %v5227_v22 = vshrl.u32 %v10181_v15, 16  ;;  %v3760_v52 = vpop.f32.mrf.mxu0  ;;  %v3471_v31 = vpop.f32.mrf.mxu3  ;;  %5509 = vmatpush.bf16.msrb.mxu2 %v8008_v63  ;;  %v3951_v18 = vld [vmem:[#allocation3 + $0x74] sm:$0x1] }
 0x30a   : > { %v4421_v32 = vor.u32 %v4420_v16, %v4417_v26  ;;  %v3889_v12 = vpack.c.bf16 %v3869_v30, %v3869_v30  ;;  %v8028_v45 = vld [vmem:[#allocation3 + $0x48] sm:$0xff]  ;;  %v7541_v0 = vrot.slane %v4759_v61, 9  ;;  %v10219_v14 = vrot.slane %v5223_v9, 5 }
 0x30b   : > { %v4158_v37 = vsel %vm8922_vm9, %v4062_v24, %v4157_v44  ;;  %4592 = vmatmul.bf16.gmra.mxu1 %v4500_v38  ;;  %v7966_v34 = vld [vmem:[#allocation3 + $0x48] sm:$0xff]  ;;  %v10221_v53 = vadd.f32 %v2795_v4, %v2523_v27  ;;  %v4063_v10 = vrot.slane %v10199_v7, 4  ;;  %v3786_v1 = vadd.f32 %v3760_v52, %v10169_v40  ;;  %v4268_v11 = vld [vmem:[#allocation3 + $0x50] sm:$0x1]  ;;  %5975 = vmatmul.bf16.gmra.mxu0 %v8028_v45  ;;  %v4161_v44 = vld [vmem:[#allocation3 + $0x5c] sm:$0x1] }
 0x30c   : > { %v4243_v19 = vld [vmem:[#allocation3 + $0x4c] sm:$0xf]  ;;  %4159 = vst [vmem:[#allocation3 + $0x54] sm:$0xf] %v4158_v37  ;;  %v4065_v41 = vshrl.u32 %v3889_v12, 16  ;;  %v4824_v47 = vrot.slane %v4268_v11, 5  ;;  %4742 = vmatmul.bf16.gmra.mxu2 %v7966_v34  ;;  %5757 = vmatpush.bf16.msra.mxu3 %v8018_v51  ;;  %v3019_v37 = vpop.f32.mrf.mxu2  ;;  %v5220_v34 = vor.u32 %v10214_v54, %v10210_v20  ;;  %v3494_v54 = vadd.f32 %v3471_v31, %v10205_v56 }
 0x30d   : > { %v4821_v21 = vrot.slane %v4243_v19, 5  ;;  %v4422_v50 = vrot.slane %v4421_v32, 4  ;;  %v4424_v3 = vshll.u32 %v4243_v19, 16  ;;  %v3810_v8 = vadd.f32 %v10135_v58, %v3786_v1  ;;  %v10236_v38 = vld [vmem:[#allocation3 + $0x14] sm:$0x1]  ;;  %v8017_v1 = vld [vmem:[#allocation11 + $0x148] sm:$0xff] }
 0x30e   : > { %v4428_v46 = vshrl.u32 %v4243_v19, 16  ;;  %v4067_v40 = vrot.slane %v4065_v41, 7  ;;  %v4068_v13 = vshll.u32 %v3889_v12, 16  ;;  %v4434_v59 = vshll.u32 %v4268_v11, 16  ;;  %v4164_v41 = vld [vmem:[#allocation3 + $0x60] sm:$0xf] }
 0x30f   : > { %v4822_v9 = vsel %vm9058_vm15, %v7541_v0, %v4821_v21  ;;  %v4823_v48 = vrot.slane %v4821_v21, 4  ;;  %v4426_v2 = vrot.slane %v4424_v3, 5  ;;  %vm3830_vm13 = vcmp.gt.f32.partialorder %v3810_v8, 0.0  ;;  %v8055_v20 = vld [vmem:[#allocation11 + $0x238] sm:$0xff] }
 0x310   : > { %v3850_v25 = vmul.f32 0.01, %v3810_v8  ;;  %v4430_v36 = vrot.slane %v4428_v46, 4  ;;  %v4070_v17 = vor.u32 %v4068_v13, %v4067_v40  ;;  %v4072_v33 = vrot.slane %v4067_v40, 4  ;;  %5758 = vmatpush.bf16.msra.mxu3 %v8017_v1  ;;  %6575 = vmatpush.bf16.msra.mxu2 %v8055_v20 }
 0x311   : > { %v4825_v42 = vsel %vm9058_vm15, %v4823_v48, %v4824_v47  ;;  %v4862_v55 = vunpack.c.l.b16 %v4822_v9  ;;  %v4427_v26 = vsel %vm8972_vm12, %v4422_v50, %v4426_v2  ;;  %v5229_v23 = vrot.slane %v5227_v22, 4  ;;  %v3762_v16 = vpop.f32.mrf.mxu0  ;;  %v8016_v48 = vld [vmem:[#allocation11 + $0x140] sm:$0xff]  ;;  %v3473_v46 = vpop.f32.mrf.mxu3 }
 0x312   : > { %v4863_v7 = vunpack.c.l.b16 %v4825_v42  ;;  %v3870_v61 = vsel %vm3830_vm13, %v3810_v8, %v3850_v25  ;;  %v4431_v49 = vor.u32 %v4430_v36, %v4426_v2  ;;  %v4071_v29 = vsel %vm8915_vm8, %v4063_v10, %v4070_v17 }
 0x313   : > { %v4162_v27 = vsel %vm8884_vm3, %v4072_v33, %v4161_v44  ;;  %v3890_v35 = vpack.c.bf16 %v3870_v61, %v3870_v61  ;;  %v4244_v24 = vld [vmem:[#allocation3 + $0x54] sm:$0xf]  ;;  %4160 = vst [vmem:[#allocation3 + $0x58] sm:$0xf] %v4071_v29  ;;  %v3787_v57 = vadd.f32 %v3762_v16, %v10175_v62  ;;  %v4436_v32 = vrot.slane %v4434_v59, 5  ;;  %v8000_v62 = vld [vmem:[#allocation11 + $0xc0] sm:$0xff] }
 0x314   : > { %v4872_v4 = vpack.c.b16 %v4863_v7, %v4862_v55  ;;  %v4432_v30 = vrot.slane %v4431_v49, 4  ;;  %v3952_v22 = vsel %vm8889_vm4, 0, %v3951_v18  ;;  %4163 = vst [vmem:[#allocation3 + $0x5c] sm:$0x1] %v4162_v27  ;;  %v4439_v52 = vshrl.u32 %v4244_v24, 16  ;;  %5131 = vmatpush.bf16.msrb.mxu1 %v8000_v62  ;;  %5759 = vmatpush.bf16.msra.mxu3 %v8016_v48 }
 0x315   : > { %v4074_v12 = vshrl.u32 %v3890_v35, 16  ;;  %v4442_v45 = vshll.u32 %v4244_v24, 16  ;;  %v3811_v19 = vadd.f32 %v10135_v58, %v3787_v57  ;;  %3953 = vst [vmem:[#allocation3 + $0x74] sm:$0x1] %v3952_v22  ;;  %v5230_v10 = vor.u32 %v5229_v23, %v10219_v14  ;;  %v4760_v9 = vld [vmem:[#allocation3 + $0x54] sm:$0xe] }
 0x316   : > { %4968 = vmatmul.bf16.gmra.mxu3 %v4872_v4  ;;  %v4437_v0 = vsel %vm8972_vm12, %v4432_v30, %v4436_v32  ;;  %v5233_v6 = vshll.u32 %v10236_v38, 16  ;;  %v4077_v21 = vshll.u32 %v3890_v35, 16  ;;  %v4491_v47 = vunpack.c.l.b16 %v4427_v26  ;;  %v8047_v30 = vld [vmem:[#allocation11 + $0x1f8] sm:$0xff] }
 0x317   : > { %v10248_v11 = vrot.slane %v4074_v12, 7  ;;  %v4492_v50 = vunpack.c.l.b16 %v4437_v0  ;;  %v3041_v3 = vadd.f32 %v3019_v37, %v10221_v53  ;;  %vm3831_vm4 = vcmp.gt.f32.partialorder %v3811_v19, 0.0 }
 0x318   : > { %v3851_v8 = vmul.f32 0.01, %v3811_v19  ;;  %v4441_v40 = vrot.slane %v4439_v52, 4  ;;  %v4444_v13 = vrot.slane %v4442_v45, 5  ;;  %v10253_v59 = vrot.slane %v5220_v34, 4  ;;  %6325 = vmatpush.bf16.msra.mxu1 %v8047_v30 }
 0x319   : > { %v4079_v63 = vor.u32 %v4077_v21, %v10248_v11  ;;  %v4501_v51 = vpack.c.b16 %v4492_v50, %v4491_v47  ;;  %v10255_v44 = vrot.slane %v5230_v10, 4  ;;  %v10257_v56 = vrot.slane %v5233_v6, 5  ;;  %v3765_v42 = vpop.f32.mrf.mxu0  ;;  %v4168_v52 = vld [vmem:[#allocation3 + $0x68] sm:$0x1]  ;;  %v10272_v47 = vld [vmem:[#allocation3 + $0x1c] sm:$0xf] }
 0x31a   : > { %v3871_v2 = vsel %vm3831_vm4, %v3811_v19, %v3851_v8  ;;  %v4080_v53 = vrot.slane %v10248_v11, 4  ;;  %v8029_v36 = vld [vmem:[#allocation3 + $0x54] sm:$0xff]  ;;  %v7542_v55 = vrot.slane %v4760_v9, 9  ;;  %v3495_v7 = vadd.f32 %v3473_v46, %v3041_v3 }
 0x31b   : > { %v4165_v31 = vsel %vm8922_vm9, %v4079_v63, %v4164_v41  ;;  %v3891_v25 = vpack.c.bf16 %v3871_v2, %v3871_v2  ;;  %4597 = vmatmul.bf16.gmra.mxu1 %v4501_v51  ;;  %v7967_v17 = vld [vmem:[#allocation3 + $0x54] sm:$0xff]  ;;  %v3788_v18 = vadd.f32 %v3765_v42, %v3494_v54  ;;  %v4269_v61 = vld [vmem:[#allocation3 + $0x5c] sm:$0x1]  ;;  %5980 = vmatmul.bf16.gmra.mxu0 %v8029_v36  ;;  %v5601_v41 = vrot.slane %v10181_v15, 5  ;;  %v8054_v42 = vld [vmem:[#allocation11 + $0x230] sm:$0xff] }
 0x31c   : > { %v4245_v33 = vld [vmem:[#allocation3 + $0x58] sm:$0xf]  ;;  %4166 = vst [vmem:[#allocation3 + $0x60] sm:$0xf] %v4165_v31  ;;  %v4831_v29 = vrot.slane %v4269_v61, 5  ;;  %v4445_v27 = vor.u32 %v4444_v13, %v4441_v40  ;;  %4747 = vmatmul.bf16.gmra.mxu2 %v7967_v17  ;;  %v4458_v19 = vshll.u32 %v4269_v61, 16  ;;  %v5236_v21 = vsel %vm8972_vm12, %v10255_v44, %v10257_v56 }
 0x31d   : > { %v4828_v26 = vrot.slane %v4245_v33, 5  ;;  %v4448_v49 = vshll.u32 %v4245_v33, 16  ;;  %v4082_v23 = vshrl.u32 %v3891_v25, 16  ;;  %v4452_v35 = vshrl.u32 %v4245_v33, 16  ;;  %v5192_v51 = vld [vmem:[#allocation3 + $0x18] sm:$0xf]  ;;  %6576 = vmatpush.bf16.msra.mxu2 %v8054_v42 }
 0x31e   : > { %v3812_v16 = vadd.f32 %v10135_v58, %v3788_v18  ;;  %v4085_v22 = vshll.u32 %v3891_v25, 16  ;;  %v4446_v11 = vrot.slane %v4445_v27, 4  ;;  %v4460_v63 = vrot.slane %v4458_v19, 5  ;;  %v4223_v61 = vld [vmem:[#allocation3 + $0x6c] sm:$0xf] }
 0x31f   : > { %v4829_v4 = vsel %vm9058_vm15, %v7542_v55, %v4828_v26  ;;  %v4830_v24 = vrot.slane %v4828_v26, 4  ;;  %v4450_v57 = vrot.slane %v4448_v49, 5  ;;  %v4084_v32 = vrot.slane %v4082_v23, 7  ;;  %v5567_v55 = vld [vmem:[#allocation3 + $0xc] sm:$0xe] }
 0x320   : > { %v4864_v37 = vunpack.c.l.b16 %v4829_v4  ;;  %v4454_v12 = vrot.slane %v4452_v35, 4  ;;  %vm3832_vm14 = vcmp.gt.f32.partialorder %v3812_v16, 0.0  ;;  %v3852_v45 = vmul.f32 0.01, %v3812_v16  ;;  %v5195_v15 = vld [vmem:[#allocation3 + $0x24] sm:$0xf] }
 0x321   : > { %v4832_v34 = vsel %vm9058_vm15, %v4830_v24, %v4831_v29  ;;  %v4087_v0 = vor.u32 %v4085_v22, %v4084_v32  ;;  %v4089_v62 = vrot.slane %v4084_v32, 4  ;;  %v3767_v3 = vpop.f32.mrf.mxu0  ;;  %v4451_v48 = vsel %vm8972_vm12, %v4446_v11, %v4450_v57  ;;  %6577 = vmatpush.bf16.msra.mxu2 %v8053_v28 }
 0x322   : > { %v4865_v10 = vunpack.c.l.b16 %v4832_v34  ;;  %v4455_v6 = vor.u32 %v4454_v12, %v4450_v57  ;;  %v3872_v1 = vsel %vm3832_vm14, %v3812_v16, %v3852_v45  ;;  %v3789_v9 = vadd.f32 %v3767_v3, %v3495_v7  ;;  %v8046_v57 = vld [vmem:[#allocation11 + $0x1f0] sm:$0xff]  ;;  %v10298_v12 = vld [vmem:[#allocation3 + $0x20] sm:$0x1] }
 0x323   : > { %v4088_v50 = vsel %vm8915_vm8, %v4080_v53, %v4087_v0  ;;  %v4169_v20 = vsel %vm8884_vm3, %v4089_v62, %v4168_v52  ;;  %v3892_v54 = vpack.c.bf16 %v3872_v1, %v3872_v1  ;;  %v5226_v13 = vsel %vm8972_vm12, %v10253_v59, %v10219_v14  ;;  %6326 = vmatpush.bf16.msra.mxu1 %v8046_v57  ;;  %v4227_v1 = vld [vmem:[#allocation3 + $0x74] sm:$0x1] }
 0x324   : > { %v4873_v8 = vpack.c.b16 %v4865_v10, %v4864_v37  ;;  %4167 = vst [vmem:[#allocation3 + $0x64] sm:$0xf] %v4088_v50  ;;  %v4456_v46 = vrot.slane %v4455_v6, 4  ;;  %v5247_v2 = vshll.u32 %v10272_v47, 16  ;;  %v5251_v44 = vshrl.u32 %v10272_v47, 16 }
 0x325   : > { %4170 = vst [vmem:[#allocation3 + $0x68] sm:$0x1] %v4169_v20  ;;  %v4200_v40 = vsel %vm9181_vm0, 0, %v3892_v54  ;;  %v3813_v53 = vadd.f32 %v10135_v58, %v3789_v9  ;;  %v5603_v25 = vrot.slane %v5601_v41, 4  ;;  %v4493_v36 = vunpack.c.l.b16 %v4451_v48  ;;  %v10306_v9 = vld [vmem:[#allocation3 + $0x28] sm:$0xf] }
 0x326   : > { %v4203_v56 = vshrl.u32 %v4200_v40, 16  ;;  %4973 = vmatmul.bf16.gmra.mxu3 %v4873_v8  ;;  %v4461_v31 = vsel %vm8972_vm12, %v4456_v46, %v4460_v63  ;;  %v5423_v33 = vunpack.c.l.b16 %v5236_v21  ;;  %v5238_v7 = vshrl.u32 %v5192_v51, 16 }
 0x327   : > { %v4494_v17 = vunpack.c.l.b16 %v4461_v31  ;;  %v4206_v14 = vshll.u32 %v4200_v40, 16  ;;  %vm3833_vm1 = vcmp.gt.f32.partialorder %v3813_v53, 0.0  ;;  %v3853_v59 = vmul.f32 0.01, %v3813_v53 }
 0x328   : > { %v4205_v18 = vrot.slane %v4203_v56, 7  ;;  %v5241_v49 = vshll.u32 %v5192_v51, 16  ;;  %v10291_v58 = vrot.slane %v5247_v2, 5  ;;  %v5253_v23 = vrot.slane %v5251_v44, 4 }
 0x329   : > { %v4502_v26 = vpack.c.b16 %v4494_v17, %v4493_v36  ;;  %v3873_v27 = vsel %vm3833_vm1, %v3813_v53, %v3853_v59  ;;  %v5422_v35 = vunpack.c.l.b16 %v5226_v13  ;;  %v5604_v16 = vrot.slane %v10236_v38, 5  ;;  %v7992_v17 = vld [vmem:[#allocation3 + $0xc] sm:$0xff] }
 0x32a   : > { %v4208_v29 = vor.u32 %v4206_v14, %v4205_v18  ;;  %v3893_v4 = vpack.c.bf16 %v3873_v27, %v3873_v27  ;;  %v7671_v22 = vrot.slane %v5567_v55, 9  ;;  %v5240_v38 = vrot.slane %v5238_v7, 4 }
 0x32b   : > { %4602 = vmatmul.bf16.gmra.mxu1 %v4502_v26  ;;  %v8030_v24 = vld [vmem:[#allocation3 + $0x60] sm:$0xff]  ;;  %v5438_v32 = vpack.c.b16 %v5423_v33, %v5422_v35  ;;  %v5605_v37 = vsel %vm9058_vm15, %v5603_v25, %v5604_v16  ;;  %v5243_v45 = vrot.slane %v5241_v49, 5  ;;  %v5254_v34 = vor.u32 %v5253_v23, %v10291_v58  ;;  %v5568_v33 = vld [vmem:[#allocation3 + $0x18] sm:$0xe] }
 0x32c   : > { %v4224_v30 = vsel %vm8922_vm9, %v4208_v29, %v4223_v61  ;;  %v4201_v52 = vsel %vm9181_vm0, 0, %v3893_v4  ;;  %5985 = vmatmul.bf16.gmra.mxu0 %v8030_v24  ;;  %v5602_v39 = vsel %vm9058_vm15, %v7671_v22, %v5601_v41  ;;  %v5257_v0 = vshll.u32 %v10298_v12, 16  ;;  %v8045_v26 = vld [vmem:[#allocation11 + $0x1e8] sm:$0xff]  ;;  %v5197_v29 = vld [vmem:[#allocation3 + $0x2c] sm:$0x1] }
 0x32d   : > { %4225 = vst [vmem:[#allocation3 + $0x6c] sm:$0xf] %v4224_v30  ;;  %v4211_v19 = vshrl.u32 %v4201_v52, 16  ;;  %5510 = vmatmul.bf16.vlgmr.msrb.gmra.mxu2 %v5438_v32  ;;  %v4214_v10 = vshll.u32 %v4201_v52, 16  ;;  %v5673_v6 = vunpack.c.l.b16 %v5605_v37  ;;  %v5244_v21 = vor.u32 %v5243_v45, %v5240_v38  ;;  %6327 = vmatpush.bf16.msra.mxu1 %v8045_v26 }
 0x32e   : > { %v4713_v11 = vpop.f32.mrf.mxu2  ;;  %v5255_v50 = vrot.slane %v5254_v34, 4  ;;  %v4209_v20 = vrot.slane %v4205_v18, 4  ;;  %v5672_v8 = vunpack.c.l.b16 %v5602_v39  ;;  %v5259_v48 = vrot.slane %v5257_v0, 5  ;;  %v10327_v34 = vld [vmem:[#allocation3 + $0x34] sm:$0xf] }
 0x32f   : > { %v4213_v62 = vrot.slane %v4211_v19, 7  ;;  %v5608_v51 = vrot.slane %v10272_v47, 5  ;;  %v5245_v40 = vrot.slane %v5244_v21, 4  ;;  %v5271_v2 = vshll.u32 %v10306_v9, 16 }
 0x330   : > { %v5688_v63 = vpack.c.b16 %v5673_v6, %v5672_v8  ;;  %v5260_v13 = vsel %vm8972_vm12, %v5255_v50, %v5259_v48  ;;  %v5275_v44 = vshrl.u32 %v10306_v9, 16  ;;  %v5262_v31 = vshrl.u32 %v5195_v15, 16  ;;  %v8052_v50 = vld [vmem:[#allocation11 + $0x220] sm:$0xff] }
 0x331   : > { %v4216_v54 = vor.u32 %v4214_v10, %v4213_v62  ;;  %v4218_v3 = vrot.slane %v4213_v62, 4  ;;  %v5250_v5 = vsel %vm8972_vm12, %v5245_v40, %v10291_v58  ;;  %v5425_v53 = vunpack.c.l.b16 %v5260_v13  ;;  %6578 = vmatpush.bf16.msra.mxu2 %v8052_v50 }
 0x332   : > { %v5610_v47 = vrot.slane %v5608_v51, 4  ;;  %v5265_v55 = vshll.u32 %v5195_v15, 16  ;;  %v5273_v7 = vrot.slane %v5271_v2, 5  ;;  %v5277_v18 = vrot.slane %v5275_v44, 4 }
 0x333   : > { %v4217_v46 = vsel %vm8915_vm8, %v4209_v20, %v4216_v54  ;;  %v4228_v41 = vsel %vm8884_vm3, %v4218_v3, %v4227_v1  ;;  %v5424_v14 = vunpack.c.l.b16 %v5250_v5  ;;  %v5611_v61 = vrot.slane %v10298_v12, 5  ;;  %v5198_v1 = vld [vmem:[#allocation3 + $0x30] sm:$0xf]  ;;  %v8044_v5 = vld [vmem:[#allocation11 + $0x1e0] sm:$0xff] }
 0x334   : > { %4226 = vst [vmem:[#allocation3 + $0x70] sm:$0xf] %v4217_v46  ;;  %v7672_v23 = vrot.slane %v5568_v33, 9  ;;  %v5264_v35 = vrot.slane %v5262_v31, 4  ;;  %v5267_v16 = vrot.slane %v5265_v55, 5  ;;  %v5278_v4 = vor.u32 %v5277_v18, %v5273_v7  ;;  %6328 = vmatpush.bf16.msra.mxu1 %v8044_v5 }
 0x335   : > { %4229 = vst [vmem:[#allocation3 + $0x74] sm:$0x1] %v4228_v41  ;;  %v5439_v49 = vpack.c.b16 %v5425_v53, %v5424_v14  ;;  %v5612_v27 = vsel %vm9058_vm15, %v5610_v47, %v5611_v61  ;;  %v5281_v57 = vshll.u32 %v5197_v29, 16  ;;  %v5615_v62 = vrot.slane %v10306_v9, 5  ;;  %v5200_v47 = vld [vmem:[#allocation3 + $0x38] sm:$0x1] }
 0x336   : > { %5760 = vmatmul.bf16.vlgmr.msra.gmra.mxu3 %v5688_v63  ;;  %v4715_v36 = vpop.f32.mrf.mxu2  ;;  %v5609_v24 = vsel %vm9058_vm15, %v7672_v23, %v5608_v51  ;;  %v5675_v32 = vunpack.c.l.b16 %v5612_v27  ;;  %v5268_v52 = vor.u32 %v5267_v16, %v5264_v35  ;;  %v5279_v38 = vrot.slane %v5278_v4, 4  ;;  %v7993_v63 = vld [vmem:[#allocation3 + $0x18] sm:$0xff]  ;;  %v5569_v51 = vld [vmem:[#allocation3 + $0x24] sm:$0xe]  ;;  %v10344_v23 = vld [vmem:[#allocation3 + $0x40] sm:$0xf] }
 0x337   : > { %v4568_v56 = vpop.f32.mrf.mxu1  ;;  %v5674_v45 = vunpack.c.l.b16 %v5609_v24  ;;  %v5283_v39 = vrot.slane %v5281_v57, 5  ;;  %v5299_v21 = vshrl.u32 %v10327_v34, 16  ;;  %v5617_v8 = vrot.slane %v5615_v62, 4  ;;  %v5201_v57 = vld [vmem:[#allocation3 + $0x3c] sm:$0xf] }
 0x338   : > { %v4714_v25 = vadd.f32 %v4713_v11, %v4568_v56  ;;  %v4939_v42 = vpop.f32.mrf.mxu3  ;;  %v5269_v10 = vrot.slane %v5268_v52, 4  ;;  %v5295_v11 = vshll.u32 %v10327_v34, 16  ;;  %v5286_v48 = vshrl.u32 %v5198_v1, 16 }
 0x339   : > { %v5689_v0 = vpack.c.b16 %v5675_v32, %v5674_v45  ;;  %v5284_v6 = vsel %vm8972_vm12, %v5279_v38, %v5283_v39  ;;  %v5289_v15 = vshll.u32 %v5198_v1, 16  ;;  %v5301_v13 = vrot.slane %v5299_v21, 4 }
 0x33a   : > { %v10320_v59 = vadd.f32 %v4939_v42, %v4714_v25  ;;  %v5274_v20 = vsel %vm8972_vm12, %v5269_v10, %v5273_v7  ;;  %v5427_v3 = vunpack.c.l.b16 %v5284_v6  ;;  %v5297_v40 = vrot.slane %v5295_v11, 5  ;;  %v5570_v10 = vld [vmem:[#allocation3 + $0x30] sm:$0xe] }
 0x33b   : > { %5132 = vmatmul.bf16.vlgmr.msrb.gmra.mxu1 %v7992_v17  ;;  %v8031_v58 = vld [vmem:[#allocation3 + $0x6c] sm:$0xff]  ;;  %v5426_v2 = vunpack.c.l.b16 %v5274_v20  ;;  %v5618_v28 = vrot.slane %v5197_v29, 5  ;;  %v7673_v53 = vrot.slane %v5569_v51, 9  ;;  %v5288_v25 = vrot.slane %v5286_v48, 4  ;;  %v5203_v48 = vld [vmem:[#allocation3 + $0x44] sm:$0x1] }
 0x33c   : > { %5990 = vmatmul.bf16.gmra.mxu0 %v8031_v58  ;;  %v5291_v42 = vrot.slane %v5289_v15, 5  ;;  %v5305_v33 = vshll.u32 %v5200_v47, 16  ;;  %v5622_v16 = vrot.slane %v10327_v34, 5  ;;  %v5323_v32 = vshrl.u32 %v10344_v23, 16 }
 0x33d   : > { %5515 = vmatmul.bf16.gmra.mxu2 %v5439_v49  ;;  %v5440_v56 = vpack.c.b16 %v5427_v3, %v5426_v2  ;;  %v5619_v31 = vsel %vm9058_vm15, %v5617_v8, %v5618_v28  ;;  %v5616_v17 = vsel %vm9058_vm15, %v7673_v53, %v5615_v62  ;;  %v5310_v38 = vshrl.u32 %v5201_v57, 16  ;;  %v7994_v62 = vld [vmem:[#allocation3 + $0x24] sm:$0xff] }
 0x33e   : > { %v4718_v12 = vpop.f32.mrf.mxu2  ;;  %v5677_v7 = vunpack.c.l.b16 %v5619_v31  ;;  %v5292_v26 = vor.u32 %v5291_v42, %v5288_v25  ;;  %v5676_v58 = vunpack.c.l.b16 %v5616_v17  ;;  %v5307_v27 = vrot.slane %v5305_v33, 5  ;;  %v10361_v31 = vld [vmem:[#allocation3 + $0x4c] sm:$0xf] }
 0x33f   : > { %v4570_v30 = vpop.f32.mrf.mxu1  ;;  %v5313_v45 = vshll.u32 %v5201_v57, 16  ;;  %v5624_v6 = vrot.slane %v5622_v16, 4  ;;  %v5325_v11 = vrot.slane %v5323_v32, 4  ;;  %v5625_v20 = vrot.slane %v5200_v47, 5  ;;  %v5571_v57 = vld [vmem:[#allocation3 + $0x3c] sm:$0xe] }
 0x340   : > { %v4716_v22 = vadd.f32 %v4715_v36, %v4570_v30  ;;  %v4941_v37 = vpop.f32.mrf.mxu3  ;;  %v5302_v36 = vor.u32 %v5301_v13, %v5297_v40  ;;  %v5690_v35 = vpack.c.b16 %v5677_v7, %v5676_v58  ;;  %v5293_v4 = vrot.slane %v5292_v26, 4  ;;  %v5204_v7 = vld [vmem:[#allocation3 + $0x48] sm:$0xf] }
 0x341   : > { %v5319_v30 = vshll.u32 %v10344_v23, 16  ;;  %v7674_v8 = vrot.slane %v5570_v10, 9  ;;  %v5329_v15 = vshll.u32 %v5203_v48, 16  ;;  %v5629_v17 = vrot.slane %v10344_v23, 5 }
 0x342   : > { %v10329_v19 = vadd.f32 %v4941_v37, %v4716_v22  ;;  %v5303_v49 = vrot.slane %v5302_v36, 4  ;;  %v8051_v22 = vld [vmem:[#allocation11 + $0x218] sm:$0xff]  ;;  %v5298_v37 = vsel %vm8972_vm12, %v5293_v4, %v5297_v40  ;;  %vm6772_vm8 = vcmask 27648  }
 0x343   : > { %6579 = vmatpush.bf16.msra.mxu2 %v8051_v22  ;;  %v5321_v1 = vrot.slane %v5319_v30, 5  ;;  %v5428_v21 = vunpack.c.l.b16 %v5298_v37  ;;  %v5623_v51 = vsel %vm9058_vm15, %v7674_v8, %v5622_v16  ;;  %v5331_v42 = vrot.slane %v5329_v15, 5 }
 0x344   : > { %v5308_v24 = vsel %vm8972_vm12, %v5303_v49, %v5307_v27  ;;  %v5678_v47 = vunpack.c.l.b16 %v5623_v51  ;;  %v5334_v27 = vshrl.u32 %v5204_v7, 16  ;;  %v5631_v30 = vrot.slane %v5629_v17, 4 }
 0x345   : > { %v5429_v52 = vunpack.c.l.b16 %v5308_v24  ;;  %v7995_v24 = vld [vmem:[#allocation3 + $0x30] sm:$0xff] }
 0x346   : > { %5765 = vmatmul.bf16.gmra.mxu3 %v5689_v0  ;;  %v4720_v41 = vpop.f32.mrf.mxu2 }
 0x347   : > { %v4573_v54 = vpop.f32.mrf.mxu1  ;;  %v5441_v3 = vpack.c.b16 %v5429_v52, %v5428_v21  ;;  %v5632_v52 = vrot.slane %v5203_v48, 5 }
 0x348   : > { %v4719_v9 = vadd.f32 %v4718_v12, %v4573_v54  ;;  %v4944_v46 = vpop.f32.mrf.mxu3  ;;  %v8043_v54 = vld [vmem:[#allocation11 + $0x1d8] sm:$0xff] }
 0x349   : > { %6329 = vmatpush.bf16.msra.mxu1 %v8043_v54 }
 0x34a   : > { %v10338_v44 = vadd.f32 %v4944_v46, %v4719_v9  ;;  %v5626_v9 = vsel %vm9058_vm15, %v5624_v6, %v5625_v20  ;;  %v5312_v46 = vrot.slane %v5310_v38, 4  ;;  %v8042_v38 = vld [vmem:[#allocation11 + $0x1d0] sm:$0xff] }
 0x34b   : > { %5137 = vmatmul.bf16.gmra.mxu1 %v7993_v63  ;;  %v5326_v63 = vor.u32 %v5325_v11, %v5321_v1  ;;  %v5679_v13 = vunpack.c.l.b16 %v5626_v9 }
 0x34d   : > { %5520 = vmatmul.bf16.gmra.mxu2 %v5440_v56  ;;  %v5327_v53 = vrot.slane %v5326_v63, 4  ;;  %v5691_v36 = vpack.c.b16 %v5679_v13, %v5678_v47  ;;  %6330 = vmatpush.bf16.msra.mxu1 %v8042_v38 }
 0x34f   : > { %v4575_v55 = vpop.f32.mrf.mxu1  ;;  %v4723_v61 = vpop.f32.mrf.mxu2 }
 0x350   : > { %v4721_v18 = vadd.f32 %v4720_v41, %v4575_v55  ;;  %v4946_v14 = vpop.f32.mrf.mxu3  ;;  %v5315_v41 = vrot.slane %v5313_v45, 5  ;;  %v5332_v55 = vsel %vm8972_vm12, %v5327_v53, %v5331_v42  ;;  %v8049_v53 = vld [vmem:[#allocation11 + $0x208] sm:$0xff] }
 0x351   : > { %v5431_v58 = vunpack.c.l.b16 %v5332_v55 }
 0x352   : > { %v10346_v29 = vadd.f32 %v4946_v14, %v4721_v18  ;;  %v5316_v56 = vor.u32 %v5315_v41, %v5312_v46  ;;  %v5343_v18 = vshll.u32 %v10361_v31, 16  ;;  %v5347_v14 = vshrl.u32 %v10361_v31, 16  ;;  %v10378_v41 = vld [vmem:[#allocation3 + $0x58] sm:$0xf] }
 0x354   : > { %v5317_v33 = vrot.slane %v5316_v56, 4  ;;  %v5345_v32 = vrot.slane %v5343_v18, 5  ;;  %v5349_v22 = vrot.slane %v5347_v14, 4  ;;  %v5371_v56 = vshrl.u32 %v10378_v41, 16  ;;  %v7996_v18 = vld [vmem:[#allocation3 + $0x3c] sm:$0xff] }
 0x355   : > { %v5572_v14 = vld [vmem:[#allocation3 + $0x48] sm:$0xe] }
 0x356   : > { %5770 = vmatmul.bf16.gmra.mxu3 %v5690_v35  ;;  %v5322_v26 = vsel %vm8972_vm12, %v5317_v33, %v5321_v1  ;;  %v5337_v35 = vshll.u32 %v5204_v7, 16  ;;  %v5350_v6 = vor.u32 %v5349_v22, %v5345_v32 }
 0x357   : > { %v4578_v12 = vpop.f32.mrf.mxu1  ;;  %v4725_v0 = vpop.f32.mrf.mxu2  ;;  %v5430_v37 = vunpack.c.l.b16 %v5322_v26 }
 0x358   : > { %v4724_v34 = vadd.f32 %v4723_v61, %v4578_v12  ;;  %v8050_v61 = vld [vmem:[#allocation11 + $0x210] sm:$0xff]  ;;  %v5339_v10 = vrot.slane %v5337_v35, 5  ;;  %v5351_v9 = vrot.slane %v5350_v6, 4 }
 0x359   : > { %v4949_v39 = vpop.f32.mrf.mxu3  ;;  %6580 = vmatpush.bf16.msra.mxu2 %v8050_v61  ;;  %v5442_v45 = vpack.c.b16 %v5431_v58, %v5430_v37 }
 0x35a   : > { %v10355_v50 = vadd.f32 %v4949_v39, %v4724_v34  ;;  %v7675_v34 = vrot.slane %v5571_v57, 9  ;;  %v5206_v39 = vld [vmem:[#allocation3 + $0x50] sm:$0x1] }
 0x35b   : > { %5142 = vmatmul.bf16.gmra.mxu1 %v7994_v62  ;;  %v5336_v62 = vrot.slane %v5334_v27, 4  ;;  %v5353_v11 = vshll.u32 %v5206_v39, 16  ;;  %v5639_v35 = vrot.slane %v5206_v39, 5 }
 0x35c   : > { %v5630_v1 = vsel %vm9058_vm15, %v7675_v34, %v5629_v17 }
 0x35d   : > { %5525 = vmatmul.bf16.gmra.mxu2 %v5441_v3  ;;  %v5340_v48 = vor.u32 %v5339_v10, %v5336_v62  ;;  %v5680_v46 = vunpack.c.l.b16 %v5630_v1  ;;  %v5355_v51 = vrot.slane %v5353_v11, 5  ;;  %v10395_v1 = vld [vmem:[#allocation3 + $0x64] sm:$0xf] }
 0x35e   : > { %6581 = vmatpush.bf16.msra.mxu2 %v8049_v53  ;;  %v7997_v53 = vld [vmem:[#allocation3 + $0x48] sm:$0xff] }
 0x35f   : > { %v4580_v40 = vpop.f32.mrf.mxu1  ;;  %v4728_v5 = vpop.f32.mrf.mxu2  ;;  %v5341_v13 = vrot.slane %v5340_v48, 4  ;;  %v5210_v48 = vld [vmem:[#allocation3 + $0x60] sm:$0xf] }
 0x360   : > { %v4726_v2 = vadd.f32 %v4725_v0, %v4580_v40  ;;  %v5633_v0 = vsel %vm9058_vm15, %v5631_v30, %v5632_v52  ;;  %v5636_v40 = vrot.slane %v10361_v31, 5 }
 0x361   : > { %v4951_v28 = vpop.f32.mrf.mxu3  ;;  %v5681_v20 = vunpack.c.l.b16 %v5633_v0  ;;  %v5346_v47 = vsel %vm8972_vm12, %v5341_v13, %v5345_v32 }
 0x362   : > { %v10363_v25 = vadd.f32 %v4951_v28, %v4726_v2  ;;  %v5356_v2 = vsel %vm8972_vm12, %v5351_v9, %v5355_v51  ;;  %v5207_v28 = vld [vmem:[#allocation3 + $0x54] sm:$0xf]  ;;  %v5638_v17 = vrot.slane %v5636_v40, 4  ;;  %v5432_v58 = vunpack.c.l.b16 %v5346_v47  ;;  %v8048_v51 = vld [vmem:[#allocation11 + $0x200] sm:$0xff] }
 0x363   : > { %v5692_v15 = vpack.c.b16 %v5681_v20, %v5680_v46  ;;  %v5358_v33 = vshrl.u32 %v5207_v28, 16  ;;  %v5361_v61 = vshll.u32 %v5207_v28, 16  ;;  %v5391_v9 = vshll.u32 %v10395_v1, 16  ;;  %6582 = vmatpush.bf16.msra.mxu2 %v8048_v51  ;;  %v5573_v47 = vld [vmem:[#allocation3 + $0x54] sm:$0xe] }
 0x364   : > { %v5640_v57 = vsel %vm9058_vm15, %v5638_v17, %v5639_v35  ;;  %v5395_v46 = vshrl.u32 %v10395_v1, 16  ;;  %v5382_v28 = vshrl.u32 %v5210_v48, 16  ;;  %v6013_v51 = vld [vmem:[#allocation3 + $0x1c] sm:$0xf] }
 0x365   : > { %v5360_v30 = vrot.slane %v5358_v33, 4  ;;  %v5363_v32 = vrot.slane %v5361_v61, 5  ;;  %v5212_v61 = vld [vmem:[#allocation3 + $0x68] sm:$0x1] }
 0x366   : > { %5775 = vmatmul.bf16.gmra.mxu3 %v5691_v36  ;;  %v5433_v36 = vunpack.c.l.b16 %v5356_v2  ;;  %v5397_v17 = vrot.slane %v5395_v46, 4  ;;  %v5574_v46 = vld [vmem:[#allocation3 + $0x60] sm:$0xe] }
 0x367   : > { %v4730_v4 = vpop.f32.mrf.mxu2  ;;  %v5364_v62 = vor.u32 %v5363_v32, %v5360_v30 }
 0x368   : > { %v4583_v49 = vpop.f32.mrf.mxu1 }
 0x369   : > { %v4729_v23 = vadd.f32 %v4728_v5, %v4583_v49  ;;  %v4954_v16 = vpop.f32.mrf.mxu3  ;;  %v5367_v5 = vshll.u32 %v10378_v41, 16  ;;  %v5373_v49 = vrot.slane %v5371_v56, 4 }
 0x36b   : > { %v10372_v12 = vadd.f32 %v4954_v16, %v4729_v23  ;;  %5147 = vmatmul.bf16.gmra.mxu1 %v7995_v24  ;;  %v5369_v26 = vrot.slane %v5367_v5, 5  ;;  %v8041_v23 = vld [vmem:[#allocation11 + $0x1c8] sm:$0xff]  ;;  %v5443_v16 = vpack.c.b16 %v5433_v36, %v5432_v58  ;;  %v5209_v24 = vld [vmem:[#allocation3 + $0x5c] sm:$0x1]  ;;  %v5393_v36 = vrot.slane %v5391_v9, 5 }
 0x36c   : > { %6331 = vmatpush.bf16.msra.mxu1 %v8041_v23  ;;  %v5377_v52 = vshll.u32 %v5209_v24, 16 }
 0x36d   : > { %5530 = vmatmul.bf16.gmra.mxu2 %v5442_v45  ;;  %v5374_v22 = vor.u32 %v5373_v49, %v5369_v26  ;;  %v5683_v45 = vunpack.c.l.b16 %v5640_v57  ;;  %v5384_v49 = vrot.slane %v5382_v28, 4  ;;  %v5398_v35 = vor.u32 %v5397_v17, %v5393_v36 }
 0x36e   : > { %v6424_v28 = vrot.slane %v6013_v51, 5 }
 0x36f   : > { %v4733_v8 = vpop.f32.mrf.mxu2  ;;  %v5375_v10 = vrot.slane %v5374_v22, 4 }
 0x370   : > { %v4585_v21 = vpop.f32.mrf.mxu1  ;;  %v6426_v17 = vrot.slane %v6424_v28, 4 }
 0x371   : > { %v4731_v54 = vadd.f32 %v4730_v4, %v4585_v21  ;;  %v4956_v3 = vpop.f32.mrf.mxu3  ;;  %v7676_v4 = vrot.slane %v5572_v14, 9  ;;  %v5379_v21 = vrot.slane %v5377_v52, 5  ;;  %v7677_v14 = vrot.slane %v5573_v47, 9 }
 0x373   : > { %v10380_v63 = vadd.f32 %v4956_v3, %v4731_v54  ;;  %v5637_v37 = vsel %vm9058_vm15, %v7676_v4, %v5636_v40  ;;  %v5643_v54 = vrot.slane %v10378_v41, 5  ;;  %v5365_v3 = vrot.slane %v5364_v62, 4 }
 0x374   : > { %v5682_v6 = vunpack.c.l.b16 %v5637_v37  ;;  %v5399_v37 = vrot.slane %v5398_v35, 4  ;;  %v5650_v62 = vrot.slane %v10395_v1, 5  ;;  %v7678_v1 = vrot.slane %v5574_v46, 9  ;;  %v6017_v46 = vld [vmem:[#allocation3 + $0x2c] sm:$0x1] }
 0x375   : > { %v5645_v2 = vrot.slane %v5643_v54, 4  ;;  %v5644_v23 = vsel %vm9058_vm15, %v7677_v14, %v5643_v54 }
 0x376   : > { %5780 = vmatmul.bf16.gmra.mxu3 %v5692_v15  ;;  %v5693_v20 = vpack.c.b16 %v5683_v45, %v5682_v6  ;;  %v5370_v15 = vsel %vm8972_vm12, %v5365_v3, %v5369_v26  ;;  %v5684_v52 = vunpack.c.l.b16 %v5644_v23 }
 0x377   : > { %v4735_v7 = vpop.f32.mrf.mxu2  ;;  %v5434_v33 = vunpack.c.l.b16 %v5370_v15 }
 0x378   : > { %v4588_v42 = vpop.f32.mrf.mxu1 }
 0x379   : > { %v4734_v31 = vadd.f32 %v4733_v8, %v4588_v42  ;;  %v4959_v55 = vpop.f32.mrf.mxu3  ;;  %v5380_v8 = vsel %vm8972_vm12, %v5375_v10, %v5379_v21  ;;  %v5385_v42 = vshll.u32 %v5210_v48, 16  ;;  %v5652_v48 = vrot.slane %v5650_v62, 4 }
 0x37a   : > { %v5435_v13 = vunpack.c.l.b16 %v5380_v8  ;;  %v7998_v8 = vld [vmem:[#allocation3 + $0x54] sm:$0xff] }
 0x37b   : > { %v10389_v27 = vadd.f32 %v4959_v55, %v4734_v31  ;;  %5152 = vmatmul.bf16.gmra.mxu1 %v7996_v18  ;;  %v5646_v55 = vrot.slane %v5209_v24, 5  ;;  %v5387_v58 = vrot.slane %v5385_v42, 5 }
 0x37c   : > { %v5444_v18 = vpack.c.b16 %v5435_v13, %v5434_v33 }
 0x37d   : > { %5535 = vmatmul.bf16.gmra.mxu2 %v5443_v16  ;;  %v5647_v26 = vsel %vm9058_vm15, %v5645_v2, %v5646_v55  ;;  %v5401_v16 = vshll.u32 %v5212_v61, 16  ;;  %v5388_v22 = vor.u32 %v5387_v58, %v5384_v49  ;;  %v6390_v55 = vld [vmem:[#allocation3 + $0x18] sm:$0xe] }
 0x37e   : > { %v5685_v57 = vunpack.c.l.b16 %v5647_v26  ;;  %v6012_v26 = vld [vmem:[#allocation3 + $0x18] sm:$0xf]  ;;  %v7807_v58 = vrot.slane %v6390_v55, 9 }
 0x37f   : > { %v4738_v0 = vpop.f32.mrf.mxu2  ;;  %v5403_v45 = vrot.slane %v5401_v16, 5  ;;  %v6037_v23 = vshrl.u32 %v6012_v26, 16  ;;  %v6040_v16 = vshll.u32 %v6012_v26, 16 }
 0x380   : > { %v4590_v38 = vpop.f32.mrf.mxu1 }
 0x381   : > { %v4736_v34 = vadd.f32 %v4735_v7, %v4590_v38  ;;  %v4961_v39 = vpop.f32.mrf.mxu3  ;;  %v8040_v7 = vld [vmem:[#allocation11 + $0x1c0] sm:$0xff] }
 0x382   : > { %6332 = vmatpush.bf16.msra.mxu1 %v8040_v7  ;;  %v6046_v7 = vshll.u32 %v6013_v51, 16 }
 0x383   : > { %v10397_v11 = vadd.f32 %v4961_v39, %v4736_v34  ;;  %v5694_v34 = vpack.c.b16 %v5685_v57, %v5684_v52  ;;  %v5389_v39 = vrot.slane %v5388_v22, 4 }
 0x385   : > { %v5394_v10 = vsel %vm8972_vm12, %v5389_v39, %v5393_v36  ;;  %v6039_v39 = vrot.slane %v6037_v23, 4 }
 0x386   : > { %5785 = vmatmul.bf16.gmra.mxu3 %v5693_v20  ;;  %v5436_v9 = vunpack.c.l.b16 %v5394_v10  ;;  %v6016_v10 = vld [vmem:[#allocation3 + $0x28] sm:$0xf] }
 0x387   : > { %v4740_v56 = vpop.f32.mrf.mxu2 }
 0x388   : > { %v4593_v40 = vpop.f32.mrf.mxu1 }
 0x389   : > { %v4739_v41 = vadd.f32 %v4738_v0, %v4593_v40  ;;  %v4964_v5 = vpop.f32.mrf.mxu3  ;;  %v5404_v0 = vsel %vm8972_vm12, %v5399_v37, %v5403_v45  ;;  %v5653_v40 = vrot.slane %v5212_v61, 5  ;;  %v7999_v45 = vld [vmem:[#allocation3 + $0x60] sm:$0xff] }
 0x38a   : > { %v5437_v21 = vunpack.c.l.b16 %v5404_v0  ;;  %v6042_v0 = vrot.slane %v6040_v16, 5 }
 0x38b   : > { %v10406_v31 = vadd.f32 %v4964_v5, %v4739_v41  ;;  %5157 = vmatmul.bf16.gmra.mxu1 %v7997_v53  ;;  %v5654_v2 = vsel %vm9058_vm15, %v5652_v48, %v5653_v40  ;;  %v5651_v41 = vsel %vm9058_vm15, %v7678_v1, %v5650_v62  ;;  %v6014_v53 = vld [vmem:[#allocation3 + $0x20] sm:$0x1] }
 0x38c   : > { %v5445_v13 = vpack.c.b16 %v5437_v21, %v5436_v9  ;;  %v5686_v33 = vunpack.c.l.b16 %v5651_v41  ;;  %v6427_v61 = vrot.slane %v6014_v53, 5  ;;  %v6391_v41 = vld [vmem:[#allocation3 + $0x24] sm:$0xe] }
 0x38d   : > { %5540 = vmatmul.bf16.gmra.mxu2 %v5444_v18  ;;  %v6050_v18 = vshrl.u32 %v6013_v51, 16 }
 0x38e   : > { %v6428_v35 = vsel %vm9058_vm15, %v6426_v17, %v6427_v61 }
 0x38f   : > { %v4743_v32 = vpop.f32.mrf.mxu2  ;;  %v6052_v57 = vrot.slane %v6050_v18, 4 }
 0x390   : > { %v4595_v4 = vpop.f32.mrf.mxu1 }
 0x391   : > { %v4741_v30 = vadd.f32 %v4740_v56, %v4595_v4  ;;  %v4966_v24 = vpop.f32.mrf.mxu3  ;;  %v5687_v56 = vunpack.c.l.b16 %v5654_v2  ;;  %v6048_v4 = vrot.slane %v6046_v7, 5 }
 0x393   : > { %v10412_v38 = vadd.f32 %v4966_v24, %v4741_v30  ;;  %v5695_v49 = vpack.c.b16 %v5687_v56, %v5686_v33  ;;  %v6425_v30 = vsel %vm9058_vm15, %v7807_v58, %v6424_v28  ;;  %v6053_v62 = vor.u32 %v6052_v57, %v6048_v4 }
 0x394   : > { %v6074_v56 = vshrl.u32 %v6016_v10, 16  ;;  %v7808_v33 = vrot.slane %v6391_v41, 9 }
 0x396   : > { %5790 = vmatmul.bf16.gmra.mxu3 %v5694_v34  ;;  %v6495_v34 = vunpack.c.l.b16 %v6425_v30  ;;  %v6076_v26 = vrot.slane %v6074_v56, 4 }
 0x397   : > { %v4745_v3 = vpop.f32.mrf.mxu2 }
 0x398   : > { %v4598_v6 = vpop.f32.mrf.mxu1 }
 0x399   : > { %v4744_v20 = vadd.f32 %v4743_v32, %v4598_v6  ;;  %v4969_v54 = vpop.f32.mrf.mxu3  ;;  %v6496_v32 = vunpack.c.l.b16 %v6428_v35 }
 0x39b   : > { %v10419_v15 = vadd.f32 %v4969_v54, %v4744_v20  ;;  %5162 = vmatmul.bf16.gmra.mxu1 %v7998_v8  ;;  %v6511_v21 = vpack.c.b16 %v6496_v32, %v6495_v34  ;;  %v6056_v20 = vshll.u32 %v6014_v53, 16  ;;  %v6431_v54 = vrot.slane %v6016_v10, 5 }
 0x39c   : > { %v6054_v8 = vrot.slane %v6053_v62, 4  ;;  %v6434_v53 = vrot.slane %v6017_v46, 5  ;;  %v6080_v34 = vshll.u32 %v6017_v46, 16 }
 0x39d   : > { %5545 = vmatmul.bf16.gmra.mxu2 %v5445_v13  ;;  %v6058_v9 = vrot.slane %v6056_v20, 5  ;;  %v6433_v1 = vrot.slane %v6431_v54, 4  ;;  %v6432_v58 = vsel %vm9058_vm15, %v7808_v33, %v6431_v54  ;;  %v6020_v20 = vld [vmem:[#allocation3 + $0x38] sm:$0x1] }
 0x39e   : > { %v6441_v46 = vrot.slane %v6020_v20, 5 }
 0x39f   : > { %v4748_v36 = vpop.f32.mrf.mxu2  ;;  %v6059_v28 = vsel %vm8972_vm12, %v6054_v8, %v6058_v9  ;;  %v6435_v55 = vsel %vm9058_vm15, %v6433_v1, %v6434_v53  ;;  %v6392_v9 = vld [vmem:[#allocation3 + $0x30] sm:$0xe] }
 0x3a0   : > { %v4600_v5 = vpop.f32.mrf.mxu1  ;;  %v6246_v17 = vunpack.c.l.b16 %v6059_v28  ;;  %v6498_v23 = vunpack.c.l.b16 %v6435_v55  ;;  %v6018_v1 = vld [vmem:[#allocation3 + $0x30] sm:$0xf]  ;;  %v7809_v41 = vrot.slane %v6392_v9, 9 }
 0x3a1   : > { %v4746_v47 = vadd.f32 %v4745_v3, %v4600_v5  ;;  %v4971_v42 = vpop.f32.mrf.mxu3  ;;  %v6043_v3 = vor.u32 %v6042_v0, %v6039_v39  ;;  %v6070_v5 = vshll.u32 %v6016_v10, 16  ;;  %v6088_v56 = vshll.u32 %v6018_v1, 16 }
 0x3a3   : > { %v10425_v14 = vadd.f32 %v4971_v42, %v4746_v47  ;;  %v6044_v2 = vrot.slane %v6043_v3, 4  ;;  %v6015_v42 = vld [vmem:[#allocation3 + $0x24] sm:$0xf]  ;;  %v6072_v61 = vrot.slane %v6070_v5, 5  ;;  %v6085_v5 = vshrl.u32 %v6018_v1, 16 }
 0x3a4   : > { %v6061_v7 = vshrl.u32 %v6015_v42, 16  ;;  %v6064_v18 = vshll.u32 %v6015_v42, 16 }
 0x3a6   : > { %5795 = vmatmul.bf16.gmra.mxu3 %v5695_v49  ;;  %v6066_v32 = vrot.slane %v6064_v18, 5 }
 0x3a7   : > { %v4750_v52 = vpop.f32.mrf.mxu2 }
 0x3a8   : > { %v4603_v24 = vpop.f32.mrf.mxu1 }
 0x3a9   : > { %v4749_v22 = vadd.f32 %v4748_v36, %v4603_v24  ;;  %v4974_v37 = vpop.f32.mrf.mxu3  ;;  %v6049_v36 = vsel %vm8972_vm12, %v6044_v2, %v6048_v4  ;;  %v6497_v4 = vunpack.c.l.b16 %v6432_v58  ;;  %v6063_v24 = vrot.slane %v6061_v7, 4 }
 0x3aa   : > { %v6245_v49 = vunpack.c.l.b16 %v6049_v36  ;;  %v6090_v58 = vrot.slane %v6088_v56, 5 }
 0x3ab   : > { %v10431_v6 = vadd.f32 %v4974_v37, %v4749_v22  ;;  %5167 = vmatmul.bf16.gmra.mxu1 %v7999_v45  ;;  %v6077_v22 = vor.u32 %v6076_v26, %v6072_v61  ;;  %v6019_v37 = vld [vmem:[#allocation3 + $0x34] sm:$0xf]  ;;  %v6512_v45 = vpack.c.b16 %v6498_v23, %v6497_v4  ;;  %v6067_v0 = vor.u32 %v6066_v32, %v6063_v24  ;;  %v6022_v23 = vld [vmem:[#allocation3 + $0x40] sm:$0xf] }
 0x3ac   : > { %v6261_v30 = vpack.c.b16 %v6246_v17, %v6245_v49  ;;  %v6438_v39 = vrot.slane %v6019_v37, 5  ;;  %v6087_v49 = vrot.slane %v6085_v5, 4  ;;  %v6445_v4 = vrot.slane %v6022_v23, 5 }
 0x3ad   : > { %6583 = vmatmul.bf16.vlgmr.msra.gmra.mxu2 %v6511_v21  ;;  %v6078_v62 = vrot.slane %v6077_v22, 4  ;;  %v6082_v21 = vrot.slane %v6080_v34, 5  ;;  %v6068_v8 = vrot.slane %v6067_v0, 4 }
 0x3ae   : > { %v6440_v3 = vrot.slane %v6438_v39, 4  ;;  %v6439_v17 = vsel %vm9058_vm15, %v7809_v41, %v6438_v39  ;;  %v6091_v24 = vor.u32 %v6090_v58, %v6087_v49  ;;  %v6447_v39 = vrot.slane %v6445_v4, 4 }
 0x3af   : > { %v6073_v2 = vsel %vm8972_vm12, %v6068_v8, %v6072_v61  ;;  %v6499_v61 = vunpack.c.l.b16 %v6439_v17 }
 0x3b0   : > { %v4605_v48 = vpop.f32.mrf.mxu1  ;;  %v5511_v13 = vpop.f32.mrf.mxu2  ;;  %v6247_v36 = vunpack.c.l.b16 %v6073_v2  ;;  %v6092_v0 = vrot.slane %v6091_v24, 4 }
 0x3b1   : > { %v4751_v51 = vadd.f32 %v4750_v52, %v4605_v48  ;;  %v4976_v40 = vpop.f32.mrf.mxu3  ;;  %v6083_v48 = vsel %vm8972_vm12, %v6078_v62, %v6082_v21  ;;  %v6118_v21 = vshll.u32 %v6022_v23, 16 }
 0x3b2   : > { %v6248_v28 = vunpack.c.l.b16 %v6083_v48 }
 0x3b3   : > { %v10435_v47 = vadd.f32 %v4976_v40, %v4751_v51  ;;  %v6094_v51 = vshll.u32 %v6019_v37, 16  ;;  %v6098_v40 = vshrl.u32 %v6019_v37, 16 }
 0x3b4   : > { %v6262_v26 = vpack.c.b16 %v6248_v28, %v6247_v36 }
 0x3b5   : > { %v6096_v53 = vrot.slane %v6094_v51, 5  ;;  %v6100_v42 = vrot.slane %v6098_v40, 4 }
 0x3b7   : > { %v6097_v8 = vsel %vm8972_vm12, %v6092_v0, %v6096_v53 }
 0x3b8   : > { %v5133_v35 = vpop.f32.mrf.mxu1  ;;  %v5513_v57 = vpop.f32.mrf.mxu2  ;;  %v6249_v2 = vunpack.c.l.b16 %v6097_v8 }
 0x3b9   : > { %v5173_v16 = vadd.f32 %v5133_v35, %v10320_v59  ;;  %v6101_v35 = vor.u32 %v6100_v42, %v6096_v53 }
 0x3bb   : > { %v10444_v52 = vadd.f32 %v5511_v13, %v5173_v16  ;;  %6333 = vmatmul.bf16.vlgmr.msra.gmra.mxu1 %v6261_v30  ;;  %v6104_v30 = vshll.u32 %v6020_v20, 16  ;;  %v6102_v32 = vrot.slane %v6101_v35, 4 }
 0x3bd   : > { %6588 = vmatmul.bf16.gmra.mxu2 %v6512_v45  ;;  %v6106_v37 = vrot.slane %v6104_v30, 5  ;;  %v6023_v45 = vld [vmem:[#allocation3 + $0x44] sm:$0x1] }
 0x3be   : > { %v6448_v20 = vrot.slane %v6023_v45, 5 }
 0x3bf   : > { %v6107_v62 = vsel %vm8972_vm12, %v6102_v32, %v6106_v37 }
 0x3c0   : > { %v5135_v10 = vpop.f32.mrf.mxu1  ;;  %v5516_v54 = vpop.f32.mrf.mxu2  ;;  %v6250_v48 = vunpack.c.l.b16 %v6107_v62 }
 0x3c1   : > { %v5174_v59 = vadd.f32 %v5135_v10, %v10329_v19  ;;  %v6442_v19 = vsel %vm9058_vm15, %v6440_v3, %v6441_v46  ;;  %v6393_v10 = vld [vmem:[#allocation3 + $0x3c] sm:$0xe]  ;;  %v6120_v46 = vrot.slane %v6118_v21, 5 }
 0x3c2   : > { %v6500_v55 = vunpack.c.l.b16 %v6442_v19  ;;  %v6021_v3 = vld [vmem:[#allocation3 + $0x3c] sm:$0xf]  ;;  %v7810_v9 = vrot.slane %v6393_v10, 9  ;;  %v6263_v42 = vpack.c.b16 %v6250_v48, %v6249_v2 }
 0x3c3   : > { %v10449_v13 = vadd.f32 %v5513_v57, %v5174_v59  ;;  %v6122_v59 = vshrl.u32 %v6022_v23, 16  ;;  %v6109_v51 = vshrl.u32 %v6021_v3, 16  ;;  %v6112_v40 = vshll.u32 %v6021_v3, 16 }
 0x3c4   : > { %v6513_v57 = vpack.c.b16 %v6500_v55, %v6499_v61  ;;  %v6446_v28 = vsel %vm9058_vm15, %v7810_v9, %v6445_v4  ;;  %v6025_v55 = vld [vmem:[#allocation3 + $0x4c] sm:$0xf] }
 0x3c5   : > { %v6124_v1 = vrot.slane %v6122_v59, 4  ;;  %v6501_v53 = vunpack.c.l.b16 %v6446_v28  ;;  %v6111_v36 = vrot.slane %v6109_v51, 4  ;;  %v6114_v17 = vrot.slane %v6112_v40, 5 }
 0x3c6   : > { %v6452_v61 = vrot.slane %v6025_v55, 5  ;;  %v6142_v37 = vshll.u32 %v6025_v55, 16 }
 0x3c7   : > { %v6115_v49 = vor.u32 %v6114_v17, %v6111_v36 }
 0x3c8   : > { %v5138_v33 = vpop.f32.mrf.mxu1  ;;  %v5518_v18 = vpop.f32.mrf.mxu2  ;;  %v6454_v4 = vrot.slane %v6452_v61, 4 }
 0x3c9   : > { %v5175_v7 = vadd.f32 %v5138_v33, %v10338_v44  ;;  %v6125_v33 = vor.u32 %v6124_v1, %v6120_v46  ;;  %v6116_v24 = vrot.slane %v6115_v49, 4 }
 0x3cb   : > { %v10458_v16 = vadd.f32 %v5516_v54, %v5175_v7  ;;  %6338 = vmatmul.bf16.gmra.mxu1 %v6262_v26  ;;  %v6128_v26 = vshll.u32 %v6023_v45, 16  ;;  %v6126_v58 = vrot.slane %v6125_v33, 4  ;;  %v6121_v0 = vsel %vm8972_vm12, %v6116_v24, %v6120_v46 }
 0x3cc   : > { %v6251_v8 = vunpack.c.l.b16 %v6121_v0 }
 0x3cd   : > { %6593 = vmatmul.bf16.gmra.mxu2 %v6513_v57  ;;  %v6130_v23 = vrot.slane %v6128_v26, 5  ;;  %v6026_v57 = vld [vmem:[#allocation3 + $0x50] sm:$0x1] }
 0x3ce   : > { %v6455_v45 = vrot.slane %v6026_v57, 5 }
 0x3cf   : > { %v6131_v32 = vsel %vm8972_vm12, %v6126_v58, %v6130_v23 }
 0x3d0   : > { %v5140_v22 = vpop.f32.mrf.mxu1  ;;  %v5521_v34 = vpop.f32.mrf.mxu2  ;;  %v6252_v62 = vunpack.c.l.b16 %v6131_v32 }
 0x3d1   : > { %v5176_v44 = vadd.f32 %v5140_v22, %v10346_v29  ;;  %v6449_v29 = vsel %vm9058_vm15, %v6447_v39, %v6448_v20  ;;  %v6394_v22 = vld [vmem:[#allocation3 + $0x48] sm:$0xe]  ;;  %v6144_v20 = vrot.slane %v6142_v37, 5 }
 0x3d2   : > { %v6502_v19 = vunpack.c.l.b16 %v6449_v29  ;;  %v6024_v39 = vld [vmem:[#allocation3 + $0x48] sm:$0xf]  ;;  %v7811_v10 = vrot.slane %v6394_v22, 9  ;;  %v6264_v1 = vpack.c.b16 %v6252_v62, %v6251_v8 }
 0x3d3   : > { %v10463_v54 = vadd.f32 %v5518_v18, %v5176_v44  ;;  %v6146_v44 = vshrl.u32 %v6025_v55, 16  ;;  %v6133_v21 = vshrl.u32 %v6024_v39, 16  ;;  %v6136_v59 = vshll.u32 %v6024_v39, 16 }
 0x3d4   : > { %v6514_v18 = vpack.c.b16 %v6502_v19, %v6501_v53  ;;  %v6453_v48 = vsel %vm9058_vm15, %v7811_v10, %v6452_v61  ;;  %v6028_v19 = vld [vmem:[#allocation3 + $0x58] sm:$0xf] }
 0x3d5   : > { %v6148_v3 = vrot.slane %v6146_v44, 4  ;;  %v6503_v46 = vunpack.c.l.b16 %v6453_v48  ;;  %v6135_v2 = vrot.slane %v6133_v21, 4  ;;  %v6138_v28 = vrot.slane %v6136_v59, 5 }
 0x3d6   : > { %v6459_v53 = vrot.slane %v6028_v19, 5  ;;  %v6166_v23 = vshll.u32 %v6028_v19, 16 }
 0x3d7   : > { %v6139_v36 = vor.u32 %v6138_v28, %v6135_v2 }
 0x3d8   : > { %v5143_v41 = vpop.f32.mrf.mxu1  ;;  %v5523_v56 = vpop.f32.mrf.mxu2  ;;  %v6461_v61 = vrot.slane %v6459_v53, 4 }
 0x3d9   : > { %v5177_v5 = vadd.f32 %v5143_v41, %v10355_v50  ;;  %v6149_v41 = vor.u32 %v6148_v3, %v6144_v20  ;;  %v6140_v49 = vrot.slane %v6139_v36, 4 }
 0x3db   : > { %v10472_v7 = vadd.f32 %v5521_v34, %v5177_v5  ;;  %6343 = vmatmul.bf16.gmra.mxu1 %v6263_v42  ;;  %v6152_v42 = vshll.u32 %v6026_v57, 16  ;;  %v6150_v17 = vrot.slane %v6149_v41, 4  ;;  %v6145_v24 = vsel %vm8972_vm12, %v6140_v49, %v6144_v20 }
 0x3dc   : > { %v6253_v0 = vunpack.c.l.b16 %v6145_v24 }
 0x3dd   : > { %6598 = vmatmul.bf16.gmra.mxu2 %v6514_v18  ;;  %v6154_v55 = vrot.slane %v6152_v42, 5  ;;  %v6029_v18 = vld [vmem:[#allocation3 + $0x5c] sm:$0x1] }
 0x3de   : > { %v6462_v57 = vrot.slane %v6029_v18, 5 }
 0x3df   : > { %v6155_v58 = vsel %vm8972_vm12, %v6150_v17, %v6154_v55 }
 0x3e0   : > { %v5145_v35 = vpop.f32.mrf.mxu1  ;;  %v5526_v30 = vpop.f32.mrf.mxu2  ;;  %v6254_v32 = vunpack.c.l.b16 %v6155_v58 }
 0x3e1   : > { %v5178_v50 = vadd.f32 %v5145_v35, %v10363_v25  ;;  %v6456_v25 = vsel %vm9058_vm15, %v6454_v4, %v6455_v45  ;;  %v6395_v35 = vld [vmem:[#allocation3 + $0x54] sm:$0xe]  ;;  %v6168_v45 = vrot.slane %v6166_v23, 5 }
 0x3e2   : > { %v6504_v29 = vunpack.c.l.b16 %v6456_v25  ;;  %v6027_v4 = vld [vmem:[#allocation3 + $0x54] sm:$0xf]  ;;  %v7812_v22 = vrot.slane %v6395_v35, 9  ;;  %v6265_v3 = vpack.c.b16 %v6254_v32, %v6253_v0 }
 0x3e3   : > { %v10477_v34 = vadd.f32 %v5523_v56, %v5178_v50  ;;  %v6170_v50 = vshrl.u32 %v6028_v19, 16  ;;  %v6157_v37 = vshrl.u32 %v6027_v4, 16  ;;  %v6160_v44 = vshll.u32 %v6027_v4, 16 }
 0x3e4   : > { %v6515_v56 = vpack.c.b16 %v6504_v29, %v6503_v46  ;;  %v6460_v62 = vsel %vm9058_vm15, %v7812_v22, %v6459_v53  ;;  %v6031_v29 = vld [vmem:[#allocation3 + $0x64] sm:$0xf] }
 0x3e5   : > { %v6172_v39 = vrot.slane %v6170_v50, 4  ;;  %v6505_v20 = vunpack.c.l.b16 %v6460_v62  ;;  %v6159_v8 = vrot.slane %v6157_v37, 4  ;;  %v6162_v48 = vrot.slane %v6160_v44, 5 }
 0x3e6   : > { %v6466_v46 = vrot.slane %v6031_v29, 5  ;;  %v6190_v55 = vshll.u32 %v6031_v29, 16 }
 0x3e7   : > { %v6163_v2 = vor.u32 %v6162_v48, %v6159_v8 }
 0x3e8   : > { %v5148_v9 = vpop.f32.mrf.mxu1  ;;  %v5528_v40 = vpop.f32.mrf.mxu2  ;;  %v6468_v53 = vrot.slane %v6466_v46, 4 }
 0x3e9   : > { %v5179_v51 = vadd.f32 %v5148_v9, %v10372_v12  ;;  %v6173_v9 = vor.u32 %v6172_v39, %v6168_v45  ;;  %v6164_v36 = vrot.slane %v6163_v2, 4 }
 0x3eb   : > { %v10486_v5 = vadd.f32 %v5526_v30, %v5179_v51  ;;  %6348 = vmatmul.bf16.gmra.mxu1 %v6264_v1  ;;  %v6176_v1 = vshll.u32 %v6029_v18, 16  ;;  %v6174_v28 = vrot.slane %v6173_v9, 4  ;;  %v6169_v49 = vsel %vm8972_vm12, %v6164_v36, %v6168_v45  ;;  %v5761_v36 = vpop.f32.mrf.mxu3 }
 0x3ec   : > { %v6255_v24 = vunpack.c.l.b16 %v6169_v49 }
 0x3ed   : > { %6603 = vmatmul.bf16.gmra.mxu2 %v6515_v56  ;;  %v6178_v19 = vrot.slane %v6176_v1, 5  ;;  %v6032_v56 = vld [vmem:[#allocation3 + $0x68] sm:$0x1] }
 0x3ee   : > { %v6469_v18 = vrot.slane %v6032_v56, 5 }
 0x3ef   : > { %v6179_v17 = vsel %vm8972_vm12, %v6174_v28, %v6178_v19 }
 0x3f0   : > { %v5150_v33 = vpop.f32.mrf.mxu1  ;;  %v5531_v26 = vpop.f32.mrf.mxu2  ;;  %v6256_v58 = vunpack.c.l.b16 %v6179_v17 }
 0x3f1   : > { %v5180_v12 = vadd.f32 %v5150_v33, %v10380_v63  ;;  %v6463_v63 = vsel %vm9058_vm15, %v6461_v61, %v6462_v57  ;;  %v6396_v33 = vld [vmem:[#allocation3 + $0x60] sm:$0xe]  ;;  %v6192_v57 = vrot.slane %v6190_v55, 5 }
 0x3f2   : > { %v6506_v25 = vunpack.c.l.b16 %v6463_v63  ;;  %v6030_v61 = vld [vmem:[#allocation3 + $0x60] sm:$0xf]  ;;  %v7813_v35 = vrot.slane %v6396_v33, 9  ;;  %v6266_v39 = vpack.c.b16 %v6256_v58, %v6255_v24 }
 0x3f3   : > { %v10491_v30 = vadd.f32 %v5528_v40, %v5180_v12  ;;  %v6194_v12 = vshrl.u32 %v6031_v29, 16  ;;  %v6181_v23 = vshrl.u32 %v6030_v61, 16  ;;  %v6184_v50 = vshll.u32 %v6030_v61, 16 }
 0x3f4   : > { %v6516_v40 = vpack.c.b16 %v6506_v25, %v6505_v20  ;;  %v6467_v32 = vsel %vm9058_vm15, %v7813_v35, %v6466_v46  ;;  %v6034_v25 = vld [vmem:[#allocation3 + $0x70] sm:$0xf] }
 0x3f5   : > { %v6196_v4 = vrot.slane %v6194_v12, 4  ;;  %v6507_v45 = vunpack.c.l.b16 %v6467_v32  ;;  %v6183_v0 = vrot.slane %v6181_v23, 4  ;;  %v6186_v62 = vrot.slane %v6184_v50, 5 }
 0x3f6   : > { %v6473_v20 = vrot.slane %v6034_v25, 5  ;;  %v6214_v19 = vshll.u32 %v6034_v25, 16 }
 0x3f7   : > { %v6187_v8 = vor.u32 %v6186_v62, %v6183_v0  ;;  %v5763_v0 = vpop.f32.mrf.mxu3 }
 0x3f8   : > { %v5153_v10 = vpop.f32.mrf.mxu1  ;;  %v5533_v59 = vpop.f32.mrf.mxu2  ;;  %v6475_v46 = vrot.slane %v6473_v20, 4  ;;  %v6216_v61 = vrot.slane %v6214_v19, 5 }
 0x3f9   : > { %v5181_v21 = vadd.f32 %v5153_v10, %v10389_v27  ;;  %v6197_v10 = vor.u32 %v6196_v4, %v6192_v57  ;;  %v6188_v2 = vrot.slane %v6187_v8, 4 }
 0x3fb   : > { %v10500_v51 = vadd.f32 %v5531_v26, %v5181_v21  ;;  %6353 = vmatmul.bf16.gmra.mxu1 %v6265_v3  ;;  %v6200_v3 = vshll.u32 %v6032_v56, 16  ;;  %v6198_v48 = vrot.slane %v6197_v10, 4  ;;  %v6193_v17 = vsel %vm8972_vm12, %v6188_v2, %v6192_v57 }
 0x3fc   : > { %v6257_v58 = vunpack.c.l.b16 %v6193_v17 }
 0x3fd   : > { %6608 = vmatmul.bf16.gmra.mxu2 %v6516_v40  ;;  %v6202_v29 = vrot.slane %v6200_v3, 5  ;;  %v6035_v40 = vld [vmem:[#allocation3 + $0x74] sm:$0x1] }
 0x3fe   : > { %v6476_v56 = vrot.slane %v6035_v40, 5 }
 0x3ff   : > { %v6203_v28 = vsel %vm8972_vm12, %v6198_v48, %v6202_v29 }
 0x400   : > { %v5155_v41 = vpop.f32.mrf.mxu1  ;;  %v5536_v42 = vpop.f32.mrf.mxu2  ;;  %v6258_v33 = vunpack.c.l.b16 %v6203_v28 }
 0x401   : > { %v5182_v27 = vadd.f32 %v5155_v41, %v10397_v11  ;;  %v6470_v11 = vsel %vm9058_vm15, %v6468_v53, %v6469_v18  ;;  %v6397_v41 = vld [vmem:[#allocation3 + $0x6c] sm:$0xe] }
 0x402   : > { %v6508_v63 = vunpack.c.l.b16 %v6470_v11  ;;  %v6033_v53 = vld [vmem:[#allocation3 + $0x6c] sm:$0xf]  ;;  %v7814_v55 = vrot.slane %v6397_v41, 9  ;;  %v5956_v11 = vpop.f32.mrf.mxu0  ;;  %v6267_v57 = vpack.c.b16 %v6258_v33, %v6257_v58 }
 0x403   : > { %v10505_v26 = vadd.f32 %v5533_v59, %v5182_v27  ;;  %v6218_v27 = vshrl.u32 %v6034_v25, 16  ;;  %v6205_v12 = vshrl.u32 %v6033_v53, 16  ;;  %v6208_v18 = vshll.u32 %v6033_v53, 16 }
 0x404   : > { %v6517_v59 = vpack.c.b16 %v6508_v63, %v6507_v45  ;;  %v6474_v35 = vsel %vm9058_vm15, %v7814_v55, %v6473_v20  ;;  %v6224_v45 = vshll.u32 %v6035_v40, 16  ;;  %v5801_v53 = vadd.f32 %v5761_v36, %v10444_v52 }
 0x405   : > { %v6220_v49 = vrot.slane %v6218_v27, 4  ;;  %v6509_v32 = vunpack.c.l.b16 %v6474_v35  ;;  %v6210_v63 = vrot.slane %v6208_v18, 5  ;;  %v10551_v18 = vld [vmem:[%s10808_s12] ss:$0 sm:$0xff] }
 0x406   : > { %v6226_v25 = vrot.slane %v6224_v45, 5  ;;  %v5996_v33 = vadd.f32 %v5956_v11, %v5801_v53 }
 0x408   : > { %v5158_v22 = vpop.f32.mrf.mxu1  ;;  %v5538_v44 = vpop.f32.mrf.mxu2 }
 0x409   : > { %v5183_v37 = vadd.f32 %v5158_v22, %v10406_v31  ;;  %v6207_v22 = vrot.slane %v6205_v12, 4 }
 0x40a   : > { %v5958_v3 = vpop.f32.mrf.mxu0 }
 0x40b   : > { %v10514_v21 = vadd.f32 %v5536_v42, %v5183_v37  ;;  %6358 = vmatmul.bf16.gmra.mxu1 %v6266_v39  ;;  %v6221_v37 = vor.u32 %v6220_v49, %v6216_v61  ;;  %v6211_v43 = vor.u32 %v6210_v63, %v6207_v22 }
 0x40d   : > { %6613 = vmatmul.bf16.gmra.mxu2 %v6517_v59  ;;  %v6222_v62 = vrot.slane %v6221_v37, 4  ;;  %v6212_v20 = vrot.slane %v6211_v43, 4 }
 0x40f   : > { %v6227_v8 = vsel %vm8972_vm12, %v6222_v62, %v6226_v25  ;;  %v8088_v62 = vld [vmem:[%s8856_s22 + $0x8] sm:$0xff]  }
 0x410   : > { %v5160_v9 = vpop.f32.mrf.mxu1  ;;  %v5541_v1 = vpop.f32.mrf.mxu2  ;;  %v6260_v29 = vunpack.c.l.b16 %v6227_v8 }
 0x411   : > { %v5184_v31 = vadd.f32 %v5160_v9, %v10412_v38  ;;  %v6477_v38 = vsel %vm9058_vm15, %v6475_v46, %v6476_v56  ;;  %v6217_v9 = vsel %vm8972_vm12, %v6212_v20, %v6216_v61  ;;  %v5802_v61 = vadd.f32 %v5763_v0, %v10449_v13 }
 0x412   : > { %v6510_v50 = vunpack.c.l.b16 %v6477_v38  ;;  %v6259_v40 = vunpack.c.l.b16 %v6217_v9  ;;  %v5961_v41 = vpop.f32.mrf.mxu0  ;;  %v8057_v38 = vld [vmem:[%s8856_s22] sm:$0xff]   ;;  %v8062_v9 = vunpack.c.l.bf16 %v8088_v62 }
 0x413   : > { %v10519_v42 = vadd.f32 %v5538_v44, %v5184_v31  ;;  %v5766_v31 = vpop.f32.mrf.mxu3  ;;  %v8058_v36 = vunpack.c.l.bf16 %v8057_v38  ;;  %v5997_v11 = vadd.f32 %v5958_v3, %v5802_v61  ;;  %v8059_v63 = vunpack.c.h.bf16 %v8057_v38 }
 0x414   : > { %v6518_v39 = vpack.c.b16 %v6510_v50, %v6509_v32  ;;  %v6268_v2 = vpack.c.b16 %v6260_v29, %v6259_v40  ;;  %v5803_v32 = vadd.f32 %v5766_v31, %v10458_v16 }
 0x416   : > { %v5998_v43 = vadd.f32 %v5961_v41, %v5803_v32 }
 0x418   : > { %v5163_v23 = vpop.f32.mrf.mxu1  ;;  %v5543_v24 = vpop.f32.mrf.mxu2 }
 0x419   : > { %v5185_v4 = vadd.f32 %v5163_v23, %v10419_v15 }
 0x41b   : > { %v10528_v44 = vadd.f32 %v5541_v1, %v5185_v4  ;;  %6363 = vmatmul.bf16.gmra.mxu1 %v6267_v57  ;;  %v5768_v56 = vpop.f32.mrf.mxu3 }
 0x41c   : > { %v5804_v3 = vadd.f32 %v5768_v56, %v10463_v54  ;;  %v8063_v56 = vunpack.c.h.bf16 %v8088_v62 }
 0x41d   : > { %6618 = vmatmul.bf16.gmra.mxu2 %v6518_v39 }
 0x420   : > { %v5165_v10 = vpop.f32.mrf.mxu1  ;;  %v5546_v15 = vpop.f32.mrf.mxu2 }
 0x421   : > { %v5186_v59 = vadd.f32 %v5165_v10, %v10425_v14 }
 0x423   : > { %v10533_v48 = vadd.f32 %v5543_v24, %v5186_v59  ;;  %v5771_v49 = vpop.f32.mrf.mxu3 }
 0x424   : > { %v5805_v54 = vadd.f32 %v5771_v49, %v10472_v7 }
 0x428   : > { %v5168_v1 = vpop.f32.mrf.mxu1  ;;  %v5548_v46 = vpop.f32.mrf.mxu2 }
 0x429   : > { %v5187_v14 = vadd.f32 %v5168_v1, %v10431_v6  ;;  %v5963_v6 = vpop.f32.mrf.mxu0 }
 0x42a   : > { %v5999_v1 = vadd.f32 %v5963_v6, %v5804_v3 }
 0x42b   : > { %v10538_v28 = vadd.f32 %v5546_v15, %v5187_v14  ;;  %6368 = vmatmul.bf16.gmra.mxu1 %v6268_v2  ;;  %v5773_v45 = vpop.f32.mrf.mxu3 }
 0x42c   : > { %v5806_v7 = vadd.f32 %v5773_v45, %v10477_v34 }
 0x430   : > { %v5170_v19 = vpop.f32.mrf.mxu1  ;;  %v6584_v27 = vpop.f32.mrf.mxu2 }
 0x431   : > { %v5188_v60 = vadd.f32 %v5170_v19, %v10435_v47  ;;  %v5966_v23 = vpop.f32.mrf.mxu0 }
 0x432   : > { %v6000_v6 = vadd.f32 %v5966_v23, %v5805_v54 }
 0x433   : > { %v10544_v17 = vadd.f32 %v5548_v46, %v5188_v60  ;;  %v5776_v14 = vpop.f32.mrf.mxu3 }
 0x434   : > { %v5807_v34 = vadd.f32 %v5776_v14, %v10486_v5 }
 0x438   : > { %v6334_v55 = vpop.f32.mrf.mxu1  ;;  %v6586_v47 = vpop.f32.mrf.mxu2 }
 0x439   : > { %v6374_v12 = vadd.f32 %v6334_v55, %v5996_v33  ;;  %v5968_v15 = vpop.f32.mrf.mxu0 }
 0x43b   : > { %v6624_v52 = vadd.f32 %v6584_v27, %v6374_v12 }
 0x43d   : > { %v6676_v58 = vadd.f32 %v10551_v18, %v6624_v52 }
 0x43f   : > { %v6692_v35 = vadd.f32 %v8058_v36, %v6676_v58  ;;  %v5778_v58 = vpop.f32.mrf.mxu3 }
 0x440   : > { %v6336_v50 = vpop.f32.mrf.mxu1  ;;  %v6589_v57 = vpop.f32.mrf.mxu2  ;;  %v5808_v5 = vadd.f32 %v5778_v58, %v10491_v30 }
 0x441   : > { %vm6708_vm3 = vcmp.gt.f32.partialorder %v6692_v35, 0.0  ;;  %v6724_v4 = vmul.f32 0.01, %v6692_v35  ;;  %v6375_v24 = vadd.f32 %v6336_v50, %v5997_v11  ;;  %v5971_v53 = vpop.f32.mrf.mxu0 }
 0x443   : > { %v6740_v13 = vsel %vm6708_vm3, %v6692_v35, %v6724_v4  ;;  %v6625_v22 = vadd.f32 %v6586_v47, %v6375_v24  ;;  %v8089_v47 = vld [vmem:[%s8856_s22 + $0x10] sm:$0xff]  }
 0x444   : > { %v6756_v37 = vpack.c.bf16 %v6740_v13, %v6740_v13  ;;  %v8066_v11 = vunpack.c.l.bf16 %v8089_v47  ;;  %v8067_v45 = vunpack.c.h.bf16 %v8089_v47 }
 0x445   : > { %v6677_v39 = vadd.f32 %v10551_v18, %v6625_v22 }
 0x446   : > { %6773 = vst.msk [vmem:[%s10559_s30] sm:$0xf] %vm6772_vm8, %v6756_v37 }
 0x447   : > { %v6693_v0 = vadd.f32 %v8059_v63, %v6677_v39 }
 0x448   : > { %v6339_v16 = vpop.f32.mrf.mxu1  ;;  %v6591_v59 = vpop.f32.mrf.mxu2 }
 0x449   : > { %vm6709_vm9 = vcmp.gt.f32.partialorder %v6693_v0, 0.0  ;;  %v6725_v10 = vmul.f32 0.01, %v6693_v0  ;;  %v6376_v25 = vadd.f32 %v6339_v16, %v5998_v43  ;;  %v5973_v24 = vpop.f32.mrf.mxu0 }
 0x44b   : > { %v6741_v20 = vsel %vm6709_vm9, %v6693_v0, %v6725_v10  ;;  %v6626_v8 = vadd.f32 %v6589_v57, %v6376_v25  ;;  %v6001_v57 = vadd.f32 %v5968_v15, %v5806_v7  ;;  %v5781_v0 = vpop.f32.mrf.mxu3  ;;  %v6002_v10 = vadd.f32 %v5971_v53, %v5807_v34  ;;  %v8090_v15 = vld [vmem:[%s8856_s22 + $0x18] sm:$0xff]  }
 0x44c   : > { %v6757_v29 = vpack.c.bf16 %v6741_v20, %v6741_v20  ;;  %v5809_v30 = vadd.f32 %v5781_v0, %v10500_v51 }
 0x44d   : > { %v6678_v40 = vadd.f32 %v10551_v18, %v6626_v8 }
 0x44e   : > { %6774 = vst.msk [vmem:[%s10559_s30 + $0x4] sm:$0xf] %vm6772_vm8, %v6757_v29 }
 0x44f   : > { %v6694_v31 = vadd.f32 %v8062_v9, %v6678_v40  ;;  %v8070_v40 = vunpack.c.l.bf16 %v8090_v15 }
 0x450   : > { %v6341_v46 = vpop.f32.mrf.mxu1  ;;  %v6594_v19 = vpop.f32.mrf.mxu2 }
 0x451   : > { %vm6710_vm12 = vcmp.gt.f32.partialorder %v6694_v31, 0.0  ;;  %v6726_v2 = vmul.f32 0.01, %v6694_v31  ;;  %v6377_v41 = vadd.f32 %v6341_v46, %v5999_v1  ;;  %v5976_v25 = vpop.f32.mrf.mxu0 }
 0x453   : > { %v6742_v60 = vsel %vm6710_vm12, %v6694_v31, %v6726_v2  ;;  %v6627_v27 = vadd.f32 %v6591_v59, %v6377_v41  ;;  %v5783_v14 = vpop.f32.mrf.mxu3  ;;  %v6003_v2 = vadd.f32 %v5973_v24, %v5808_v5 }
 0x454   : > { %v6758_v33 = vpack.c.bf16 %v6742_v60, %v6742_v60  ;;  %v5810_v51 = vadd.f32 %v5783_v14, %v10505_v26 }
 0x455   : > { %v6679_v55 = vadd.f32 %v10551_v18, %v6627_v27 }
 0x456   : > { %6775 = vst.msk [vmem:[%s10559_s30 + $0x8] sm:$0xf] %vm6772_vm8, %v6758_v33  ;;  %v8071_v33 = vunpack.c.h.bf16 %v8090_v15 }
 0x457   : > { %v6695_v38 = vadd.f32 %v8063_v56, %v6679_v55 }
 0x458   : > { %v6344_v12 = vpop.f32.mrf.mxu1  ;;  %v6596_v36 = vpop.f32.mrf.mxu2 }
 0x459   : > { %vm6711_vm15 = vcmp.gt.f32.partialorder %v6695_v38, 0.0  ;;  %v6727_v61 = vmul.f32 0.01, %v6695_v38  ;;  %v6378_v52 = vadd.f32 %v6344_v12, %v6000_v6  ;;  %v5978_v27 = vpop.f32.mrf.mxu0  ;;  %v6004_v12 = vadd.f32 %v5976_v25, %v5809_v30 }
 0x45b   : > { %v6743_v49 = vsel %vm6711_vm15, %v6695_v38, %v6727_v61  ;;  %v6628_v35 = vadd.f32 %v6594_v19, %v6378_v52  ;;  %v5786_v47 = vpop.f32.mrf.mxu3  ;;  %v8091_v52 = vld [vmem:[%s8856_s22 + $0x20] sm:$0xff]  }
 0x45c   : > { %v6759_v50 = vpack.c.bf16 %v6743_v49, %v6743_v49  ;;  %v5811_v26 = vadd.f32 %v5786_v47, %v10514_v21 }
 0x45d   : > { %v6680_v4 = vadd.f32 %v10551_v18, %v6628_v35 }
 0x45e   : > { %6776 = vst.msk [vmem:[%s10559_s30 + $0xc] sm:$0xf] %vm6772_vm8, %v6759_v50 }
 0x45f   : > { %v6696_v23 = vadd.f32 %v8066_v11, %v6680_v4  ;;  %v8074_v11 = vunpack.c.l.bf16 %v8091_v52 }
 0x460   : > { %v6346_v32 = vpop.f32.mrf.mxu1  ;;  %v6599_v63 = vpop.f32.mrf.mxu2 }
 0x461   : > { %vm6712_vm0 = vcmp.gt.f32.partialorder %v6696_v23, 0.0  ;;  %v6728_v13 = vmul.f32 0.01, %v6696_v23  ;;  %v6379_v22 = vadd.f32 %v6346_v32, %v6001_v57  ;;  %v5981_v50 = vpop.f32.mrf.mxu0  ;;  %v6005_v57 = vadd.f32 %v5978_v27, %v5810_v51 }
 0x463   : > { %v6744_v37 = vsel %vm6712_vm0, %v6696_v23, %v6728_v13  ;;  %v6629_v39 = vadd.f32 %v6596_v36, %v6379_v22  ;;  %v5788_v34 = vpop.f32.mrf.mxu3 }
 0x464   : > { %v6760_v43 = vpack.c.bf16 %v6744_v37, %v6744_v37  ;;  %v5812_v21 = vadd.f32 %v5788_v34, %v10519_v42 }
 0x465   : > { %v6681_v16 = vadd.f32 %v10551_v18, %v6629_v39 }
 0x466   : > { %6777 = vst.msk [vmem:[%s10559_s30 + $0x10] sm:$0xf] %vm6772_vm8, %v6760_v43 }
 0x467   : > { %v6697_v62 = vadd.f32 %v8067_v45, %v6681_v16  ;;  %v8075_v45 = vunpack.c.h.bf16 %v8091_v52 }
 0x468   : > { %v6349_v59 = vpop.f32.mrf.mxu1  ;;  %v6601_v8 = vpop.f32.mrf.mxu2 }
 0x469   : > { %vm6713_vm2 = vcmp.gt.f32.partialorder %v6697_v62, 0.0  ;;  %v6729_v3 = vmul.f32 0.01, %v6697_v62  ;;  %v6380_v20 = vadd.f32 %v6349_v59, %v6002_v10  ;;  %v5983_v16 = vpop.f32.mrf.mxu0  ;;  %v6006_v10 = vadd.f32 %v5981_v50, %v5811_v26  ;;  %v8092_v59 = vld [vmem:[%s8856_s22 + $0x28] sm:$0xff]  }
 0x46a   : > { %v6007_v14 = vadd.f32 %v5983_v16, %v5812_v21  ;;  %v8079_v27 = vunpack.c.h.bf16 %v8092_v59 }
 0x46b   : > { %v6745_v9 = vsel %vm6713_vm2, %v6697_v62, %v6729_v3  ;;  %v6630_v29 = vadd.f32 %v6599_v63, %v6380_v20 }
 0x46c   : > { %v6761_v31 = vpack.c.bf16 %v6745_v9, %v6745_v9  ;;  %v8078_v9 = vunpack.c.l.bf16 %v8092_v59 }
 0x46d   : > { %v6682_v1 = vadd.f32 %v10551_v18, %v6630_v29  ;;  %v5791_v29 = vpop.f32.mrf.mxu3 }
 0x46e   : > { %6778 = vst.msk [vmem:[%s10559_s30 + $0x14] sm:$0xf] %vm6772_vm8, %v6761_v31  ;;  %v5813_v42 = vadd.f32 %v5791_v29, %v10528_v44 }
 0x46f   : > { %v6698_v46 = vadd.f32 %v8070_v40, %v6682_v1 }
 0x470   : > { %v6351_v41 = vpop.f32.mrf.mxu1  ;;  %v6604_v60 = vpop.f32.mrf.mxu2 }
 0x471   : > { %vm6714_vm5 = vcmp.gt.f32.partialorder %v6698_v46, 0.0  ;;  %v6730_v19 = vmul.f32 0.01, %v6698_v46  ;;  %v6381_v54 = vadd.f32 %v6351_v41, %v6003_v2 }
 0x473   : > { %v6746_v56 = vsel %vm6714_vm5, %v6698_v46, %v6730_v19  ;;  %v6631_v53 = vadd.f32 %v6601_v8, %v6381_v54  ;;  %v5986_v46 = vpop.f32.mrf.mxu0 }
 0x474   : > { %v6762_v55 = vpack.c.bf16 %v6746_v56, %v6746_v56 }
 0x475   : > { %v6683_v38 = vadd.f32 %v10551_v18, %v6631_v53 }
 0x476   : > { %6779 = vst.msk [vmem:[%s10559_s30 + $0x18] sm:$0xf] %vm6772_vm8, %v6762_v55 }
 0x477   : > { %v6699_v6 = vadd.f32 %v8071_v33, %v6683_v38  ;;  %v5793_v33 = vpop.f32.mrf.mxu3  ;;  %v6008_v38 = vadd.f32 %v5986_v46, %v5813_v42 }
 0x478   : > { %v6354_v61 = vpop.f32.mrf.mxu1  ;;  %v6606_v7 = vpop.f32.mrf.mxu2  ;;  %v5814_v44 = vadd.f32 %v5793_v33, %v10533_v48 }
 0x479   : > { %vm6715_vm6 = vcmp.gt.f32.partialorder %v6699_v6, 0.0  ;;  %v6731_v36 = vmul.f32 0.01, %v6699_v6  ;;  %v6382_v58 = vadd.f32 %v6354_v61, %v6004_v12  ;;  %v8093_v12 = vld [vmem:[%s8856_s22 + $0x30] sm:$0xff]  }
 0x47b   : > { %v6747_v49 = vsel %vm6715_vm6, %v6699_v6, %v6731_v36  ;;  %v6632_v35 = vadd.f32 %v6604_v60, %v6382_v58  ;;  %v5988_v52 = vpop.f32.mrf.mxu0 }
 0x47c   : > { %v6763_v4 = vpack.c.bf16 %v6747_v49, %v6747_v49  ;;  %v6009_v50 = vadd.f32 %v5988_v52, %v5814_v44 }
 0x47d   : > { %v6684_v24 = vadd.f32 %v10551_v18, %v6632_v35 }
 0x47e   : > { %6780 = vst.msk [vmem:[%s10559_s30 + $0x1c] sm:$0xf] %vm6772_vm8, %v6763_v4 }
 0x47f   : > { %v6700_v23 = vadd.f32 %v8074_v11, %v6684_v24  ;;  %v5796_v4 = vpop.f32.mrf.mxu3 }
 0x480   : > { %v6356_v32 = vpop.f32.mrf.mxu1  ;;  %v6609_v63 = vpop.f32.mrf.mxu2  ;;  %v5815_v48 = vadd.f32 %v5796_v4, %v10538_v28 }
 0x481   : > { %vm6716_vm7 = vcmp.gt.f32.partialorder %v6700_v23, 0.0  ;;  %v6732_v13 = vmul.f32 0.01, %v6700_v23  ;;  %v6383_v22 = vadd.f32 %v6356_v32, %v6005_v57 }
 0x483   : > { %v6748_v37 = vsel %vm6716_vm7, %v6700_v23, %v6732_v13  ;;  %v6633_v39 = vadd.f32 %v6606_v7, %v6383_v22  ;;  %v8082_v7 = vunpack.c.l.bf16 %v8093_v12  ;;  %v8083_v22 = vunpack.c.h.bf16 %v8093_v12 }
 0x484   : > { %v6764_v0 = vpack.c.bf16 %v6748_v37, %v6748_v37 }
 0x485   : > { %v6685_v43 = vadd.f32 %v10551_v18, %v6633_v39 }
 0x486   : > { %6781 = vst.msk [vmem:[%s10559_s30 + $0x20] sm:$0xf] %vm6772_vm8, %v6764_v0 }
 0x487   : > { %v6701_v62 = vadd.f32 %v8075_v45, %v6685_v43  ;;  %v8094_v43 = vld [vmem:[%s8856_s22 + $0x38] sm:$0xff]  }
 0x488   : > { %v6359_v25 = vpop.f32.mrf.mxu1  ;;  %v6611_v20 = vpop.f32.mrf.mxu2 }
 0x489   : > { %vm6717_vm10 = vcmp.gt.f32.partialorder %v6701_v62, 0.0  ;;  %v6733_v15 = vmul.f32 0.01, %v6701_v62  ;;  %v6384_v3 = vadd.f32 %v6359_v25, %v6006_v10  ;;  %v5798_v10 = vpop.f32.mrf.mxu3 }
 0x48a   : > { %v5816_v28 = vadd.f32 %v5798_v10, %v10544_v17 }
 0x48b   : > { %v6749_v8 = vsel %vm6717_vm10, %v6701_v62, %v6733_v15  ;;  %v6634_v5 = vadd.f32 %v6609_v63, %v6384_v3  ;;  %v5991_v63 = vpop.f32.mrf.mxu0  ;;  %v8086_v15 = vunpack.c.l.bf16 %v8094_v43 }
 0x48c   : > { %v6765_v40 = vpack.c.bf16 %v6749_v8, %v6749_v8  ;;  %v6010_v39 = vadd.f32 %v5991_v63, %v5815_v48 }
 0x48d   : > { %v6686_v31 = vadd.f32 %v10551_v18, %v6634_v5 }
 0x48e   : > { %6782 = vst.msk [vmem:[%s10559_s30 + $0x24] sm:$0xf] %vm6772_vm8, %v6765_v40 }
 0x48f   : > { %v6702_v1 = vadd.f32 %v8078_v9, %v6686_v31 }
 0x490   : > { %v6361_v2 = vpop.f32.mrf.mxu1  ;;  %v6614_v56 = vpop.f32.mrf.mxu2 }
 0x491   : > { %vm6718_vm11 = vcmp.gt.f32.partialorder %v6702_v1, 0.0  ;;  %v6734_v41 = vmul.f32 0.01, %v6702_v1  ;;  %v6385_v19 = vadd.f32 %v6361_v2, %v6007_v14  ;;  %v8087_v14 = vunpack.c.h.bf16 %v8094_v43 }
 0x493   : > { %v6750_v54 = vsel %vm6718_vm11, %v6702_v1, %v6734_v41  ;;  %v6635_v60 = vadd.f32 %v6611_v20, %v6385_v19  ;;  %v5993_v21 = vpop.f32.mrf.mxu0 }
 0x494   : > { %v6766_v30 = vpack.c.bf16 %v6750_v54, %v6750_v54  ;;  %v6011_v5 = vadd.f32 %v5993_v21, %v5816_v28 }
 0x495   : > { %v6687_v53 = vadd.f32 %v10551_v18, %v6635_v60 }
 0x496   : > { %6783 = vst.msk [vmem:[%s10559_s30 + $0x28] sm:$0xf] %vm6772_vm8, %v6766_v30 }
 0x497   : > { %v6703_v55 = vadd.f32 %v8079_v27, %v6687_v53 }
 0x498   : > { %v6364_v6 = vpop.f32.mrf.mxu1  ;;  %v6616_v35 = vpop.f32.mrf.mxu2 }
 0x499   : > { %vm6719_vm13 = vcmp.gt.f32.partialorder %v6703_v55, 0.0  ;;  %v6735_v47 = vmul.f32 0.01, %v6703_v55  ;;  %v6386_v61 = vadd.f32 %v6364_v6, %v6008_v38 }
 0x49b   : > { %v6751_v36 = vsel %vm6719_vm13, %v6703_v55, %v6735_v47  ;;  %v6636_v58 = vadd.f32 %v6614_v56, %v6386_v61 }
 0x49c   : > { %v6767_v51 = vpack.c.bf16 %v6751_v36, %v6751_v36 }
 0x49d   : > { %v6688_v49 = vadd.f32 %v10551_v18, %v6636_v58 }
 0x49e   : > { %6784 = vst.msk [vmem:[%s10559_s30 + $0x2c] sm:$0xf] %vm6772_vm8, %v6767_v51 }
 0x49f   : > { %v6704_v11 = vadd.f32 %v8082_v7, %v6688_v49 }
 0x4a0   : > { %v6366_v24 = vpop.f32.mrf.mxu1  ;;  %v6619_v45 = vpop.f32.mrf.mxu2 }
 0x4a1   : > { %vm6720_vm4 = vcmp.gt.f32.partialorder %v6704_v11, 0.0  ;;  %v6736_v23 = vmul.f32 0.01, %v6704_v11  ;;  %v6387_v57 = vadd.f32 %v6366_v24, %v6009_v50 }
 0x4a3   : > { %v6752_v32 = vsel %vm6720_vm4, %v6704_v11, %v6736_v23  ;;  %v6637_v13 = vadd.f32 %v6616_v35, %v6387_v57 }
 0x4a4   : > { %v6768_v34 = vpack.c.bf16 %v6752_v32, %v6752_v32 }
 0x4a5   : > { %v6689_v26 = vadd.f32 %v10551_v18, %v6637_v13 }
 0x4a6   : > { %6785 = vst.msk [vmem:[%s10559_s30 + $0x30] sm:$0xf] %vm6772_vm8, %v6768_v34 }
 0x4a7   : > { %v6705_v37 = vadd.f32 %v8083_v22, %v6689_v26 }
 0x4a8   : > { %v6369_v0 = vpop.f32.mrf.mxu1  ;;  %v6621_v31 = vpop.f32.mrf.mxu2 }
 0x4a9   : > { %vm6721_vm14 = vcmp.gt.f32.partialorder %v6705_v37, 0.0  ;;  %v6737_v16 = vmul.f32 0.01, %v6705_v37  ;;  %v6388_v62 = vadd.f32 %v6369_v0, %v6010_v39 }
 0x4ab   : > { %v6753_v25 = vsel %vm6721_vm14, %v6705_v37, %v6737_v16  ;;  %v6638_v59 = vadd.f32 %v6619_v45, %v6388_v62 }
 0x4ac   : > { %v6769_v3 = vpack.c.bf16 %v6753_v25, %v6753_v25 }
 0x4ad   : > { %v6690_v20 = vadd.f32 %v10551_v18, %v6638_v59 }
 0x4ae   : > { %6786 = vst.msk [vmem:[%s10559_s30 + $0x34] sm:$0xf] %vm6772_vm8, %v6769_v3 }
 0x4af   : > { %v6706_v8 = vadd.f32 %v8086_v15, %v6690_v20 }
 0x4b0   : > { %v6371_v9 = vpop.f32.mrf.mxu1 }
 0x4b1   : > { %vm6722_vm1 = vcmp.gt.f32.partialorder %v6706_v8, 0.0  ;;  %v6738_v29 = vmul.f32 0.01, %v6706_v8  ;;  %v6389_v40 = vadd.f32 %v6371_v9, %v6011_v5 }
 0x4b3   : > { %v6754_v1 = vsel %vm6722_vm1, %v6706_v8, %v6738_v29  ;;  %v6639_v17 = vadd.f32 %v6621_v31, %v6389_v40 }
 0x4b4   : > { %v6770_v46 = vpack.c.bf16 %v6754_v1, %v6754_v1 }
 0x4b5   : > { %v6691_v2 = vadd.f32 %v10551_v18, %v6639_v17 }
 0x4b6   : > { %6787 = vst.msk [vmem:[%s10559_s30 + $0x38] sm:$0xf] %vm6772_vm8, %v6770_v46 }
 0x4b7   : > { %v6707_v41 = vadd.f32 %v8087_v14, %v6691_v2 }
 0x4b9   : > { %vm6723_vm3 = vcmp.gt.f32.partialorder %v6707_v41, 0.0  ;;  %v6739_v19 = vmul.f32 0.01, %v6707_v41 }
 0x4bb   : > { %v6755_v42 = vsel %vm6723_vm3, %v6707_v41, %v6739_v19 }
 0x4bc   : > { %v6771_v54 = vpack.c.bf16 %v6755_v42, %v6755_v42 }
 0x4be   : > { %6788 = vst.msk [vmem:[%s10559_s30 + $0x3c] sm:$0xf] %vm6772_vm8, %v6771_v54 }
 0x4bf PF: > { %s24_s14 = sadd.s32 1, %s8558_s14   ;;  %s10811_s17 = smov %s8839_s24 }
 0x4c0   : > { %p10629_p8 = scmp.ge.s32.totalorder %s24_s14, 6   ;;  %s10812_s27 = sld [smem:[#allocation16_spill]] }
 0x4c1   : > { %s10813_s15 = sld [smem:[#allocation26_spill]]  ;;  %s10818_s24 = smov %s8510_s25 }
 0x4c2   : > { %s10814_s10 = sld [smem:[#allocation19_spill]]  ;;  %s10819_s25 = smov %s8514_s26 }
 0x4c3   : > { %s10815_s11 = sld [smem:[#allocation20_spill]]  ;;  %s10820_s26 = smov %s10811_s17 }
 0x4c4   : > { %s10816_s12 = sld [smem:[#allocation22_spill]]  ;;  %s10821_s28 = smov %s8526_s29 }
 0x4c5   : > { %s10817_s13 = sld [smem:[#allocation23_spill]]  ;;  %s10823_s30 = smov %s8534_s8 }
 0x4c6   : > { %s10824_s8 = smov %s8538_s9  ;;  %s10825_s9 = smov %s8784_s3 }
 0x4c7   : > { %s10822_s29 = smov %s10813_s15  ;;  %23 = sbr.rel (!%p10629_p8) target bundleno = 20 (0x14), region = 142 }
 0x4cc   :  { %6821 = vsyncpa [#allocation5], 1 }
 0x4cd   :  { %6823 = vsyncpa [#allocation5 + $0x1], 1 }
 0x4ce   :  { %6824 = vsyncpa [#allocation7], 1 }
 0x4cf   :  { %6826 = vsyncpa [#allocation7 + $0x1], 1 }
 0x4d0   :  { %6827 = vsyncpa [#allocation10], 1 }

</bundles_post_ra>
